<compile_context>
chip_gen: v7x
topology: tpu7x:2x2x1
jax: 0.10.0
libtpu: 0.0.40
codegen_flags: <defaults>
</compile_context>

<pallas_src>
import math

import jax
import jax.numpy as jnp
from jax.experimental import pallas as pl
from jax.experimental.pallas import tpu as pltpu


def cnn1d_kernel(x_ref,
                 w1_ref, b1_ref, s1_ref, t1_ref,
                 w2_ref, b2_ref, s2_ref, t2_ref,
                 w3_ref, b3_ref, s3_ref, t3_ref,
                 wf_ref, bf_ref,
                 out_ref):
    f32 = jnp.float32
    bf16 = jnp.bfloat16

    # Static per-stage geometry (Python ints derived from ref shapes).
    n1 = x_ref.shape[1] // 8                  # rows per conv1-output phase (8 phases)
    c1 = w1_ref.shape[1]                      # 16
    k2 = w2_ref.shape[0] // c1                # 32
    n2 = ((4 * n1 - k2 + 1) // 2) // 2        # rows per conv2-output phase (4 phases)
    c2 = w2_ref.shape[1]                      # 32
    k3 = w3_ref.shape[0] // c2                # 16
    n3 = (2 * n2 - k3 + 1) // 2               # rows per conv3-output phase (2 phases)

    def flat_dot(a3, w):
        # Single MXU matmul per stage: (TB, M, K) -> (TB*M, K) @ (K, Cout).
        # M is a multiple of 16 here, so the reshapes are pure relayouts.
        tb_, m, k = a3.shape
        y = jnp.dot(a3.reshape(tb_ * m, k).astype(bf16), w,
                    preferred_element_type=f32)
        return y.reshape(tb_, m, w.shape[1])

    def pool_bn(y, n, scale, shift):
        # y rows are phase-major: phase q block (n rows) holds conv outputs at
        # positions P*m + q.  MaxPool1d(2,2) therefore reduces adjacent phase
        # blocks with a contiguous VPU max (floor mode preserved: only the rows
        # the pool keeps were ever computed), followed by the eval-mode
        # BatchNorm affine.  Returns the pooled activation as a list of phases
        # (half as many), each (TB, n, C).
        nph = y.shape[1] // n
        return [jnp.maximum(y[:, (2 * j) * n:(2 * j + 1) * n, :],
                            y[:, (2 * j + 1) * n:(2 * j + 2) * n, :]) * scale + shift
                for j in range(nph // 2)]

    def conv_relu(phases, w, b, n_out):
        # Polyphase im2col conv.  `phases[j][m] = h[P*m + j]` (P = len(phases))
        # holds the previous pooled activation split by row parity class, so
        # every slice below is a unit-stride sublane slice (no strided access,
        # no gathers).  Output rows come out phase-major:
        # row r*n_out + i  =  conv_out[P*i + r].
        P = len(phases)
        cin = phases[0].shape[2]
        K = w.shape[0] // cin

        def phase_cols(r):
            # im2col for output positions P*i + r: tap k reads h[P*i + r + k]
            # = phases[(r+k) % P][i + (r+k)//P].
            return jnp.concatenate(
                [phases[(r + k) % P][:, (r + k) // P:(r + k) // P + n_out, :]
                 for k in range(K)], axis=-1)

        a = jnp.concatenate([phase_cols(r) for r in range(P)], axis=1)
        return jnp.maximum(flat_dot(a, w) + b, 0.0)

    # Stage 1: conv1 (wrapper-built phase-major im2col) + ReLU + pool + BN.
    y1 = jnp.maximum(flat_dot(x_ref[...], w1_ref[...]) + b1_ref[...], 0.0)
    h1 = pool_bn(y1, n1, s1_ref[...], t1_ref[...])        # 4 phases, each (TB, n1, 16)
    # TODO(synk): Dropout(p=0.25) after each pool and after linear1 is treated
    # as inference-mode identity (training-mode RNG masking not reproduced).
    y2 = conv_relu(h1, w2_ref[...], b2_ref[...], n2)      # (TB, 4*n2, 32) phase-major
    h2 = pool_bn(y2, n2, s2_ref[...], t2_ref[...])        # 2 phases, each (TB, n2, 32)
    y3 = conv_relu(h2, w3_ref[...], b3_ref[...], n3)      # (TB, 2*n3, 64) phase-major
    (h3,) = pool_bn(y3, n3, s3_ref[...], t3_ref[...])     # (TB, n3, 64)

    z = jnp.mean(h3, axis=1)                              # AdaptiveAvgPool1d(1) -> (TB, 64)
    # linear1 -> dropout(identity) -> linear2 folded into one affine map.
    z = jnp.dot(z.astype(bf16), wf_ref[...], preferred_element_type=f32) + bf_ref[...]
    out_ref[0] = jax.nn.sigmoid(z)


def cnn1d_forward(x_ncl, params, *, tb=4):
    """x_ncl: (B, Cin, L) — PyTorch NCL layout.

    tb: items per grid step.  Keep cdiv(B, tb) >= 2 on v7x (2 TensorCores);
    on v5e/v6e (single TC) raise tb (16-64) for large B — VMEM has >10x headroom.
    """
    B, Cin, L = x_ncl.shape
    (w1, b1, s1, t1, w2, b2, s2, t2, w3, b3, s3, t3,
     lw1, lb1, lw2, lb2) = params

    K1, K2, K3 = 64, 32, 16
    Lp1 = (L - K1 + 1) // 2
    Lp2 = (Lp1 - K2 + 1) // 2
    Lp3 = (Lp2 - K3 + 1) // 2
    num_classes = lw2.shape[1]
    # Polyphase schedule needs 8 equal conv1-output phases / 2 equal pool2 phases.
    assert Lp1 % 4 == 0 and Lp2 % 2 == 0 and Lp3 >= 1, (Lp1, Lp2, Lp3)

    lout1 = 2 * Lp1                   # conv1 rows that survive floor-mode pooling
    n1 = lout1 // 8

    # conv1 im2col via shifted slices (no gather), only the rows the pool keeps,
    # reordered phase-major: row q*n1 + m  <->  conv1 output position 8*m + q.
    x_lc = jnp.transpose(x_ncl, (0, 2, 1)).astype(jnp.float32)        # (B, L, Cin)
    x_im = jnp.concatenate([x_lc[:, k:k + lout1, :] for k in range(K1)],
                           axis=-1)                                    # (B, lout1, K1*Cin)
    x_im = x_im.reshape(B, n1, 8, K1 * Cin).transpose(0, 2, 1, 3)
    x_im = x_im.reshape(B, lout1, K1 * Cin).astype(jnp.bfloat16)

    # linear1 -> dropout(identity in eval) -> linear2: fold into one affine map.
    w_fc = (lw1 @ lw2).astype(jnp.bfloat16)                            # (64, num_classes)
    b_fc = lb1 @ lw2 + lb2                                             # (1, num_classes)

    cast = lambda a: a.astype(jnp.bfloat16)
    ops = (cast(w1), b1, s1, t1,
           cast(w2), b2, s2, t2,
           cast(w3), b3, s3, t3,
           w_fc, b_fc)

    tb = max(1, min(tb, B))
    nblk = -(-B // tb)                         # cdiv
    Bp = nblk * tb
    if Bp != B:
        x_im = jnp.pad(x_im, ((0, Bp - B), (0, 0), (0, 0)))

    in_specs = [pl.BlockSpec((tb, lout1, K1 * Cin), lambda b: (b, 0, 0))]
    for p in ops:
        in_specs.append(pl.BlockSpec(p.shape, lambda b, n=p.ndim: (0,) * n))

    out = pl.pallas_call(
        cnn1d_kernel,
        out_shape=jax.ShapeDtypeStruct((nblk, tb, num_classes), jnp.float32),
        grid=(nblk,),
        in_specs=in_specs,
        out_specs=pl.BlockSpec((1, tb, num_classes), lambda b: (b, 0, 0)),
        compiler_params=pltpu.CompilerParams(
            dimension_semantics=("parallel",)),
    )(x_im, *ops)
    return out.reshape(Bp, num_classes)[:B]


def cnn1d_reference(x_ncl, params):
    """Pure-JAX (XLA, f32) reference of the eval-mode PyTorch forward."""
    (w1, b1, s1, t1, w2, b2, s2, t2, w3, b3, s3, t3,
     lw1, lb1, lw2, lb2) = params
    h = jnp.transpose(x_ncl, (0, 2, 1)).astype(jnp.float32)            # (B, L, Cin)

    def conv_relu_pool_bn(h, w, b, k, s, t):
        lout = h.shape[1] - k + 1
        a = jnp.concatenate([h[:, j:j + lout, :] for j in range(k)], axis=-1)
        y = jax.nn.relu(jnp.einsum("blk,kc->blc", a, w) + b)
        lp = lout // 2
        y = y[:, :2 * lp, :].reshape(y.shape[0], lp, 2, y.shape[2])
        return jnp.max(y, axis=2) * s + t

    h = conv_relu_pool_bn(h, w1, b1, 64, s1, t1)
    h = conv_relu_pool_bn(h, w2, b2, 32, s2, t2)
    h = conv_relu_pool_bn(h, w3, b3, 16, s3, t3)
    z = jnp.mean(h, axis=1)
    z = z @ lw1 + lb1          # dropout between the linears is identity in eval
    z = z @ lw2 + lb2
    return jax.nn.sigmoid(z)


def init_params(key, input_channels=1, num_classes=1):
    """Deterministic init mirroring CNN1D.init_weights (xavier_normal weights,
    zero biases, default BatchNorm affine / running stats).  Conv weights are
    stored tap-major (K, Cin, Cout) flattened to (K*Cin, Cout) to match the
    im2col column order; PyTorch layout is (Cout, Cin, K)."""
    ks = jax.random.split(key, 5)

    def xavier(k, shape, fan_in, fan_out):
        std = math.sqrt(2.0 / (fan_in + fan_out))
        return (std * jax.random.normal(k, shape)).astype(jnp.float32)

    eps = 1e-5

    def bn_fold(c):
        gamma = jnp.ones((1, c), jnp.float32)
        beta = jnp.zeros((1, c), jnp.float32)
        r_mean = jnp.zeros((1, c), jnp.float32)
        r_var = jnp.ones((1, c), jnp.float32)
        scale = gamma / jnp.sqrt(r_var + eps)
        shift = beta - r_mean * scale
        return scale, shift

    w1 = xavier(ks[0], (64, input_channels, 16),
                fan_in=input_channels * 64, fan_out=16 * 64).reshape(-1, 16)
    b1 = jnp.zeros((1, 16), jnp.float32)
    s1, t1 = bn_fold(16)

    w2 = xavier(ks[1], (32, 16, 32), fan_in=16 * 32, fan_out=32 * 32).reshape(-1, 32)
    b2 = jnp.zeros((1, 32), jnp.float32)
    s2, t2 = bn_fold(32)

    w3 = xavier(ks[2], (16, 32, 64), fan_in=32 * 16, fan_out=64 * 16).reshape(-1, 64)
    b3 = jnp.zeros((1, 64), jnp.float32)
    s3, t3 = bn_fold(64)

    # Linear weights stored as (in, out); PyTorch layout is (out, in).
    lw1 = xavier(ks[3], (64, 128), fan_in=64, fan_out=128)
    lb1 = jnp.zeros((1, 128), jnp.float32)
    lw2 = xavier(ks[4], (128, num_classes), fan_in=128, fan_out=num_classes)
    lb2 = jnp.zeros((1, num_classes), jnp.float32)

    return (w1, b1, s1, t1,
            w2, b2, s2, t2,
            w3, b3, s3, t3,
            lw1, lb1, lw2, lb2)


if __name__ == "__main__":
    key = jax.random.PRNGKey(0)
    k_x, k_p = jax.random.split(key)

    B, Cin, L, num_classes = 8, 1, 256, 1   # conv chain needs L >= 190
    x = jax.random.normal(k_x, (B, Cin, L), dtype=jnp.float32)
    params = init_params(k_p, input_channels=Cin, num_classes=num_classes)

    y = cnn1d_forward(x, params, tb=4)      # 2 grid steps -> both v7x TCs get work
    y = jax.block_until_ready(y)
    y_ref = jax.block_until_ready(cnn1d_reference(x, params))

    assert y.shape == (B, num_classes), y.shape
    assert bool(jnp.all(jnp.isfinite(y)))
    assert bool(jnp.all((y >= 0.0) & (y <= 1.0)))          # sigmoid outputs
    # bf16 matmuls (f32 accumulation) vs. the f32 reference: loose tolerance.
    max_err = float(jnp.max(jnp.abs(y - y_ref)))
    assert max_err < 5e-2, max_err
    print("KERNEL_OK")
</pallas_src>

<mosaic_0001>
module attributes {stable_mosaic.version = 11 : i64} {
  func.func @cnn1d_kernel(%arg0: i32, %arg1: memref<4x192x64xbf16, #tpu.memory_space<vmem>>, %arg2: memref<64x16xbf16, #tpu.memory_space<vmem>>, %arg3: memref<1x16xf32, #tpu.memory_space<vmem>>, %arg4: memref<1x16xf32, #tpu.memory_space<vmem>>, %arg5: memref<1x16xf32, #tpu.memory_space<vmem>>, %arg6: memref<512x32xbf16, #tpu.memory_space<vmem>>, %arg7: memref<1x32xf32, #tpu.memory_space<vmem>>, %arg8: memref<1x32xf32, #tpu.memory_space<vmem>>, %arg9: memref<1x32xf32, #tpu.memory_space<vmem>>, %arg10: memref<512x64xbf16, #tpu.memory_space<vmem>>, %arg11: memref<1x64xf32, #tpu.memory_space<vmem>>, %arg12: memref<1x64xf32, #tpu.memory_space<vmem>>, %arg13: memref<1x64xf32, #tpu.memory_space<vmem>>, %arg14: memref<64x1xbf16, #tpu.memory_space<vmem>>, %arg15: memref<1x1xf32, #tpu.memory_space<vmem>>, %arg16: memref<1x4x1xf32, #tpu.memory_space<vmem>>) attributes {dimension_semantics = [#tpu.dimension_semantics<parallel>], iteration_bounds = array<i64: 2>, scalar_prefetch = 0 : i64, scratch_operands = 0 : i64, tpu.core_type = #tpu.core_type<tc>, window_params = [{transform_indices = @transform_0, window_bounds = array<i64: 4, 192, 64>}, {pipeline_mode = #tpu.pipeline_mode<synchronous>, transform_indices = @transform_1, window_bounds = array<i64: 64, 16>}, {pipeline_mode = #tpu.pipeline_mode<synchronous>, transform_indices = @transform_2, window_bounds = array<i64: 1, 16>}, {pipeline_mode = #tpu.pipeline_mode<synchronous>, transform_indices = @transform_3, window_bounds = array<i64: 1, 16>}, {pipeline_mode = #tpu.pipeline_mode<synchronous>, transform_indices = @transform_4, window_bounds = array<i64: 1, 16>}, {pipeline_mode = #tpu.pipeline_mode<synchronous>, transform_indices = @transform_5, window_bounds = array<i64: 512, 32>}, {pipeline_mode = #tpu.pipeline_mode<synchronous>, transform_indices = @transform_6, window_bounds = array<i64: 1, 32>}, {pipeline_mode = #tpu.pipeline_mode<synchronous>, transform_indices = @transform_7, window_bounds = array<i64: 1, 32>}, {pipeline_mode = #tpu.pipeline_mode<synchronous>, transform_indices = @transform_8, window_bounds = array<i64: 1, 32>}, {pipeline_mode = #tpu.pipeline_mode<synchronous>, transform_indices = @transform_9, window_bounds = array<i64: 512, 64>}, {pipeline_mode = #tpu.pipeline_mode<synchronous>, transform_indices = @transform_10, window_bounds = array<i64: 1, 64>}, {pipeline_mode = #tpu.pipeline_mode<synchronous>, transform_indices = @transform_11, window_bounds = array<i64: 1, 64>}, {pipeline_mode = #tpu.pipeline_mode<synchronous>, transform_indices = @transform_12, window_bounds = array<i64: 1, 64>}, {pipeline_mode = #tpu.pipeline_mode<synchronous>, transform_indices = @transform_13, window_bounds = array<i64: 64, 1>}, {pipeline_mode = #tpu.pipeline_mode<synchronous>, transform_indices = @transform_14, window_bounds = array<i64: 1, 1>}, {transform_indices = @transform_15, window_bounds = array<i64: 1, 4, 1>}]} {
    %c0 = arith.constant 0 : index
    %c0_0 = arith.constant 0 : index
    %c0_1 = arith.constant 0 : index
    %0 = vector.load %arg1[%c0, %c0_0, %c0_1] : memref<4x192x64xbf16, #tpu.memory_space<vmem>>, vector<4x192x64xbf16>
    %c0_2 = arith.constant 0 : index
    %c0_3 = arith.constant 0 : index
    %1 = vector.load %arg2[%c0_2, %c0_3] : memref<64x16xbf16, #tpu.memory_space<vmem>>, vector<64x16xbf16>
    %2 = vector.shape_cast %0 : vector<4x192x64xbf16> to vector<768x64xbf16>
    %cst = arith.constant dense<0.000000e+00> : vector<768x16xf32>
    %3 = tpu.matmul %2, %1, %cst {dimension_numbers = #tpu.dot_dimension_numbers<[1], [0], [0], [1], [0, 0, 1, 1], [], []>} : vector<768x64xbf16>, vector<64x16xbf16>, vector<768x16xf32> -> vector<768x16xf32>
    %4 = vector.shape_cast %3 : vector<768x16xf32> to vector<4x192x16xf32>
    %c0_4 = arith.constant 0 : index
    %c0_5 = arith.constant 0 : index
    %5 = vector.load %arg3[%c0_4, %c0_5] : memref<1x16xf32, #tpu.memory_space<vmem>>, vector<1x16xf32>
    %6 = vector.shape_cast %5 : vector<1x16xf32> to vector<1x1x16xf32>
    %7 = vector.broadcast %6 : vector<1x1x16xf32> to vector<4x192x16xf32>
    %8 = arith.addf %4, %7 : vector<4x192x16xf32>
    %cst_6 = arith.constant 0.000000e+00 : f32
    %9 = vector.broadcast %cst_6 : f32 to vector<4x192x16xf32>
    %10 = arith.maximumf %8, %9 : vector<4x192x16xf32>
    %c0_7 = arith.constant 0 : index
    %c0_8 = arith.constant 0 : index
    %11 = vector.load %arg4[%c0_7, %c0_8] : memref<1x16xf32, #tpu.memory_space<vmem>>, vector<1x16xf32>
    %c0_9 = arith.constant 0 : index
    %c0_10 = arith.constant 0 : index
    %12 = vector.load %arg5[%c0_9, %c0_10] : memref<1x16xf32, #tpu.memory_space<vmem>>, vector<1x16xf32>
    %13 = vector.extract_strided_slice %10 {offsets = [0, 0, 0], sizes = [4, 24, 16], strides = [1, 1, 1]} : vector<4x192x16xf32> to vector<4x24x16xf32>
    %14 = vector.extract_strided_slice %10 {offsets = [0, 24, 0], sizes = [4, 24, 16], strides = [1, 1, 1]} : vector<4x192x16xf32> to vector<4x24x16xf32>
    %15 = arith.maximumf %13, %14 : vector<4x24x16xf32>
    %16 = vector.shape_cast %11 : vector<1x16xf32> to vector<1x1x16xf32>
    %17 = vector.broadcast %16 : vector<1x1x16xf32> to vector<4x24x16xf32>
    %18 = arith.mulf %15, %17 : vector<4x24x16xf32>
    %19 = vector.shape_cast %12 : vector<1x16xf32> to vector<1x1x16xf32>
    %20 = vector.broadcast %19 : vector<1x1x16xf32> to vector<4x24x16xf32>
    %21 = arith.addf %18, %20 : vector<4x24x16xf32>
    %22 = vector.extract_strided_slice %10 {offsets = [0, 48, 0], sizes = [4, 24, 16], strides = [1, 1, 1]} : vector<4x192x16xf32> to vector<4x24x16xf32>
    %23 = vector.extract_strided_slice %10 {offsets = [0, 72, 0], sizes = [4, 24, 16], strides = [1, 1, 1]} : vector<4x192x16xf32> to vector<4x24x16xf32>
    %24 = arith.maximumf %22, %23 : vector<4x24x16xf32>
    %25 = vector.shape_cast %11 : vector<1x16xf32> to vector<1x1x16xf32>
    %26 = vector.broadcast %25 : vector<1x1x16xf32> to vector<4x24x16xf32>
    %27 = arith.mulf %24, %26 : vector<4x24x16xf32>
    %28 = vector.shape_cast %12 : vector<1x16xf32> to vector<1x1x16xf32>
    %29 = vector.broadcast %28 : vector<1x1x16xf32> to vector<4x24x16xf32>
    %30 = arith.addf %27, %29 : vector<4x24x16xf32>
    %31 = vector.extract_strided_slice %10 {offsets = [0, 96, 0], sizes = [4, 24, 16], strides = [1, 1, 1]} : vector<4x192x16xf32> to vector<4x24x16xf32>
    %32 = vector.extract_strided_slice %10 {offsets = [0, 120, 0], sizes = [4, 24, 16], strides = [1, 1, 1]} : vector<4x192x16xf32> to vector<4x24x16xf32>
    %33 = arith.maximumf %31, %32 : vector<4x24x16xf32>
    %34 = vector.shape_cast %11 : vector<1x16xf32> to vector<1x1x16xf32>
    %35 = vector.broadcast %34 : vector<1x1x16xf32> to vector<4x24x16xf32>
    %36 = arith.mulf %33, %35 : vector<4x24x16xf32>
    %37 = vector.shape_cast %12 : vector<1x16xf32> to vector<1x1x16xf32>
    %38 = vector.broadcast %37 : vector<1x1x16xf32> to vector<4x24x16xf32>
    %39 = arith.addf %36, %38 : vector<4x24x16xf32>
    %40 = vector.extract_strided_slice %10 {offsets = [0, 144, 0], sizes = [4, 24, 16], strides = [1, 1, 1]} : vector<4x192x16xf32> to vector<4x24x16xf32>
    %41 = vector.extract_strided_slice %10 {offsets = [0, 168, 0], sizes = [4, 24, 16], strides = [1, 1, 1]} : vector<4x192x16xf32> to vector<4x24x16xf32>
    %42 = arith.maximumf %40, %41 : vector<4x24x16xf32>
    %43 = vector.shape_cast %11 : vector<1x16xf32> to vector<1x1x16xf32>
    %44 = vector.broadcast %43 : vector<1x1x16xf32> to vector<4x24x16xf32>
    %45 = arith.mulf %42, %44 : vector<4x24x16xf32>
    %46 = vector.shape_cast %12 : vector<1x16xf32> to vector<1x1x16xf32>
    %47 = vector.broadcast %46 : vector<1x1x16xf32> to vector<4x24x16xf32>
    %48 = arith.addf %45, %47 : vector<4x24x16xf32>
    %c0_11 = arith.constant 0 : index
    %c0_12 = arith.constant 0 : index
    %49 = vector.load %arg6[%c0_11, %c0_12] : memref<512x32xbf16, #tpu.memory_space<vmem>>, vector<512x32xbf16>
    %c0_13 = arith.constant 0 : index
    %c0_14 = arith.constant 0 : index
    %50 = vector.load %arg7[%c0_13, %c0_14] : memref<1x32xf32, #tpu.memory_space<vmem>>, vector<1x32xf32>
    %51 = vector.extract_strided_slice %21 {offsets = [0, 0, 0], sizes = [4, 16, 16], strides = [1, 1, 1]} : vector<4x24x16xf32> to vector<4x16x16xf32>
    %52 = vector.extract_strided_slice %30 {offsets = [0, 0, 0], sizes = [4, 16, 16], strides = [1, 1, 1]} : vector<4x24x16xf32> to vector<4x16x16xf32>
    %53 = vector.extract_strided_slice %39 {offsets = [0, 0, 0], sizes = [4, 16, 16], strides = [1, 1, 1]} : vector<4x24x16xf32> to vector<4x16x16xf32>
    %54 = vector.extract_strided_slice %48 {offsets = [0, 0, 0], sizes = [4, 16, 16], strides = [1, 1, 1]} : vector<4x24x16xf32> to vector<4x16x16xf32>
    %55 = vector.extract_strided_slice %21 {offsets = [0, 1, 0], sizes = [4, 16, 16], strides = [1, 1, 1]} : vector<4x24x16xf32> to vector<4x16x16xf32>
    %56 = vector.extract_strided_slice %30 {offsets = [0, 1, 0], sizes = [4, 16, 16], strides = [1, 1, 1]} : vector<4x24x16xf32> to vector<4x16x16xf32>
    %57 = vector.extract_strided_slice %39 {offsets = [0, 1, 0], sizes = [4, 16, 16], strides = [1, 1, 1]} : vector<4x24x16xf32> to vector<4x16x16xf32>
    %58 = vector.extract_strided_slice %48 {offsets = [0, 1, 0], sizes = [4, 16, 16], strides = [1, 1, 1]} : vector<4x24x16xf32> to vector<4x16x16xf32>
    %59 = vector.extract_strided_slice %21 {offsets = [0, 2, 0], sizes = [4, 16, 16], strides = [1, 1, 1]} : vector<4x24x16xf32> to vector<4x16x16xf32>
    %60 = vector.extract_strided_slice %30 {offsets = [0, 2, 0], sizes = [4, 16, 16], strides = [1, 1, 1]} : vector<4x24x16xf32> to vector<4x16x16xf32>
    %61 = vector.extract_strided_slice %39 {offsets = [0, 2, 0], sizes = [4, 16, 16], strides = [1, 1, 1]} : vector<4x24x16xf32> to vector<4x16x16xf32>
    %62 = vector.extract_strided_slice %48 {offsets = [0, 2, 0], sizes = [4, 16, 16], strides = [1, 1, 1]} : vector<4x24x16xf32> to vector<4x16x16xf32>
    %63 = vector.extract_strided_slice %21 {offsets = [0, 3, 0], sizes = [4, 16, 16], strides = [1, 1, 1]} : vector<4x24x16xf32> to vector<4x16x16xf32>
    %64 = vector.extract_strided_slice %30 {offsets = [0, 3, 0], sizes = [4, 16, 16], strides = [1, 1, 1]} : vector<4x24x16xf32> to vector<4x16x16xf32>
    %65 = vector.extract_strided_slice %39 {offsets = [0, 3, 0], sizes = [4, 16, 16], strides = [1, 1, 1]} : vector<4x24x16xf32> to vector<4x16x16xf32>
    %66 = vector.extract_strided_slice %48 {offsets = [0, 3, 0], sizes = [4, 16, 16], strides = [1, 1, 1]} : vector<4x24x16xf32> to vector<4x16x16xf32>
    %67 = vector.extract_strided_slice %21 {offsets = [0, 4, 0], sizes = [4, 16, 16], strides = [1, 1, 1]} : vector<4x24x16xf32> to vector<4x16x16xf32>
    %68 = vector.extract_strided_slice %30 {offsets = [0, 4, 0], sizes = [4, 16, 16], strides = [1, 1, 1]} : vector<4x24x16xf32> to vector<4x16x16xf32>
    %69 = vector.extract_strided_slice %39 {offsets = [0, 4, 0], sizes = [4, 16, 16], strides = [1, 1, 1]} : vector<4x24x16xf32> to vector<4x16x16xf32>
    %70 = vector.extract_strided_slice %48 {offsets = [0, 4, 0], sizes = [4, 16, 16], strides = [1, 1, 1]} : vector<4x24x16xf32> to vector<4x16x16xf32>
    %71 = vector.extract_strided_slice %21 {offsets = [0, 5, 0], sizes = [4, 16, 16], strides = [1, 1, 1]} : vector<4x24x16xf32> to vector<4x16x16xf32>
    %72 = vector.extract_strided_slice %30 {offsets = [0, 5, 0], sizes = [4, 16, 16], strides = [1, 1, 1]} : vector<4x24x16xf32> to vector<4x16x16xf32>
    %73 = vector.extract_strided_slice %39 {offsets = [0, 5, 0], sizes = [4, 16, 16], strides = [1, 1, 1]} : vector<4x24x16xf32> to vector<4x16x16xf32>
    %74 = vector.extract_strided_slice %48 {offsets = [0, 5, 0], sizes = [4, 16, 16], strides = [1, 1, 1]} : vector<4x24x16xf32> to vector<4x16x16xf32>
    %75 = vector.extract_strided_slice %21 {offsets = [0, 6, 0], sizes = [4, 16, 16], strides = [1, 1, 1]} : vector<4x24x16xf32> to vector<4x16x16xf32>
    %76 = vector.extract_strided_slice %30 {offsets = [0, 6, 0], sizes = [4, 16, 16], strides = [1, 1, 1]} : vector<4x24x16xf32> to vector<4x16x16xf32>
    %77 = vector.extract_strided_slice %39 {offsets = [0, 6, 0], sizes = [4, 16, 16], strides = [1, 1, 1]} : vector<4x24x16xf32> to vector<4x16x16xf32>
    %78 = vector.extract_strided_slice %48 {offsets = [0, 6, 0], sizes = [4, 16, 16], strides = [1, 1, 1]} : vector<4x24x16xf32> to vector<4x16x16xf32>
    %79 = vector.extract_strided_slice %21 {offsets = [0, 7, 0], sizes = [4, 16, 16], strides = [1, 1, 1]} : vector<4x24x16xf32> to vector<4x16x16xf32>
    %80 = vector.extract_strided_slice %30 {offsets = [0, 7, 0], sizes = [4, 16, 16], strides = [1, 1, 1]} : vector<4x24x16xf32> to vector<4x16x16xf32>
    %81 = vector.extract_strided_slice %39 {offsets = [0, 7, 0], sizes = [4, 16, 16], strides = [1, 1, 1]} : vector<4x24x16xf32> to vector<4x16x16xf32>
    %82 = vector.extract_strided_slice %48 {offsets = [0, 7, 0], sizes = [4, 16, 16], strides = [1, 1, 1]} : vector<4x24x16xf32> to vector<4x16x16xf32>
    %83 = tpu.concatenate %51, %52, %53, %54, %55, %56, %57, %58, %59, %60, %61, %62, %63, %64, %65, %66 in 2 : vector<4x16x16xf32>, vector<4x16x16xf32>, vector<4x16x16xf32>, vector<4x16x16xf32>, vector<4x16x16xf32>, vector<4x16x16xf32>, vector<4x16x16xf32>, vector<4x16x16xf32>, vector<4x16x16xf32>, vector<4x16x16xf32>, vector<4x16x16xf32>, vector<4x16x16xf32>, vector<4x16x16xf32>, vector<4x16x16xf32>, vector<4x16x16xf32>, vector<4x16x16xf32> -> vector<4x16x256xf32>
    %84 = tpu.concatenate %67, %68, %69, %70, %71, %72, %73, %74, %75, %76, %77, %78, %79, %80, %81, %82 in 2 : vector<4x16x16xf32>, vector<4x16x16xf32>, vector<4x16x16xf32>, vector<4x16x16xf32>, vector<4x16x16xf32>, vector<4x16x16xf32>, vector<4x16x16xf32>, vector<4x16x16xf32>, vector<4x16x16xf32>, vector<4x16x16xf32>, vector<4x16x16xf32>, vector<4x16x16xf32>, vector<4x16x16xf32>, vector<4x16x16xf32>, vector<4x16x16xf32>, vector<4x16x16xf32> -> vector<4x16x256xf32>
    %85 = tpu.concatenate %83, %84 in 2 : vector<4x16x256xf32>, vector<4x16x256xf32> -> vector<4x16x512xf32>
    %86 = vector.extract_strided_slice %30 {offsets = [0, 0, 0], sizes = [4, 16, 16], strides = [1, 1, 1]} : vector<4x24x16xf32> to vector<4x16x16xf32>
    %87 = vector.extract_strided_slice %39 {offsets = [0, 0, 0], sizes = [4, 16, 16], strides = [1, 1, 1]} : vector<4x24x16xf32> to vector<4x16x16xf32>
    %88 = vector.extract_strided_slice %48 {offsets = [0, 0, 0], sizes = [4, 16, 16], strides = [1, 1, 1]} : vector<4x24x16xf32> to vector<4x16x16xf32>
    %89 = vector.extract_strided_slice %21 {offsets = [0, 1, 0], sizes = [4, 16, 16], strides = [1, 1, 1]} : vector<4x24x16xf32> to vector<4x16x16xf32>
    %90 = vector.extract_strided_slice %30 {offsets = [0, 1, 0], sizes = [4, 16, 16], strides = [1, 1, 1]} : vector<4x24x16xf32> to vector<4x16x16xf32>
    %91 = vector.extract_strided_slice %39 {offsets = [0, 1, 0], sizes = [4, 16, 16], strides = [1, 1, 1]} : vector<4x24x16xf32> to vector<4x16x16xf32>
    %92 = vector.extract_strided_slice %48 {offsets = [0, 1, 0], sizes = [4, 16, 16], strides = [1, 1, 1]} : vector<4x24x16xf32> to vector<4x16x16xf32>
    %93 = vector.extract_strided_slice %21 {offsets = [0, 2, 0], sizes = [4, 16, 16], strides = [1, 1, 1]} : vector<4x24x16xf32> to vector<4x16x16xf32>
    %94 = vector.extract_strided_slice %30 {offsets = [0, 2, 0], sizes = [4, 16, 16], strides = [1, 1, 1]} : vector<4x24x16xf32> to vector<4x16x16xf32>
    %95 = vector.extract_strided_slice %39 {offsets = [0, 2, 0], sizes = [4, 16, 16], strides = [1, 1, 1]} : vector<4x24x16xf32> to vector<4x16x16xf32>
    %96 = vector.extract_strided_slice %48 {offsets = [0, 2, 0], sizes = [4, 16, 16], strides = [1, 1, 1]} : vector<4x24x16xf32> to vector<4x16x16xf32>
    %97 = vector.extract_strided_slice %21 {offsets = [0, 3, 0], sizes = [4, 16, 16], strides = [1, 1, 1]} : vector<4x24x16xf32> to vector<4x16x16xf32>
    %98 = vector.extract_strided_slice %30 {offsets = [0, 3, 0], sizes = [4, 16, 16], strides = [1, 1, 1]} : vector<4x24x16xf32> to vector<4x16x16xf32>
    %99 = vector.extract_strided_slice %39 {offsets = [0, 3, 0], sizes = [4, 16, 16], strides = [1, 1, 1]} : vector<4x24x16xf32> to vector<4x16x16xf32>
    %100 = vector.extract_strided_slice %48 {offsets = [0, 3, 0], sizes = [4, 16, 16], strides = [1, 1, 1]} : vector<4x24x16xf32> to vector<4x16x16xf32>
    %101 = vector.extract_strided_slice %21 {offsets = [0, 4, 0], sizes = [4, 16, 16], strides = [1, 1, 1]} : vector<4x24x16xf32> to vector<4x16x16xf32>
    %102 = vector.extract_strided_slice %30 {offsets = [0, 4, 0], sizes = [4, 16, 16], strides = [1, 1, 1]} : vector<4x24x16xf32> to vector<4x16x16xf32>
    %103 = vector.extract_strided_slice %39 {offsets = [0, 4, 0], sizes = [4, 16, 16], strides = [1, 1, 1]} : vector<4x24x16xf32> to vector<4x16x16xf32>
    %104 = vector.extract_strided_slice %48 {offsets = [0, 4, 0], sizes = [4, 16, 16], strides = [1, 1, 1]} : vector<4x24x16xf32> to vector<4x16x16xf32>
    %105 = vector.extract_strided_slice %21 {offsets = [0, 5, 0], sizes = [4, 16, 16], strides = [1, 1, 1]} : vector<4x24x16xf32> to vector<4x16x16xf32>
    %106 = vector.extract_strided_slice %30 {offsets = [0, 5, 0], sizes = [4, 16, 16], strides = [1, 1, 1]} : vector<4x24x16xf32> to vector<4x16x16xf32>
    %107 = vector.extract_strided_slice %39 {offsets = [0, 5, 0], sizes = [4, 16, 16], strides = [1, 1, 1]} : vector<4x24x16xf32> to vector<4x16x16xf32>
    %108 = vector.extract_strided_slice %48 {offsets = [0, 5, 0], sizes = [4, 16, 16], strides = [1, 1, 1]} : vector<4x24x16xf32> to vector<4x16x16xf32>
    %109 = vector.extract_strided_slice %21 {offsets = [0, 6, 0], sizes = [4, 16, 16], strides = [1, 1, 1]} : vector<4x24x16xf32> to vector<4x16x16xf32>
    %110 = vector.extract_strided_slice %30 {offsets = [0, 6, 0], sizes = [4, 16, 16], strides = [1, 1, 1]} : vector<4x24x16xf32> to vector<4x16x16xf32>
    %111 = vector.extract_strided_slice %39 {offsets = [0, 6, 0], sizes = [4, 16, 16], strides = [1, 1, 1]} : vector<4x24x16xf32> to vector<4x16x16xf32>
    %112 = vector.extract_strided_slice %48 {offsets = [0, 6, 0], sizes = [4, 16, 16], strides = [1, 1, 1]} : vector<4x24x16xf32> to vector<4x16x16xf32>
    %113 = vector.extract_strided_slice %21 {offsets = [0, 7, 0], sizes = [4, 16, 16], strides = [1, 1, 1]} : vector<4x24x16xf32> to vector<4x16x16xf32>
    %114 = vector.extract_strided_slice %30 {offsets = [0, 7, 0], sizes = [4, 16, 16], strides = [1, 1, 1]} : vector<4x24x16xf32> to vector<4x16x16xf32>
    %115 = vector.extract_strided_slice %39 {offsets = [0, 7, 0], sizes = [4, 16, 16], strides = [1, 1, 1]} : vector<4x24x16xf32> to vector<4x16x16xf32>
    %116 = vector.extract_strided_slice %48 {offsets = [0, 7, 0], sizes = [4, 16, 16], strides = [1, 1, 1]} : vector<4x24x16xf32> to vector<4x16x16xf32>
    %117 = vector.extract_strided_slice %21 {offsets = [0, 8, 0], sizes = [4, 16, 16], strides = [1, 1, 1]} : vector<4x24x16xf32> to vector<4x16x16xf32>
    %118 = tpu.concatenate %86, %87, %88, %89, %90, %91, %92, %93, %94, %95, %96, %97, %98, %99, %100, %101 in 2 : vector<4x16x16xf32>, vector<4x16x16xf32>, vector<4x16x16xf32>, vector<4x16x16xf32>, vector<4x16x16xf32>, vector<4x16x16xf32>, vector<4x16x16xf32>, vector<4x16x16xf32>, vector<4x16x16xf32>, vector<4x16x16xf32>, vector<4x16x16xf32>, vector<4x16x16xf32>, vector<4x16x16xf32>, vector<4x16x16xf32>, vector<4x16x16xf32>, vector<4x16x16xf32> -> vector<4x16x256xf32>
    %119 = tpu.concatenate %102, %103, %104, %105, %106, %107, %108, %109, %110, %111, %112, %113, %114, %115, %116, %117 in 2 : vector<4x16x16xf32>, vector<4x16x16xf32>, vector<4x16x16xf32>, vector<4x16x16xf32>, vector<4x16x16xf32>, vector<4x16x16xf32>, vector<4x16x16xf32>, vector<4x16x16xf32>, vector<4x16x16xf32>, vector<4x16x16xf32>, vector<4x16x16xf32>, vector<4x16x16xf32>, vector<4x16x16xf32>, vector<4x16x16xf32>, vector<4x16x16xf32>, vector<4x16x16xf32> -> vector<4x16x256xf32>
    %120 = tpu.concatenate %118, %119 in 2 : vector<4x16x256xf32>, vector<4x16x256xf32> -> vector<4x16x512xf32>
    %121 = vector.extract_strided_slice %39 {offsets = [0, 0, 0], sizes = [4, 16, 16], strides = [1, 1, 1]} : vector<4x24x16xf32> to vector<4x16x16xf32>
    %122 = vector.extract_strided_slice %48 {offsets = [0, 0, 0], sizes = [4, 16, 16], strides = [1, 1, 1]} : vector<4x24x16xf32> to vector<4x16x16xf32>
    %123 = vector.extract_strided_slice %21 {offsets = [0, 1, 0], sizes = [4, 16, 16], strides = [1, 1, 1]} : vector<4x24x16xf32> to vector<4x16x16xf32>
    %124 = vector.extract_strided_slice %30 {offsets = [0, 1, 0], sizes = [4, 16, 16], strides = [1, 1, 1]} : vector<4x24x16xf32> to vector<4x16x16xf32>
    %125 = vector.extract_strided_slice %39 {offsets = [0, 1, 0], sizes = [4, 16, 16], strides = [1, 1, 1]} : vector<4x24x16xf32> to vector<4x16x16xf32>
    %126 = vector.extract_strided_slice %48 {offsets = [0, 1, 0], sizes = [4, 16, 16], strides = [1, 1, 1]} : vector<4x24x16xf32> to vector<4x16x16xf32>
    %127 = vector.extract_strided_slice %21 {offsets = [0, 2, 0], sizes = [4, 16, 16], strides = [1, 1, 1]} : vector<4x24x16xf32> to vector<4x16x16xf32>
    %128 = vector.extract_strided_slice %30 {offsets = [0, 2, 0], sizes = [4, 16, 16], strides = [1, 1, 1]} : vector<4x24x16xf32> to vector<4x16x16xf32>
    %129 = vector.extract_strided_slice %39 {offsets = [0, 2, 0], sizes = [4, 16, 16], strides = [1, 1, 1]} : vector<4x24x16xf32> to vector<4x16x16xf32>
    %130 = vector.extract_strided_slice %48 {offsets = [0, 2, 0], sizes = [4, 16, 16], strides = [1, 1, 1]} : vector<4x24x16xf32> to vector<4x16x16xf32>
    %131 = vector.extract_strided_slice %21 {offsets = [0, 3, 0], sizes = [4, 16, 16], strides = [1, 1, 1]} : vector<4x24x16xf32> to vector<4x16x16xf32>
    %132 = vector.extract_strided_slice %30 {offsets = [0, 3, 0], sizes = [4, 16, 16], strides = [1, 1, 1]} : vector<4x24x16xf32> to vector<4x16x16xf32>
    %133 = vector.extract_strided_slice %39 {offsets = [0, 3, 0], sizes = [4, 16, 16], strides = [1, 1, 1]} : vector<4x24x16xf32> to vector<4x16x16xf32>
    %134 = vector.extract_strided_slice %48 {offsets = [0, 3, 0], sizes = [4, 16, 16], strides = [1, 1, 1]} : vector<4x24x16xf32> to vector<4x16x16xf32>
    %135 = vector.extract_strided_slice %21 {offsets = [0, 4, 0], sizes = [4, 16, 16], strides = [1, 1, 1]} : vector<4x24x16xf32> to vector<4x16x16xf32>
    %136 = vector.extract_strided_slice %30 {offsets = [0, 4, 0], sizes = [4, 16, 16], strides = [1, 1, 1]} : vector<4x24x16xf32> to vector<4x16x16xf32>
    %137 = vector.extract_strided_slice %39 {offsets = [0, 4, 0], sizes = [4, 16, 16], strides = [1, 1, 1]} : vector<4x24x16xf32> to vector<4x16x16xf32>
    %138 = vector.extract_strided_slice %48 {offsets = [0, 4, 0], sizes = [4, 16, 16], strides = [1, 1, 1]} : vector<4x24x16xf32> to vector<4x16x16xf32>
    %139 = vector.extract_strided_slice %21 {offsets = [0, 5, 0], sizes = [4, 16, 16], strides = [1, 1, 1]} : vector<4x24x16xf32> to vector<4x16x16xf32>
    %140 = vector.extract_strided_slice %30 {offsets = [0, 5, 0], sizes = [4, 16, 16], strides = [1, 1, 1]} : vector<4x24x16xf32> to vector<4x16x16xf32>
    %141 = vector.extract_strided_slice %39 {offsets = [0, 5, 0], sizes = [4, 16, 16], strides = [1, 1, 1]} : vector<4x24x16xf32> to vector<4x16x16xf32>
    %142 = vector.extract_strided_slice %48 {offsets = [0, 5, 0], sizes = [4, 16, 16], strides = [1, 1, 1]} : vector<4x24x16xf32> to vector<4x16x16xf32>
    %143 = vector.extract_strided_slice %21 {offsets = [0, 6, 0], sizes = [4, 16, 16], strides = [1, 1, 1]} : vector<4x24x16xf32> to vector<4x16x16xf32>
    %144 = vector.extract_strided_slice %30 {offsets = [0, 6, 0], sizes = [4, 16, 16], strides = [1, 1, 1]} : vector<4x24x16xf32> to vector<4x16x16xf32>
    %145 = vector.extract_strided_slice %39 {offsets = [0, 6, 0], sizes = [4, 16, 16], strides = [1, 1, 1]} : vector<4x24x16xf32> to vector<4x16x16xf32>
    %146 = vector.extract_strided_slice %48 {offsets = [0, 6, 0], sizes = [4, 16, 16], strides = [1, 1, 1]} : vector<4x24x16xf32> to vector<4x16x16xf32>
    %147 = vector.extract_strided_slice %21 {offsets = [0, 7, 0], sizes = [4, 16, 16], strides = [1, 1, 1]} : vector<4x24x16xf32> to vector<4x16x16xf32>
    %148 = vector.extract_strided_slice %30 {offsets = [0, 7, 0], sizes = [4, 16, 16], strides = [1, 1, 1]} : vector<4x24x16xf32> to vector<4x16x16xf32>
    %149 = vector.extract_strided_slice %39 {offsets = [0, 7, 0], sizes = [4, 16, 16], strides = [1, 1, 1]} : vector<4x24x16xf32> to vector<4x16x16xf32>
    %150 = vector.extract_strided_slice %48 {offsets = [0, 7, 0], sizes = [4, 16, 16], strides = [1, 1, 1]} : vector<4x24x16xf32> to vector<4x16x16xf32>
    %151 = vector.extract_strided_slice %21 {offsets = [0, 8, 0], sizes = [4, 16, 16], strides = [1, 1, 1]} : vector<4x24x16xf32> to vector<4x16x16xf32>
    %152 = vector.extract_strided_slice %30 {offsets = [0, 8, 0], sizes = [4, 16, 16], strides = [1, 1, 1]} : vector<4x24x16xf32> to vector<4x16x16xf32>
    %153 = tpu.concatenate %121, %122, %123, %124, %125, %126, %127, %128, %129, %130, %131, %132, %133, %134, %135, %136 in 2 : vector<4x16x16xf32>, vector<4x16x16xf32>, vector<4x16x16xf32>, vector<4x16x16xf32>, vector<4x16x16xf32>, vector<4x16x16xf32>, vector<4x16x16xf32>, vector<4x16x16xf32>, vector<4x16x16xf32>, vector<4x16x16xf32>, vector<4x16x16xf32>, vector<4x16x16xf32>, vector<4x16x16xf32>, vector<4x16x16xf32>, vector<4x16x16xf32>, vector<4x16x16xf32> -> vector<4x16x256xf32>
    %154 = tpu.concatenate %137, %138, %139, %140, %141, %142, %143, %144, %145, %146, %147, %148, %149, %150, %151, %152 in 2 : vector<4x16x16xf32>, vector<4x16x16xf32>, vector<4x16x16xf32>, vector<4x16x16xf32>, vector<4x16x16xf32>, vector<4x16x16xf32>, vector<4x16x16xf32>, vector<4x16x16xf32>, vector<4x16x16xf32>, vector<4x16x16xf32>, vector<4x16x16xf32>, vector<4x16x16xf32>, vector<4x16x16xf32>, vector<4x16x16xf32>, vector<4x16x16xf32>, vector<4x16x16xf32> -> vector<4x16x256xf32>
    %155 = tpu.concatenate %153, %154 in 2 : vector<4x16x256xf32>, vector<4x16x256xf32> -> vector<4x16x512xf32>
    %156 = vector.extract_strided_slice %48 {offsets = [0, 0, 0], sizes = [4, 16, 16], strides = [1, 1, 1]} : vector<4x24x16xf32> to vector<4x16x16xf32>
    %157 = vector.extract_strided_slice %21 {offsets = [0, 1, 0], sizes = [4, 16, 16], strides = [1, 1, 1]} : vector<4x24x16xf32> to vector<4x16x16xf32>
    %158 = vector.extract_strided_slice %30 {offsets = [0, 1, 0], sizes = [4, 16, 16], strides = [1, 1, 1]} : vector<4x24x16xf32> to vector<4x16x16xf32>
    %159 = vector.extract_strided_slice %39 {offsets = [0, 1, 0], sizes = [4, 16, 16], strides = [1, 1, 1]} : vector<4x24x16xf32> to vector<4x16x16xf32>
    %160 = vector.extract_strided_slice %48 {offsets = [0, 1, 0], sizes = [4, 16, 16], strides = [1, 1, 1]} : vector<4x24x16xf32> to vector<4x16x16xf32>
    %161 = vector.extract_strided_slice %21 {offsets = [0, 2, 0], sizes = [4, 16, 16], strides = [1, 1, 1]} : vector<4x24x16xf32> to vector<4x16x16xf32>
    %162 = vector.extract_strided_slice %30 {offsets = [0, 2, 0], sizes = [4, 16, 16], strides = [1, 1, 1]} : vector<4x24x16xf32> to vector<4x16x16xf32>
    %163 = vector.extract_strided_slice %39 {offsets = [0, 2, 0], sizes = [4, 16, 16], strides = [1, 1, 1]} : vector<4x24x16xf32> to vector<4x16x16xf32>
    %164 = vector.extract_strided_slice %48 {offsets = [0, 2, 0], sizes = [4, 16, 16], strides = [1, 1, 1]} : vector<4x24x16xf32> to vector<4x16x16xf32>
    %165 = vector.extract_strided_slice %21 {offsets = [0, 3, 0], sizes = [4, 16, 16], strides = [1, 1, 1]} : vector<4x24x16xf32> to vector<4x16x16xf32>
    %166 = vector.extract_strided_slice %30 {offsets = [0, 3, 0], sizes = [4, 16, 16], strides = [1, 1, 1]} : vector<4x24x16xf32> to vector<4x16x16xf32>
    %167 = vector.extract_strided_slice %39 {offsets = [0, 3, 0], sizes = [4, 16, 16], strides = [1, 1, 1]} : vector<4x24x16xf32> to vector<4x16x16xf32>
    %168 = vector.extract_strided_slice %48 {offsets = [0, 3, 0], sizes = [4, 16, 16], strides = [1, 1, 1]} : vector<4x24x16xf32> to vector<4x16x16xf32>
    %169 = vector.extract_strided_slice %21 {offsets = [0, 4, 0], sizes = [4, 16, 16], strides = [1, 1, 1]} : vector<4x24x16xf32> to vector<4x16x16xf32>
    %170 = vector.extract_strided_slice %30 {offsets = [0, 4, 0], sizes = [4, 16, 16], strides = [1, 1, 1]} : vector<4x24x16xf32> to vector<4x16x16xf32>
    %171 = vector.extract_strided_slice %39 {offsets = [0, 4, 0], sizes = [4, 16, 16], strides = [1, 1, 1]} : vector<4x24x16xf32> to vector<4x16x16xf32>
    %172 = vector.extract_strided_slice %48 {offsets = [0, 4, 0], sizes = [4, 16, 16], strides = [1, 1, 1]} : vector<4x24x16xf32> to vector<4x16x16xf32>
    %173 = vector.extract_strided_slice %21 {offsets = [0, 5, 0], sizes = [4, 16, 16], strides = [1, 1, 1]} : vector<4x24x16xf32> to vector<4x16x16xf32>
    %174 = vector.extract_strided_slice %30 {offsets = [0, 5, 0], sizes = [4, 16, 16], strides = [1, 1, 1]} : vector<4x24x16xf32> to vector<4x16x16xf32>
    %175 = vector.extract_strided_slice %39 {offsets = [0, 5, 0], sizes = [4, 16, 16], strides = [1, 1, 1]} : vector<4x24x16xf32> to vector<4x16x16xf32>
    %176 = vector.extract_strided_slice %48 {offsets = [0, 5, 0], sizes = [4, 16, 16], strides = [1, 1, 1]} : vector<4x24x16xf32> to vector<4x16x16xf32>
    %177 = vector.extract_strided_slice %21 {offsets = [0, 6, 0], sizes = [4, 16, 16], strides = [1, 1, 1]} : vector<4x24x16xf32> to vector<4x16x16xf32>
    %178 = vector.extract_strided_slice %30 {offsets = [0, 6, 0], sizes = [4, 16, 16], strides = [1, 1, 1]} : vector<4x24x16xf32> to vector<4x16x16xf32>
    %179 = vector.extract_strided_slice %39 {offsets = [0, 6, 0], sizes = [4, 16, 16], strides = [1, 1, 1]} : vector<4x24x16xf32> to vector<4x16x16xf32>
    %180 = vector.extract_strided_slice %48 {offsets = [0, 6, 0], sizes = [4, 16, 16], strides = [1, 1, 1]} : vector<4x24x16xf32> to vector<4x16x16xf32>
    %181 = vector.extract_strided_slice %21 {offsets = [0, 7, 0], sizes = [4, 16, 16], strides = [1, 1, 1]} : vector<4x24x16xf32> to vector<4x16x16xf32>
    %182 = vector.extract_strided_slice %30 {offsets = [0, 7, 0], sizes = [4, 16, 16], strides = [1, 1, 1]} : vector<4x24x16xf32> to vector<4x16x16xf32>
    %183 = vector.extract_strided_slice %39 {offsets = [0, 7, 0], sizes = [4, 16, 16], strides = [1, 1, 1]} : vector<4x24x16xf32> to vector<4x16x16xf32>
    %184 = vector.extract_strided_slice %48 {offsets = [0, 7, 0], sizes = [4, 16, 16], strides = [1, 1, 1]} : vector<4x24x16xf32> to vector<4x16x16xf32>
    %185 = vector.extract_strided_slice %21 {offsets = [0, 8, 0], sizes = [4, 16, 16], strides = [1, 1, 1]} : vector<4x24x16xf32> to vector<4x16x16xf32>
    %186 = vector.extract_strided_slice %30 {offsets = [0, 8, 0], sizes = [4, 16, 16], strides = [1, 1, 1]} : vector<4x24x16xf32> to vector<4x16x16xf32>
    %187 = vector.extract_strided_slice %39 {offsets = [0, 8, 0], sizes = [4, 16, 16], strides = [1, 1, 1]} : vector<4x24x16xf32> to vector<4x16x16xf32>
    %188 = tpu.concatenate %156, %157, %158, %159, %160, %161, %162, %163, %164, %165, %166, %167, %168, %169, %170, %171 in 2 : vector<4x16x16xf32>, vector<4x16x16xf32>, vector<4x16x16xf32>, vector<4x16x16xf32>, vector<4x16x16xf32>, vector<4x16x16xf32>, vector<4x16x16xf32>, vector<4x16x16xf32>, vector<4x16x16xf32>, vector<4x16x16xf32>, vector<4x16x16xf32>, vector<4x16x16xf32>, vector<4x16x16xf32>, vector<4x16x16xf32>, vector<4x16x16xf32>, vector<4x16x16xf32> -> vector<4x16x256xf32>
    %189 = tpu.concatenate %172, %173, %174, %175, %176, %177, %178, %179, %180, %181, %182, %183, %184, %185, %186, %187 in 2 : vector<4x16x16xf32>, vector<4x16x16xf32>, vector<4x16x16xf32>, vector<4x16x16xf32>, vector<4x16x16xf32>, vector<4x16x16xf32>, vector<4x16x16xf32>, vector<4x16x16xf32>, vector<4x16x16xf32>, vector<4x16x16xf32>, vector<4x16x16xf32>, vector<4x16x16xf32>, vector<4x16x16xf32>, vector<4x16x16xf32>, vector<4x16x16xf32>, vector<4x16x16xf32> -> vector<4x16x256xf32>
    %190 = tpu.concatenate %188, %189 in 2 : vector<4x16x256xf32>, vector<4x16x256xf32> -> vector<4x16x512xf32>
    %191 = tpu.concatenate %85, %120, %155, %190 in 1 : vector<4x16x512xf32>, vector<4x16x512xf32>, vector<4x16x512xf32>, vector<4x16x512xf32> -> vector<4x64x512xf32>
    %192 = vector.shape_cast %191 : vector<4x64x512xf32> to vector<256x512xf32>
    %193 = arith.truncf %192 : vector<256x512xf32> to vector<256x512xbf16>
    %cst_15 = arith.constant dense<0.000000e+00> : vector<256x32xf32>
    %194 = tpu.matmul %193, %49, %cst_15 {dimension_numbers = #tpu.dot_dimension_numbers<[1], [0], [0], [1], [0, 0, 1, 1], [], []>} : vector<256x512xbf16>, vector<512x32xbf16>, vector<256x32xf32> -> vector<256x32xf32>
    %195 = vector.shape_cast %194 : vector<256x32xf32> to vector<4x64x32xf32>
    %196 = vector.shape_cast %50 : vector<1x32xf32> to vector<1x1x32xf32>
    %197 = vector.broadcast %196 : vector<1x1x32xf32> to vector<4x64x32xf32>
    %198 = arith.addf %195, %197 : vector<4x64x32xf32>
    %cst_16 = arith.constant 0.000000e+00 : f32
    %199 = vector.broadcast %cst_16 : f32 to vector<4x64x32xf32>
    %200 = arith.maximumf %198, %199 : vector<4x64x32xf32>
    %c0_17 = arith.constant 0 : index
    %c0_18 = arith.constant 0 : index
    %201 = vector.load %arg8[%c0_17, %c0_18] : memref<1x32xf32, #tpu.memory_space<vmem>>, vector<1x32xf32>
    %c0_19 = arith.constant 0 : index
    %c0_20 = arith.constant 0 : index
    %202 = vector.load %arg9[%c0_19, %c0_20] : memref<1x32xf32, #tpu.memory_space<vmem>>, vector<1x32xf32>
    %203 = vector.extract_strided_slice %200 {offsets = [0, 0, 0], sizes = [4, 16, 32], strides = [1, 1, 1]} : vector<4x64x32xf32> to vector<4x16x32xf32>
    %204 = vector.extract_strided_slice %200 {offsets = [0, 16, 0], sizes = [4, 16, 32], strides = [1, 1, 1]} : vector<4x64x32xf32> to vector<4x16x32xf32>
    %205 = arith.maximumf %203, %204 : vector<4x16x32xf32>
    %206 = vector.shape_cast %201 : vector<1x32xf32> to vector<1x1x32xf32>
    %207 = vector.broadcast %206 : vector<1x1x32xf32> to vector<4x16x32xf32>
    %208 = arith.mulf %205, %207 : vector<4x16x32xf32>
    %209 = vector.shape_cast %202 : vector<1x32xf32> to vector<1x1x32xf32>
    %210 = vector.broadcast %209 : vector<1x1x32xf32> to vector<4x16x32xf32>
    %211 = arith.addf %208, %210 : vector<4x16x32xf32>
    %212 = vector.extract_strided_slice %200 {offsets = [0, 32, 0], sizes = [4, 16, 32], strides = [1, 1, 1]} : vector<4x64x32xf32> to vector<4x16x32xf32>
    %213 = vector.extract_strided_slice %200 {offsets = [0, 48, 0], sizes = [4, 16, 32], strides = [1, 1, 1]} : vector<4x64x32xf32> to vector<4x16x32xf32>
    %214 = arith.maximumf %212, %213 : vector<4x16x32xf32>
    %215 = vector.shape_cast %201 : vector<1x32xf32> to vector<1x1x32xf32>
    %216 = vector.broadcast %215 : vector<1x1x32xf32> to vector<4x16x32xf32>
    %217 = arith.mulf %214, %216 : vector<4x16x32xf32>
    %218 = vector.shape_cast %202 : vector<1x32xf32> to vector<1x1x32xf32>
    %219 = vector.broadcast %218 : vector<1x1x32xf32> to vector<4x16x32xf32>
    %220 = arith.addf %217, %219 : vector<4x16x32xf32>
    %c0_21 = arith.constant 0 : index
    %c0_22 = arith.constant 0 : index
    %221 = vector.load %arg10[%c0_21, %c0_22] : memref<512x64xbf16, #tpu.memory_space<vmem>>, vector<512x64xbf16>
    %c0_23 = arith.constant 0 : index
    %c0_24 = arith.constant 0 : index
    %222 = vector.load %arg11[%c0_23, %c0_24] : memref<1x64xf32, #tpu.memory_space<vmem>>, vector<1x64xf32>
    %223 = vector.extract_strided_slice %211 {offsets = [0, 0, 0], sizes = [4, 8, 32], strides = [1, 1, 1]} : vector<4x16x32xf32> to vector<4x8x32xf32>
    %224 = vector.extract_strided_slice %220 {offsets = [0, 0, 0], sizes = [4, 8, 32], strides = [1, 1, 1]} : vector<4x16x32xf32> to vector<4x8x32xf32>
    %225 = vector.extract_strided_slice %211 {offsets = [0, 1, 0], sizes = [4, 8, 32], strides = [1, 1, 1]} : vector<4x16x32xf32> to vector<4x8x32xf32>
    %226 = vector.extract_strided_slice %220 {offsets = [0, 1, 0], sizes = [4, 8, 32], strides = [1, 1, 1]} : vector<4x16x32xf32> to vector<4x8x32xf32>
    %227 = vector.extract_strided_slice %211 {offsets = [0, 2, 0], sizes = [4, 8, 32], strides = [1, 1, 1]} : vector<4x16x32xf32> to vector<4x8x32xf32>
    %228 = vector.extract_strided_slice %220 {offsets = [0, 2, 0], sizes = [4, 8, 32], strides = [1, 1, 1]} : vector<4x16x32xf32> to vector<4x8x32xf32>
    %229 = vector.extract_strided_slice %211 {offsets = [0, 3, 0], sizes = [4, 8, 32], strides = [1, 1, 1]} : vector<4x16x32xf32> to vector<4x8x32xf32>
    %230 = vector.extract_strided_slice %220 {offsets = [0, 3, 0], sizes = [4, 8, 32], strides = [1, 1, 1]} : vector<4x16x32xf32> to vector<4x8x32xf32>
    %231 = vector.extract_strided_slice %211 {offsets = [0, 4, 0], sizes = [4, 8, 32], strides = [1, 1, 1]} : vector<4x16x32xf32> to vector<4x8x32xf32>
    %232 = vector.extract_strided_slice %220 {offsets = [0, 4, 0], sizes = [4, 8, 32], strides = [1, 1, 1]} : vector<4x16x32xf32> to vector<4x8x32xf32>
    %233 = vector.extract_strided_slice %211 {offsets = [0, 5, 0], sizes = [4, 8, 32], strides = [1, 1, 1]} : vector<4x16x32xf32> to vector<4x8x32xf32>
    %234 = vector.extract_strided_slice %220 {offsets = [0, 5, 0], sizes = [4, 8, 32], strides = [1, 1, 1]} : vector<4x16x32xf32> to vector<4x8x32xf32>
    %235 = vector.extract_strided_slice %211 {offsets = [0, 6, 0], sizes = [4, 8, 32], strides = [1, 1, 1]} : vector<4x16x32xf32> to vector<4x8x32xf32>
    %236 = vector.extract_strided_slice %220 {offsets = [0, 6, 0], sizes = [4, 8, 32], strides = [1, 1, 1]} : vector<4x16x32xf32> to vector<4x8x32xf32>
    %237 = vector.extract_strided_slice %211 {offsets = [0, 7, 0], sizes = [4, 8, 32], strides = [1, 1, 1]} : vector<4x16x32xf32> to vector<4x8x32xf32>
    %238 = vector.extract_strided_slice %220 {offsets = [0, 7, 0], sizes = [4, 8, 32], strides = [1, 1, 1]} : vector<4x16x32xf32> to vector<4x8x32xf32>
    %239 = tpu.concatenate %223, %224, %225, %226, %227, %228, %229, %230, %231, %232, %233, %234, %235, %236, %237, %238 in 2 : vector<4x8x32xf32>, vector<4x8x32xf32>, vector<4x8x32xf32>, vector<4x8x32xf32>, vector<4x8x32xf32>, vector<4x8x32xf32>, vector<4x8x32xf32>, vector<4x8x32xf32>, vector<4x8x32xf32>, vector<4x8x32xf32>, vector<4x8x32xf32>, vector<4x8x32xf32>, vector<4x8x32xf32>, vector<4x8x32xf32>, vector<4x8x32xf32>, vector<4x8x32xf32> -> vector<4x8x512xf32>
    %240 = vector.extract_strided_slice %220 {offsets = [0, 0, 0], sizes = [4, 8, 32], strides = [1, 1, 1]} : vector<4x16x32xf32> to vector<4x8x32xf32>
    %241 = vector.extract_strided_slice %211 {offsets = [0, 1, 0], sizes = [4, 8, 32], strides = [1, 1, 1]} : vector<4x16x32xf32> to vector<4x8x32xf32>
    %242 = vector.extract_strided_slice %220 {offsets = [0, 1, 0], sizes = [4, 8, 32], strides = [1, 1, 1]} : vector<4x16x32xf32> to vector<4x8x32xf32>
    %243 = vector.extract_strided_slice %211 {offsets = [0, 2, 0], sizes = [4, 8, 32], strides = [1, 1, 1]} : vector<4x16x32xf32> to vector<4x8x32xf32>
    %244 = vector.extract_strided_slice %220 {offsets = [0, 2, 0], sizes = [4, 8, 32], strides = [1, 1, 1]} : vector<4x16x32xf32> to vector<4x8x32xf32>
    %245 = vector.extract_strided_slice %211 {offsets = [0, 3, 0], sizes = [4, 8, 32], strides = [1, 1, 1]} : vector<4x16x32xf32> to vector<4x8x32xf32>
    %246 = vector.extract_strided_slice %220 {offsets = [0, 3, 0], sizes = [4, 8, 32], strides = [1, 1, 1]} : vector<4x16x32xf32> to vector<4x8x32xf32>
    %247 = vector.extract_strided_slice %211 {offsets = [0, 4, 0], sizes = [4, 8, 32], strides = [1, 1, 1]} : vector<4x16x32xf32> to vector<4x8x32xf32>
    %248 = vector.extract_strided_slice %220 {offsets = [0, 4, 0], sizes = [4, 8, 32], strides = [1, 1, 1]} : vector<4x16x32xf32> to vector<4x8x32xf32>
    %249 = vector.extract_strided_slice %211 {offsets = [0, 5, 0], sizes = [4, 8, 32], strides = [1, 1, 1]} : vector<4x16x32xf32> to vector<4x8x32xf32>
    %250 = vector.extract_strided_slice %220 {offsets = [0, 5, 0], sizes = [4, 8, 32], strides = [1, 1, 1]} : vector<4x16x32xf32> to vector<4x8x32xf32>
    %251 = vector.extract_strided_slice %211 {offsets = [0, 6, 0], sizes = [4, 8, 32], strides = [1, 1, 1]} : vector<4x16x32xf32> to vector<4x8x32xf32>
    %252 = vector.extract_strided_slice %220 {offsets = [0, 6, 0], sizes = [4, 8, 32], strides = [1, 1, 1]} : vector<4x16x32xf32> to vector<4x8x32xf32>
    %253 = vector.extract_strided_slice %211 {offsets = [0, 7, 0], sizes = [4, 8, 32], strides = [1, 1, 1]} : vector<4x16x32xf32> to vector<4x8x32xf32>
    %254 = vector.extract_strided_slice %220 {offsets = [0, 7, 0], sizes = [4, 8, 32], strides = [1, 1, 1]} : vector<4x16x32xf32> to vector<4x8x32xf32>
    %255 = vector.extract_strided_slice %211 {offsets = [0, 8, 0], sizes = [4, 8, 32], strides = [1, 1, 1]} : vector<4x16x32xf32> to vector<4x8x32xf32>
    %256 = tpu.concatenate %240, %241, %242, %243, %244, %245, %246, %247, %248, %249, %250, %251, %252, %253, %254, %255 in 2 : vector<4x8x32xf32>, vector<4x8x32xf32>, vector<4x8x32xf32>, vector<4x8x32xf32>, vector<4x8x32xf32>, vector<4x8x32xf32>, vector<4x8x32xf32>, vector<4x8x32xf32>, vector<4x8x32xf32>, vector<4x8x32xf32>, vector<4x8x32xf32>, vector<4x8x32xf32>, vector<4x8x32xf32>, vector<4x8x32xf32>, vector<4x8x32xf32>, vector<4x8x32xf32> -> vector<4x8x512xf32>
    %257 = tpu.concatenate %239, %256 in 1 : vector<4x8x512xf32>, vector<4x8x512xf32> -> vector<4x16x512xf32>
    %258 = vector.shape_cast %257 : vector<4x16x512xf32> to vector<64x512xf32>
    %259 = arith.truncf %258 : vector<64x512xf32> to vector<64x512xbf16>
    %cst_25 = arith.constant dense<0.000000e+00> : vector<64x64xf32>
    %260 = tpu.matmul %259, %221, %cst_25 {dimension_numbers = #tpu.dot_dimension_numbers<[1], [0], [0], [1], [0, 0, 1, 1], [], []>} : vector<64x512xbf16>, vector<512x64xbf16>, vector<64x64xf32> -> vector<64x64xf32>
    %261 = vector.shape_cast %260 : vector<64x64xf32> to vector<4x16x64xf32>
    %262 = vector.shape_cast %222 : vector<1x64xf32> to vector<1x1x64xf32>
    %263 = vector.broadcast %262 : vector<1x1x64xf32> to vector<4x16x64xf32>
    %264 = arith.addf %261, %263 : vector<4x16x64xf32>
    %cst_26 = arith.constant 0.000000e+00 : f32
    %265 = vector.broadcast %cst_26 : f32 to vector<4x16x64xf32>
    %266 = arith.maximumf %264, %265 : vector<4x16x64xf32>
    %c0_27 = arith.constant 0 : index
    %c0_28 = arith.constant 0 : index
    %267 = vector.load %arg12[%c0_27, %c0_28] : memref<1x64xf32, #tpu.memory_space<vmem>>, vector<1x64xf32>
    %c0_29 = arith.constant 0 : index
    %c0_30 = arith.constant 0 : index
    %268 = vector.load %arg13[%c0_29, %c0_30] : memref<1x64xf32, #tpu.memory_space<vmem>>, vector<1x64xf32>
    %269 = vector.extract_strided_slice %266 {offsets = [0, 0, 0], sizes = [4, 8, 64], strides = [1, 1, 1]} : vector<4x16x64xf32> to vector<4x8x64xf32>
    %270 = vector.extract_strided_slice %266 {offsets = [0, 8, 0], sizes = [4, 8, 64], strides = [1, 1, 1]} : vector<4x16x64xf32> to vector<4x8x64xf32>
    %271 = arith.maximumf %269, %270 : vector<4x8x64xf32>
    %272 = vector.shape_cast %267 : vector<1x64xf32> to vector<1x1x64xf32>
    %273 = vector.broadcast %272 : vector<1x1x64xf32> to vector<4x8x64xf32>
    %274 = arith.mulf %271, %273 : vector<4x8x64xf32>
    %275 = vector.shape_cast %268 : vector<1x64xf32> to vector<1x1x64xf32>
    %276 = vector.broadcast %275 : vector<1x1x64xf32> to vector<4x8x64xf32>
    %277 = arith.addf %274, %276 : vector<4x8x64xf32>
    %cst_31 = arith.constant dense<0.000000e+00> : vector<4x64xf32>
    %278 = vector.multi_reduction <add>, %277, %cst_31 [1] : vector<4x8x64xf32> to vector<4x64xf32>
    %cst_32 = arith.constant 8.000000e+00 : f32
    %279 = vector.broadcast %cst_32 : f32 to vector<4x64xf32>
    %280 = arith.divf %278, %279 : vector<4x64xf32>
    %281 = arith.truncf %280 : vector<4x64xf32> to vector<4x64xbf16>
    %c0_33 = arith.constant 0 : index
    %c0_34 = arith.constant 0 : index
    %282 = vector.load %arg14[%c0_33, %c0_34] : memref<64x1xbf16, #tpu.memory_space<vmem>>, vector<64x1xbf16>
    %cst_35 = arith.constant dense<0.000000e+00> : vector<4x1xf32>
    %283 = tpu.matmul %281, %282, %cst_35 {dimension_numbers = #tpu.dot_dimension_numbers<[1], [0], [0], [1], [0, 0, 1, 1], [], []>} : vector<4x64xbf16>, vector<64x1xbf16>, vector<4x1xf32> -> vector<4x1xf32>
    %c0_36 = arith.constant 0 : index
    %c0_37 = arith.constant 0 : index
    %284 = vector.load %arg15[%c0_36, %c0_37] : memref<1x1xf32, #tpu.memory_space<vmem>>, vector<1x1xf32>
    %285 = vector.broadcast %284 : vector<1x1xf32> to vector<4x1xf32>
    %286 = arith.addf %283, %285 : vector<4x1xf32>
    %287 = arith.negf %286 : vector<4x1xf32>
    %288 = math.exp %287 : vector<4x1xf32>
    %cst_38 = arith.constant 1.000000e+00 : f32
    %289 = vector.broadcast %cst_38 : f32 to vector<4x1xf32>
    %290 = arith.addf %289, %288 : vector<4x1xf32>
    %291 = arith.divf %289, %290 : vector<4x1xf32>
    %c0_39 = arith.constant 0 : index
    %c0_40 = arith.constant 0 : index
    %c0_41 = arith.constant 0 : index
    %292 = vector.load %arg16[%c0_39, %c0_40, %c0_41] : memref<1x4x1xf32, #tpu.memory_space<vmem>>, vector<1x4x1xf32>
    %293 = vector.shape_cast %292 : vector<1x4x1xf32> to vector<4x1xf32>
    %294 = vector.shape_cast %291 : vector<4x1xf32> to vector<1x4x1xf32>
    tpu.vector_store %arg16[%c0_39, %c0_40, %c0_41], %294 {strides = array<i32>} : memref<1x4x1xf32, #tpu.memory_space<vmem>>, vector<1x4x1xf32>,
    return
  }
  func.func @transform_0(%arg0: i32) -> (i32, i32, i32) {
    %c0_i32 = arith.constant 0 : i32
    %c0_i32_0 = arith.constant 0 : i32
    %c0_i32_1 = arith.constant 0 : i32
    return %arg0, %c0_i32, %c0_i32_0 : i32, i32, i32
  }
  func.func @transform_1(%arg0: i32) -> (i32, i32) {
    %c0_i32 = arith.constant 0 : i32
    %c0_i32_0 = arith.constant 0 : i32
    %c0_i32_1 = arith.constant 0 : i32
    return %c0_i32, %c0_i32_0 : i32, i32
  }
  func.func @transform_2(%arg0: i32) -> (i32, i32) {
    %c0_i32 = arith.constant 0 : i32
    %c0_i32_0 = arith.constant 0 : i32
    %c0_i32_1 = arith.constant 0 : i32
    return %c0_i32, %c0_i32_0 : i32, i32
  }
  func.func @transform_3(%arg0: i32) -> (i32, i32) {
    %c0_i32 = arith.constant 0 : i32
    %c0_i32_0 = arith.constant 0 : i32
    %c0_i32_1 = arith.constant 0 : i32
    return %c0_i32, %c0_i32_0 : i32, i32
  }
  func.func @transform_4(%arg0: i32) -> (i32, i32) {
    %c0_i32 = arith.constant 0 : i32
    %c0_i32_0 = arith.constant 0 : i32
    %c0_i32_1 = arith.constant 0 : i32
    return %c0_i32, %c0_i32_0 : i32, i32
  }
  func.func @transform_5(%arg0: i32) -> (i32, i32) {
    %c0_i32 = arith.constant 0 : i32
    %c0_i32_0 = arith.constant 0 : i32
    %c0_i32_1 = arith.constant 0 : i32
    return %c0_i32, %c0_i32_0 : i32, i32
  }
  func.func @transform_6(%arg0: i32) -> (i32, i32) {
    %c0_i32 = arith.constant 0 : i32
    %c0_i32_0 = arith.constant 0 : i32
    %c0_i32_1 = arith.constant 0 : i32
    return %c0_i32, %c0_i32_0 : i32, i32
  }
  func.func @transform_7(%arg0: i32) -> (i32, i32) {
    %c0_i32 = arith.constant 0 : i32
    %c0_i32_0 = arith.constant 0 : i32
    %c0_i32_1 = arith.constant 0 : i32
    return %c0_i32, %c0_i32_0 : i32, i32
  }
  func.func @transform_8(%arg0: i32) -> (i32, i32) {
    %c0_i32 = arith.constant 0 : i32
    %c0_i32_0 = arith.constant 0 : i32
    %c0_i32_1 = arith.constant 0 : i32
    return %c0_i32, %c0_i32_0 : i32, i32
  }
  func.func @transform_9(%arg0: i32) -> (i32, i32) {
    %c0_i32 = arith.constant 0 : i32
    %c0_i32_0 = arith.constant 0 : i32
    %c0_i32_1 = arith.constant 0 : i32
    return %c0_i32, %c0_i32_0 : i32, i32
  }
  func.func @transform_10(%arg0: i32) -> (i32, i32) {
    %c0_i32 = arith.constant 0 : i32
    %c0_i32_0 = arith.constant 0 : i32
    %c0_i32_1 = arith.constant 0 : i32
    return %c0_i32, %c0_i32_0 : i32, i32
  }
  func.func @transform_11(%arg0: i32) -> (i32, i32) {
    %c0_i32 = arith.constant 0 : i32
    %c0_i32_0 = arith.constant 0 : i32
    %c0_i32_1 = arith.constant 0 : i32
    return %c0_i32, %c0_i32_0 : i32, i32
  }
  func.func @transform_12(%arg0: i32) -> (i32, i32) {
    %c0_i32 = arith.constant 0 : i32
    %c0_i32_0 = arith.constant 0 : i32
    %c0_i32_1 = arith.constant 0 : i32
    return %c0_i32, %c0_i32_0 : i32, i32
  }
  func.func @transform_13(%arg0: i32) -> (i32, i32) {
    %c0_i32 = arith.constant 0 : i32
    %c0_i32_0 = arith.constant 0 : i32
    %c0_i32_1 = arith.constant 0 : i32
    return %c0_i32, %c0_i32_0 : i32, i32
  }
  func.func @transform_14(%arg0: i32) -> (i32, i32) {
    %c0_i32 = arith.constant 0 : i32
    %c0_i32_0 = arith.constant 0 : i32
    %c0_i32_1 = arith.constant 0 : i32
    return %c0_i32, %c0_i32_0 : i32, i32
  }
  func.func @transform_15(%arg0: i32) -> (i32, i32, i32) {
    %c0_i32 = arith.constant 0 : i32
    %c0_i32_0 = arith.constant 0 : i32
    %c0_i32_1 = arith.constant 0 : i32
    return %arg0, %c0_i32, %c0_i32_0 : i32, i32, i32
  }
}

</mosaic_0001>

<bundles_post_ra>
// kernel: tpu_custom_call.1
= control target key start
LH: loop header
LB: loop body
LE: loop exit
PB: predicated region body
PF: predicated region fallthrough
CT: control target
= control target key end

     0   :  { %s10203_s20 = smov 0   ;;  %s16019_s0 = inlined_call_operand.vmem [shape: bf16[8,192,64], index: 0, kind: input, shape index: {}]   ;;  %s16020_s1 = inlined_call_operand.vmem [shape: bf16[64,16], index: 1, kind: input, shape index: {}]   ;;  %s16021_s2 = inlined_call_operand.vmem [shape: f32[1,16], index: 2, kind: input, shape index: {}]   ;;  %s16022_s3 = inlined_call_operand.vmem [shape: f32[1,16], index: 3, kind: input, shape index: {}]   ;;  %s16023_s4 = inlined_call_operand.vmem [shape: f32[1,16], index: 4, kind: input, shape index: {}]   ;;  %s16024_s5 = inlined_call_operand.vmem [shape: bf16[512,32], index: 5, kind: input, shape index: {}]   ;;  %s16025_s6 = inlined_call_operand.vmem [shape: f32[1,32], index: 6, kind: input, shape index: {}]   ;;  %s16026_s7 = inlined_call_operand.vmem [shape: f32[1,32], index: 7, kind: input, shape index: {}]   ;;  %s16027_s8 = inlined_call_operand.vmem [shape: f32[1,32], index: 8, kind: input, shape index: {}]   ;;  %s16028_s9 = inlined_call_operand.vmem [shape: bf16[512,64], index: 9, kind: input, shape index: {}]   ;;  %s16029_s10 = inlined_call_operand.vmem [shape: f32[1,64], index: 10, kind: input, shape index: {}]   ;;  %s16030_s11 = inlined_call_operand.vmem [shape: f32[1,64], index: 11, kind: input, shape index: {}]   ;;  %s16031_s12 = inlined_call_operand.vmem [shape: f32[1,64], index: 12, kind: input, shape index: {}]   ;;  %s16032_s13 = inlined_call_operand.vmem [shape: bf16[64,1], index: 13, kind: input, shape index: {}]   ;;  %s16033_s14 = inlined_call_operand.<no memory space> [shape: f32[1,1], index: 14, kind: input, shape index: {}]   ;;  %s16034_s15 = inlined_call_operand.vmem [shape: f32[2,4,1], index: 15, kind: output, shape index: {}]  }
   0x1   :  { %v20_v0 = vstv %s16033_s14 }
   0x2   :  { %21 = vst [vmem:[#allocation2] sm:$0x1] %v20_v0 }
   0x3 LB: > { %s10209_s21 = sadd.s32 4294967295, %s10109_s20   ;;  %p7318_p0 = scmp.ge.s32.totalorder %s10109_s20, 1  ;;  %s10109_s20 = sphi %s10203_s20, %s27_s20  }
   0x4   : > { %p441_p1 = scmp.lt.s32.totalorder %s10109_s20, 3 }
   0x6   : > { %p442_p2 = pnand %p7318_p0, %p441_p1 }
   0x8   : > { %445 = sbr.rel (%p442_p2) target bundleno = 2004 (0x7d4), region = 80 }
   0xf   : > { %v9974_v1 = vld [vmem:[%s16020_s1] sm:$0xff]   ;;  %s7319_s14 = sshll.u32 %s10209_s21, 2  ;;  %v9975_v2 = vld [vmem:[%s16020_s1 + $0x8] sm:$0xff]   ;;  %v9976_v3 = vld [vmem:[%s16020_s1 + $0x10] sm:$0xff]   ;;  %vm869_vm0 = vcmask 523264   ;;  %vm2311_vm1 = vcmask 1044480  }
  0x10   : > { %p490_p3 = scmp.lt.s32.totalorder %s7319_s14, 7  ;;  %7865 = vmatprep.subr.bf16.mxu0 %v9974_v1  ;;  %v9977_v4 = vld [vmem:[%s16020_s1 + $0x18] sm:$0xff]   ;;  %v10330_v53 = vld [vmem:[%s16021_s2] ss:$0 sm:$0xff]  ;;  %vm1961_vm2 = vcmask 1046528   ;;  %vm2858_vm3 = vcmask 1043456  }
  0x11   : > { %7866 = vmatpush3.bf16.msra.mxu0 %v9974_v1  ;;  %s10111_s26 = smov 32   ;;  %s10112_s27 = smov 64   ;;  %vm2150_vm4 = vcmask 1045504   ;;  %vm2488_vm5 = vcmask 130048   ;;  %vm2497_vm6 = vcmask 261120   ;;  %vm2506_vm7 = vcmask 392192  }
  0x12   : > { %s17769_s14 = smov (!%p490_p3, %s7319_s14), 7  ;;  %7867 = vmatprep.subr.bf16.mxu0 %v9975_v2  ;;  %s10114_s29 = smov 16   ;;  %vm2523_vm8 = vcmask 654336   ;;  %vm2532_vm9 = vcmask 785408   ;;  %vm2541_vm10 = vcmask 916480   ;;  %vm6342_vm11 = vcmask 1042432  }
  0x13   : > { %s7981_s28 = smul.u32 96, %s17769_s14  ;;  %s10115_s30 = smov 48   ;;  %vm6432_vm12 = vcmask 1040384   ;;  %vm6391_vm13 = vcmask 1041408   ;;  %vm10119_vm14 = vmmov 0   ;;  %vm7179_vm15 = vcmask 1041409  }
  0x14   : > { %s10116_s16 = smov 80   ;;  %s10117_s17 = smov 112  }
  0x15   : > { %7868 = vmatpush3.bf16.msra.mxu0 %v9975_v2  ;;  %s10229_s18 = scalar_lea.vmem %s16019_s0, %s7981_s28  ;;  %s10113_s28 = smov 96  }
  0x16   : > { %7869 = vmatprep.subr.bf16.mxu0 %v9976_v3  ;;  %v9978_v5 = vld [vmem:[%s10229_s18] sm:$0xff]   ;;  %v9979_v6 = vld [vmem:[%s10229_s18 + $0x8] sm:$0xff]   ;;  %v9980_v7 = vld [vmem:[%s10229_s18 + $0x10] sm:$0xff]   ;;  %p496_p4 = scmp.lt.s32.totalorder %s10209_s21, 1 }
  0x17   : > { %7873 = vmatprep.mubr.msk.bf16.mxu0 %vm869_vm0, %v9978_v5  ;;  %v9981_v8 = vld [vmem:[%s10229_s18 + $0x18] sm:$0xff]   ;;  %v9982_v9 = vld [vmem:[%s10229_s18 + $0x20] sm:$0xff]   ;;  %v9983_v10 = vld [vmem:[%s10229_s18 + $0x28] sm:$0xff]  }
  0x18   : > { %v9984_v11 = vld [vmem:[%s10229_s18 + $0x30] sm:$0xff]   ;;  %v9985_v12 = vld [vmem:[%s10229_s18 + $0x38] sm:$0xff]   ;;  %v9986_v13 = vld [vmem:[%s10229_s18 + $0x40] sm:$0xff]   ;;  %s17771_s21 = smov (!%p496_p4, %s10209_s21), 1 }
  0x19   : > { %7870 = vmatpush3.bf16.msra.mxu0 %v9976_v3  ;;  %v9987_v14 = vld [vmem:[%s10229_s18 + $0x48] sm:$0xff]   ;;  %v9988_v15 = vld [vmem:[%s10229_s18 + $0x50] sm:$0xff]   ;;  %v9989_v16 = vld [vmem:[%s10229_s18 + $0x58] sm:$0xff]  }
  0x1a   : > { %7871 = vmatprep.subr.bf16.mxu0 %v9977_v4  ;;  %v9990_v17 = vld [vmem:[%s10229_s18 + $0x60] sm:$0xff]   ;;  %v9991_v18 = vld [vmem:[%s10229_s18 + $0x68] sm:$0xff]   ;;  %v9992_v19 = vld [vmem:[%s10229_s18 + $0x70] sm:$0xff]  }
  0x1b   : > { %v9993_v20 = vld [vmem:[%s10229_s18 + $0x78] sm:$0xff]   ;;  %v9994_v21 = vld [vmem:[%s10229_s18 + $0x80] sm:$0xff]   ;;  %v9995_v22 = vld [vmem:[%s10229_s18 + $0x88] sm:$0xff]  }
  0x1c   : > { %v9996_v23 = vld [vmem:[%s10229_s18 + $0x90] sm:$0xff]   ;;  %v9997_v24 = vld [vmem:[%s10229_s18 + $0x98] sm:$0xff]   ;;  %v9998_v25 = vld [vmem:[%s10229_s18 + $0xa0] sm:$0xff]  }
  0x1d   : > { %7872 = vmatpush3.bf16.msra.mxu0 %v9977_v4  ;;  %v9999_v26 = vld [vmem:[%s10229_s18 + $0xa8] sm:$0xff]   ;;  %v10000_v27 = vld [vmem:[%s10229_s18 + $0xb0] sm:$0xff]   ;;  %v10001_v28 = vld [vmem:[%s10229_s18 + $0xb8] sm:$0xff]  }
  0x1e   : > { %v10002_v29 = vld [vmem:[%s10229_s18 + $0xc0] sm:$0xff]   ;;  %v10003_v30 = vld [vmem:[%s10229_s18 + $0xc8] sm:$0xff]   ;;  %v10004_v31 = vld [vmem:[%s10229_s18 + $0xd0] sm:$0xff]  }
  0x1f   : > { %v10005_v32 = vld [vmem:[%s10229_s18 + $0xd8] sm:$0xff]   ;;  %v10006_v33 = vld [vmem:[%s10229_s18 + $0xe0] sm:$0xff]   ;;  %v10007_v34 = vld [vmem:[%s10229_s18 + $0xe8] sm:$0xff]  }
  0x20   : > { %7874 = vmatmul.mubr.msk.bf16.vlgmr.msra.gmra.mrb[0].mxu0 %vm869_vm0, %v9979_v6  ;;  %v10008_v35 = vld [vmem:[%s10229_s18 + $0xf0] sm:$0xff]   ;;  %v10009_v36 = vld [vmem:[%s10229_s18 + $0xf8] sm:$0xff]   ;;  %v10010_v37 = vld [vmem:[%s10229_s18 + $0x100] sm:$0xff]  }
  0x21   : > { %7877 = vmatprep.mubr.msk.bf16.mxu0 %vm869_vm0, %v9980_v7  ;;  %v10011_v38 = vld [vmem:[%s10229_s18 + $0x108] sm:$0xff]   ;;  %v10012_v39 = vld [vmem:[%s10229_s18 + $0x110] sm:$0xff]   ;;  %v10013_v40 = vld [vmem:[%s10229_s18 + $0x118] sm:$0xff]  }
  0x22   : > { %v10014_v41 = vld [vmem:[%s10229_s18 + $0x120] sm:$0xff]   ;;  %v10015_v42 = vld [vmem:[%s10229_s18 + $0x128] sm:$0xff]   ;;  %v10016_v43 = vld [vmem:[%s10229_s18 + $0x130] sm:$0xff]  }
  0x23   : > { %v10017_v44 = vld [vmem:[%s10229_s18 + $0x138] sm:$0xff]   ;;  %v10018_v45 = vld [vmem:[%s10229_s18 + $0x140] sm:$0xff]   ;;  %v10019_v46 = vld [vmem:[%s10229_s18 + $0x148] sm:$0xff]  }
  0x24   : > { %v10020_v47 = vld [vmem:[%s10229_s18 + $0x150] sm:$0xff]   ;;  %v10021_v48 = vld [vmem:[%s10229_s18 + $0x158] sm:$0xff]   ;;  %v10022_v49 = vld [vmem:[%s10229_s18 + $0x160] sm:$0xff]  }
  0x25   : > { %v10023_v50 = vld [vmem:[%s10229_s18 + $0x168] sm:$0xff]   ;;  %v10024_v51 = vld [vmem:[%s10229_s18 + $0x170] sm:$0xff]   ;;  %v10025_v52 = vld [vmem:[%s10229_s18 + $0x178] sm:$0xff]  }
  0x26   : > { %v10340_v5 = vld [vmem:[%s16022_s3] ss:$0 sm:$0xff] }
  0x28   : > { %7878 = vmatmul.mubr.msk.bf16.gmra.mrb[4].mxu0 %vm869_vm0, %v9981_v8 }
  0x29   : > { %7881 = vmatprep.mubr.msk.bf16.mxu0 %vm869_vm0, %v9982_v9 }
  0x30   : > { %7882 = vmatmul.mubr.msk.bf16.gmra.mrb[8].mxu0 %vm869_vm0, %v9983_v10 }
  0x31   : > { %7885 = vmatprep.mubr.msk.bf16.mxu0 %vm869_vm0, %v9984_v11 }
  0x38   : > { %7886 = vmatmul.mubr.msk.bf16.gmra.mrb[12].mxu0 %vm869_vm0, %v9985_v12 }
  0x39   : > { %7889 = vmatprep.mubr.msk.bf16.mxu0 %vm869_vm0, %v9986_v13 }
  0x40   : > { %7890 = vmatmul.mubr.msk.bf16.gmra.mrb[16].mxu0 %vm869_vm0, %v9987_v14  ;;  %v10347_v14 = vld [vmem:[%s16023_s4] ss:$0 sm:$0xff] }
  0x41   : > { %7893 = vmatprep.mubr.msk.bf16.mxu0 %vm869_vm0, %v9988_v15 }
  0x48   : > { %7894 = vmatmul.mubr.msk.bf16.gmra.mrb[20].mxu0 %vm869_vm0, %v9989_v16 }
  0x49   : > { %7897 = vmatprep.mubr.msk.bf16.mxu0 %vm869_vm0, %v9990_v17 }
  0x50   : > { %7898 = vmatmul.mubr.msk.bf16.gmra.mrb[24].mxu0 %vm869_vm0, %v9991_v18 }
  0x51   : > { %7901 = vmatprep.mubr.msk.bf16.mxu0 %vm869_vm0, %v9992_v19 }
  0x58   : > { %7902 = vmatmul.mubr.msk.bf16.gmra.mrb[28].mxu0 %vm869_vm0, %v9993_v20 }
  0x59   : > { %7905 = vmatprep.mubr.msk.bf16.mxu0 %vm869_vm0, %v9994_v21 }
  0x60   : > { %7906 = vmatmul.mubr.msk.bf16.gmra.mrb[32].mxu0 %vm869_vm0, %v9995_v22 }
  0x61   : > { %7909 = vmatprep.mubr.msk.bf16.mxu0 %vm869_vm0, %v9996_v23 }
  0x68   : > { %7910 = vmatmul.mubr.msk.bf16.gmra.mrb[36].mxu0 %vm869_vm0, %v9997_v24 }
  0x69   : > { %7913 = vmatprep.mubr.msk.bf16.mxu0 %vm869_vm0, %v9998_v25 }
  0x70   : > { %7914 = vmatmul.mubr.msk.bf16.gmra.mrb[40].mxu0 %vm869_vm0, %v9999_v26 }
  0x71   : > { %7917 = vmatprep.mubr.msk.bf16.mxu0 %vm869_vm0, %v10000_v27 }
  0x78   : > { %7918 = vmatmul.mubr.msk.bf16.gmra.mrb[44].mxu0 %vm869_vm0, %v10001_v28 }
  0x79   : > { %7921 = vmatprep.mubr.msk.bf16.mxu0 %vm869_vm0, %v10002_v29 }
  0x80   : > { %7922 = vmatmul.mubr.msk.bf16.gmra.mrb[48].mxu0 %vm869_vm0, %v10003_v30 }
  0x81   : > { %7925 = vmatprep.mubr.msk.bf16.mxu0 %vm869_vm0, %v10004_v31 }
  0x88   : > { %7926 = vmatmul.mubr.msk.bf16.gmra.mrb[52].mxu0 %vm869_vm0, %v10005_v32 }
  0x89   : > { %7929 = vmatprep.mubr.msk.bf16.mxu0 %vm869_vm0, %v10006_v33 }
  0x90   : > { %7930 = vmatmul.mubr.msk.bf16.gmra.mrb[56].mxu0 %vm869_vm0, %v10007_v34 }
  0x91   : > { %7933 = vmatprep.mubr.msk.bf16.mxu0 %vm869_vm0, %v10008_v35 }
  0x98   : > { %7934 = vmatmul.mubr.msk.bf16.gmra.mrb[60].mxu0 %vm869_vm0, %v10009_v36 }
  0x99   : > { %7937 = vmatprep.mubr.msk.bf16.mxu0 %vm869_vm0, %v10010_v37 }
  0xa0   : > { %7938 = vmatmul.mubr.msk.bf16.gmra.mrb[64].mxu0 %vm869_vm0, %v10011_v38 }
  0xa1   : > { %7941 = vmatprep.mubr.msk.bf16.mxu0 %vm869_vm0, %v10012_v39 }
  0xa8   : > { %7942 = vmatmul.mubr.msk.bf16.gmra.mrb[68].mxu0 %vm869_vm0, %v10013_v40 }
  0xa9   : > { %7945 = vmatprep.mubr.msk.bf16.mxu0 %vm869_vm0, %v10014_v41 }
  0xb0   : > { %7946 = vmatmul.mubr.msk.bf16.gmra.mrb[72].mxu0 %vm869_vm0, %v10015_v42 }
  0xb1   : > { %7949 = vmatprep.mubr.msk.bf16.mxu0 %vm869_vm0, %v10016_v43 }
  0xb8   : > { %7950 = vmatmul.mubr.msk.bf16.gmra.mrb[76].mxu0 %vm869_vm0, %v10017_v44 }
  0xb9   : > { %7953 = vmatprep.mubr.msk.bf16.mxu0 %vm869_vm0, %v10018_v45 }
  0xc0   : > { %7954 = vmatmul.mubr.msk.bf16.gmra.mrb[80].mxu0 %vm869_vm0, %v10019_v46 }
  0xc1   : > { %7957 = vmatprep.mubr.msk.bf16.mxu0 %vm869_vm0, %v10020_v47 }
  0xc8   : > { %7958 = vmatmul.mubr.msk.bf16.gmra.mrb[84].mxu0 %vm869_vm0, %v10021_v48 }
  0xc9   : > { %7961 = vmatprep.mubr.msk.bf16.mxu0 %vm869_vm0, %v10022_v49 }
  0xd0   : > { %7962 = vmatmul.mubr.msk.bf16.gmra.mrb[88].mxu0 %vm869_vm0, %v10023_v50 }
  0xd1   : > { %7965 = vmatprep.mubr.msk.bf16.mxu0 %vm869_vm0, %v10024_v51 }
  0xd8   : > { %7966 = vmatmul.mubr.msk.bf16.gmra.mrb[92].mxu0 %vm869_vm0, %v10025_v52 }
  0xf3   : > { %v7875_v54 = vpop.f32.mrb[0].mxu0 }
  0xf4   : > { %v1048_v55 = vpop.f32.mrb[1].mxu0  ;;  %v1440_v2 = vadd.f32 %v7875_v54, %v10330_v53 }
  0xf5   : > { %v1438_v56 = vadd.f32 %v10330_v53, %v1048_v55  ;;  %v7876_v57 = vpop.f32.mrb[2].mxu0 }
  0xf6   : > { %v1441_v58 = vadd.f32 %v7876_v57, %v10330_v53  ;;  %v1051_v59 = vpop.f32.mrb[3].mxu0  ;;  %v1536_v10 = vmax.f32 %v1440_v2, 0.0 }
  0xf7   : > { %v1534_v60 = vmax.f32 %v1438_v56, 0.0  ;;  %v1439_v63 = vadd.f32 %v10330_v53, %v1051_v59 }
  0xf8   : > { %v1537_v61 = vmax.f32 %v1441_v58, 0.0 }
  0xf9   : > { %v1535_v7 = vmax.f32 %v1439_v63, 0.0 }
  0xfa   : > { %v1632_v62 = vmax.f32 %v1534_v60, %v1537_v61 }
  0xfb   : > { %v7879_v0 = vpop.f32.mrb[4].mxu0 }
  0xfc   : > { %v1064_v1 = vpop.f32.mrb[5].mxu0  ;;  %v1650_v11 = vmul.f32 %v10340_v5, %v1632_v62  ;;  %v1444_v19 = vadd.f32 %v7879_v0, %v10330_v53 }
  0xfd   : > { %v1442_v3 = vadd.f32 %v10330_v53, %v1064_v1  ;;  %v7880_v4 = vpop.f32.mrb[6].mxu0 }
  0xfe   : > { %v1067_v6 = vpop.f32.mrb[7].mxu0  ;;  %v1445_v15 = vadd.f32 %v7880_v4, %v10330_v53  ;;  %v10354_v22 = vadd.f32 %v10347_v14, %v1650_v11  ;;  %v1540_v38 = vmax.f32 %v1444_v19, 0.0 }
  0xff   : > { %v1538_v8 = vmax.f32 %v1442_v3, 0.0  ;;  %v1443_v9 = vadd.f32 %v10330_v53, %v1067_v6 }
 0x100   : > { %16588 = vst [vmem:[#allocation3_spill] sm:$0xff] %v10354_v22  ;;  %v1541_v27 = vmax.f32 %v1445_v15, 0.0  ;;  %v2312_v40 = vrot.slane %v10354_v22, 3  ;;  %v1962_v43 = vrot.slane %v10354_v22, 1  ;;  %v3235_v56 = vrot.slane %v10354_v22, 4 }
 0x101   : > { %v1633_v12 = vmax.f32 %v1535_v7, %v1538_v8  ;;  %v1539_v13 = vmax.f32 %v1443_v9, 0.0  ;;  %v2151_v19 = vrot.slane %v10354_v22, 2 }
 0x103   : > { %v1651_v16 = vmul.f32 %v10340_v5, %v1633_v12  ;;  %v1634_v17 = vmax.f32 %v1536_v10, %v1539_v13  ;;  %v7883_v18 = vpop.f32.mrb[8].mxu0 }
 0x104   : > { %v1448_v20 = vadd.f32 %v7883_v18, %v10330_v53  ;;  %v1080_v21 = vpop.f32.mrb[9].mxu0 }
 0x105   : > { %v10357_v23 = vadd.f32 %v10347_v14, %v1651_v16  ;;  %v1652_v24 = vmul.f32 %v10340_v5, %v1634_v17  ;;  %v1446_v25 = vadd.f32 %v10330_v53, %v1080_v21  ;;  %v7884_v26 = vpop.f32.mrb[10].mxu0 }
 0x106   : > { %v1544_v28 = vmax.f32 %v1448_v20, 0.0  ;;  %v1449_v29 = vadd.f32 %v7884_v26, %v10330_v53  ;;  %v1083_v30 = vpop.f32.mrb[11].mxu0 }
 0x107   : > { %16589 = vst [vmem:[#allocation4_spill] sm:$0xff] %v10357_v23  ;;  %v10363_v31 = vadd.f32 %v10347_v14, %v1652_v24  ;;  %v1542_v32 = vmax.f32 %v1446_v25, 0.0  ;;  %v1447_v33 = vadd.f32 %v10330_v53, %v1083_v30  ;;  %v2313_v34 = vrot.slane %v10357_v23, 3 }
 0x108   : > { %v1681_v35 = vmax.f32 %v1541_v27, %v1544_v28  ;;  %v1545_v36 = vmax.f32 %v1449_v29, 0.0  ;;  %v1963_v37 = vrot.slane %v10357_v23, 1  ;;  %v10377_v45 = vrot.slane %v10357_v23, 4 }
 0x109   : > { %16590 = vst [vmem:[#allocation5_spill] sm:$0xff] %v10363_v31  ;;  %v1543_v39 = vmax.f32 %v1447_v33, 0.0  ;;  %v10370_v41 = vrot.slane %v10363_v31, 3  ;;  %v10374_v44 = vrot.slane %v10363_v31, 1  ;;  %v10380_v47 = vsel %vm2311_vm1, %v2312_v40, %v2313_v34 }
 0x10a   : > { %v1682_v42 = vmax.f32 %v1542_v32, %v1545_v36  ;;  %16593 = vst [vmem:[#allocation8_spill] sm:$0xff] %v10377_v45  ;;  %v16037_v50 = vrot.slane %v10363_v31, 4  ;;  %v1964_v52 = vsel %vm1961_vm2, %v1962_v43, %v1963_v37  ;;  %v1693_v1 = vmul.f32 %v10340_v5, %v1681_v35 }
 0x10b   : > { %16591 = vst [vmem:[#allocation6_spill] sm:$0xff] %v10370_v41  ;;  %16592 = vst [vmem:[#allocation7_spill] sm:$0xff] %v10374_v44  ;;  %v1680_v46 = vmax.f32 %v1540_v38, %v1543_v39  ;;  %v2316_v48 = vsel %vm2311_vm1, %v2313_v34, %v10370_v41  ;;  %v7887_v49 = vpop.f32.mrb[12].mxu0  ;;  %v10391_v54 = vsel %vm1961_vm2, %v1963_v37, %v10374_v44  ;;  %v10418_v8 = vrot.slane %v10363_v31, 2 }
 0x10c   : > { %v10386_v51 = vpack.i.bf16 %v2316_v48, %v10380_v47  ;;  %16594 = vst [vmem:[#allocation9_spill] sm:$0xff] %v10391_v54  ;;  %v1096_v55 = vpop.f32.mrb[13].mxu0  ;;  %v1694_v57 = vmul.f32 %v10340_v5, %v1682_v42  ;;  %v10397_v59 = vpack.i.bf16 %v10391_v54, %v1964_v52  ;;  %v3239_v63 = vsel %vm2858_vm3, %v10377_v45, %v16037_v50 }
 0x10d   : > { %v1692_v58 = vmul.f32 %v10340_v5, %v1680_v46  ;;  %v1450_v60 = vadd.f32 %v10330_v53, %v1096_v55  ;;  %v7888_v61 = vpop.f32.mrb[14].mxu0  ;;  %v3237_v3 = vsel %vm2858_vm3, %v3235_v56, %v10377_v45  ;;  %16596 = vst [vmem:[#allocation11_spill] sm:$0xff] %v10418_v8  ;;  %v1452_v11 = vadd.f32 %v7887_v49, %v10330_v53 }
 0x10e   : > { %8030 = vrot.lane.b32.xlu1 %v10386_v51, %s10111_s26  ;;  %v1453_v62 = vadd.f32 %v7888_v61, %v10330_v53  ;;  %v1099_v0 = vpop.f32.mrb[15].mxu0  ;;  %8000 = vrot.lane.b32.xlu0 %v10397_v59, %s10112_s27  ;;  %v10415_v7 = vpack.i.bf16 %v3239_v63, %v3237_v3  ;;  %v10421_v9 = vadd.f32 %v10347_v14, %v1694_v57  ;;  %v2152_v16 = vrot.slane %v10357_v23, 2 }
 0x10f   : > { %v1546_v2 = vmax.f32 %v1450_v60, 0.0  ;;  %v10413_v4 = vadd.f32 %v10347_v14, %v1692_v58  ;;  %v1451_v10 = vadd.f32 %v10330_v53, %v1099_v0  ;;  %v10428_v13 = vadd.f32 %v10347_v14, %v1693_v1 }
 0x110   : > { %v1549_v6 = vmax.f32 %v1453_v62, 0.0  ;;  %16597 = vst [vmem:[#allocation12_spill] sm:$0xff] %v10421_v9  ;;  %v8049_v18 = vpack.i.bf16 %v1964_v52, %v2316_v48  ;;  %v10438_v26 = vsel %vm2150_vm4, %v2152_v16, %v10418_v8  ;;  %v10441_v27 = vrot.slane %v10421_v9, 3 }
 0x111   : > { %16595 = vst [vmem:[#allocation10_spill] sm:$0xff] %v10413_v4  ;;  %16598 = vst [vmem:[#allocation13_spill] sm:$0xff] %v10428_v13  ;;  %v2356_v20 = vrot.slane %v10413_v4, 3  ;;  %v1547_v21 = vmax.f32 %v1451_v10, 0.0  ;;  %v1548_v28 = vmax.f32 %v1452_v11, 0.0  ;;  %v10448_v33 = vsel %vm2150_vm4, %v2151_v19, %v2152_v16 }
 0x112   : > { %v1716_v12 = vmax.f32 %v1546_v2, %v1549_v6  ;;  %8040 = vrot.lane.b32.xlu1 %v10415_v7, %s10113_s28  ;;  %8005 = vrot.lane.b32.xlu0 %v10386_v51, %s10112_s27  ;;  %16599 = vst [vmem:[#allocation14_spill] sm:$0xff] %v10438_v26  ;;  %16600 = vst [vmem:[#allocation15_spill] sm:$0xff] %v10441_v27  ;;  %v2357_v34 = vrot.slane %v10428_v13, 3  ;;  %v10454_v36 = vpack.i.bf16 %v10438_v26, %v10448_v33 }
 0x113   : > { %v7891_v15 = vpop.f32.mrb[16].mxu0  ;;  %16601 = vst [vmem:[#allocation16_spill] sm:$0xff] %v10448_v33  ;;  %v4035_v58 = vrot.slane %v10413_v4, 4  ;;  %v16036_v60 = vrot.slane %v10421_v9, 4  ;;  %v10478_v6 = vrot.slane %v10428_v13, 4 }
 0x114   : > { %v1112_v17 = vpop.f32.mrb[17].mxu0  ;;  %v2358_v39 = vsel %vm2311_vm1, %v2356_v20, %v2357_v34  ;;  %v2360_v40 = vsel %vm2311_vm1, %v2357_v34, %v10441_v27  ;;  %v1456_v42 = vadd.f32 %v7891_v15, %v10330_v53  ;;  %v1728_v61 = vmul.f32 %v10340_v5, %v1716_v12 }
 0x115   : > { %v1454_v24 = vadd.f32 %v10330_v53, %v1112_v17  ;;  %v7892_v25 = vpop.f32.mrb[18].mxu0  ;;  %v10465_v55 = vpack.i.bf16 %v2360_v40, %v2358_v39  ;;  %16602 = vst [vmem:[#allocation17_spill] sm:$0xff] %v10478_v6  ;;  %v4037_v16 = vsel %vm2858_vm3, %v4035_v58, %v10478_v6  ;;  %v4039_v17 = vsel %vm2858_vm3, %v10478_v6, %v16036_v60 }
 0x116   : > { %8050 = vrot.lane.b32.xlu1 %v8049_v18, %s10114_s29  ;;  %v1115_v29 = vpop.f32.mrb[19].mxu0  ;;  %8010 = vrot.lane.b32.xlu0 %v10397_v59, %s10115_s30  ;;  %v1457_v35 = vadd.f32 %v7892_v25, %v10330_v53  ;;  %v1552_v1 = vmax.f32 %v1456_v42, 0.0  ;;  %v8104_v25 = vpack.i.bf16 %v4039_v17, %v4037_v16 }
 0x117   : > { %v1550_v30 = vmax.f32 %v1454_v24, 0.0  ;;  %v1455_v32 = vadd.f32 %v10330_v53, %v1115_v29 }
 0x118   : > { %v1553_v48 = vmax.f32 %v1457_v35, 0.0 }
 0x119   : > { %v1717_v37 = vmax.f32 %v1547_v21, %v1550_v30  ;;  %v1551_v38 = vmax.f32 %v1455_v32, 0.0  ;;  %v10493_v21 = vadd.f32 %v10347_v14, %v1728_v61 }
 0x11a   : > { %8055 = vrot.lane.b32.xlu1 %v10415_v7, %s10116_s16  ;;  %8015 = vrot.lane.b32.xlu0 %v10454_v36, %s10117_s17 }
 0x11b   : > { %v1718_v43 = vmax.f32 %v1548_v28, %v1551_v38  ;;  %v7895_v46 = vpop.f32.mrb[20].mxu0  ;;  %v1729_v10 = vmul.f32 %v10340_v5, %v1717_v37  ;;  %16603 = vst [vmem:[#allocation18_spill] sm:$0xff] %v10493_v21  ;;  %v2400_v38 = vrot.slane %v10493_v21, 3 }
 0x11c   : > { %v1460_v49 = vadd.f32 %v7895_v46, %v10330_v53  ;;  %v1128_v52 = vpop.f32.mrb[21].mxu0  ;;  %v2010_v46 = vrot.slane %v10413_v4, 1 }
 0x11d   : > { %v1458_v56 = vadd.f32 %v10330_v53, %v1128_v52  ;;  %v7896_v57 = vpop.f32.mrb[22].mxu0  ;;  %v10496_v24 = vadd.f32 %v10347_v14, %v1729_v10 }
 0x11e   : > { %v1556_v62 = vmax.f32 %v1460_v49, 0.0  ;;  %v1461_v63 = vadd.f32 %v7896_v57, %v10330_v53  ;;  %8090 = vrot.lane.b32.xlu1 %v10465_v55, %s10112_s27  ;;  %v1131_v0 = vpop.f32.mrb[23].mxu0  ;;  %8020 = vrot.lane.b32.xlu0 %v10386_v51, %s10115_s30  ;;  %v1730_v51 = vmul.f32 %v10340_v5, %v1718_v43  ;;  %v2011_v57 = vrot.slane %v10428_v13, 1 }
 0x11f   : > { %v1554_v2 = vmax.f32 %v1458_v56, 0.0  ;;  %v1459_v3 = vadd.f32 %v10330_v53, %v1131_v0  ;;  %16604 = vst [vmem:[#allocation19_spill] sm:$0xff] %v10496_v24  ;;  %v2401_v39 = vrot.slane %v10496_v24, 3  ;;  %v2224_v54 = vrot.slane %v10496_v24, 2 }
 0x120   : > { %v1753_v11 = vmax.f32 %v1553_v48, %v1556_v62  ;;  %v1557_v12 = vmax.f32 %v1461_v63, 0.0  ;;  %v10502_v35 = vadd.f32 %v10347_v14, %v1730_v51  ;;  %v2012_v10 = vsel %vm1961_vm2, %v2010_v46, %v2011_v57 }
 0x121   : > { %v1555_v15 = vmax.f32 %v1459_v3, 0.0  ;;  %v2402_v56 = vsel %vm2311_vm1, %v2400_v38, %v2401_v39  ;;  %v8064_v3 = vpack.i.bf16 %v10428_v13, %v10413_v4 }
 0x122   : > { %v1754_v18 = vmax.f32 %v1554_v2, %v1557_v12  ;;  %8095 = vrot.lane.b32.xlu1 %v10465_v55, %s10115_s30  ;;  %8025 = vrot.lane.b32.xlu0 %v10415_v7, %s10117_s17  ;;  %16605 = vst [vmem:[#allocation20_spill] sm:$0xff] %v10502_v35  ;;  %v10510_v42 = vrot.slane %v10502_v35, 3 }
 0x123   : > { %v1752_v19 = vmax.f32 %v1552_v1, %v1555_v15  ;;  %v7899_v20 = vpop.f32.mrb[24].mxu0  ;;  %v1765_v1 = vmul.f32 %v10340_v5, %v1753_v11  ;;  %v4851_v11 = vrot.slane %v10493_v21, 4 }
 0x124   : > { %v1144_v28 = vpop.f32.mrb[25].mxu0  ;;  %16606 = vst [vmem:[#allocation21_spill] sm:$0xff] %v10510_v42  ;;  %v1464_v48 = vadd.f32 %v7899_v20, %v10330_v53  ;;  %v1766_v58 = vmul.f32 %v10340_v5, %v1754_v18  ;;  %v2404_v0 = vsel %vm2311_vm1, %v2401_v39, %v10510_v42  ;;  %v10544_v20 = vrot.slane %v10496_v24, 4 }
 0x125   : > { %v1462_v29 = vadd.f32 %v10330_v53, %v1144_v28  ;;  %v7900_v30 = vpop.f32.mrb[26].mxu0  ;;  %v10541_v51 = vpack.i.bf16 %v2404_v0, %v2402_v56  ;;  %v10563_v38 = vadd.f32 %v10347_v14, %v1765_v1 }
 0x126   : > { %8105 = vrot.lane.b32.xlu1 %v8104_v25, %s10117_s17  ;;  %v1465_v32 = vadd.f32 %v7900_v30, %v10330_v53  ;;  %v1147_v34 = vpop.f32.mrb[27].mxu0  ;;  %8035 = vrot.lane.b32.xlu0 %v10397_v59, %s10111_s26  ;;  %v10518_v59 = vrot.slane %v10421_v9, 1  ;;  %v1560_v15 = vmax.f32 %v1464_v48, 0.0  ;;  %16608 = vst [vmem:[#allocation23_spill] sm:$0xff] %v10544_v20  ;;  %v10548_v28 = vadd.f32 %v10347_v14, %v1766_v58 }
 0x127   : > { %v1558_v7 = vmax.f32 %v1462_v29, 0.0  ;;  %v1463_v40 = vadd.f32 %v10330_v53, %v1147_v34  ;;  %v1764_v29 = vmul.f32 %v10340_v5, %v1752_v19  ;;  %v2179_v34 = vrot.slane %v10413_v4, 2  ;;  %16611 = vst [vmem:[#allocation26_spill] sm:$0xff] %v10563_v38 }
 0x128   : > { %v1561_v37 = vmax.f32 %v1465_v32, 0.0  ;;  %16607 = vst [vmem:[#allocation22_spill] sm:$0xff] %v10518_v59  ;;  %v2014_v12 = vsel %vm1961_vm2, %v2011_v57, %v10518_v59  ;;  %16609 = vst [vmem:[#allocation24_spill] sm:$0xff] %v10548_v28  ;;  %v4853_v56 = vsel %vm2858_vm3, %v4851_v11, %v10544_v20 }
 0x129   : > { %v1559_v61 = vmax.f32 %v1463_v40, 0.0  ;;  %v10555_v32 = vpack.i.bf16 %v2014_v12, %v2012_v10  ;;  %v10575_v58 = vadd.f32 %v10347_v14, %v1764_v29 }
 0x12a   : > { %v10512_v43 = vmax.f32 %v1558_v7, %v1561_v37  ;;  %8115 = vrot.lane.b32.xlu1 %v10465_v55, %s10111_s26  ;;  %8045 = vrot.lane.b32.xlu0 %v10454_v36, %s10113_s28  ;;  %v2180_v7 = vrot.slane %v10428_v13, 2  ;;  %v10560_v37 = vrot.slane %v10421_v9, 2 }
 0x12b   : > { %v7903_v49 = vpop.f32.mrb[28].mxu0  ;;  %16612 = vst [vmem:[#allocation27_spill] sm:$0xff] %v10575_v58 }
 0x12c   : > { %v1160_v52 = vpop.f32.mrb[29].mxu0  ;;  %16610 = vst [vmem:[#allocation25_spill] sm:$0xff] %v10560_v37  ;;  %v1468_v19 = vadd.f32 %v7903_v49, %v10330_v53 }
 0x12d   : > { %v1466_v62 = vadd.f32 %v10330_v53, %v1160_v52  ;;  %v7904_v63 = vpop.f32.mrb[30].mxu0 }
 0x12e   : > { %8125 = vrot.lane.b32.xlu1 %v8104_v25, %s10113_s28  ;;  %v1163_v2 = vpop.f32.mrb[31].mxu0  ;;  %8060 = vrot.lane.b32.xlu0 %v10454_v36, %s10116_s16  ;;  %v1469_v18 = vadd.f32 %v7904_v63, %v10330_v53  ;;  %v16035_v25 = vrot.slane %v10502_v35, 4  ;;  %v10580_v63 = vrot.slane %v10548_v28, 2  ;;  %v1564_v12 = vmax.f32 %v1468_v19, 0.0 }
 0x12f   : > { %v1562_v16 = vmax.f32 %v1466_v62, 0.0  ;;  %v1467_v17 = vadd.f32 %v10330_v53, %v1163_v2  ;;  %v2268_v62 = vrot.slane %v10563_v38, 2  ;;  %v10586_v2 = vsel %vm2150_vm4, %v2179_v34, %v2180_v7 }
 0x130   : > { %v1565_v46 = vmax.f32 %v1469_v18, 0.0  ;;  %v4855_v57 = vsel %vm2858_vm3, %v10544_v20, %v16035_v25  ;;  %16613 = vst [vmem:[#allocation28_spill] sm:$0xff] %v10580_v63  ;;  %16614 = vst [vmem:[#allocation29_spill] sm:$0xff] %v10586_v2 }
 0x131   : > { %v10551_v30 = vmax.f32 %v1559_v61, %v1562_v16  ;;  %v1563_v36 = vmax.f32 %v1467_v17, 0.0  ;;  %v8194_v18 = vpack.i.bf16 %v4855_v57, %v4853_v56  ;;  %v2444_v56 = vrot.slane %v10575_v58, 3 }
 0x132   : > { %8175 = vrot.lane.b32.xlu1 %v10541_v51, %s10112_s27  ;;  %8065 = vrot.lane.b32.xlu0 %v8064_v3, %s10114_s29  ;;  %v10590_v3 = vsel %vm2150_vm4, %v2180_v7, %v10560_v37  ;;  %v2267_v7 = vrot.slane %v10575_v58, 2 }
 0x133   : > { %v1637_v39 = vmax.f32 %v1560_v15, %v1563_v36  ;;  %v7907_v40 = vpop.f32.mrb[32].mxu0  ;;  %16615 = vst [vmem:[#allocation30_spill] sm:$0xff] %v10590_v3  ;;  %v10599_v29 = vpack.i.bf16 %v10590_v3, %v10586_v2  ;;  %v10603_v36 = vsel %vm2150_vm4, %v2268_v62, %v10580_v63 }
 0x134   : > { %v1472_v48 = vadd.f32 %v7907_v40, %v10330_v53  ;;  %v1176_v52 = vpop.f32.mrb[33].mxu0  ;;  %16616 = vst [vmem:[#allocation31_spill] sm:$0xff] %v10603_v36 }
 0x135   : > { %v1470_v49 = vadd.f32 %v10330_v53, %v1176_v52  ;;  %v7908_v61 = vpop.f32.mrb[34].mxu0 }
 0x136   : > { %v1568_v0 = vmax.f32 %v1472_v48, 0.0  ;;  %v1473_v1 = vadd.f32 %v7908_v61, %v10330_v53  ;;  %8185 = vrot.lane.b32.xlu1 %v10541_v51, %s10115_s30  ;;  %v1179_v10 = vpop.f32.mrb[35].mxu0  ;;  %8070 = vrot.lane.b32.xlu0 %v10555_v32, %s10116_s16  ;;  %v8219_v48 = vpack.i.bf16 %v10575_v58, %v10603_v36  ;;  %v10618_v61 = vsel %vm2150_vm4, %v2267_v7, %v2268_v62 }
 0x137   : > { %v1566_v15 = vmax.f32 %v1470_v49, 0.0  ;;  %v1471_v16 = vadd.f32 %v10330_v53, %v1179_v10  ;;  %16617 = vst [vmem:[#allocation32_spill] sm:$0xff] %v10618_v61  ;;  %v1653_v62 = vmul.f32 %v10340_v5, %v10512_v43 }
 0x138   : > { %v10595_v17 = vmax.f32 %v1565_v46, %v1568_v0  ;;  %v1569_v11 = vmax.f32 %v1473_v1, 0.0  ;;  %v2445_v0 = vrot.slane %v10563_v38, 3  ;;  %v10622_v1 = vrot.slane %v10548_v28, 3 }
 0x139   : > { %v1567_v34 = vmax.f32 %v1471_v16, 0.0 }
 0x13a   : > { %v10606_v19 = vmax.f32 %v1566_v15, %v1569_v11  ;;  %8195 = vrot.lane.b32.xlu1 %v8194_v18, %s10117_s17  ;;  %8075 = vrot.lane.b32.xlu0 %v10599_v29, %s10114_s29  ;;  %16618 = vst [vmem:[#allocation33_spill] sm:$0xff] %v10622_v1  ;;  %v10630_v11 = vpack.i.bf16 %v10603_v36, %v10618_v61  ;;  %v2223_v61 = vrot.slane %v10493_v21, 2 }
 0x13b   : > { %v10611_v40 = vmax.f32 %v1564_v12, %v1567_v34  ;;  %v7911_v46 = vpop.f32.mrb[36].mxu0  ;;  %v2446_v34 = vsel %vm2311_vm1, %v2444_v56, %v2445_v0  ;;  %v2448_v7 = vsel %vm2311_vm1, %v2445_v0, %v10622_v1  ;;  %v10651_v0 = vadd.f32 %v10347_v14, %v1653_v62 }
 0x13c   : > { %v1192_v52 = vpop.f32.mrb[37].mxu0 }
 0x13d   : > { %v1474_v57 = vadd.f32 %v10330_v53, %v1192_v52  ;;  %v7912_v49 = vpop.f32.mrb[38].mxu0  ;;  %v1655_v52 = vmul.f32 %v10340_v5, %v1637_v39  ;;  %16619 = vst [vmem:[#allocation34_spill] sm:$0xff] %v10651_v0 }
 0x13e   : > { %8220 = vrot.lane.b32.xlu1 %v8219_v48, %s10114_s29  ;;  %v1477_v10 = vadd.f32 %v7912_v49, %v10330_v53  ;;  %v1195_v12 = vpop.f32.mrb[39].mxu0  ;;  %8080 = vrot.lane.b32.xlu0 %v10465_v55, %s10116_s16  ;;  %v1654_v48 = vmul.f32 %v10340_v5, %v10551_v30  ;;  %v10648_v49 = vpack.i.bf16 %v2448_v7, %v2446_v34 }
 0x13f   : > { %v1570_v15 = vmax.f32 %v1474_v57, 0.0  ;;  %v1475_v18 = vadd.f32 %v10330_v53, %v1195_v12  ;;  %v1476_v57 = vadd.f32 %v7911_v46, %v10330_v53  ;;  %v10660_v46 = vadd.f32 %v10347_v14, %v1655_v52 }
 0x140   : > { %v1573_v16 = vmax.f32 %v1477_v10, 0.0 }
 0x141   : > { %v1571_v30 = vmax.f32 %v1475_v18, 0.0  ;;  %16621 = vst [vmem:[#allocation36_spill] sm:$0xff] %v10660_v46  ;;  %v10673_v52 = vrot.slane %v10660_v46, 1  ;;  %v10695_v6 = vrot.slane %v10660_v46, 3 }
 0x142   : > { %v10640_v55 = vmax.f32 %v1570_v15, %v1573_v16  ;;  %8245 = vrot.lane.b32.xlu1 %v10630_v11, %s10111_s26  ;;  %8085 = vrot.lane.b32.xlu0 %v10555_v32, %s10112_s27  ;;  %v10655_v15 = vadd.f32 %v10347_v14, %v1654_v48  ;;  %v1572_v16 = vmax.f32 %v1476_v57, 0.0 }
 0x143   : > { %v7915_v43 = vpop.f32.mrb[40].mxu0  ;;  %16622 = vst [vmem:[#allocation37_spill] sm:$0xff] %v10673_v52  ;;  %16624 = vst [vmem:[#allocation39_spill] sm:$0xff] %v10695_v6 }
 0x144   : > { %v1208_v56 = vpop.f32.mrb[41].mxu0  ;;  %16620 = vst [vmem:[#allocation35_spill] sm:$0xff] %v10655_v15  ;;  %v1968_v25 = vrot.slane %v10655_v15, 1  ;;  %v1480_v57 = vadd.f32 %v7915_v43, %v10330_v53 }
 0x145   : > { %v1478_v10 = vadd.f32 %v10330_v53, %v1208_v56  ;;  %v7916_v12 = vpop.f32.mrb[42].mxu0  ;;  %v1967_v56 = vrot.slane %v10651_v0, 1 }
 0x146   : > { %8250 = vrot.lane.b32.xlu1 %v10648_v49, %s10113_s28  ;;  %v1211_v39 = vpop.f32.mrb[43].mxu0  ;;  %8100 = vrot.lane.b32.xlu0 %v10555_v32, %s10115_s30  ;;  %v1481_v18 = vadd.f32 %v7916_v12, %v10330_v53  ;;  %v10688_v43 = vsel %vm1961_vm2, %v1968_v25, %v10673_v52 }
 0x147   : > { %v1574_v34 = vmax.f32 %v1478_v10, 0.0  ;;  %v1479_v62 = vadd.f32 %v10330_v53, %v1211_v39  ;;  %v10684_v20 = vsel %vm1961_vm2, %v1967_v56, %v1968_v25  ;;  %16623 = vst [vmem:[#allocation38_spill] sm:$0xff] %v10688_v43 }
 0x148   : > { %v1577_v12 = vmax.f32 %v1481_v18, 0.0 }
 0x149   : > { %v10666_v7 = vmax.f32 %v1571_v30, %v1574_v34  ;;  %v1575_v48 = vmax.f32 %v1479_v62, 0.0  ;;  %v2317_v62 = vrot.slane %v10651_v0, 3 }
 0x14a   : > { %8255 = vrot.lane.b32.xlu1 %v10648_v49, %s10116_s16  ;;  %8110 = vrot.lane.b32.xlu0 %v10599_v29, %s10117_s17 }
 0x14b   : > { %v10676_v10 = vmax.f32 %v1572_v16, %v1575_v48  ;;  %v7919_v30 = vpop.f32.mrb[44].mxu0  ;;  %v2318_v16 = vrot.slane %v10655_v15, 3 }
 0x14c   : > { %v1484_v39 = vadd.f32 %v7919_v30, %v10330_v53  ;;  %v1224_v34 = vpop.f32.mrb[45].mxu0 }
 0x14d   : > { %v1482_v60 = vadd.f32 %v10330_v53, %v1224_v34  ;;  %v7920_v50 = vpop.f32.mrb[46].mxu0  ;;  %v1576_v34 = vmax.f32 %v1480_v57, 0.0  ;;  %v10707_v45 = vsel %vm2311_vm1, %v2317_v62, %v2318_v16  ;;  %v10711_v57 = vsel %vm2311_vm1, %v2318_v16, %v10695_v6 }
 0x14e   : > { %v1580_v48 = vmax.f32 %v1484_v39, 0.0  ;;  %v1485_v18 = vadd.f32 %v7920_v50, %v10330_v53  ;;  %8265 = vrot.lane.b32.xlu1 %v10648_v49, %s10112_s27  ;;  %v1227_v30 = vpop.f32.mrb[47].mxu0  ;;  %8120 = vrot.lane.b32.xlu0 %v10555_v32, %s10111_s26  ;;  %v10704_v50 = vpack.i.bf16 %v10688_v43, %v10684_v20  ;;  %16625 = vst [vmem:[#allocation40_spill] sm:$0xff] %v10707_v45  ;;  %v2058_v16 = vrot.slane %v10493_v21, 1 }
 0x14f   : > { %v1578_v8 = vmax.f32 %v1482_v60, 0.0  ;;  %v1483_v25 = vadd.f32 %v10330_v53, %v1227_v30  ;;  %v10725_v62 = vpack.i.bf16 %v10711_v57, %v10707_v45  ;;  %v10733_v30 = vrot.slane %v10660_v46, 2 }
 0x150   : > { %v10700_v56 = vmax.f32 %v1577_v12, %v1580_v48  ;;  %v1581_v31 = vmax.f32 %v1485_v18, 0.0  ;;  %v8134_v12 = vpack.i.bf16 %v10496_v24, %v10493_v21 }
 0x151   : > { %v1579_v39 = vmax.f32 %v1483_v25, 0.0  ;;  %16627 = vst [vmem:[#allocation42_spill] sm:$0xff] %v10733_v30 }
 0x152   : > { %v10713_v60 = vmax.f32 %v1578_v8, %v1581_v31  ;;  %8285 = vrot.lane.b32.xlu1 %v10704_v50, %s10112_s27  ;;  %8130 = vrot.lane.b32.xlu0 %v10599_v29, %s10113_s28  ;;  %v2059_v31 = vrot.slane %v10496_v24, 1  ;;  %v10730_v8 = vrot.slane %v10502_v35, 1  ;;  %v2156_v29 = vrot.slane %v10651_v0, 2 }
 0x153   : > { %v10717_v32 = vmax.f32 %v1576_v34, %v1579_v39  ;;  %v7923_v48 = vpop.f32.mrb[48].mxu0  ;;  %v2157_v34 = vrot.slane %v10655_v15, 2 }
 0x154   : > { %16626 = vst [vmem:[#allocation41_spill] sm:$0xff] %v10730_v8  ;;  %v1240_v18 = vpop.f32.mrb[49].mxu0  ;;  %v2060_v63 = vsel %vm1961_vm2, %v2058_v16, %v2059_v31 }
 0x155   : > { %v1486_v25 = vadd.f32 %v10330_v53, %v1240_v18  ;;  %v7924_v39 = vpop.f32.mrb[50].mxu0  ;;  %v2062_v18 = vsel %vm1961_vm2, %v2059_v31, %v10730_v8  ;;  %v10748_v13 = vsel %vm2150_vm4, %v2156_v29, %v2157_v34 }
 0x156   : > { %8290 = vrot.lane.b32.xlu1 %v10725_v62, %s10112_s27  ;;  %v1489_v43 = vadd.f32 %v7924_v39, %v10330_v53  ;;  %v1243_v36 = vpop.f32.mrb[51].mxu0  ;;  %8135 = vrot.lane.b32.xlu0 %v8134_v12, %s10111_s26  ;;  %16628 = vst [vmem:[#allocation43_spill] sm:$0xff] %v10748_v13  ;;  %v10752_v39 = vsel %vm2150_vm4, %v2157_v34, %v10733_v30 }
 0x157   : > { %v1582_v1 = vmax.f32 %v1486_v25, 0.0  ;;  %16629 = vst [vmem:[#allocation44_spill] sm:$0xff] %v10752_v39  ;;  %v1487_v2 = vadd.f32 %v10330_v53, %v1243_v36  ;;  %v10758_v25 = vrot.slane %v10502_v35, 2  ;;  %v10764_v29 = vpack.i.bf16 %v2062_v18, %v2060_v63 }
 0x158   : > { %v1585_v4 = vmax.f32 %v1489_v43, 0.0  ;;  %v1488_v43 = vadd.f32 %v7923_v48, %v10330_v53  ;;  %v10768_v34 = vpack.i.bf16 %v10752_v39, %v10748_v13  ;;  %v10771_v36 = vsel %vm2150_vm4, %v2223_v61, %v2224_v54 }
 0x159   : > { %16630 = vst [vmem:[#allocation45_spill] sm:$0xff] %v10758_v25  ;;  %16631 = vst [vmem:[#allocation46_spill] sm:$0xff] %v10771_v36  ;;  %v10775_v30 = vsel %vm2150_vm4, %v2224_v54, %v10758_v25  ;;  %v1583_v48 = vmax.f32 %v1487_v2, 0.0  ;;  %v10787_v54 = vrot.slane %v10655_v15, 4  ;;  %v1695_v2 = vmul.f32 %v10340_v5, %v10611_v40 }
 0x15a   : > { %8295 = vrot.lane.b32.xlu1 %v10704_v50, %s10115_s30  ;;  %v10760_v16 = vmax.f32 %v1582_v1, %v1585_v4  ;;  %8140 = vrot.lane.b32.xlu0 %v8134_v12, %s10114_s29  ;;  %16632 = vst [vmem:[#allocation47_spill] sm:$0xff] %v10775_v30  ;;  %v3240_v1 = vrot.slane %v10651_v0, 4  ;;  %v10779_v12 = vrot.slane %v10660_v46, 4  ;;  %v1584_v61 = vmax.f32 %v1488_v43, 0.0 }
 0x15b   : > { %v7927_v31 = vpop.f32.mrb[52].mxu0  ;;  %16634 = vst [vmem:[#allocation49_spill] sm:$0xff] %v10787_v54  ;;  %v1697_v40 = vmul.f32 %v10340_v5, %v10606_v19 }
 0x15c   : > { %v1256_v4 = vpop.f32.mrb[53].mxu0  ;;  %16633 = vst [vmem:[#allocation48_spill] sm:$0xff] %v10779_v12  ;;  %v3242_v39 = vsel %vm2858_vm3, %v3240_v1, %v10787_v54  ;;  %v3244_v43 = vsel %vm2858_vm3, %v10787_v54, %v10779_v12  ;;  %v1492_v1 = vadd.f32 %v7927_v31, %v10330_v53  ;;  %v10819_v54 = vadd.f32 %v10347_v14, %v1695_v2 }
 0x15d   : > { %v1490_v63 = vadd.f32 %v10330_v53, %v1256_v4  ;;  %v7928_v18 = vpop.f32.mrb[54].mxu0  ;;  %v10794_v4 = vpack.i.bf16 %v10775_v30, %v10771_v36 }
 0x15e   : > { %8300 = vrot.lane.b32.xlu1 %v10768_v34, %s10117_s17  ;;  %v1259_v24 = vpop.f32.mrb[55].mxu0  ;;  %8145 = vrot.lane.b32.xlu0 %v10764_v29, %s10113_s28  ;;  %v1493_v46 = vadd.f32 %v7928_v18, %v10330_v53  ;;  %16635 = vst [vmem:[#allocation50_spill] sm:$0xff] %v10819_v54 }
 0x15f   : > { %v1586_v13 = vmax.f32 %v1490_v63, 0.0  ;;  %v1491_v0 = vadd.f32 %v10330_v53, %v1259_v24  ;;  %v1696_v24 = vmul.f32 %v10340_v5, %v10595_v17 }
 0x161   : > { %v10802_v15 = vmax.f32 %v1583_v48, %v1586_v13  ;;  %v1587_v63 = vmax.f32 %v1491_v0, 0.0  ;;  %v10815_v13 = vpack.i.bf16 %v3244_v43, %v3242_v39  ;;  %v1589_v0 = vmax.f32 %v1493_v46, 0.0 }
 0x162   : > { %8315 = vrot.lane.b32.xlu1 %v10725_v62, %s10111_s26  ;;  %8150 = vrot.lane.b32.xlu0 %v10794_v4, %s10111_s26  ;;  %v10823_v21 = vadd.f32 %v10347_v14, %v1696_v24  ;;  %v10829_v46 = vadd.f32 %v10347_v14, %v1697_v40 }
 0x163   : > { %v10813_v18 = vmax.f32 %v1584_v61, %v1587_v63  ;;  %v7931_v12 = vpop.f32.mrb[56].mxu0  ;;  %v8334_v63 = vpack.i.bf16 %v10684_v20, %v10711_v57 }
 0x164   : > { %v1496_v48 = vadd.f32 %v7931_v12, %v10330_v53  ;;  %v1272_v17 = vpop.f32.mrb[57].mxu0  ;;  %16636 = vst [vmem:[#allocation51_spill] sm:$0xff] %v10823_v21  ;;  %16637 = vst [vmem:[#allocation52_spill] sm:$0xff] %v10829_v46  ;;  %v1588_v12 = vmax.f32 %v1492_v1, 0.0  ;;  %v2016_v30 = vrot.slane %v10823_v21, 1  ;;  %v10848_v20 = vrot.slane %v10829_v46, 1 }
 0x165   : > { %v1494_v36 = vadd.f32 %v10330_v53, %v1272_v17  ;;  %v7932_v19 = vpop.f32.mrb[58].mxu0  ;;  %v10890_v26 = vrot.slane %v10829_v46, 3 }
 0x166   : > { %8325 = vrot.lane.b32.xlu1 %v10815_v13, %s10113_s28  ;;  %v1592_v31 = vmax.f32 %v1496_v48, 0.0  ;;  %v1497_v39 = vadd.f32 %v7932_v19, %v10330_v53  ;;  %v1275_v61 = vpop.f32.mrb[59].mxu0  ;;  %8155 = vrot.lane.b32.xlu0 %v10541_v51, %s10113_s28  ;;  %v2015_v19 = vrot.slane %v10819_v54, 1  ;;  %16638 = vst [vmem:[#allocation53_spill] sm:$0xff] %v10848_v20 }
 0x167   : > { %v1590_v2 = vmax.f32 %v1494_v36, 0.0  ;;  %v1495_v43 = vadd.f32 %v10330_v53, %v1275_v61  ;;  %16643 = vst [vmem:[#allocation58_spill] sm:$0xff] %v10890_v26 }
 0x168   : > { %v10836_v24 = vmax.f32 %v1589_v0, %v1592_v31  ;;  %v1593_v17 = vmax.f32 %v1497_v39, 0.0  ;;  %v2184_v0 = vrot.slane %v10819_v54, 2  ;;  %v2185_v31 = vrot.slane %v10823_v21, 2 }
 0x169   : > { %v1591_v48 = vmax.f32 %v1495_v43, 0.0  ;;  %v2019_v43 = vsel %vm1961_vm2, %v2016_v30, %v10848_v20 }
 0x16a   : > { %8335 = vrot.lane.b32.xlu1 %v8334_v63, %s10114_s29  ;;  %v10841_v40 = vmax.f32 %v1590_v2, %v1593_v17  ;;  %8160 = vrot.lane.b32.xlu0 %v10764_v29, %s10116_s16  ;;  %v2017_v2 = vsel %vm1961_vm2, %v2015_v19, %v2016_v30  ;;  %v10867_v19 = vsel %vm2150_vm4, %v2184_v0, %v2185_v31  ;;  %v10026_v30 = vld [vmem:[%s16024_s5 + $0x40] sm:$0xff]  }
 0x16b   : > { %v10845_v36 = vmax.f32 %v1588_v12, %v1591_v48  ;;  %v7935_v1 = vpop.f32.mrb[60].mxu0  ;;  %v10862_v48 = vrot.slane %v10829_v46, 2  ;;  %v10864_v3 = vpack.i.bf16 %v2019_v43, %v2017_v2  ;;  %16641 = vst [vmem:[#allocation56_spill] sm:$0xff] %v10867_v19  ;;  %v2361_v2 = vrot.slane %v10819_v54, 3  ;;  %7556 = vmatprep.subr.bf16.mxu1 %v10026_v30 }
 0x16c   : > { %v1288_v57 = vpop.f32.mrb[61].mxu0  ;;  %v2362_v43 = vrot.slane %v10823_v21, 3 }
 0x16d   : > { %v1498_v39 = vadd.f32 %v10330_v53, %v1288_v57  ;;  %v7936_v61 = vpop.f32.mrb[62].mxu0  ;;  %16639 = vst [vmem:[#allocation54_spill] sm:$0xff] %v10862_v48  ;;  %16640 = vst [vmem:[#allocation55_spill] sm:$0xff] %v10864_v3 }
 0x16e   : > { %8340 = vrot.lane.b32.xlu1 %v10815_v13, %s10116_s16  ;;  %v1501_v12 = vadd.f32 %v7936_v61, %v10330_v53  ;;  %v1291_v63 = vpop.f32.mrb[63].mxu0  ;;  %8165 = vrot.lane.b32.xlu0 %v10794_v4, %s10114_s29  ;;  %v10027_v61 = vld [vmem:[%s16024_s5] sm:$0xff]   ;;  %v2363_v45 = vsel %vm2311_vm1, %v2361_v2, %v2362_v43  ;;  %v2365_v42 = vsel %vm2311_vm1, %v2362_v43, %v10890_v26 }
 0x16f   : > { %v1594_v17 = vmax.f32 %v1498_v39, 0.0  ;;  %v1499_v33 = vadd.f32 %v10330_v53, %v1291_v63  ;;  %v10878_v39 = vsel %vm2150_vm4, %v2185_v31, %v10862_v48  ;;  %v10028_v31 = vld [vmem:[%s16024_s5 + $0x48] sm:$0xff]   ;;  %7557 = vmatpush3.bf16.msra.mxu1 %v10027_v61  ;;  %v1733_v61 = vmul.f32 %v10340_v5, %v10676_v10 }
 0x170   : > { %v1597_v57 = vmax.f32 %v1501_v12, 0.0  ;;  %16642 = vst [vmem:[#allocation57_spill] sm:$0xff] %v10878_v39  ;;  %v1500_v12 = vadd.f32 %v7935_v1, %v10330_v53  ;;  %v10899_v30 = vpack.i.bf16 %v10878_v39, %v10867_v19  ;;  %7558 = vmatprep.subr.bf16.mxu1 %v10028_v31 }
 0x171   : > { %v1595_v1 = vmax.f32 %v1499_v33, 0.0 }
 0x172   : > { %v10882_v0 = vmax.f32 %v1594_v17, %v1597_v57  ;;  %8375 = vrot.lane.b32.xlu1 %v10864_v3, %s10116_s16  ;;  %8170 = vrot.lane.b32.xlu0 %v10541_v51, %s10116_s16  ;;  %v1731_v17 = vmul.f32 %v10340_v5, %v10640_v55  ;;  %16644 = vst [vmem:[#allocation59_spill] sm:$0xff] %v10899_v30  ;;  %v10029_v51 = vld [vmem:[%s16024_s5 + $0x8] sm:$0xff]   ;;  %v1596_v33 = vmax.f32 %v1500_v12, 0.0 }
 0x173   : > { %v7939_v63 = vpop.f32.mrb[64].mxu0  ;;  %v1732_v55 = vmul.f32 %v10340_v5, %v10666_v7  ;;  %v10921_v7 = vpack.i.bf16 %v2365_v42, %v2363_v45  ;;  %7559 = vmatpush3.bf16.msra.mxu1 %v10029_v51  ;;  %v8204_v42 = vpack.i.bf16 %v10380_v47, %v10563_v38  ;;  %v10032_v47 = vld [vmem:[%s16024_s5 + $0x58] sm:$0xff]  }
 0x174   : > { %v1304_v57 = vpop.f32.mrb[65].mxu0  ;;  %v10918_v43 = vadd.f32 %v10347_v14, %v1731_v17 }
 0x175   : > { %v1502_v22 = vadd.f32 %v10330_v53, %v1304_v57  ;;  %v7940_v23 = vpop.f32.mrb[66].mxu0  ;;  %v10926_v57 = vadd.f32 %v10347_v14, %v1732_v55 }
 0x176   : > { %8380 = vrot.lane.b32.xlu1 %v10899_v30, %s10114_s29  ;;  %v1307_v19 = vpop.f32.mrb[67].mxu0  ;;  %8180 = vrot.lane.b32.xlu0 %v10764_v29, %s10112_s27  ;;  %16645 = vst [vmem:[#allocation60_spill] sm:$0xff] %v10918_v43  ;;  %v1505_v31 = vadd.f32 %v7940_v23, %v10330_v53  ;;  %v10942_v23 = vld [vmem:[%s16021_s2] ss:$0 sm:$0xff]  ;;  %v2405_v17 = vrot.slane %v10918_v43, 3 }
 0x177   : > { %v1598_v39 = vmax.f32 %v1502_v22, 0.0  ;;  %v1503_v2 = vadd.f32 %v10330_v53, %v1307_v19  ;;  %16646 = vst [vmem:[#allocation61_spill] sm:$0xff] %v10926_v57  ;;  %v10929_v22 = vadd.f32 %v10347_v14, %v1733_v61  ;;  %v10030_v19 = vld [vmem:[%s16024_s5 + $0x50] sm:$0xff]   ;;  %v1504_v45 = vadd.f32 %v10942_v23, %v7939_v63 }
 0x178   : > { %v10031_v53 = vld [vmem:[%s16024_s5 + $0x10] sm:$0xff]   ;;  %v1601_v12 = vmax.f32 %v1505_v31, 0.0  ;;  %v2406_v51 = vrot.slane %v10926_v57, 3  ;;  %7560 = vmatprep.subr.bf16.mxu1 %v10030_v19  ;;  %v2063_v63 = vrot.slane %v10918_v43, 1  ;;  %v2064_v61 = vrot.slane %v10926_v57, 1 }
 0x179   : > { %v10923_v5 = vmax.f32 %v1595_v1, %v1598_v39  ;;  %v1599_v10 = vmax.f32 %v1503_v2, 0.0  ;;  %16647 = vst [vmem:[#allocation62_spill] sm:$0xff] %v10929_v22  ;;  %7561 = vmatpush3.bf16.msra.mxu1 %v10031_v53  ;;  %v10033_v2 = vld [vmem:[%s16024_s5 + $0x18] sm:$0xff]   ;;  %v4040_v31 = vrot.slane %v10819_v54, 4  ;;  %v10973_v25 = vrot.slane %v10929_v22, 1 }
 0x17a   : > { %8385 = vrot.lane.b32.xlu1 %v10921_v7, %s10116_s16  ;;  %8190 = vrot.lane.b32.xlu0 %v10764_v29, %s10115_s30 }
 0x17b   : > { %v10945_v14 = vmax.f32 %v1596_v33, %v1599_v10  ;;  %v7943_v39 = vpop.f32.mrb[68].mxu0  ;;  %v10967_v10 = vrot.slane %v10929_v22, 3  ;;  %16650 = vst [vmem:[#allocation65_spill] sm:$0xff] %v10973_v25  ;;  %7562 = vmatprep.subr.bf16.mxu1 %v10032_v47  ;;  %v2067_v47 = vsel %vm1961_vm2, %v2064_v61, %v10973_v25 }
 0x17c   : > { %v1508_v1 = vadd.f32 %v10942_v23, %v7943_v39  ;;  %v1320_v55 = vpop.f32.mrb[69].mxu0 }
 0x17d   : > { %16648 = vst [vmem:[#allocation63_spill] sm:$0xff] %v10945_v14  ;;  %v1506_v33 = vadd.f32 %v10942_v23, %v1320_v55  ;;  %v7944_v29 = vpop.f32.mrb[70].mxu0  ;;  %16649 = vst [vmem:[#allocation64_spill] sm:$0xff] %v10967_v10  ;;  %v1600_v55 = vmax.f32 %v1504_v45, 0.0  ;;  %7563 = vmatpush3.bf16.msra.mxu1 %v10033_v2 }
 0x17e   : > { %8390 = vrot.lane.b32.xlu1 %v10864_v3, %s10112_s27  ;;  %v1604_v19 = vmax.f32 %v1508_v1, 0.0  ;;  %v1509_v39 = vadd.f32 %v10942_v23, %v7944_v29  ;;  %v1323_v53 = vpop.f32.mrb[71].mxu0  ;;  %8200 = vrot.lane.b32.xlu0 %v10794_v4, %s10117_s17  ;;  %v2407_v3 = vsel %vm2311_vm1, %v2405_v17, %v2406_v51  ;;  %v2409_v1 = vsel %vm2311_vm1, %v2406_v51, %v10967_v10  ;;  %v10034_v17 = vld [vmem:[%s16024_s5 + $0x60] sm:$0xff]  }
 0x17f   : > { %v1602_v8 = vmax.f32 %v1506_v33, 0.0  ;;  %v1507_v35 = vadd.f32 %v10942_v23, %v1323_v53  ;;  %v10986_v4 = vrot.slane %v10829_v46, 4  ;;  %v2065_v33 = vsel %vm1961_vm2, %v2063_v63, %v2064_v61  ;;  %7564 = vmatprep.subr.bf16.mxu1 %v10034_v17 }
 0x180   : > { %v10976_v30 = vpop.permute.xlu1 %8030  ;;  %v10981_v29 = vmax.f32 %v1601_v12, %v1604_v19  ;;  %v1605_v45 = vmax.f32 %v1509_v39, 0.0  ;;  %v10983_v14 = vpop.permute.xlu0 %8000  ;;  %v10035_v12 = vld [vmem:[%s16024_s5 + $0x20] sm:$0xff]   ;;  %v11003_v63 = vrot.slane %v10823_v21, 4  ;;  %v11007_v2 = vpack.i.bf16 %v2409_v1, %v2407_v3  ;;  %v10036_v19 = vld [vmem:[%s16024_s5 + $0x68] sm:$0xff]  }
 0x181   : > { %16651 = vst [vmem:[#allocation66_spill] sm:$0xff] %v10976_v30  ;;  %16652 = vst [vmem:[#allocation67_spill] sm:$0xff] %v10986_v4  ;;  %v1603_v53 = vmax.f32 %v1507_v35, 0.0  ;;  %7565 = vmatpush3.bf16.msra.mxu1 %v10035_v12  ;;  %v2107_v17 = vrot.slane %v10563_v38, 1 }
 0x182   : > { %8395 = vrot.lane.b32.xlu1 %v10921_v7, %s10112_s27  ;;  %v10999_v51 = vmax.f32 %v1602_v8, %v1605_v45  ;;  %8205 = vrot.lane.b32.xlu0 %v8204_v42, %s10114_s29  ;;  %16653 = vst [vmem:[#allocation68_spill] sm:$0xff] %v11003_v63  ;;  %v11014_v8 = vpack.i.bf16 %v2067_v47, %v2065_v33  ;;  %v10037_v33 = vld [vmem:[%s16024_s5 + $0x28] sm:$0xff]   ;;  %v2106_v47 = vrot.slane %v10575_v58, 1 }
 0x183   : > { %v11005_v35 = vmax.f32 %v1600_v55, %v1603_v53  ;;  %v7947_v61 = vpop.f32.mrb[72].mxu0  ;;  %v8209_v42 = vpack.i.bf16 %v10563_v38, %v10575_v58  ;;  %v4042_v55 = vsel %vm2858_vm3, %v4040_v31, %v11003_v63  ;;  %v4044_v3 = vsel %vm2858_vm3, %v11003_v63, %v10986_v4  ;;  %7566 = vmatprep.subr.bf16.mxu1 %v10036_v19  ;;  %v10039_v19 = vld [vmem:[%s16024_s5 + $0x30] sm:$0xff]  }
 0x184   : > { %v11012_v39 = vpop.permute.xlu1 %8040  ;;  %v1336_v30 = vpop.f32.mrb[73].mxu0  ;;  %v11034_v31 = vrot.slane %v10548_v28, 1  ;;  %v8409_v63 = vpack.i.bf16 %v4044_v3, %v4042_v55  ;;  %v1512_v3 = vadd.f32 %v10942_v23, %v7947_v61 }
 0x185   : > { %16654 = vst [vmem:[#allocation69_spill] sm:$0xff] %v11012_v39  ;;  %v11016_v45 = vpop.permute.xlu0 %8005  ;;  %v1510_v1 = vadd.f32 %v10942_v23, %v1336_v30  ;;  %v7948_v53 = vpop.f32.mrb[74].mxu0  ;;  %7567 = vmatpush3.bf16.msra.mxu1 %v10037_v33  ;;  %v10040_v33 = vld [vmem:[%s16024_s5 + $0x78] sm:$0xff]  }
 0x186   : > { %16655 = vst [vmem:[#allocation70_spill] sm:$0xff] %v11016_v45  ;;  %8400 = vrot.lane.b32.xlu1 %v10921_v7, %s10115_s30  ;;  %16656 = vst [vmem:[#allocation71_spill] sm:$0xff] %v11034_v31  ;;  %v1339_v39 = vpop.f32.mrb[75].mxu0  ;;  %8210 = vrot.lane.b32.xlu0 %v8209_v42, %s10115_s30  ;;  %v1513_v12 = vadd.f32 %v10942_v23, %v7948_v53  ;;  %v10038_v45 = vld [vmem:[%s16024_s5 + $0x70] sm:$0xff]   ;;  %v2110_v55 = vsel %vm1961_vm2, %v2107_v17, %v11034_v31 }
 0x187   : > { %v1606_v30 = vmax.f32 %v1510_v1, 0.0  ;;  %v1511_v28 = vadd.f32 %v10942_v23, %v1339_v39  ;;  %v2108_v1 = vsel %vm1961_vm2, %v2106_v47, %v2107_v17  ;;  %7568 = vmatprep.subr.bf16.mxu1 %v10038_v45 }
 0x188   : > { %v11038_v4 = vpop.permute.xlu1 %8050  ;;  %v1609_v38 = vmax.f32 %v1513_v12, 0.0  ;;  %v11064_v47 = vpack.i.bf16 %v2110_v55, %v2108_v1 }
 0x189   : > { %16657 = vst [vmem:[#allocation72_spill] sm:$0xff] %v11038_v4  ;;  %v11043_v58 = vpop.permute.xlu0 %8010  ;;  %v1607_v17 = vmax.f32 %v1511_v28, 0.0  ;;  %7569 = vmatpush3.bf16.msra.mxu1 %v10039_v19 }
 0x18a   : > { %16658 = vst [vmem:[#allocation73_spill] sm:$0xff] %v11043_v58  ;;  %8410 = vrot.lane.b32.xlu1 %v8409_v63, %s10117_s17  ;;  %8215 = vrot.lane.b32.xlu0 %v8209_v42, %s10111_s26  ;;  %v11055_v53 = vmax.f32 %v1606_v30, %v1609_v38  ;;  %v10041_v38 = vld [vmem:[%s16024_s5 + $0x38] sm:$0xff]   ;;  %v1608_v30 = vmax.f32 %v1512_v3, 0.0 }
 0x18b   : > { %v7951_v39 = vpop.f32.mrb[76].mxu0  ;;  %7570 = vmatprep.subr.bf16.mxu1 %v10040_v33 }
 0x18c   : > { %16659 = vst [vmem:[#allocation74_spill] sm:$0xff] %v11055_v53  ;;  %v11060_v12 = vpop.permute.xlu1 %8055  ;;  %v1352_v4 = vpop.f32.mrb[77].mxu0 }
 0x18d   : > { %16660 = vst [vmem:[#allocation75_spill] sm:$0xff] %v11060_v12  ;;  %v11062_v58 = vpop.permute.xlu0 %8015  ;;  %v1514_v45 = vadd.f32 %v10942_v23, %v1352_v4  ;;  %v7952_v42 = vpop.f32.mrb[78].mxu0  ;;  %7571 = vmatpush3.bf16.msra.mxu1 %v10041_v38  ;;  %v1516_v38 = vadd.f32 %v10942_v23, %v7951_v39  ;;  %v2228_v39 = vrot.slane %v10918_v43, 2 }
 0x18e   : > { %16661 = vst [vmem:[#allocation76_spill] sm:$0xff] %v11062_v58  ;;  %8420 = vrot.lane.b32.xlu1 %v10921_v7, %s10111_s26  ;;  %v1355_v61 = vpop.f32.mrb[79].mxu0  ;;  %8225 = vrot.lane.b32.xlu0 %v11064_v47, %s10117_s17  ;;  %v1517_v4 = vadd.f32 %v10942_v23, %v7952_v42 }
 0x18f   : > { %v1610_v1 = vmax.f32 %v1514_v45, 0.0  ;;  %v1515_v28 = vadd.f32 %v10942_v23, %v1355_v61  ;;  %v8439_v45 = vpack.i.bf16 %v10926_v57, %v10918_v43 }
 0x190   : > { %v11075_v55 = vpop.permute.xlu1 %8090  ;;  %v1613_v42 = vmax.f32 %v1517_v4, 0.0 }
 0x191   : > { %v11078_v19 = vpop.permute.xlu0 %8020  ;;  %v11080_v12 = vmax.f32 %v1607_v17, %v1610_v1  ;;  %v1611_v53 = vmax.f32 %v1515_v28, 0.0 }
 0x192   : > { %8430 = vrot.lane.b32.xlu1 %v8409_v63, %s10113_s28  ;;  %8230 = vrot.lane.b32.xlu0 %v10630_v11, %s10115_s30 }
 0x193   : > { %16662 = vst [vmem:[#allocation77_spill] sm:$0xff] %v11080_v12  ;;  %v11085_v7 = vmax.f32 %v1608_v30, %v1611_v53  ;;  %v7955_v3 = vpop.f32.mrb[80].mxu0 }
 0x194   : > { %v11087_v33 = vpop.permute.xlu1 %8095  ;;  %v1520_v61 = vadd.f32 %v10942_v23, %v7955_v3  ;;  %v1368_v17 = vpop.f32.mrb[81].mxu0 }
 0x195   : > { %16663 = vst [vmem:[#allocation78_spill] sm:$0xff] %v11085_v7  ;;  %16664 = vst [vmem:[#allocation79_spill] sm:$0xff] %v11087_v33  ;;  %v11092_v1 = vpop.permute.xlu0 %8025  ;;  %v7956_v63 = vpop.f32.mrb[82].mxu0  ;;  %v1518_v53 = vadd.f32 %v10942_v23, %v1368_v17  ;;  %v1612_v7 = vmax.f32 %v1516_v38, 0.0 }
 0x196   : > { %8440 = vrot.lane.b32.xlu1 %v8439_v45, %s10111_s26  ;;  %v1616_v11 = vmax.f32 %v1520_v61, 0.0  ;;  %v1371_v30 = vpop.f32.mrb[83].mxu0  ;;  %8235 = vrot.lane.b32.xlu0 %v10648_v49, %s10117_s17  ;;  %v1521_v28 = vadd.f32 %v10942_v23, %v7956_v63  ;;  %v2229_v61 = vrot.slane %v10926_v57, 2  ;;  %v11113_v49 = vrot.slane %v10929_v22, 2 }
 0x197   : > { %v1519_v4 = vadd.f32 %v10942_v23, %v1371_v30  ;;  %v1614_v17 = vmax.f32 %v1518_v53, 0.0 }
 0x198   : > { %v11101_v3 = vpop.permute.xlu1 %8105  ;;  %v11103_v33 = vmax.f32 %v1613_v42, %v1616_v11  ;;  %16667 = vst [vmem:[#allocation82_spill] sm:$0xff] %v11113_v49  ;;  %v1617_v63 = vmax.f32 %v1521_v28, 0.0  ;;  %v11120_v58 = vsel %vm2150_vm4, %v2228_v39, %v2229_v61 }
 0x199   : > { %16665 = vst [vmem:[#allocation80_spill] sm:$0xff] %v11101_v3  ;;  %v11105_v12 = vpop.permute.xlu0 %8035  ;;  %v1615_v30 = vmax.f32 %v1519_v4, 0.0  ;;  %16670 = vst [vmem:[#allocation85_spill] sm:$0xff] %v11120_v58 }
 0x19a   : > { %16666 = vst [vmem:[#allocation81_spill] sm:$0xff] %v11105_v12  ;;  %8445 = vrot.lane.b32.xlu1 %v8439_v45, %s10114_s29  ;;  %8240 = vrot.lane.b32.xlu0 %v11064_v47, %s10113_s28  ;;  %v11124_v45 = vsel %vm2150_vm4, %v2229_v61, %v11113_v49  ;;  %v11126_v38 = vmax.f32 %v1614_v17, %v1617_v63 }
 0x19b   : > { %v7959_v42 = vpop.f32.mrb[84].mxu0  ;;  %16671 = vst [vmem:[#allocation86_spill] sm:$0xff] %v11124_v45  ;;  %v11128_v53 = vmax.f32 %v1612_v7, %v1615_v30  ;;  %v11140_v61 = vpack.i.bf16 %v11124_v45, %v11120_v58 }
 0x19c   : > { %v11115_v11 = vpop.permute.xlu1 %8115  ;;  %v1384_v12 = vpop.f32.mrb[85].mxu0 }
 0x19d   : > { %16668 = vst [vmem:[#allocation83_spill] sm:$0xff] %v11115_v11  ;;  %v11117_v3 = vpop.permute.xlu0 %8045  ;;  %v7960_v31 = vpop.f32.mrb[86].mxu0  ;;  %v1522_v28 = vadd.f32 %v10942_v23, %v1384_v12  ;;  %16673 = vst [vmem:[#allocation88_spill] sm:$0xff] %v11140_v61 }
 0x19e   : > { %16669 = vst [vmem:[#allocation84_spill] sm:$0xff] %v11117_v3  ;;  %8470 = vrot.lane.b32.xlu1 %v11014_v8, %s10113_s28  ;;  %v1387_v4 = vpop.f32.mrb[87].mxu0  ;;  %8260 = vrot.lane.b32.xlu0 %v11064_v47, %s10116_s16  ;;  %v1525_v39 = vadd.f32 %v10942_v23, %v7960_v31 }
 0x19f   : > { %v1618_v7 = vmax.f32 %v1522_v28, 0.0  ;;  %v1523_v63 = vadd.f32 %v10942_v23, %v1387_v4  ;;  %v8274_v4 = vpack.i.bf16 %v10673_v52, %v10374_v44 }
 0x1a0   : > { %v11136_v3 = vpop.permute.xlu1 %8125  ;;  %v1621_v12 = vmax.f32 %v1525_v39, 0.0 }
 0x1a1   : > { %16672 = vst [vmem:[#allocation87_spill] sm:$0xff] %v11136_v3  ;;  %v11142_v17 = vpop.permute.xlu0 %8060  ;;  %v1524_v3 = vadd.f32 %v10942_v23, %v7959_v42 }
 0x1a2   : > { %16674 = vst [vmem:[#allocation89_spill] sm:$0xff] %v11142_v17  ;;  %8475 = vrot.lane.b32.xlu1 %v11140_v61, %s10111_s26  ;;  %8270 = vrot.lane.b32.xlu0 %v11064_v47, %s10112_s27  ;;  %v11154_v58 = vmax.f32 %v1618_v7, %v1621_v12  ;;  %v1619_v17 = vmax.f32 %v1523_v63, 0.0  ;;  %v11168_v7 = vld [vmem:[%s16022_s3] ss:$0 sm:$0xff] }
 0x1a3   : > { %v11149_v30 = vpop.f32.mrb[88].mxu0  ;;  %v1658_v63 = vmul.f32 %v11168_v7, %v10813_v18  ;;  %v1656_v44 = vmul.f32 %v11168_v7, %v10760_v16  ;;  %v11191_v16 = vld [vmem:[%s16023_s4] ss:$0 sm:$0xff] }
 0x1a4   : > { %v11151_v31 = vpop.permute.xlu1 %8175  ;;  %16676 = vst [vmem:[#allocation91_spill] sm:$0xff] %v11154_v58  ;;  %v1400_v28 = vpop.f32.mrb[89].mxu0 }
 0x1a5   : > { %16675 = vst [vmem:[#allocation90_spill] sm:$0xff] %v11151_v31  ;;  %v11156_v45 = vpop.permute.xlu0 %8065  ;;  %v1526_v39 = vadd.f32 %v10942_v23, %v1400_v28  ;;  %v7964_v11 = vpop.f32.mrb[90].mxu0  ;;  %v1620_v28 = vmax.f32 %v1524_v3, 0.0 }
 0x1a6   : > { %8480 = vrot.lane.b32.xlu1 %v11007_v2, %s10113_s28  ;;  %v1403_v47 = vpop.f32.mrb[91].mxu0  ;;  %8275 = vrot.lane.b32.xlu0 %v8274_v4, %s10112_s27  ;;  %v1529_v52 = vadd.f32 %v10942_v23, %v7964_v11  ;;  %v1657_v4 = vmul.f32 %v11168_v7, %v10802_v15  ;;  %v11194_v15 = vadd.f32 %v11191_v16, %v1658_v63 }
 0x1a7   : > { %v1622_v31 = vmax.f32 %v1526_v39, 0.0  ;;  %v1527_v42 = vadd.f32 %v10942_v23, %v1403_v47  ;;  %v8279_v47 = vpack.i.bf16 %v10695_v6, %v10370_v41 }
 0x1a8   : > { %v11172_v12 = vpop.permute.xlu1 %8185  ;;  %16679 = vst [vmem:[#allocation94_spill] sm:$0xff] %v11194_v15  ;;  %v1625_v6 = vmax.f32 %v1529_v52, 0.0 }
 0x1a9   : > { %16677 = vst [vmem:[#allocation92_spill] sm:$0xff] %v11172_v12  ;;  %v11179_v39 = vpop.permute.xlu0 %8070  ;;  %v11183_v58 = vmax.f32 %v1619_v17, %v1622_v31  ;;  %v1623_v18 = vmax.f32 %v1527_v42, 0.0  ;;  %v11202_v42 = vadd.f32 %v11191_v16, %v1656_v44  ;;  %v11216_v44 = vrot.slane %v11194_v15, 3 }
 0x1aa   : > { %8485 = vrot.lane.b32.xlu1 %v11014_v8, %s10116_s16  ;;  %8280 = vrot.lane.b32.xlu0 %v8279_v47, %s10112_s27  ;;  %v11205_v47 = vadd.f32 %v11191_v16, %v1657_v4 }
 0x1ab   : > { %16678 = vst [vmem:[#allocation93_spill] sm:$0xff] %v11183_v58  ;;  %v7967_v3 = vpop.f32.mrb[92].mxu0  ;;  %v11198_v17 = vmax.f32 %v1620_v28, %v1623_v18  ;;  %16682 = vst [vmem:[#allocation97_spill] sm:$0xff] %v11202_v42 }
 0x1ac   : > { %v11196_v11 = vpop.permute.xlu1 %8195  ;;  %v1532_v31 = vadd.f32 %v10942_v23, %v7967_v3  ;;  %v1416_v41 = vpop.f32.mrb[93].mxu0  ;;  %16683 = vst [vmem:[#allocation98_spill] sm:$0xff] %v11205_v47  ;;  %16684 = vst [vmem:[#allocation99_spill] sm:$0xff] %v11216_v44  ;;  %v4856_v3 = vrot.slane %v10918_v43, 4 }
 0x1ad   : > { %16680 = vst [vmem:[#allocation95_spill] sm:$0xff] %v11196_v11  ;;  %16681 = vst [vmem:[#allocation96_spill] sm:$0xff] %v11198_v17  ;;  %v11207_v12 = vpop.permute.xlu0 %8075  ;;  %v1530_v58 = vadd.f32 %v10942_v23, %v1416_v41  ;;  %v7968_v63 = vpop.f32.mrb[94].mxu0 }
 0x1ae   : > { %8490 = vrot.lane.b32.xlu1 %v11140_v61, %s10114_s29  ;;  %v1628_v52 = vmax.f32 %v1532_v31, 0.0  ;;  %8305 = vrot.lane.b32.xlu0 %v10725_v62, %s10115_s30  ;;  %v1533_v18 = vadd.f32 %v10942_v23, %v7968_v63  ;;  %v2322_v31 = vrot.slane %v11202_v42, 3  ;;  %v2323_v62 = vrot.slane %v11205_v47, 3 }
 0x1af   : > { %v1626_v28 = vmax.f32 %v1530_v58, 0.0  ;;  %v11233_v63 = vrot.slane %v10926_v57, 4 }
 0x1b0   : > { %v11218_v4 = vpop.permute.xlu1 %8220  ;;  %v11221_v11 = vmax.f32 %v1625_v6, %v1628_v52  ;;  %v1629_v58 = vmax.f32 %v1533_v18, 0.0  ;;  %v16690_v18 = vrot.slane %v10929_v22, 4 }
 0x1b1   : > { %16685 = vst [vmem:[#allocation100_spill] sm:$0xff] %v11218_v4  ;;  %v11223_v41 = vpop.permute.xlu0 %8080  ;;  %16687 = vst [vmem:[#allocation102_spill] sm:$0xff] %v11233_v63  ;;  %v4858_v17 = vsel %vm2858_vm3, %v4856_v3, %v11233_v63  ;;  %v1769_v3 = vmul.f32 %v11168_v7, %v10713_v60 }
 0x1b2   : > { %16686 = vst [vmem:[#allocation101_spill] sm:$0xff] %v11221_v11  ;;  %8500 = vrot.lane.b32.xlu1 %v11007_v2, %s10112_s27  ;;  %8310 = vrot.lane.b32.xlu0 %v10815_v13, %s10117_s17  ;;  %v11235_v6 = vmax.f32 %v1626_v28, %v1629_v58  ;;  %v4860_v4 = vsel %vm2858_vm3, %v11233_v63, %v16690_v18 }
 0x1b3   : > { %v2324_v11 = vsel %vm2311_vm1, %v2322_v31, %v2323_v62  ;;  %v2326_v13 = vsel %vm2311_vm1, %v2323_v62, %v11216_v44  ;;  %v1768_v28 = vmul.f32 %v11168_v7, %v10700_v56  ;;  %v1767_v58 = vmul.f32 %v11168_v7, %v10717_v32 }
 0x1b4   : > { %16688 = vst [vmem:[#allocation103_spill] sm:$0xff] %v11235_v6  ;;  %v11237_v52 = vpop.permute.xlu1 %8245  ;;  %v8519_v31 = vpack.i.bf16 %v4860_v4, %v4858_v17  ;;  %v11262_v63 = vpack.i.bf16 %v2326_v13, %v2324_v11  ;;  %v1700_v56 = vmul.f32 %v11168_v7, %v10841_v40  ;;  %v1698_v32 = vmul.f32 %v11168_v7, %v10845_v36 }
 0x1b5   : > { %v11239_v43 = vpop.permute.xlu0 %8085  ;;  %v11271_v57 = vadd.f32 %v11191_v16, %v1768_v28  ;;  %v11274_v60 = vadd.f32 %v11191_v16, %v1767_v58  ;;  %v1699_v11 = vmul.f32 %v11168_v7, %v10836_v24 }
 0x1b6   : > { %16689 = vst [vmem:[#allocation104_spill] sm:$0xff] %v11239_v43  ;;  %8510 = vrot.lane.b32.xlu1 %v11007_v2, %s10115_s30  ;;  %8320 = vrot.lane.b32.xlu0 %v10704_v50, %s10111_s26  ;;  %v11278_v50 = vadd.f32 %v11191_v16, %v1769_v3  ;;  %v11289_v17 = vadd.f32 %v11191_v16, %v1700_v56 }
 0x1b7   : > { %16692 = vst [vmem:[#allocation106_spill] sm:$0xff] %v11271_v57  ;;  %16693 = vst [vmem:[#allocation107_spill] sm:$0xff] %v11274_v60  ;;  %v8539_v36 = vpack.i.bf16 %v11271_v57, %v11274_v60  ;;  %v11292_v4 = vadd.f32 %v11191_v16, %v1698_v32  ;;  %v11298_v24 = vadd.f32 %v11191_v16, %v1699_v11  ;;  %v2273_v28 = vrot.slane %v11271_v57, 2 }
 0x1b8   : > { %v11260_v18 = vpop.permute.xlu1 %8250  ;;  %16694 = vst [vmem:[#allocation108_spill] sm:$0xff] %v11278_v50  ;;  %16696 = vst [vmem:[#allocation110_spill] sm:$0xff] %v11289_v17  ;;  %v11304_v58 = vrot.slane %v11278_v50, 2  ;;  %v2111_v56 = vrot.slane %v11274_v60, 1  ;;  %v2112_v32 = vrot.slane %v11271_v57, 1 }
 0x1b9   : > { %v11268_v62 = vpop.permute.xlu0 %8100  ;;  %16697 = vst [vmem:[#allocation111_spill] sm:$0xff] %v11292_v4  ;;  %16699 = vst [vmem:[#allocation113_spill] sm:$0xff] %v11298_v24 }
 0x1ba   : > { %16691 = vst [vmem:[#allocation105_spill] sm:$0xff] %v11268_v62  ;;  %8520 = vrot.lane.b32.xlu1 %v8519_v31, %s10117_s17  ;;  %8330 = vrot.lane.b32.xlu0 %v10768_v34, %s10113_s28  ;;  %16700 = vst [vmem:[#allocation114_spill] sm:$0xff] %v11304_v58  ;;  %v8349_v31 = vpack.i.bf16 %v10829_v46, %v10421_v9  ;;  %v11316_v11 = vsel %vm2150_vm4, %v2273_v28, %v11304_v58  ;;  %v11321_v62 = vrot.slane %v11289_v17, 3 }
 0x1bb   : > { %16703 = vst [vmem:[#allocation117_spill] sm:$0xff] %v11316_v11  ;;  %v11326_v46 = vrot.slane %v11278_v50, 1  ;;  %v2113_v44 = vsel %vm1961_vm2, %v2111_v56, %v2112_v32 }
 0x1bc   : > { %v11284_v40 = vpop.permute.xlu1 %8255  ;;  %16704 = vst [vmem:[#allocation118_spill] sm:$0xff] %v11321_v62 }
 0x1bd   : > { %16695 = vst [vmem:[#allocation109_spill] sm:$0xff] %v11284_v40  ;;  %v11294_v13 = vpop.permute.xlu0 %8110  ;;  %v2367_v40 = vrot.slane %v11298_v24, 3  ;;  %16705 = vst [vmem:[#allocation119_spill] sm:$0xff] %v11326_v46 }
 0x1be   : > { %16698 = vst [vmem:[#allocation112_spill] sm:$0xff] %v11294_v13  ;;  %8540 = vrot.lane.b32.xlu1 %v8539_v36, %s10115_s30  ;;  %8345 = vrot.lane.b32.xlu0 %v10768_v34, %s10116_s16  ;;  %v2366_v34 = vrot.slane %v11292_v4, 3 }
 0x1bf   : > { %v2370_v58 = vsel %vm2311_vm1, %v2367_v40, %v11321_v62  ;;  %v16723_v62 = vld [vmem:[#allocation55_spill] sm:$0xff] }
 0x1c0   : > { %v11306_v3 = vpop.permute.xlu1 %8265 }
 0x1c1   : > { %16701 = vst [vmem:[#allocation115_spill] sm:$0xff] %v11306_v3  ;;  %v11312_v13 = vpop.permute.xlu0 %8120  ;;  %v8564_v3 = vpack.i.bf16 %v11274_v60, %v11316_v11 }
 0x1c2   : > { %16702 = vst [vmem:[#allocation116_spill] sm:$0xff] %v11312_v13  ;;  %8545 = vrot.lane.b32.xlu1 %v8539_v36, %s10111_s26  ;;  %8350 = vrot.lane.b32.xlu0 %v8349_v31, %s10114_s29  ;;  %v8354_v13 = vpack.i.bf16 %v10823_v21, %v10819_v54  ;;  %v2115_v36 = vsel %vm1961_vm2, %v2112_v32, %v11326_v46  ;;  %v2272_v54 = vrot.slane %v11274_v60, 2 }
 0x1c3   : > { %v2368_v31 = vsel %vm2311_vm1, %v2366_v34, %v2367_v40  ;;  %v8359_v32 = vpack.i.bf16 %v10848_v20, %v10518_v59  ;;  %v2449_v34 = vrot.slane %v11274_v60, 3  ;;  %v2450_v40 = vrot.slane %v11271_v57, 3 }
 0x1c4   : > { %v11328_v9 = vpop.permute.xlu1 %8285  ;;  %v2021_v60 = vrot.slane %v11298_v24, 1 }
 0x1c5   : > { %16706 = vst [vmem:[#allocation120_spill] sm:$0xff] %v11328_v9  ;;  %v11334_v6 = vpop.permute.xlu0 %8130  ;;  %v11347_v9 = vpack.i.bf16 %v2115_v36, %v2113_v44  ;;  %v11363_v44 = vsel %vm2150_vm4, %v2272_v54, %v2273_v28  ;;  %v1772_v36 = vmul.f32 %v11168_v7, %v10999_v51  ;;  %v8364_v54 = vpack.i.bf16 %v10862_v48, %v10560_v37 }
 0x1c6   : > { %16707 = vst [vmem:[#allocation121_spill] sm:$0xff] %v11334_v6  ;;  %8565 = vrot.lane.b32.xlu1 %v8564_v3, %s10114_s29  ;;  %8355 = vrot.lane.b32.xlu0 %v8354_v13, %s10114_s29  ;;  %v11349_v6 = vpack.i.bf16 %v2370_v58, %v2368_v31  ;;  %v1770_v13 = vmul.f32 %v11168_v7, %v11005_v35  ;;  %16710 = vst [vmem:[#allocation124_spill] sm:$0xff] %v11363_v44  ;;  %v11366_v58 = vrot.slane %v11278_v50, 3 }
 0x1c7   : > { %16709 = vst [vmem:[#allocation123_spill] sm:$0xff] %v11347_v9  ;;  %v1771_v3 = vmul.f32 %v11168_v7, %v10981_v29  ;;  %v8574_v20 = vpack.i.bf16 %v11316_v11, %v11363_v44  ;;  %v2451_v28 = vsel %vm2311_vm1, %v2449_v34, %v2450_v40  ;;  %v11392_v59 = vadd.f32 %v11191_v16, %v1772_v36 }
 0x1c8   : > { %v11345_v21 = vpop.permute.xlu1 %8290  ;;  %16711 = vst [vmem:[#allocation125_spill] sm:$0xff] %v11366_v58  ;;  %v11385_v29 = vadd.f32 %v11191_v16, %v1770_v13  ;;  %v11402_v13 = vrot.slane %v11194_v15, 1 }
 0x1c9   : > { %16708 = vst [vmem:[#allocation122_spill] sm:$0xff] %v11345_v21  ;;  %v11351_v56 = vpop.permute.xlu0 %8135  ;;  %v11389_v51 = vadd.f32 %v11191_v16, %v1771_v3  ;;  %16715 = vst [vmem:[#allocation129_spill] sm:$0xff] %v11392_v59 }
 0x1ca   : > { %8570 = vrot.lane.b32.xlu1 %v11347_v9, %s10117_s17  ;;  %8360 = vrot.lane.b32.xlu0 %v8359_v32, %s10116_s16  ;;  %v2453_v32 = vsel %vm2311_vm1, %v2450_v40, %v11366_v58  ;;  %16713 = vst [vmem:[#allocation127_spill] sm:$0xff] %v11385_v29  ;;  %v8369_v40 = vpack.i.bf16 %v10890_v26, %v10441_v27  ;;  %16718 = vst [vmem:[#allocation132_spill] sm:$0xff] %v11402_v13  ;;  %v2454_v3 = vrot.slane %v11385_v29, 3 }
 0x1cb   : > { %16714 = vst [vmem:[#allocation128_spill] sm:$0xff] %v11389_v51  ;;  %v8579_v48 = vpack.i.bf16 %v2453_v32, %v2451_v28  ;;  %v2455_v36 = vrot.slane %v11389_v51, 3  ;;  %v11410_v28 = vrot.slane %v11392_v59, 3  ;;  %v1972_v32 = vrot.slane %v11202_v42, 1 }
 0x1cc   : > { %v11372_v31 = vpop.permute.xlu1 %8295  ;;  %v1973_v26 = vrot.slane %v11205_v47, 1  ;;  %v2020_v27 = vrot.slane %v11292_v4, 1 }
 0x1cd   : > { %16712 = vst [vmem:[#allocation126_spill] sm:$0xff] %v11372_v31  ;;  %v11376_v35 = vpop.permute.xlu0 %8140  ;;  %16720 = vst [vmem:[#allocation134_spill] sm:$0xff] %v11410_v28  ;;  %v16722_v31 = vld [vmem:[#allocation63_spill] sm:$0xff]  ;;  %v2456_v58 = vsel %vm2311_vm1, %v2454_v3, %v2455_v36  ;;  %v2458_v43 = vsel %vm2311_vm1, %v2455_v36, %v11410_v28 }
 0x1ce   : > { %8575 = vrot.lane.b32.xlu1 %v8574_v20, %s10115_s30  ;;  %8365 = vrot.lane.b32.xlu0 %v8364_v54, %s10114_s29  ;;  %v1736_v21 = vmul.f32 %v11168_v7, %v16722_v31  ;;  %v2022_v31 = vsel %vm1961_vm2, %v2020_v27, %v2021_v60 }
 0x1d0   : > { %v11394_v11 = vpop.permute.xlu1 %8300  ;;  %v11451_v36 = vadd.f32 %v11191_v16, %v1736_v21 }
 0x1d1   : > { %16716 = vst [vmem:[#allocation130_spill] sm:$0xff] %v11394_v11  ;;  %v11396_v34 = vpop.permute.xlu0 %8145  ;;  %v1735_v11 = vmul.f32 %v11168_v7, %v10923_v5  ;;  %v1976_v5 = vsel %vm1961_vm2, %v1973_v26, %v11402_v13  ;;  %v16741_v13 = vld [vmem:[#allocation45_spill] sm:$0xff] }
 0x1d2   : > { %16717 = vst [vmem:[#allocation131_spill] sm:$0xff] %v11396_v34  ;;  %8580 = vrot.lane.b32.xlu1 %v8579_v48, %s10117_s17  ;;  %8370 = vrot.lane.b32.xlu0 %v8369_v40, %s10116_s16  ;;  %v11419_v40 = vrot.slane %v11289_v17, 1  ;;  %16727 = vst [vmem:[#allocation137_spill] sm:$0xff] %v11451_v36 }
 0x1d3   : > { %v11448_v3 = vadd.f32 %v11191_v16, %v1735_v11  ;;  %v11465_v11 = vrot.slane %v11451_v36, 1 }
 0x1d4   : > { %v11406_v54 = vpop.permute.xlu1 %8315  ;;  %16721 = vst [vmem:[#allocation135_spill] sm:$0xff] %v11419_v40 }
 0x1d5   : > { %16719 = vst [vmem:[#allocation133_spill] sm:$0xff] %v11406_v54  ;;  %v11414_v37 = vpop.permute.xlu0 %8150  ;;  %v1734_v54 = vmul.f32 %v11168_v7, %v10882_v0  ;;  %v1974_v0 = vsel %vm1961_vm2, %v1972_v32, %v1973_v26  ;;  %16726 = vst [vmem:[#allocation136_spill] sm:$0xff] %v11448_v3  ;;  %v16728_v26 = vld [vmem:[#allocation59_spill] sm:$0xff]  ;;  %v11456_v32 = vpack.i.bf16 %v2458_v43, %v2456_v58 }
 0x1d6   : > { %8585 = vrot.lane.b32.xlu1 %v11347_v9, %s10113_s28  ;;  %8405 = vrot.lane.b32.xlu0 %v16723_v62, %s10115_s30  ;;  %v2024_v9 = vsel %vm1961_vm2, %v2021_v60, %v11419_v40  ;;  %v11458_v27 = vpack.i.bf16 %v1976_v5, %v1974_v0  ;;  %16731 = vst [vmem:[#allocation139_spill] sm:$0xff] %v11465_v11  ;;  %v2278_v40 = vrot.slane %v11389_v51, 2 }
 0x1d7   : > { %v11445_v34 = vadd.f32 %v11191_v16, %v1734_v54  ;;  %v2069_v54 = vrot.slane %v11448_v3, 1  ;;  %v11467_v21 = vpack.i.bf16 %v2024_v9, %v2022_v31  ;;  %v2411_v31 = vrot.slane %v11448_v3, 3 }
 0x1d8   : > { %v11431_v44 = vpop.permute.xlu1 %8325  ;;  %16729 = vst [vmem:[#allocation59_spill] sm:$0xff] %v11458_v27  ;;  %v16745_v27 = vld [vmem:[#allocation73_spill] sm:$0xff] }
 0x1d9   : > { %16724 = vst [vmem:[#allocation63_spill] sm:$0xff] %v11431_v44  ;;  %v11439_v61 = vpop.permute.xlu0 %8155  ;;  %16725 = vst [vmem:[#allocation55_spill] sm:$0xff] %v11445_v34  ;;  %v2068_v60 = vrot.slane %v11445_v34, 1  ;;  %v2072_v58 = vsel %vm1961_vm2, %v2069_v54, %v11465_v11  ;;  %v16738_v11 = vld [vmem:[#allocation20_spill] sm:$0xff] }
 0x1da   : > { %8595 = vrot.lane.b32.xlu1 %v8574_v20, %s10111_s26  ;;  %8415 = vrot.lane.b32.xlu0 %v16728_v26, %s10117_s17  ;;  %16732 = vst [vmem:[#allocation140_spill] sm:$0xff] %v11467_v21  ;;  %v11508_v21 = vrot.slane %v11392_v59, 2 }
 0x1db   : > { %v2070_v43 = vsel %vm1961_vm2, %v2068_v60, %v2069_v54  ;;  %v11491_v60 = vrot.slane %v11451_v36, 3  ;;  %v11494_v54 = vrot.slane %v11205_v47, 4  ;;  %v1702_v47 = vmul.f32 %v11168_v7, %v11103_v33 }
 0x1dc   : > { %v11460_v28 = vpop.permute.xlu1 %8335  ;;  %v11484_v9 = vpack.i.bf16 %v2072_v58, %v2070_v43  ;;  %v16739_v43 = vld [vmem:[#allocation41_spill] sm:$0xff]  ;;  %16740 = vst [vmem:[#allocation146_spill] sm:$0xff] %v11508_v21  ;;  %v1701_v33 = vmul.f32 %v11168_v7, %v11128_v53  ;;  %v8068_v36 = vunpack.i.h.bf16 %v11156_v45 }
 0x1dd   : > { %16730 = vst [vmem:[#allocation138_spill] sm:$0xff] %v11460_v28  ;;  %v11469_v44 = vpop.permute.xlu0 %8160  ;;  %16736 = vst [vmem:[#allocation144_spill] sm:$0xff] %v11491_v60  ;;  %v8454_v58 = vpack.i.bf16 %v10973_v25, %v16739_v43  ;;  %v8659_v25 = vpack.i.bf16 %v11298_v24, %v11292_v4  ;;  %v16742_v43 = vld [vmem:[#allocation21_spill] sm:$0xff]  ;;  %v2414_v59 = vsel %vm2311_vm1, %v2411_v31, %v11491_v60  ;;  %v16768_v60 = vld [vmem:[#allocation30_spill] sm:$0xff] }
 0x1de   : > { %8600 = vrot.lane.b32.xlu1 %v8579_v48, %s10113_s28  ;;  %8425 = vrot.lane.b32.xlu0 %v16723_v62, %s10111_s26  ;;  %16734 = vst [vmem:[#allocation142_spill] sm:$0xff] %v11484_v9  ;;  %v2410_v62 = vrot.slane %v11445_v34, 3  ;;  %16737 = vst [vmem:[#allocation145_spill] sm:$0xff] %v11494_v54  ;;  %v2277_v9 = vrot.slane %v11385_v29, 2  ;;  %v8067_v29 = vunpack.i.l.bf16 %v11156_v45  ;;  %v16757_v45 = vrot.slane %v11194_v15, 4 }
 0x1df   : > { %v11593_v53 = vadd.f32 %v11191_v16, %v1701_v33  ;;  %v16766_v33 = vld [vmem:[#allocation14_spill] sm:$0xff] }
 0x1e0   : > { %v11474_v20 = vpop.permute.xlu1 %8340  ;;  %v2412_v51 = vsel %vm2311_vm1, %v2410_v62, %v2411_v31  ;;  %v11534_v62 = vsel %vm2150_vm4, %v2277_v9, %v2278_v40 }
 0x1e1   : > { %16733 = vst [vmem:[#allocation141_spill] sm:$0xff] %v11474_v20  ;;  %v11479_v0 = vpop.permute.xlu0 %8165  ;;  %v1419_v20 = vpop.f32.mrb[95].mxu0  ;;  %16747 = vst [vmem:[#allocation73_spill] sm:$0xff] %v11534_v62  ;;  %v11542_v31 = vpack.i.bf16 %v2414_v59, %v2412_v51  ;;  %v3245_v59 = vrot.slane %v11202_v42, 4 }
 0x1e2   : > { %8605 = vrot.lane.b32.xlu1 %v8579_v48, %s10116_s16  ;;  %8435 = vrot.lane.b32.xlu0 %v16728_v26, %s10113_s28  ;;  %v8449_v26 = vpack.i.bf16 %v10929_v22, %v16738_v11  ;;  %v8459_v22 = vpack.i.bf16 %v11113_v49, %v16741_v13  ;;  %v16744_v49 = vld [vmem:[#allocation70_spill] sm:$0xff]  ;;  %16759 = vst [vmem:[#allocation155_spill] sm:$0xff] %v11593_v53 }
 0x1e3   : > { %v3247_v13 = vsel %vm2858_vm3, %v3245_v59, %v11494_v54 }
 0x1e4   : > { %v11486_v5 = vpop.permute.xlu1 %8375 }
 0x1e5   : > { %16735 = vst [vmem:[#allocation143_spill] sm:$0xff] %v11486_v5  ;;  %v11496_v28 = vpop.permute.xlu0 %8170  ;;  %v1528_v5 = vadd.f32 %v10942_v23, %v11149_v30  ;;  %v8464_v30 = vpack.i.bf16 %v10967_v10, %v16742_v43 }
 0x1e6   : > { %8615 = vrot.lane.b32.xlu1 %v8579_v48, %s10112_s27  ;;  %8450 = vrot.lane.b32.xlu0 %v8449_v26, %s10111_s26  ;;  %v1531_v26 = vadd.f32 %v10942_v23, %v1419_v20  ;;  %v11538_v23 = vsel %vm2150_vm4, %v2278_v40, %v11508_v21 }
 0x1e7   : > { %v1624_v43 = vmax.f32 %v1528_v5, 0.0  ;;  %16748 = vst [vmem:[#allocation148_spill] sm:$0xff] %v11538_v23  ;;  %v11555_v20 = vpack.i.bf16 %v11538_v23, %v11534_v62  ;;  %v4045_v5 = vrot.slane %v11292_v4, 4  ;;  %v16760_v23 = vld [vmem:[#allocation4_spill] sm:$0xff] }
 0x1e8   : > { %v11518_v11 = vpop.permute.xlu1 %8380  ;;  %v1627_v9 = vmax.f32 %v1531_v26, 0.0  ;;  %v2490_v59 = vsel %vm2488_vm5, %v16760_v23, %v8068_v36  ;;  %v11613_v36 = vrot.slane %v11298_v24, 4 }
 0x1e9   : > { %16743 = vst [vmem:[#allocation147_spill] sm:$0xff] %v11518_v11  ;;  %v11528_v10 = vpop.permute.xlu0 %8180 }
 0x1ea   : > { %16746 = vst [vmem:[#allocation70_spill] sm:$0xff] %v11528_v10  ;;  %8655 = vrot.lane.b32.xlu1 %v11262_v63, %s10111_s26  ;;  %8455 = vrot.lane.b32.xlu0 %v8454_v58, %s10113_s28  ;;  %v1703_v58 = vmul.f32 %v11168_v7, %v11126_v38  ;;  %v11564_v26 = vmax.f32 %v1624_v43, %v1627_v9  ;;  %v16756_v9 = vld [vmem:[#allocation24_spill] sm:$0xff] }
 0x1eb   : > { %v11572_v38 = vadd.f32 %v11191_v16, %v1702_v47  ;;  %v8078_v47 = vunpack.i.h.bf16 %v11207_v12 }
 0x1ec   : > { %v11548_v48 = vpop.permute.xlu1 %8385  ;;  %16751 = vst [vmem:[#allocation151_spill] sm:$0xff] %v11564_v26  ;;  %v11590_v62 = vadd.f32 %v11191_v16, %v1703_v58  ;;  %v16762_v58 = vld [vmem:[#allocation71_spill] sm:$0xff]  ;;  %v8142_v26 = vunpack.i.l.bf16 %v11376_v35 }
 0x1ed   : > { %16749 = vst [vmem:[#allocation149_spill] sm:$0xff] %v11548_v48  ;;  %v11551_v40 = vpop.permute.xlu0 %8190  ;;  %16752 = vst [vmem:[#allocation152_spill] sm:$0xff] %v11572_v38  ;;  %v8167_v48 = vunpack.i.l.bf16 %v11479_v0 }
 0x1ee   : > { %16750 = vst [vmem:[#allocation150_spill] sm:$0xff] %v11551_v40  ;;  %8660 = vrot.lane.b32.xlu1 %v8659_v25, %s10114_s29  ;;  %8460 = vrot.lane.b32.xlu0 %v8459_v22, %s10111_s26  ;;  %v16754_v25 = vld [vmem:[#allocation40_spill] sm:$0xff]  ;;  %v3249_v22 = vsel %vm2858_vm3, %v11494_v54, %v16757_v45  ;;  %16758 = vst [vmem:[#allocation154_spill] sm:$0xff] %v11590_v62  ;;  %v8077_v45 = vunpack.i.l.bf16 %v11207_v12  ;;  %v8168_v54 = vunpack.i.h.bf16 %v11479_v0  ;;  %v8072_v12 = vunpack.i.l.bf16 %v11179_v39 }
 0x1ef   : > { %v11610_v21 = vpack.i.bf16 %v3249_v22, %v3247_v13  ;;  %v2551_v0 = vsel %vm2488_vm5, %v16766_v33, %v8078_v47  ;;  %v8143_v13 = vunpack.i.h.bf16 %v11376_v35  ;;  %v11629_v22 = vsel %vm2858_vm3, %v4045_v5, %v11613_v36  ;;  %v16771_v33 = vld [vmem:[#allocation13_spill] sm:$0xff] }
 0x1f0   : > { %v11574_v51 = vpop.permute.xlu1 %8390  ;;  %v8248_v47 = vunpack.i.h.bf16 %v11237_v52  ;;  %v3336_v5 = vsel %vm2488_vm5, %v16768_v60, %v8168_v54 }
 0x1f1   : > { %16753 = vst [vmem:[#allocation153_spill] sm:$0xff] %v11574_v51  ;;  %v11578_v43 = vpop.permute.xlu0 %8200  ;;  %v3280_v60 = vsel %vm2488_vm5, %v16771_v33, %v8143_v13  ;;  %v2372_v13 = vrot.slane %v11572_v38, 3  ;;  %v16773_v33 = vld [vmem:[#allocation10_spill] sm:$0xff] }
 0x1f2   : > { %16755 = vst [vmem:[#allocation40_spill] sm:$0xff] %v11578_v43  ;;  %8685 = vrot.lane.b32.xlu1 %v11349_v6, %s10112_s27  ;;  %v16761_v43 = vld [vmem:[#allocation3_spill] sm:$0xff]  ;;  %8465 = vrot.lane.b32.xlu0 %v8464_v30, %s10113_s28  ;;  %v8138_v30 = vunpack.i.h.bf16 %v11351_v56 }
 0x1f3   : > { %v2489_v51 = vsel %vm2488_vm5, %v16761_v43, %v8067_v29  ;;  %16764 = vst [vmem:[#allocation3_spill] sm:$0xff] %v11613_v36  ;;  %v8073_v29 = vunpack.i.h.bf16 %v11179_v39  ;;  %v16767_v39 = vld [vmem:[#allocation16_spill] sm:$0xff] }
 0x1f4   : > { %v11608_v40 = vpop.permute.xlu1 %8395  ;;  %v2550_v10 = vsel %vm2488_vm5, %v16767_v39, %v8077_v45  ;;  %v2499_v43 = vsel %vm2497_vm6, %v2490_v59, %v8138_v30  ;;  %v8152_v59 = vunpack.i.l.bf16 %v11414_v37  ;;  %v3344_v30 = vsel %vm2497_vm6, %v3336_v5, %v8248_v47 }
 0x1f5   : > { %16763 = vst [vmem:[#allocation4_spill] sm:$0xff] %v11608_v40  ;;  %v11618_v23 = vpop.permute.xlu0 %8205  ;;  %v8137_v40 = vunpack.i.l.bf16 %v11351_v56  ;;  %v8247_v56 = vunpack.i.l.bf16 %v11237_v52  ;;  %v16775_v5 = vunpack.i.l.bf16 %v10983_v14 }
 0x1f6   : > { %16765 = vst [vmem:[#allocation71_spill] sm:$0xff] %v11618_v23  ;;  %8775 = vrot.lane.b32.xlu1 %v11349_v6, %s10115_s30  ;;  %8495 = vrot.lane.b32.xlu0 %v11007_v2, %s10116_s16  ;;  %v16769_v23 = vld [vmem:[#allocation29_spill] sm:$0xff]  ;;  %v11650_v2 = vrot.slane %v11590_v62, 1 }
 0x1f7   : > { %v3335_v45 = vsel %vm2488_vm5, %v16769_v23, %v8167_v48  ;;  %v2498_v52 = vsel %vm2497_vm6, %v2489_v51, %v8137_v40  ;;  %v8153_v48 = vunpack.i.h.bf16 %v11414_v37  ;;  %v2371_v23 = vrot.slane %v11593_v53, 3 }
 0x1f8   : > { %v11644_v39 = vpop.permute.xlu1 %8400  ;;  %16770 = vst [vmem:[#allocation14_spill] sm:$0xff] %v11650_v2  ;;  %v3343_v35 = vsel %vm2497_vm6, %v3335_v45, %v8247_v56  ;;  %v3279_v37 = vsel %vm2488_vm5, %v16773_v33, %v8142_v26  ;;  %v16774_v56 = vunpack.i.h.bf16 %v10983_v14  ;;  %v16779_v33 = vunpack.i.h.bf16 %v11078_v19 }
 0x1f9   : > { %v8211_v24 = vpop.permute.xlu0 %8210  ;;  %v2559_v14 = vsel %vm2497_vm6, %v2551_v0, %v8153_v48  ;;  %v8172_v48 = vunpack.i.l.bf16 %v11496_v28 }
 0x1fa   : > { %v8213_v54 = vunpack.i.h.bf16 %v8211_v24  ;;  %v8212_v4 = vunpack.i.l.bf16 %v8211_v24  ;;  %8785 = vrot.lane.b32.xlu1 %v11542_v31, %s10112_s27  ;;  %8505 = vrot.lane.b32.xlu0 %v11014_v8, %s10112_s27 }
 0x1fc   : > { %v2508_v40 = vsel %vm2506_vm7, %v2499_v43, %v8213_v54  ;;  %v2507_v24 = vsel %vm2506_vm7, %v2498_v52, %v8212_v4  ;;  %v11665_v51 = vpop.permute.xlu1 %8410  ;;  %v11678_v4 = vrot.slane %v11590_v62, 3  ;;  %v16777_v52 = vld [vmem:[#allocation131_spill] sm:$0xff] }
 0x1fd   : > { %16772 = vst [vmem:[#allocation16_spill] sm:$0xff] %v11665_v51  ;;  %v2516_v47 = vsel %vm869_vm0, %v2508_v40, %v16774_v56  ;;  %v2515_v45 = vsel %vm869_vm0, %v2507_v24, %v16775_v5  ;;  %v8216_v43 = vpop.permute.xlu0 %8215  ;;  %v8148_v54 = vunpack.i.h.bf16 %v16777_v52  ;;  %v8147_v11 = vunpack.i.l.bf16 %v16777_v52 }
 0x1fe   : > { %16776 = vst [vmem:[#allocation30_spill] sm:$0xff] %v11678_v4  ;;  %v16778_v51 = vunpack.i.l.bf16 %v11078_v19  ;;  %v3352_v40 = vsel %vm2506_vm7, %v3344_v30, %v16779_v33  ;;  %8795 = vrot.lane.b32.xlu1 %v11555_v20, %s10111_s26  ;;  %v2558_v24 = vsel %vm2497_vm6, %v2550_v10, %v8152_v59  ;;  %8515 = vrot.lane.b32.xlu0 %v11014_v8, %s10115_s30  ;;  %v2025_v56 = vrot.slane %v11593_v53, 1 }
 0x1ff   : > { %v2026_v5 = vrot.slane %v11572_v38, 1  ;;  %v2524_v19 = vsel %vm2523_vm8, %v2515_v45, %v8072_v12  ;;  %v2373_v30 = vsel %vm2311_vm1, %v2371_v23, %v2372_v13  ;;  %v2375_v0 = vsel %vm2311_vm1, %v2372_v13, %v11678_v4  ;;  %v16783_v13 = vld [vmem:[#allocation88_spill] sm:$0xff] }
 0x200   : > { %v3351_v26 = vsel %vm2506_vm7, %v3343_v35, %v16778_v51  ;;  %v11696_v52 = vpop.permute.xlu1 %8420  ;;  %v2525_v35 = vsel %vm2523_vm8, %v2516_v47, %v8073_v29  ;;  %v8173_v10 = vunpack.i.h.bf16 %v11496_v28  ;;  %v16781_v8 = vunpack.i.l.bf16 %v11075_v55 }
 0x201   : > { %16780 = vst [vmem:[#allocation29_spill] sm:$0xff] %v11696_v52  ;;  %v16782_v51 = vunpack.i.h.bf16 %v11075_v55  ;;  %v8226_v12 = vpop.permute.xlu0 %8225  ;;  %v8218_v45 = vunpack.i.h.bf16 %v8216_v43  ;;  %v8217_v29 = vunpack.i.l.bf16 %v8216_v43  ;;  %v2533_v28 = vsel %vm2532_vm9, %v2524_v19, %v8147_v11 }
 0x202   : > { %v3359_v59 = vsel %vm869_vm0, %v3351_v26, %v16781_v8  ;;  %v8228_v47 = vunpack.i.h.bf16 %v8226_v12  ;;  %v8227_v23 = vunpack.i.l.bf16 %v8226_v12  ;;  %8800 = vrot.lane.b32.xlu1 %v11456_v32, %s10113_s28  ;;  %8525 = vrot.lane.b32.xlu0 %v16783_v13, %s10117_s17  ;;  %v2534_v52 = vsel %vm2532_vm9, %v2525_v35, %v8148_v54 }
 0x203   : > { %v3360_v33 = vsel %vm869_vm0, %v3352_v40, %v16782_v51  ;;  %v2027_v26 = vsel %vm1961_vm2, %v2025_v56, %v2026_v5  ;;  %v11718_v55 = vpack.i.bf16 %v2375_v0, %v2373_v30  ;;  %v2029_v51 = vsel %vm1961_vm2, %v2026_v5, %v11650_v2 }
 0x204   : > { %v11720_v40 = vpop.permute.xlu1 %8430  ;;  %v2542_v43 = vsel %vm2541_vm10, %v2533_v28, %v8227_v23  ;;  %v11724_v8 = vsel %vm2541_vm10, %v2534_v52, %v8228_v47  ;;  %v3367_v12 = vsel %vm2523_vm8, %v3359_v59, %v8172_v48  ;;  %v3368_v11 = vsel %vm2523_vm8, %v3360_v33, %v8173_v10 }
 0x205   : > { %16784 = vst [vmem:[#allocation13_spill] sm:$0xff] %v11718_v55  ;;  %16785 = vst [vmem:[#allocation10_spill] sm:$0xff] %v11720_v40  ;;  %v8231_v19 = vpop.permute.xlu0 %8230  ;;  %v2859_v54 = vrot.slane %v2542_v43, 4  ;;  %v16225_v56 = vrot.slane %v11724_v8, 4  ;;  %v3288_v35 = vsel %vm2497_vm6, %v3280_v60, %v8218_v45  ;;  %v3287_v30 = vsel %vm2497_vm6, %v3279_v37, %v8217_v29 }
 0x206   : > { %16786 = vst [vmem:[#allocation131_spill] sm:$0xff] %v11724_v8  ;;  %v8233_v0 = vunpack.i.h.bf16 %v8231_v19  ;;  %v8232_v23 = vunpack.i.l.bf16 %v8231_v19  ;;  %8805 = vrot.lane.b32.xlu1 %v11555_v20, %s10114_s29  ;;  %v8158_v52 = vunpack.i.h.bf16 %v11439_v61  ;;  %v8157_v5 = vunpack.i.l.bf16 %v11439_v61 }
 0x207   : > { %v16787_v10 = vpack.i.bf16 %v16754_v25, %v11271_v57  ;;  %v11744_v60 = vsel %vm2858_vm3, %v2859_v54, %v16225_v56  ;;  %v11746_v37 = vpack.i.bf16 %v2029_v51, %v2027_v26  ;;  %v16791_v61 = vunpack.i.l.bf16 %v11260_v18  ;;  %v16834_v56 = vld [vmem:[#allocation59_spill] sm:$0xff] }
 0x208   : > { %16788 = vst [vmem:[#allocation88_spill] sm:$0xff] %v11744_v60  ;;  %v2567_v48 = vsel %vm2506_vm7, %v2559_v14, %v8233_v0  ;;  %v2566_v59 = vsel %vm2506_vm7, %v2558_v24, %v8232_v23  ;;  %v11750_v33 = vpop.permute.xlu1 %8440  ;;  %v16793_v25 = vunpack.i.h.bf16 %v11260_v18  ;;  %v16794_v47 = vunpack.i.h.bf16 %v16745_v27  ;;  %v16800_v0 = vld [vmem:[#allocation104_spill] sm:$0xff] }
 0x209   : > { %8530 = vrot.lane.b32.xlu0 %v16787_v10, %s10114_s29  ;;  %16789 = vst [vmem:[#allocation156_spill] sm:$0xff] %v11746_v37  ;;  %16790 = vst [vmem:[#allocation157_spill] sm:$0xff] %v11750_v33  ;;  %v11755_v45 = vsel %vm2532_vm9, %v3367_v12, %v16791_v61  ;;  %v16795_v28 = vunpack.i.l.bf16 %v16745_v27  ;;  %v8236_v24 = vpop.permute.xlu0 %8235  ;;  %v16796_v26 = vunpack.i.l.bf16 %v16744_v49  ;;  %v16797_v12 = vunpack.i.h.bf16 %v16744_v49 }
 0x20a   : > { %16792 = vst [vmem:[#allocation158_spill] sm:$0xff] %v11755_v45  ;;  %v3376_v29 = vsel %vm2532_vm9, %v3368_v11, %v16793_v25  ;;  %v3296_v13 = vsel %vm2506_vm7, %v3288_v35, %v16794_v47  ;;  %v8238_v18 = vunpack.i.h.bf16 %v8236_v24  ;;  %v8237_v54 = vunpack.i.l.bf16 %v8236_v24  ;;  %8810 = vrot.lane.b32.xlu1 %v11456_v32, %s10116_s16 }
 0x20b   : > { %v3295_v14 = vsel %vm2506_vm7, %v3287_v30, %v16795_v28  ;;  %v2574_v51 = vsel %vm869_vm0, %v2566_v59, %v16796_v26  ;;  %v2575_v19 = vsel %vm869_vm0, %v2567_v48, %v16797_v12  ;;  %v16798_v11 = vunpack.i.l.bf16 %v11223_v41 }
 0x20c   : > { %v16799_v35 = vunpack.i.h.bf16 %v11223_v41  ;;  %v8088_v23 = vunpack.i.h.bf16 %v16800_v0  ;;  %v8087_v10 = vunpack.i.l.bf16 %v16800_v0  ;;  %v16801_v49 = vpack.i.bf16 %v11278_v50, %v16756_v9  ;;  %v11789_v25 = vpop.permute.xlu1 %8445 }
 0x20d   : > { %v2582_v27 = vsel %vm2523_vm8, %v2574_v51, %v16798_v11  ;;  %v8163_v61 = vunpack.i.h.bf16 %v11469_v44  ;;  %16802 = vst [vmem:[#allocation104_spill] sm:$0xff] %v11789_v25  ;;  %v16805_v28 = vrot.slane %v11289_v17, 4  ;;  %v8241_v26 = vpop.permute.xlu0 %8240  ;;  %v16807_v51 = vunpack.i.h.bf16 %v11092_v1 }
 0x20e   : > { %v2583_v30 = vsel %vm2523_vm8, %v2575_v19, %v16799_v35  ;;  %8535 = vrot.lane.b32.xlu0 %v16801_v49, %s10115_s30  ;;  %v2590_v48 = vsel %vm2532_vm9, %v2582_v27, %v8157_v5  ;;  %v16806_v5 = vunpack.i.l.bf16 %v11092_v1  ;;  %v3303_v19 = vsel %vm869_vm0, %v3295_v14, %v8087_v10  ;;  %8820 = vrot.lane.b32.xlu1 %v11610_v21, %s10113_s28  ;;  %v16811_v10 = vld [vmem:[#allocation28_spill] sm:$0xff]  ;;  %v16812_v49 = vld [vmem:[#allocation114_spill] sm:$0xff] }
 0x20f   : > { %v2591_v59 = vsel %vm2532_vm9, %v2583_v30, %v8158_v52  ;;  %v11792_v41 = vsel %vm2541_vm10, %v2590_v48, %v8237_v54  ;;  %v4049_v24 = vsel %vm2858_vm3, %v11613_v36, %v16805_v28  ;;  %v11808_v12 = vsel %vm2541_vm10, %v3376_v29, %v16807_v51  ;;  %v16813_v28 = vld [vmem:[#allocation76_spill] sm:$0xff]  ;;  %v16818_v51 = vld [vmem:[#allocation33_spill] sm:$0xff] }
 0x210   : > { %16803 = vst [vmem:[#allocation159_spill] sm:$0xff] %v11792_v41  ;;  %v11795_v47 = vsel %vm2541_vm10, %v2591_v59, %v8238_v18  ;;  %v3383_v52 = vsel %vm2541_vm10, %v11755_v45, %v16806_v5  ;;  %16808 = vst [vmem:[#allocation161_spill] sm:$0xff] %v11808_v12  ;;  %v3304_v18 = vsel %vm869_vm0, %v3296_v13, %v8088_v23  ;;  %v8162_v54 = vunpack.i.l.bf16 %v11469_v44  ;;  %v11823_v14 = vpop.permute.xlu1 %8470  ;;  %v16837_v45 = vld [vmem:[#allocation74_spill] sm:$0xff] }
 0x211   : > { %16804 = vst [vmem:[#allocation160_spill] sm:$0xff] %v11795_v47  ;;  %v8243_v11 = vunpack.i.h.bf16 %v8241_v26  ;;  %v8242_v27 = vunpack.i.l.bf16 %v8241_v26  ;;  %v5364_v35 = vpack.c.bf16 %v11795_v47, %v11792_v41  ;;  %v16809_v1 = vpack.i.bf16 %v11326_v46, %v16762_v58  ;;  %16810 = vst [vmem:[#allocation162_spill] sm:$0xff] %v11823_v14  ;;  %v11828_v23 = vpop.permute.xlu0 %8260  ;;  %v16946_v47 = vld [vmem:[#allocation109_spill] sm:$0xff] }
 0x212   : > { %v5363_v29 = vpack.c.bf16 %v11724_v8, %v2542_v43  ;;  %v5368_v13 = vpack.c.bf16 %v11808_v12, %v3383_v52  ;;  %v8829_v44 = vpack.i.bf16 %v4049_v24, %v11629_v22  ;;  %v3311_v30 = vsel %vm2523_vm8, %v3303_v19, %v8162_v54  ;;  %v16819_v19 = vld [vmem:[#allocation125_spill] sm:$0xff] }
 0x213   : > { %8550 = vrot.lane.b32.xlu0 %v16809_v1, %s10117_s17  ;;  %5651 = vmatprep.mubr.bf16.mxu1 %v5364_v35  ;;  %v3312_v0 = vsel %vm2523_vm8, %v3304_v18, %v8163_v61  ;;  %v8554_v48 = vpack.i.bf16 %v16812_v49, %v16811_v10  ;;  %v3319_v59 = vsel %vm2532_vm9, %v3311_v30, %v8242_v27  ;;  %v8018_v26 = vunpack.i.h.bf16 %v16813_v28  ;;  %v16822_v35 = vld [vmem:[#allocation9_spill] sm:$0xff]  ;;  %v16823_v1 = vld [vmem:[#allocation124_spill] sm:$0xff] }
 0x214   : > { %5652 = vmatmul.mubr.bf16.vlgmr.msra.gmra.mrb[0].mxu1 %v5363_v29  ;;  %v3320_v43 = vsel %vm2532_vm9, %v3312_v0, %v8243_v11  ;;  %v8017_v5 = vunpack.i.l.bf16 %v16813_v28  ;;  %8830 = vrot.lane.b32.xlu1 %v8829_v44, %s10117_s17  ;;  %v11838_v22 = vpop.permute.xlu1 %8475  ;;  %v8559_v18 = vpack.i.bf16 %v16819_v19, %v16818_v51  ;;  %v8589_v29 = vpack.i.bf16 %v16823_v1, %v16822_v35  ;;  %v16826_v0 = vld [vmem:[#allocation123_spill] sm:$0xff]  ;;  %v16833_v35 = vld [vmem:[#allocation137_spill] sm:$0xff]  ;;  %v16840_v19 = vld [vmem:[#allocation98_spill] sm:$0xff] }
 0x215   : > { %5659 = vmatprep.mubr.bf16.mxu1 %v5368_v13  ;;  %16814 = vst [vmem:[#allocation76_spill] sm:$0xff] %v11838_v22  ;;  %v11844_v24 = vsel %vm2541_vm10, %v3320_v43, %v8018_v26  ;;  %v11846_v52 = vpop.permute.xlu0 %8270  ;;  %v16829_v43 = vld [vmem:[#allocation78_spill] sm:$0xff]  ;;  %v1659_v36 = vmul.f32 %v11168_v7, %v16837_v45  ;;  %v11911_v49 = vrot.slane %v11194_v15, 2  ;;  %v2162_v60 = vrot.slane %v16840_v19, 2  ;;  %v16841_v45 = vld [vmem:[#allocation77_spill] sm:$0xff] }
 0x216   : > { %v11841_v61 = vsel %vm2541_vm10, %v3319_v59, %v8017_v5  ;;  %16816 = vst [vmem:[#allocation164_spill] sm:$0xff] %v11844_v24  ;;  %16817 = vst [vmem:[#allocation165_spill] sm:$0xff] %v11846_v52  ;;  %v1661_v28 = vmul.f32 %v11168_v7, %v16829_v43  ;;  %v1660_v57 = vmul.f32 %v11168_v7, %v16841_v45  ;;  %v16853_v19 = vld [vmem:[#allocation93_spill] sm:$0xff]  ;;  %v8258_v14 = vunpack.i.h.bf16 %v16946_v47 }
 0x217   : > { %8555 = vrot.lane.b32.xlu0 %v8554_v48, %s10115_s30  ;;  %16815 = vst [vmem:[#allocation163_spill] sm:$0xff] %v11841_v61  ;;  %v5367_v54 = vpack.c.bf16 %v11844_v24, %v11841_v61  ;;  %16839 = vst [vmem:[#allocation173_spill] sm:$0xff] %v11911_v49  ;;  %v11936_v45 = vsel %vm2150_vm4, %v2162_v60, %v11911_v49 }
 0x218   : > { %8840 = vrot.lane.b32.xlu1 %v11262_v63, %s10114_s29  ;;  %v11855_v11 = vpop.permute.xlu1 %8480  ;;  %16847 = vst [vmem:[#allocation178_spill] sm:$0xff] %v11936_v45  ;;  %v11939_v1 = vadd.f32 %v11191_v16, %v1660_v57 }
 0x219   : > { %16820 = vst [vmem:[#allocation33_spill] sm:$0xff] %v11855_v11  ;;  %v11857_v27 = vpop.permute.xlu0 %8275 }
 0x21a   : > { %16821 = vst [vmem:[#allocation166_spill] sm:$0xff] %v11857_v27  ;;  %16848 = vst [vmem:[#allocation179_spill] sm:$0xff] %v11939_v1 }
 0x21b   : > { %8560 = vrot.lane.b32.xlu0 %v8559_v18, %s10117_s17  ;;  %v4861_v18 = vrot.slane %v11445_v34, 4 }
 0x21c   : > { %5660 = vmatmul.mubr.bf16.gmra.mrb[4].mxu1 %v5367_v54  ;;  %8850 = vrot.lane.b32.xlu1 %v11349_v6, %s10111_s26  ;;  %v11864_v13 = vpop.permute.xlu1 %8485  ;;  %v11888_v54 = vrot.slane %v11448_v3, 4 }
 0x21d   : > { %16824 = vst [vmem:[#allocation9_spill] sm:$0xff] %v11864_v13  ;;  %v11866_v30 = vpop.permute.xlu0 %8280  ;;  %v16901_v13 = vld [vmem:[#allocation135_spill] sm:$0xff] }
 0x21e   : > { %16825 = vst [vmem:[#allocation167_spill] sm:$0xff] %v11866_v30  ;;  %16832 = vst [vmem:[#allocation170_spill] sm:$0xff] %v11888_v54  ;;  %v4863_v46 = vsel %vm2858_vm3, %v4861_v18, %v11888_v54  ;;  %v16924_v30 = vld [vmem:[#allocation69_spill] sm:$0xff] }
 0x21f   : > { %8590 = vrot.lane.b32.xlu0 %v8589_v29, %s10114_s29  ;;  %v16237_v29 = vrot.slane %v16833_v35, 4 }
 0x220   : > { %8860 = vrot.lane.b32.xlu1 %v11542_v31, %s10115_s30  ;;  %v11872_v48 = vpop.permute.xlu1 %8490 }
 0x221   : > { %16827 = vst [vmem:[#allocation123_spill] sm:$0xff] %v11872_v48  ;;  %v11874_v59 = vpop.permute.xlu0 %8305  ;;  %v4865_v50 = vsel %vm2858_vm3, %v11888_v54, %v16237_v29  ;;  %v11926_v54 = vadd.f32 %v11191_v16, %v1659_v36 }
 0x222   : > { %16828 = vst [vmem:[#allocation168_spill] sm:$0xff] %v11874_v59  ;;  %v8899_v29 = vpack.i.bf16 %v4865_v50, %v4863_v46  ;;  %v16850_v50 = vld [vmem:[#allocation91_spill] sm:$0xff] }
 0x223   : > { %8610 = vrot.lane.b32.xlu0 %v16826_v0, %s10116_s16  ;;  %16844 = vst [vmem:[#allocation175_spill] sm:$0xff] %v11926_v54  ;;  %v1737_v36 = vmul.f32 %v11168_v7, %v16850_v50  ;;  %v16856_v50 = vld [vmem:[#allocation96_spill] sm:$0xff] }
 0x224   : > { %8870 = vrot.lane.b32.xlu1 %v11456_v32, %s10112_s27  ;;  %v11882_v26 = vpop.permute.xlu1 %8500 }
 0x225   : > { %16830 = vst [vmem:[#allocation78_spill] sm:$0xff] %v11882_v26  ;;  %v11884_v5 = vpop.permute.xlu0 %8310 }
 0x226   : > { %16831 = vst [vmem:[#allocation169_spill] sm:$0xff] %v11884_v5 }
 0x227   : > { %8620 = vrot.lane.b32.xlu0 %v16826_v0, %s10112_s27  ;;  %v11896_v0 = vadd.f32 %v11191_v16, %v1661_v28  ;;  %v2161_v28 = vrot.slane %v11202_v42, 2 }
 0x228   : > { %8880 = vrot.lane.b32.xlu1 %v11610_v21, %s10116_s16  ;;  %v11898_v43 = vpop.permute.xlu1 %8510 }
 0x229   : > { %16835 = vst [vmem:[#allocation171_spill] sm:$0xff] %v11896_v0  ;;  %16836 = vst [vmem:[#allocation172_spill] sm:$0xff] %v11898_v43  ;;  %v11902_v12 = vpop.permute.xlu0 %8320  ;;  %v11921_v18 = vrot.slane %v11896_v0, 1  ;;  %v11932_v15 = vsel %vm2150_vm4, %v2161_v28, %v2162_v60  ;;  %v11944_v46 = vrot.slane %v11896_v0, 3  ;;  %v16852_v28 = vld [vmem:[#allocation132_spill] sm:$0xff]  ;;  %v1738_v60 = vmul.f32 %v11168_v7, %v16853_v19  ;;  %v16858_v19 = vld [vmem:[#allocation99_spill] sm:$0xff] }
 0x22a   : > { %16838 = vst [vmem:[#allocation74_spill] sm:$0xff] %v11902_v12  ;;  %16846 = vst [vmem:[#allocation177_spill] sm:$0xff] %v11932_v15  ;;  %v11958_v57 = vpack.i.bf16 %v11936_v45, %v11932_v15  ;;  %v2327_v15 = vrot.slane %v11926_v54, 3  ;;  %v2328_v45 = vrot.slane %v11939_v1, 3  ;;  %v11974_v12 = vadd.f32 %v11191_v16, %v1737_v36 }
 0x22b   : > { %8625 = vrot.lane.b32.xlu0 %v16834_v56, %s10112_s27  ;;  %16842 = vst [vmem:[#allocation77_spill] sm:$0xff] %v11921_v18  ;;  %16849 = vst [vmem:[#allocation180_spill] sm:$0xff] %v11944_v46  ;;  %v8909_v42 = vpack.i.bf16 %v11921_v18, %v16852_v28 }
 0x22c   : > { %8890 = vrot.lane.b32.xlu1 %v8829_v44, %s10113_s28  ;;  %v11923_v8 = vpop.permute.xlu1 %8520  ;;  %16855 = vst [vmem:[#allocation181_spill] sm:$0xff] %v11958_v57  ;;  %16859 = vst [vmem:[#allocation182_spill] sm:$0xff] %v11974_v12 }
 0x22d   : > { %16843 = vst [vmem:[#allocation174_spill] sm:$0xff] %v11923_v8  ;;  %v11928_v44 = vpop.permute.xlu0 %8330  ;;  %v1978_v8 = vrot.slane %v11939_v1, 1 }
 0x22e   : > { %16845 = vst [vmem:[#allocation176_spill] sm:$0xff] %v11928_v44  ;;  %v1977_v44 = vrot.slane %v11926_v54, 1 }
 0x22f   : > { %8630 = vrot.lane.b32.xlu0 %v11262_v63, %s10112_s27 }
 0x230   : > { %8900 = vrot.lane.b32.xlu1 %v8899_v29, %s10117_s17  ;;  %v11948_v29 = vpop.permute.xlu1 %8540 }
 0x231   : > { %16851 = vst [vmem:[#allocation91_spill] sm:$0xff] %v11948_v29  ;;  %v11954_v49 = vpop.permute.xlu0 %8345  ;;  %v1739_v29 = vmul.f32 %v11168_v7, %v16856_v50  ;;  %v1979_v7 = vsel %vm1961_vm2, %v1977_v44, %v1978_v8  ;;  %v1981_v50 = vsel %vm1961_vm2, %v1978_v8, %v11921_v18  ;;  %v2331_v44 = vsel %vm2311_vm1, %v2328_v45, %v11944_v46 }
 0x232   : > { %16854 = vst [vmem:[#allocation93_spill] sm:$0xff] %v11954_v49  ;;  %v8914_v49 = vpack.i.bf16 %v11944_v46, %v16858_v19  ;;  %v2073_v8 = vrot.slane %v11974_v12, 1  ;;  %v12008_v18 = vrot.slane %v11289_v17, 2 }
 0x233   : > { %8635 = vrot.lane.b32.xlu0 %v16834_v56, %s10115_s30  ;;  %v11986_v19 = vadd.f32 %v11191_v16, %v1739_v29  ;;  %v16943_v56 = vld [vmem:[#allocation18_spill] sm:$0xff] }
 0x234   : > { %8910 = vrot.lane.b32.xlu1 %v8909_v42, %s10112_s27  ;;  %v11967_v28 = vpop.permute.xlu1 %8545  ;;  %v11977_v42 = vadd.f32 %v11191_v16, %v1738_v60  ;;  %v2329_v60 = vsel %vm2311_vm1, %v2327_v15, %v2328_v45  ;;  %v2415_v16 = vrot.slane %v11974_v12, 3  ;;  %16868 = vst [vmem:[#allocation189_spill] sm:$0xff] %v12008_v18  ;;  %v12011_v45 = vrot.slane %v11896_v0, 2 }
 0x235   : > { %16857 = vst [vmem:[#allocation96_spill] sm:$0xff] %v11967_v28  ;;  %v11979_v5 = vpop.permute.xlu0 %8350  ;;  %16862 = vst [vmem:[#allocation185_spill] sm:$0xff] %v11986_v19  ;;  %v11992_v28 = vpack.i.bf16 %v1981_v50, %v1979_v7  ;;  %v16867_v50 = vld [vmem:[#allocation113_spill] sm:$0xff]  ;;  %v12016_v46 = vrot.slane %v11986_v19, 1 }
 0x236   : > { %16860 = vst [vmem:[#allocation183_spill] sm:$0xff] %v11977_v42  ;;  %16861 = vst [vmem:[#allocation184_spill] sm:$0xff] %v11979_v5  ;;  %v2416_v29 = vrot.slane %v11977_v42, 3  ;;  %v2190_v15 = vrot.slane %v16867_v50, 2  ;;  %v2166_v50 = vrot.slane %v11926_v54, 2 }
 0x237   : > { %8640 = vrot.lane.b32.xlu0 %v11958_v57, %s10117_s17  ;;  %16864 = vst [vmem:[#allocation187_spill] sm:$0xff] %v11992_v28  ;;  %16869 = vst [vmem:[#allocation190_spill] sm:$0xff] %v12011_v45  ;;  %v2167_v57 = vrot.slane %v11939_v1, 2 }
 0x238   : > { %8915 = vrot.lane.b32.xlu1 %v8914_v49, %s10112_s27  ;;  %v11990_v36 = vpop.permute.xlu1 %8565  ;;  %v2074_v49 = vrot.slane %v11977_v42, 1  ;;  %16870 = vst [vmem:[#allocation191_spill] sm:$0xff] %v12016_v46  ;;  %v2417_v59 = vsel %vm2311_vm1, %v2415_v16, %v2416_v29 }
 0x239   : > { %16863 = vst [vmem:[#allocation186_spill] sm:$0xff] %v11990_v36  ;;  %v11997_v5 = vpop.permute.xlu0 %8355  ;;  %v12019_v36 = vrot.slane %v11986_v19, 3 }
 0x23a   : > { %16865 = vst [vmem:[#allocation188_spill] sm:$0xff] %v11997_v5  ;;  %v2075_v43 = vsel %vm1961_vm2, %v2073_v8, %v2074_v49  ;;  %v16877_v8 = vld [vmem:[#allocation140_spill] sm:$0xff] }
 0x23b   : > { %8645 = vrot.lane.b32.xlu0 %v11262_v63, %s10115_s30  ;;  %v16866_v63 = vld [vmem:[#allocation111_spill] sm:$0xff]  ;;  %16871 = vst [vmem:[#allocation192_spill] sm:$0xff] %v12019_v36  ;;  %v2419_v48 = vsel %vm2311_vm1, %v2416_v29, %v12019_v36 }
 0x23c   : > { %8920 = vrot.lane.b32.xlu1 %v11992_v28, %s10112_s27  ;;  %v2189_v7 = vrot.slane %v16866_v63, 2  ;;  %v12021_v5 = vpop.permute.xlu1 %8570  ;;  %v12023_v63 = vpack.i.bf16 %v2331_v44, %v2329_v60  ;;  %v12042_v44 = vsel %vm2150_vm4, %v2190_v15, %v12008_v18 }
 0x23d   : > { %16872 = vst [vmem:[#allocation193_spill] sm:$0xff] %v12021_v5  ;;  %v12027_v26 = vpop.permute.xlu0 %8360  ;;  %16876 = vst [vmem:[#allocation197_spill] sm:$0xff] %v12042_v44  ;;  %v17130_v40 = vld [vmem:[#allocation184_spill] sm:$0xff] }
 0x23e   : > { %16873 = vst [vmem:[#allocation194_spill] sm:$0xff] %v12023_v63  ;;  %16874 = vst [vmem:[#allocation195_spill] sm:$0xff] %v12027_v26  ;;  %v12038_v60 = vsel %vm2150_vm4, %v2189_v7, %v2190_v15  ;;  %v12059_v7 = vsel %vm2150_vm4, %v2166_v50, %v2167_v57  ;;  %v12063_v15 = vsel %vm2150_vm4, %v2167_v57, %v12011_v45  ;;  %v16889_v45 = vld [vmem:[#allocation103_spill] sm:$0xff] }
 0x23f   : > { %8650 = vrot.lane.b32.xlu0 %v11610_v21, %s10117_s17  ;;  %v2077_v21 = vsel %vm1961_vm2, %v2074_v49, %v12016_v46  ;;  %16875 = vst [vmem:[#allocation196_spill] sm:$0xff] %v12038_v60  ;;  %v12048_v49 = vpack.i.bf16 %v2419_v48, %v2417_v59  ;;  %16883 = vst [vmem:[#allocation203_spill] sm:$0xff] %v12059_v7  ;;  %v10101_v48 = vld [vmem:[%s16022_s3] ss:$0 sm:$0xff]  ;;  %v16885_v59 = vld [vmem:[#allocation101_spill] sm:$0xff]  ;;  %v12078_v57 = vpack.i.bf16 %v12063_v15, %v12059_v7 }
 0x240   : > { %8925 = vrot.lane.b32.xlu1 %v12023_v63, %s10112_s27  ;;  %v12046_v26 = vpop.permute.xlu1 %8575  ;;  %v12050_v16 = vpack.i.bf16 %v2077_v21, %v2075_v43  ;;  %v12056_v63 = vpack.i.bf16 %v12042_v44, %v12038_v60  ;;  %16884 = vst [vmem:[#allocation204_spill] sm:$0xff] %v12063_v15  ;;  %v1774_v43 = vmul.f32 %v10101_v48, %v16885_v59  ;;  %v16886_v21 = vld [vmem:[#allocation151_spill] sm:$0xff]  ;;  %v10102_v59 = vld [vmem:[%s16023_s4] ss:$0 sm:$0xff] }
 0x241   : > { %16878 = vst [vmem:[#allocation198_spill] sm:$0xff] %v12046_v26  ;;  %16879 = vst [vmem:[#allocation199_spill] sm:$0xff] %v12048_v49  ;;  %v12052_v29 = vpop.permute.xlu0 %8365  ;;  %v1773_v44 = vmul.f32 %v10101_v48, %v16886_v21  ;;  %v1775_v60 = vmul.f32 %v10101_v48, %v16889_v45  ;;  %v8939_v45 = vpack.i.bf16 %v11590_v62, %v11289_v17 }
 0x242   : > { %16880 = vst [vmem:[#allocation200_spill] sm:$0xff] %v12050_v16  ;;  %16881 = vst [vmem:[#allocation201_spill] sm:$0xff] %v12052_v29  ;;  %v12088_v29 = vadd.f32 %v10102_v59, %v1774_v43 }
 0x243   : > { %8665 = vrot.lane.b32.xlu0 %v16877_v8, %s10116_s16  ;;  %16882 = vst [vmem:[#allocation202_spill] sm:$0xff] %v12056_v63  ;;  %16888 = vst [vmem:[#allocation151_spill] sm:$0xff] %v12078_v57  ;;  %v12092_v21 = vadd.f32 %v10102_v59, %v1773_v44  ;;  %v12098_v48 = vadd.f32 %v10102_v59, %v1775_v60  ;;  %v8944_v60 = vpack.i.bf16 %v11572_v38, %v11593_v53 }
 0x244   : > { %8930 = vrot.lane.b32.xlu1 %v11992_v28, %s10115_s30  ;;  %v12074_v50 = vpop.permute.xlu1 %8580  ;;  %16891 = vst [vmem:[#allocation205_spill] sm:$0xff] %v12088_v29 }
 0x245   : > { %16887 = vst [vmem:[#allocation101_spill] sm:$0xff] %v12074_v50  ;;  %v12081_v28 = vpop.permute.xlu0 %8370  ;;  %16892 = vst [vmem:[#allocation206_spill] sm:$0xff] %v12092_v21  ;;  %v2121_v43 = vrot.slane %v12092_v21, 1  ;;  %v2459_v44 = vrot.slane %v12092_v21, 3  ;;  %v12118_v17 = vrot.slane %v12098_v48, 1 }
 0x246   : > { %16890 = vst [vmem:[#allocation103_spill] sm:$0xff] %v12081_v28  ;;  %16894 = vst [vmem:[#allocation208_spill] sm:$0xff] %v12098_v48 }
 0x247   : > { %8670 = vrot.lane.b32.xlu0 %v12056_v63, %s10114_s29  ;;  %16898 = vst [vmem:[#allocation212_spill] sm:$0xff] %v12118_v17 }
 0x248   : > { %8935 = vrot.lane.b32.xlu1 %v12078_v57, %s10117_s17  ;;  %v12094_v7 = vpop.permute.xlu1 %8585  ;;  %v2460_v57 = vrot.slane %v12088_v29, 3 }
 0x249   : > { %16893 = vst [vmem:[#allocation207_spill] sm:$0xff] %v12094_v7  ;;  %v12100_v15 = vpop.permute.xlu0 %8405  ;;  %v2233_v7 = vrot.slane %v11445_v34, 2 }
 0x24a   : > { %16895 = vst [vmem:[#allocation209_spill] sm:$0xff] %v12100_v15  ;;  %v12121_v15 = vrot.slane %v12098_v48, 3  ;;  %v2461_v5 = vsel %vm2311_vm1, %v2459_v44, %v2460_v57 }
 0x24b   : > { %8675 = vrot.lane.b32.xlu0 %v11349_v6, %s10116_s16  ;;  %v2122_v6 = vrot.slane %v12088_v29, 1 }
 0x24c   : > { %8940 = vrot.lane.b32.xlu1 %v8939_v45, %s10114_s29  ;;  %v12109_v28 = vpop.permute.xlu1 %8595  ;;  %v8689_v45 = vpack.i.bf16 %v11448_v3, %v11445_v34  ;;  %16899 = vst [vmem:[#allocation213_spill] sm:$0xff] %v12121_v15  ;;  %v2463_v26 = vsel %vm2311_vm1, %v2460_v57, %v12121_v15  ;;  %v12138_v34 = vrot.slane %v11590_v62, 2 }
 0x24d   : > { %16896 = vst [vmem:[#allocation210_spill] sm:$0xff] %v12109_v28  ;;  %v12113_v59 = vpop.permute.xlu0 %8415  ;;  %v2234_v28 = vrot.slane %v11448_v3, 2  ;;  %v2123_v50 = vsel %vm1961_vm2, %v2121_v43, %v2122_v6 }
 0x24e   : > { %16897 = vst [vmem:[#allocation211_spill] sm:$0xff] %v12113_v59  ;;  %v2125_v59 = vsel %vm1961_vm2, %v2122_v6, %v12118_v17  ;;  %16902 = vst [vmem:[#allocation215_spill] sm:$0xff] %v12138_v34  ;;  %v12146_v6 = vpack.i.bf16 %v2463_v26, %v2461_v5  ;;  %v16911_v5 = vld [vmem:[#allocation118_spill] sm:$0xff] }
 0x24f   : > { %8680 = vrot.lane.b32.xlu0 %v16877_v8, %s10112_s27  ;;  %v12144_v43 = vsel %vm2150_vm4, %v2233_v7, %v2234_v28  ;;  %v12148_v44 = vpack.i.bf16 %v2125_v59, %v2123_v50  ;;  %v8959_v7 = vpack.i.bf16 %v11678_v4, %v16911_v5  ;;  %v12166_v50 = vrot.slane %v16833_v35, 2  ;;  %v16918_v5 = vld [vmem:[#allocation100_spill] sm:$0xff] }
 0x250   : > { %8945 = vrot.lane.b32.xlu1 %v8944_v60, %s10114_s29  ;;  %v12133_v63 = vpop.permute.xlu1 %8600  ;;  %v8949_v60 = vpack.i.bf16 %v11650_v2, %v16901_v13  ;;  %16904 = vst [vmem:[#allocation217_spill] sm:$0xff] %v12144_v43  ;;  %16905 = vst [vmem:[#allocation218_spill] sm:$0xff] %v12146_v6  ;;  %v8954_v2 = vpack.i.bf16 %v12138_v34, %v12008_v18  ;;  %v16914_v18 = vld [vmem:[#allocation72_spill] sm:$0xff]  ;;  %v8223_v8 = vunpack.i.h.bf16 %v16918_v5 }
 0x251   : > { %16900 = vst [vmem:[#allocation214_spill] sm:$0xff] %v12133_v63  ;;  %v12140_v3 = vpop.permute.xlu0 %8425  ;;  %16906 = vst [vmem:[#allocation219_spill] sm:$0xff] %v12148_v44  ;;  %v16909_v63 = vld [vmem:[#allocation32_spill] sm:$0xff]  ;;  %v12181_v4 = vsel %vm2150_vm4, %v2234_v28, %v12166_v50 }
 0x252   : > { %16903 = vst [vmem:[#allocation216_spill] sm:$0xff] %v12140_v3  ;;  %v8699_v3 = vpack.i.bf16 %v16909_v63, %v12144_v43  ;;  %16912 = vst [vmem:[#allocation222_spill] sm:$0xff] %v12166_v50  ;;  %v4079_v28 = vsel %vm2488_vm5, %v16943_v56, %v8223_v8  ;;  %v16947_v8 = vld [vmem:[#allocation115_spill] sm:$0xff] }
 0x253   : > { %8690 = vrot.lane.b32.xlu0 %v8689_v45, %s10111_s26  ;;  %16917 = vst [vmem:[#allocation224_spill] sm:$0xff] %v12181_v4  ;;  %v8268_v22 = vunpack.i.h.bf16 %v16947_v8 }
 0x254   : > { %8950 = vrot.lane.b32.xlu1 %v8949_v60, %s10116_s16  ;;  %v12151_v57 = vpop.permute.xlu1 %8605  ;;  %v2195_v60 = vrot.slane %v11572_v38, 2 }
 0x255   : > { %16907 = vst [vmem:[#allocation220_spill] sm:$0xff] %v12151_v57  ;;  %v12155_v13 = vpop.permute.xlu0 %8435 }
 0x256   : > { %16908 = vst [vmem:[#allocation221_spill] sm:$0xff] %v12155_v13  ;;  %v16915_v13 = vld [vmem:[#allocation142_spill] sm:$0xff] }
 0x257   : > { %8695 = vrot.lane.b32.xlu0 %v8689_v45, %s10114_s29  ;;  %v2194_v45 = vrot.slane %v11593_v53, 2 }
 0x258   : > { %8955 = vrot.lane.b32.xlu1 %v8954_v2, %s10114_s29  ;;  %v12161_v26 = vpop.permute.xlu1 %8615  ;;  %v8053_v2 = vunpack.i.h.bf16 %v16914_v18 }
 0x259   : > { %16910 = vst [vmem:[#allocation32_spill] sm:$0xff] %v12161_v26  ;;  %v12168_v59 = vpop.permute.xlu0 %8450  ;;  %v12191_v6 = vsel %vm2150_vm4, %v2194_v45, %v2195_v60  ;;  %v16926_v45 = vld [vmem:[#allocation31_spill] sm:$0xff] }
 0x25a   : > { %16913 = vst [vmem:[#allocation223_spill] sm:$0xff] %v12168_v59  ;;  %v8222_v59 = vunpack.i.l.bf16 %v16918_v5  ;;  %16921 = vst [vmem:[#allocation226_spill] sm:$0xff] %v12191_v6  ;;  %v16938_v5 = vld [vmem:[#allocation92_spill] sm:$0xff] }
 0x25b   : > { %8700 = vrot.lane.b32.xlu0 %v8699_v3, %s10114_s29  ;;  %v8052_v3 = vunpack.i.l.bf16 %v16914_v18  ;;  %v12195_v18 = vsel %vm2150_vm4, %v2195_v60, %v12138_v34  ;;  %v16927_v60 = vld [vmem:[#allocation75_spill] sm:$0xff]  ;;  %v16934_v34 = vld [vmem:[#allocation80_spill] sm:$0xff]  ;;  %v8188_v61 = vunpack.i.h.bf16 %v16938_v5 }
 0x25c   : > { %8960 = vrot.lane.b32.xlu1 %v8959_v7, %s10116_s16  ;;  %v12177_v26 = vpop.permute.xlu1 %8655  ;;  %v12188_v7 = vpack.i.bf16 %v12181_v4, %v12144_v43  ;;  %16922 = vst [vmem:[#allocation227_spill] sm:$0xff] %v12195_v18  ;;  %v16925_v43 = vld [vmem:[#allocation27_spill] sm:$0xff]  ;;  %v12218_v29 = vpack.i.bf16 %v12195_v18, %v12191_v6 }
 0x25d   : > { %16916 = vst [vmem:[#allocation72_spill] sm:$0xff] %v12177_v26  ;;  %v12184_v57 = vpop.permute.xlu0 %8455  ;;  %v16923_v26 = vld [vmem:[#allocation66_spill] sm:$0xff]  ;;  %v12205_v21 = vsel %vm2488_vm5, %v16925_v43, %v8053_v2  ;;  %v4952_v27 = vsel %vm2488_vm5, %v16926_v45, %v8052_v3  ;;  %v16931_v2 = vld [vmem:[#allocation83_spill] sm:$0xff]  ;;  %v16936_v43 = vld [vmem:[#allocation81_spill] sm:$0xff] }
 0x25e   : > { %16919 = vst [vmem:[#allocation100_spill] sm:$0xff] %v12184_v57  ;;  %16920 = vst [vmem:[#allocation225_spill] sm:$0xff] %v12188_v7  ;;  %v8033_v44 = vunpack.i.h.bf16 %v16923_v26  ;;  %v16928_v26 = vld [vmem:[#allocation79_spill] sm:$0xff]  ;;  %v8118_v57 = vunpack.i.h.bf16 %v16931_v2  ;;  %v8037_v18 = vunpack.i.l.bf16 %v16936_v43 }
 0x25f   : > { %8705 = vrot.lane.b32.xlu0 %v16915_v13, %s10113_s28  ;;  %v8098_v11 = vunpack.i.h.bf16 %v16928_v26  ;;  %16930 = vst [vmem:[#allocation31_spill] sm:$0xff] %v12218_v29  ;;  %v16932_v3 = vld [vmem:[#allocation47_spill] sm:$0xff]  ;;  %v16944_v26 = vld [vmem:[#allocation105_spill] sm:$0xff] }
 0x260   : > { %8965 = vrot.lane.b32.xlu1 %v11746_v37, %s10116_s16  ;;  %v12214_v24 = vpop.permute.xlu1 %8660  ;;  %v4136_v45 = vsel %vm2488_vm5, %v16932_v3, %v8222_v59  ;;  %v16940_v6 = vld [vmem:[#allocation87_spill] sm:$0xff]  ;;  %v8102_v33 = vunpack.i.l.bf16 %v16944_v26  ;;  %v12357_v3 = vrot.slane %v12098_v48, 2 }
 0x261   : > { %16929 = vst [vmem:[#allocation27_spill] sm:$0xff] %v12214_v24  ;;  %v12230_v24 = vrot.slane %v11939_v1, 4  ;;  %v4144_v1 = vsel %vm2497_vm6, %v4136_v45, %v8033_v44  ;;  %v16945_v44 = vld [vmem:[#allocation90_spill] sm:$0xff] }
 0x262   : > { %v4152_v45 = vsel %vm2506_vm7, %v4144_v1, %v8098_v11  ;;  %v16951_v1 = vld [vmem:[#allocation38_spill] sm:$0xff]  ;;  %16975 = vst [vmem:[#allocation229_spill] sm:$0xff] %v12357_v3 }
 0x263   : > { %8710 = vrot.lane.b32.xlu0 %v12188_v7, %s10111_s26  ;;  %v12224_v7 = vpop.permute.xlu0 %8460  ;;  %16935 = vst [vmem:[#allocation83_spill] sm:$0xff] %v12230_v24 }
 0x264   : > { %16933 = vst [vmem:[#allocation75_spill] sm:$0xff] %v12224_v7  ;;  %8970 = vrot.lane.b32.xlu1 %v12218_v29, %s10114_s29  ;;  %v12243_v7 = vpop.permute.xlu1 %8685  ;;  %v4960_v29 = vsel %vm2497_vm6, %v4952_v27, %v8118_v57  ;;  %v8178_v27 = vunpack.i.h.bf16 %v16945_v44  ;;  %v4087_v57 = vsel %vm2497_vm6, %v4079_v28, %v8037_v18  ;;  %v8724_v44 = vpack.i.bf16 %v12181_v4, %v16951_v1 }
 0x265   : > { %16939 = vst [vmem:[#allocation47_spill] sm:$0xff] %v12243_v7  ;;  %v4968_v56 = vsel %vm2506_vm7, %v4960_v29, %v8188_v61  ;;  %v16949_v7 = vld [vmem:[#allocation95_spill] sm:$0xff]  ;;  %v12277_v41 = vsel %vm2506_vm7, %v4087_v57, %v8102_v33  ;;  %v16952_v29 = vld [vmem:[#allocation116_spill] sm:$0xff]  ;;  %v8994_v33 = vpack.i.bf16 %v11986_v19, %v16833_v35 }
 0x266   : > { %v4160_v61 = vsel %vm869_vm0, %v4152_v45, %v8178_v27  ;;  %v12292_v27 = vsel %vm869_vm0, %v4968_v56, %v8268_v22  ;;  %v16973_v35 = vld [vmem:[#allocation71_spill] sm:$0xff]  ;;  %v16987_v56 = vld [vmem:[#allocation150_spill] sm:$0xff] }
 0x267   : > { %8715 = vrot.lane.b32.xlu0 %v11542_v31, %s10113_s28  ;;  %v12248_v59 = vpop.permute.xlu0 %8465  ;;  %v12286_v28 = vsel %vm2523_vm8, %v4160_v61, %v8258_v14  ;;  %v16956_v14 = vld [vmem:[#allocation127_spill] sm:$0xff]  ;;  %v8192_v25 = vunpack.i.l.bf16 %v16987_v56 }
 0x268   : > { %16941 = vst [vmem:[#allocation81_spill] sm:$0xff] %v12248_v59  ;;  %8975 = vrot.lane.b32.xlu1 %v11718_v55, %s10116_s16  ;;  %v12266_v59 = vpop.permute.xlu1 %8775  ;;  %v8984_v55 = vpack.i.bf16 %v11977_v42, %v11974_v12  ;;  %v2116_v61 = vrot.slane %v16956_v14, 1 }
 0x269   : > { %16948 = vst [vmem:[#allocation92_spill] sm:$0xff] %v12266_v59  ;;  %v8122_v59 = vunpack.i.l.bf16 %v16952_v29 }
 0x26b   : > { %8720 = vrot.lane.b32.xlu0 %v16915_v13, %s10116_s16  ;;  %v12271_v11 = vpop.permute.xlu0 %8495  ;;  %v16957_v13 = vld [vmem:[#allocation128_spill] sm:$0xff]  ;;  %v12308_v22 = vsel %vm2497_vm6, %v12205_v21, %v8122_v59 }
 0x26c   : > { %16950 = vst [vmem:[#allocation87_spill] sm:$0xff] %v12271_v11  ;;  %8980 = vrot.lane.b32.xlu1 %v11746_v37, %s10112_s27  ;;  %v12295_v45 = vpop.permute.xlu1 %8785  ;;  %v2117_v1 = vrot.slane %v16957_v13, 1  ;;  %v16958_v37 = vld [vmem:[#allocation129_spill] sm:$0xff]  ;;  %v8734_v29 = vpack.i.bf16 %v16957_v13, %v16956_v14  ;;  %v16971_v14 = vld [vmem:[#allocation138_spill] sm:$0xff] }
 0x26d   : > { %16954 = vst [vmem:[#allocation18_spill] sm:$0xff] %v12295_v45  ;;  %v8338_v59 = vunpack.i.h.bf16 %v16971_v14  ;;  %v8337_v47 = vunpack.i.l.bf16 %v16971_v14  ;;  %v16990_v14 = vunpack.i.l.bf16 %v16931_v2  ;;  %v16996_v2 = vunpack.i.h.bf16 %v16924_v30  ;;  %v17016_v30 = vld [vmem:[#allocation15_spill] sm:$0xff] }
 0x26e   : > { %v2118_v11 = vsel %vm1961_vm2, %v2116_v61, %v2117_v1  ;;  %v16970_v61 = vld [vmem:[#allocation139_spill] sm:$0xff] }
 0x26f   : > { %8725 = vrot.lane.b32.xlu0 %v8724_v44, %s10114_s29  ;;  %v12299_v18 = vpop.permute.xlu0 %8505  ;;  %v12304_v44 = vrot.slane %v16958_v37, 1  ;;  %v8999_v13 = vpack.i.bf16 %v12016_v46, %v16970_v61 }
 0x270   : > { %16955 = vst [vmem:[#allocation105_spill] sm:$0xff] %v12299_v18  ;;  %8985 = vrot.lane.b32.xlu1 %v8984_v55, %s10111_s26  ;;  %v12323_v45 = vpop.permute.xlu1 %8795 }
 0x271   : > { %16959 = vst [vmem:[#allocation115_spill] sm:$0xff] %v12304_v44  ;;  %16965 = vst [vmem:[#allocation95_spill] sm:$0xff] %v12323_v45  ;;  %v2120_v49 = vsel %vm1961_vm2, %v2117_v1, %v12304_v44  ;;  %v16976_v1 = vld [vmem:[#allocation144_spill] sm:$0xff] }
 0x272   : > { %v9009_v46 = vpack.i.bf16 %v12019_v36, %v16976_v1  ;;  %v16983_v1 = vld [vmem:[#allocation141_spill] sm:$0xff] }
 0x273   : > { %8730 = vrot.lane.b32.xlu0 %v11542_v31, %s10116_s16  ;;  %v12325_v57 = vpop.permute.xlu0 %8515  ;;  %v12333_v31 = vrot.slane %v11986_v19, 2  ;;  %v8208_v19 = vunpack.i.h.bf16 %v16973_v35 }
 0x274   : > { %16966 = vst [vmem:[#allocation38_spill] sm:$0xff] %v12325_v57  ;;  %8990 = vrot.lane.b32.xlu1 %v8984_v55, %s10114_s29  ;;  %v12347_v18 = vpop.permute.xlu1 %8800  ;;  %v12349_v55 = vpack.i.bf16 %v2120_v49, %v2118_v11  ;;  %v16977_v49 = vld [vmem:[#allocation147_spill] sm:$0xff] }
 0x275   : > { %16967 = vst [vmem:[#allocation228_spill] sm:$0xff] %v12333_v31  ;;  %16972 = vst [vmem:[#allocation138_spill] sm:$0xff] %v12347_v18  ;;  %v9004_v57 = vpack.i.bf16 %v12333_v31, %v12166_v50  ;;  %v8383_v11 = vunpack.i.h.bf16 %v16977_v49  ;;  %v8382_v61 = vunpack.i.l.bf16 %v16977_v49  ;;  %v16980_v18 = vld [vmem:[#allocation117_spill] sm:$0xff]  ;;  %v4951_v48 = vsel %vm2488_vm5, %v16909_v63, %v8208_v19  ;;  %v16989_v19 = vld [vmem:[#allocation43_spill] sm:$0xff] }
 0x276   : > { %v12373_v45 = vsel %vm2488_vm5, %v16980_v18, %v8337_v47  ;;  %v16986_v18 = vld [vmem:[#allocation143_spill] sm:$0xff]  ;;  %v4959_v47 = vsel %vm2497_vm6, %v4951_v48, %v16990_v14  ;;  %v4176_v48 = vsel %vm2532_vm9, %v12286_v28, %v16996_v2  ;;  %v12429_v14 = vsel %vm2506_vm7, %v12308_v22, %v8192_v25 }
 0x277   : > { %8735 = vrot.lane.b32.xlu0 %v8734_v29, %s10115_s30  ;;  %v12352_v4 = vpop.permute.xlu0 %8525  ;;  %v12399_v63 = vsel %vm2488_vm5, %v16989_v19, %v8382_v61  ;;  %v16999_v28 = vunpack.i.h.bf16 %v16940_v6  ;;  %v2238_v19 = vrot.slane %v11974_v12, 2  ;;  %v12461_v22 = vpack.i.bf16 %v16756_v9, %v16811_v10  ;;  %v17031_v10 = vld [vmem:[#allocation8_spill] sm:$0xff] }
 0x278   : > { %16974 = vst [vmem:[#allocation71_spill] sm:$0xff] %v12352_v4  ;;  %8995 = vrot.lane.b32.xlu1 %v8994_v33, %s10111_s26  ;;  %v16978_v4 = vld [vmem:[#allocation107_spill] sm:$0xff]  ;;  %v16981_v33 = vld [vmem:[#allocation70_spill] sm:$0xff]  ;;  %v12376_v36 = vpop.permute.xlu1 %8805 }
 0x279   : > { %v12369_v50 = vsel %vm2488_vm5, %v16978_v4, %v8338_v59  ;;  %v8182_v21 = vunpack.i.l.bf16 %v16981_v33  ;;  %16982 = vst [vmem:[#allocation107_spill] sm:$0xff] %v12376_v36  ;;  %v16985_v59 = vld [vmem:[#allocation146_spill] sm:$0xff]  ;;  %v16988_v36 = vld [vmem:[#allocation44_spill] sm:$0xff] }
 0x27a   : > { %16979 = vst [vmem:[#allocation147_spill] sm:$0xff] %v12369_v50  ;;  %v12395_v49 = vsel %vm2488_vm5, %v16988_v36, %v8383_v11  ;;  %v16992_v36 = vunpack.i.h.bf16 %v16927_v60  ;;  %v16993_v11 = vld [vmem:[#allocation149_spill] sm:$0xff] }
 0x27b   : > { %8740 = vrot.lane.b32.xlu0 %v8734_v29, %s10111_s26  ;;  %v12384_v4 = vpop.permute.xlu0 %8530  ;;  %v12404_v50 = vsel %vm869_vm0, %v12277_v41, %v8182_v21  ;;  %v16995_v41 = vld [vmem:[#allocation134_spill] sm:$0xff]  ;;  %v17000_v21 = vld [vmem:[#allocation40_spill] sm:$0xff]  ;;  %17008 = vst [vmem:[#allocation149_spill] sm:$0xff] %v12461_v22 }
 0x27c   : > { %16984 = vst [vmem:[#allocation117_spill] sm:$0xff] %v12384_v4  ;;  %9000 = vrot.lane.b32.xlu1 %v8999_v13, %s10113_s28  ;;  %v8207_v13 = vunpack.i.l.bf16 %v16973_v35  ;;  %v12410_v37 = vpop.permute.xlu1 %8810  ;;  %v4984_v61 = vsel %vm2523_vm8, %v12292_v27, %v16992_v36  ;;  %v16997_v27 = vld [vmem:[#allocation153_spill] sm:$0xff] }
 0x27d   : > { %16991 = vst [vmem:[#allocation70_spill] sm:$0xff] %v12410_v37  ;;  %v4992_v2 = vsel %vm2532_vm9, %v4984_v61, %v16999_v28  ;;  %v2239_v61 = vrot.slane %v11977_v42, 2  ;;  %v17017_v28 = vld [vmem:[#allocation22_spill] sm:$0xff] }
 0x27e   : > { %v12480_v9 = vpack.i.bf16 %v17017_v28, %v17016_v30  ;;  %v17032_v30 = vld [vmem:[#allocation5_spill] sm:$0xff] }
 0x27f   : > { %8745 = vrot.lane.b32.xlu0 %v8734_v29, %s10114_s29  ;;  %v16998_v29 = vunpack.i.l.bf16 %v16938_v5  ;;  %v17003_v5 = vunpack.i.h.bf16 %v16934_v34  ;;  %v17122_v34 = vld [vmem:[#allocation186_spill] sm:$0xff] }
 0x280   : > { %v12418_v4 = vpop.permute.xlu0 %8535  ;;  %9005 = vrot.lane.b32.xlu1 %v9004_v57, %s10111_s26  ;;  %v17001_v57 = vld [vmem:[#allocation19_spill] sm:$0xff]  ;;  %v12446_v37 = vpop.permute.xlu1 %8820 }
 0x281   : > { %16994 = vst [vmem:[#allocation141_spill] sm:$0xff] %v12418_v4  ;;  %v4967_v35 = vsel %vm2506_vm7, %v4959_v47, %v16998_v29  ;;  %v4080_v36 = vsel %vm2488_vm5, %v17001_v57, %v8207_v13  ;;  %17002 = vst [vmem:[#allocation143_spill] sm:$0xff] %v12446_v37  ;;  %v12451_v47 = vsel %vm2541_vm10, %v4176_v48, %v17003_v5  ;;  %v17009_v13 = vunpack.i.l.bf16 %v16947_v8  ;;  %v17013_v37 = vld [vmem:[#allocation6_spill] sm:$0xff] }
 0x282   : > { %17004 = vst [vmem:[#allocation44_spill] sm:$0xff] %v12451_v47  ;;  %v17011_v57 = vunpack.i.h.bf16 %v16949_v7 }
 0x283   : > { %8750 = vrot.lane.b32.xlu0 %v12349_v55, %s10117_s17  ;;  %v12467_v48 = vsel %vm869_vm0, %v4967_v35, %v17009_v13  ;;  %v3250_v35 = vrot.slane %v11926_v54, 4  ;;  %v17021_v13 = vld [vmem:[#allocation21_spill] sm:$0xff] }
 0x284   : > { %9010 = vrot.lane.b32.xlu1 %v9009_v46, %s10113_s28  ;;  %17010 = vst [vmem:[#allocation153_spill] sm:$0xff] %v12467_v48  ;;  %v12472_v5 = vsel %vm2541_vm10, %v4992_v2, %v17011_v57  ;;  %v17019_v46 = vunpack.i.h.bf16 %v16936_v43  ;;  %v12489_v2 = vrot.slane %v11896_v0, 4  ;;  %v17022_v57 = vld [vmem:[#allocation41_spill] sm:$0xff]  ;;  %v12501_v43 = vpack.i.bf16 %v16762_v58, %v16818_v51 }
 0x285   : > { %v12453_v29 = vpop.permute.xlu0 %8550  ;;  %17012 = vst [vmem:[#allocation19_spill] sm:$0xff] %v12472_v5  ;;  %v17033_v0 = vrot.slane %v17032_v30, 4  ;;  %v17035_v58 = vunpack.i.h.bf16 %v16944_v26  ;;  %v8263_v26 = vunpack.i.h.bf16 %v11828_v23  ;;  %v17094_v5 = vld [vmem:[#allocation9_spill] sm:$0xff] }
 0x286   : > { %17005 = vst [vmem:[#allocation43_spill] sm:$0xff] %v12453_v29  ;;  %v17014_v29 = vld [vmem:[#allocation7_spill] sm:$0xff]  ;;  %v4088_v8 = vsel %vm2497_vm6, %v4080_v36, %v17019_v46  ;;  %17020 = vst [vmem:[#allocation15_spill] sm:$0xff] %v12489_v2  ;;  %v12497_v28 = vpop.permute.xlu1 %8830  ;;  %v12506_v36 = vsel %vm2150_vm4, %v2238_v19, %v2239_v61  ;;  %v12510_v46 = vsel %vm2150_vm4, %v2239_v61, %v12333_v31  ;;  %v12527_v19 = vrot.slane %v11572_v38, 4 }
 0x287   : > { %v12476_v47 = vpack.i.bf16 %v17014_v29, %v17013_v37  ;;  %17018 = vst [vmem:[#allocation7_spill] sm:$0xff] %v12480_v9  ;;  %8755 = vrot.lane.b32.xlu0 %v11555_v20, %s10115_s30  ;;  %v12493_v37 = vpack.i.bf16 %v17022_v57, %v17021_v13  ;;  %v17024_v29 = vld [vmem:[#allocation4_spill] sm:$0xff]  ;;  %17025 = vst [vmem:[#allocation21_spill] sm:$0xff] %v12497_v28  ;;  %v17030_v13 = vunpack.i.l.bf16 %v16927_v60  ;;  %v17037_v61 = vld [vmem:[#allocation11_spill] sm:$0xff]  ;;  %v17044_v38 = vunpack.i.h.bf16 %v16981_v33 }
 0x288   : > { %17026 = vst [vmem:[#allocation41_spill] sm:$0xff] %v12501_v43  ;;  %17028 = vst [vmem:[#allocation230_spill] sm:$0xff] %v12506_v36  ;;  %v12519_v54 = vpack.i.bf16 %v17033_v0, %v17031_v10  ;;  %v4096_v51 = vsel %vm2506_vm7, %v4088_v8, %v17035_v58  ;;  %9015 = vrot.lane.b32.xlu1 %v12050_v16, %s10113_s28  ;;  %v17038_v60 = vld [vmem:[#allocation17_spill] sm:$0xff]  ;;  %v3252_v10 = vsel %vm2858_vm3, %v3250_v35, %v12230_v24 }
 0x289   : > { %17015 = vst [vmem:[#allocation6_spill] sm:$0xff] %v12476_v47  ;;  %17023 = vst [vmem:[#allocation22_spill] sm:$0xff] %v12493_v37  ;;  %v12503_v20 = vpop.permute.xlu0 %8555  ;;  %v4983_v57 = vsel %vm2523_vm8, %v12467_v48, %v17030_v13  ;;  %v12531_v31 = vpack.i.bf16 %v17038_v60, %v17037_v61  ;;  %v3254_v0 = vsel %vm2858_vm3, %v12230_v24, %v12489_v2  ;;  %v17040_v8 = vld [vmem:[#allocation29_spill] sm:$0xff]  ;;  %v17043_v48 = vunpack.i.l.bf16 %v16940_v6  ;;  %v17053_v37 = vld [vmem:[#allocation199_spill] sm:$0xff] }
 0x28a   : > { %17027 = vst [vmem:[#allocation4_spill] sm:$0xff] %v12503_v20  ;;  %17029 = vst [vmem:[#allocation231_spill] sm:$0xff] %v12510_v46  ;;  %v8423_v13 = vunpack.i.h.bf16 %v17040_v8  ;;  %v12542_v58 = vpop.permute.xlu1 %8840  ;;  %v12546_v60 = vpack.i.bf16 %v12510_v46, %v12506_v36  ;;  %v4104_v2 = vsel %vm869_vm0, %v4096_v51, %v17044_v38  ;;  %v8262_v24 = vunpack.i.l.bf16 %v11828_v23  ;;  %v17055_v36 = vld [vmem:[#allocation59_spill] sm:$0xff]  ;;  %v17057_v46 = vld [vmem:[#allocation84_spill] sm:$0xff] }
 0x28b   : > { %17034 = vst [vmem:[#allocation8_spill] sm:$0xff] %v12519_v54  ;;  %17036 = vst [vmem:[#allocation5_spill] sm:$0xff] %v12527_v19  ;;  %8760 = vrot.lane.b32.xlu0 %v11456_v32, %s10117_s17  ;;  %v4991_v32 = vsel %vm2532_vm9, %v4983_v57, %v17043_v48  ;;  %v12562_v6 = vpack.i.bf16 %v3254_v0, %v3252_v10  ;;  %v8272_v57 = vunpack.i.l.bf16 %v11846_v52  ;;  %v17048_v38 = vunpack.i.l.bf16 %v16949_v7  ;;  %v17060_v47 = vld [vmem:[#allocation76_spill] sm:$0xff]  ;;  %v17120_v52 = vld [vmem:[#allocation93_spill] sm:$0xff] }
 0x28c   : > { %17039 = vst [vmem:[#allocation17_spill] sm:$0xff] %v12531_v31  ;;  %17041 = vst [vmem:[#allocation232_spill] sm:$0xff] %v12542_v58  ;;  %9020 = vrot.lane.b32.xlu1 %v12546_v60, %s10111_s26  ;;  %v12576_v51 = vsel %vm2497_vm6, %v12373_v45, %v8423_v13  ;;  %v4112_v0 = vsel %vm2523_vm8, %v4104_v2, %v8263_v26  ;;  %v4111_v48 = vsel %vm2523_vm8, %v12404_v50, %v8262_v24  ;;  %v17052_v45 = vld [vmem:[#allocation104_spill] sm:$0xff]  ;;  %v17054_v24 = vld [vmem:[#allocation157_spill] sm:$0xff] }
 0x28d   : > { %17042 = vst [vmem:[#allocation233_spill] sm:$0xff] %v12546_v60  ;;  %v12557_v54 = vpop.permute.xlu0 %8560  ;;  %17047 = vst [vmem:[#allocation235_spill] sm:$0xff] %v12562_v6  ;;  %v12571_v23 = vsel %vm2541_vm10, %v4991_v32, %v17048_v38  ;;  %v4050_v7 = vrot.slane %v11593_v53, 4  ;;  %v12587_v32 = vrot.slane %v11590_v62, 4  ;;  %v8448_v13 = vunpack.i.h.bf16 %v17052_v45  ;;  %v17104_v20 = vld [vmem:[#allocation172_spill] sm:$0xff]  ;;  %v17131_v31 = vld [vmem:[#allocation34_spill] sm:$0xff] }
 0x28e   : > { %17045 = vst [vmem:[#allocation234_spill] sm:$0xff] %v12557_v54  ;;  %17049 = vst [vmem:[#allocation236_spill] sm:$0xff] %v12571_v23  ;;  %v12578_v10 = vpop.permute.xlu1 %8850  ;;  %v8447_v26 = vunpack.i.l.bf16 %v17052_v45  ;;  %v4919_v62 = vsel %vm869_vm0, %v12429_v14, %v8272_v57  ;;  %v17058_v53 = vunpack.i.l.bf16 %v17057_v46  ;;  %v17059_v2 = vunpack.i.h.bf16 %v17057_v46  ;;  %v17063_v46 = vld [vmem:[#allocation159_spill] sm:$0xff]  ;;  %v17115_v23 = vld [vmem:[#allocation188_spill] sm:$0xff] }
 0x28f   : > { %8765 = vrot.lane.b32.xlu0 %v12349_v55, %s10113_s28  ;;  %17050 = vst [vmem:[#allocation237_spill] sm:$0xff] %v12578_v10  ;;  %17051 = vst [vmem:[#allocation238_spill] sm:$0xff] %v12587_v32  ;;  %v8478_v45 = vunpack.i.h.bf16 %v17060_v47  ;;  %v8477_v9 = vunpack.i.l.bf16 %v17060_v47  ;;  %v4052_v57 = vsel %vm2858_vm3, %v4050_v7, %v12527_v19  ;;  %v4054_v33 = vsel %vm2858_vm3, %v12527_v19, %v12587_v32  ;;  %v17065_v47 = vld [vmem:[#allocation89_spill] sm:$0xff]  ;;  %v17067_v7 = vld [vmem:[#allocation50_spill] sm:$0xff] }
 0x290   : > { %9025 = vrot.lane.b32.xlu1 %v17053_v37, %s10113_s28  ;;  %v4119_v43 = vsel %vm2532_vm9, %v4111_v48, %v17058_v53  ;;  %v4120_v50 = vsel %vm2532_vm9, %v4112_v0, %v17059_v2  ;;  %v17064_v0 = vld [vmem:[#allocation160_spill] sm:$0xff]  ;;  %v17066_v10 = vunpack.i.l.bf16 %v17065_v47  ;;  %v12633_v58 = vsel %vm2488_vm5, %v17067_v7, %v8447_v26  ;;  %v17068_v32 = vld [vmem:[#allocation162_spill] sm:$0xff]  ;;  %v17074_v26 = vld [vmem:[#allocation163_spill] sm:$0xff] }
 0x291   : > { %v12583_v35 = vpop.permute.xlu0 %8590  ;;  %v17075_v19 = vld [vmem:[#allocation164_spill] sm:$0xff]  ;;  %v17096_v7 = vld [vmem:[#allocation123_spill] sm:$0xff]  ;;  %v8513_v47 = vunpack.i.h.bf16 %v17104_v20  ;;  %v8358_v6 = vunpack.i.h.bf16 %v17115_v23 }
 0x292   : > { %v12603_v38 = vpop.permute.xlu1 %8860  ;;  %v4927_v25 = vsel %vm2523_vm8, %v4919_v62, %v17066_v10  ;;  %v12667_v10 = vpack.i.bf16 %v4054_v33, %v4052_v57  ;;  %v17081_v62 = vld [vmem:[#allocation33_spill] sm:$0xff]  ;;  %v17087_v33 = vld [vmem:[#allocation206_spill] sm:$0xff] }
 0x293   : > { %8770 = vrot.lane.b32.xlu0 %v17055_v36, %s10111_s26  ;;  %17056 = vst [vmem:[#allocation104_spill] sm:$0xff] %v12603_v38  ;;  %v17062_v38 = vld [vmem:[#allocation51_spill] sm:$0xff]  ;;  %v17088_v57 = vld [vmem:[#allocation205_spill] sm:$0xff]  ;;  %v2282_v56 = vrot.slane %v17087_v33, 2  ;;  %v12747_v8 = vsel %vm2506_vm7, %v12576_v51, %v8513_v47  ;;  %v17119_v47 = vld [vmem:[#allocation202_spill] sm:$0xff] }
 0x294   : > { %v12622_v53 = vsel %vm2488_vm5, %v17062_v38, %v8448_v13  ;;  %9030 = vrot.lane.b32.xlu1 %v12050_v16, %s10116_s16  ;;  %v17069_v38 = vld [vmem:[#allocation140_spill] sm:$0xff]  ;;  %v12656_v16 = vsel %vm2497_vm6, %v12395_v49, %v8478_v45  ;;  %17080 = vst [vmem:[#allocation51_spill] sm:$0xff] %v12667_v10  ;;  %v17083_v49 = vld [vmem:[#allocation129_spill] sm:$0xff] }
 0x295   : > { %v12613_v14 = vpop.permute.xlu0 %8610  ;;  %v17070_v13 = vld [vmem:[#allocation112_spill] sm:$0xff] }
 0x296   : > { %17061 = vst [vmem:[#allocation157_spill] sm:$0xff] %v12613_v14  ;;  %v17071_v48 = vunpack.i.l.bf16 %v17070_v13  ;;  %v17072_v22 = vunpack.i.h.bf16 %v17070_v13  ;;  %v12652_v14 = vpop.permute.xlu1 %8870 }
 0x297   : > { %8780 = vrot.lane.b32.xlu0 %v17069_v38, %s10115_s30  ;;  %17076 = vst [vmem:[#allocation84_spill] sm:$0xff] %v12652_v14  ;;  %v17082_v14 = vld [vmem:[#allocation208_spill] sm:$0xff] }
 0x298   : > { %v12641_v2 = vsel %vm2541_vm10, %v4119_v43, %v17071_v48  ;;  %v12646_v28 = vsel %vm2541_vm10, %v4120_v50, %v17072_v22  ;;  %v12660_v43 = vsel %vm2497_vm6, %v12399_v63, %v8477_v9  ;;  %v17078_v50 = vld [vmem:[#allocation121_spill] sm:$0xff]  ;;  %v17084_v45 = vpack.i.bf16 %v17082_v14, %v17083_v49 }
 0x299   : > { %17073 = vst [vmem:[#allocation59_spill] sm:$0xff] %v12646_v28  ;;  %v12662_v22 = vpop.permute.xlu0 %8620  ;;  %v17079_v48 = vunpack.i.l.bf16 %v17078_v50  ;;  %v17100_v14 = vld [vmem:[#allocation25_spill] sm:$0xff] }
 0x29a   : > { %17077 = vst [vmem:[#allocation76_spill] sm:$0xff] %v12662_v22  ;;  %9035 = vrot.lane.b32.xlu1 %v17084_v45, %s10115_s30  ;;  %v12687_v54 = vpop.permute.xlu1 %8880  ;;  %v17091_v45 = vunpack.i.l.bf16 %v17000_v21  ;;  %v8492_v21 = vunpack.i.l.bf16 %v17096_v7 }
 0x29b   : > { %v4935_v13 = vsel %vm2532_vm9, %v4927_v25, %v17079_v48  ;;  %v17086_v25 = vld [vmem:[#allocation142_spill] sm:$0xff]  ;;  %v12683_v48 = vpack.i.bf16 %v17088_v57, %v17087_v33  ;;  %17090 = vst [vmem:[#allocation50_spill] sm:$0xff] %v12687_v54  ;;  %v8493_v54 = vunpack.i.h.bf16 %v17096_v7  ;;  %v17105_v7 = vld [vmem:[#allocation57_spill] sm:$0xff] }
 0x29c   : > { %8790 = vrot.lane.b32.xlu0 %v17086_v25, %s10112_s27  ;;  %v12692_v9 = vsel %vm2541_vm10, %v4935_v13, %v17091_v45  ;;  %v17098_v45 = vld [vmem:[#allocation12_spill] sm:$0xff] }
 0x29d   : > { %17089 = vst [vmem:[#allocation159_spill] sm:$0xff] %v12683_v48  ;;  %17092 = vst [vmem:[#allocation162_spill] sm:$0xff] %v12692_v9  ;;  %v12697_v10 = vpop.permute.xlu0 %8625  ;;  %v17099_v63 = vrot.slane %v17098_v45, 4  ;;  %v12722_v22 = vsel %vm2488_vm5, %v17105_v7, %v8493_v54  ;;  %v17108_v9 = vld [vmem:[#allocation181_spill] sm:$0xff]  ;;  %v17127_v54 = vrot.slane %v17064_v0, 4 }
 0x29e   : > { %17095 = vst [vmem:[#allocation140_spill] sm:$0xff] %v12697_v10  ;;  %9040 = vrot.lane.b32.xlu1 %v12683_v48, %s10115_s30  ;;  %v12706_v13 = vpop.permute.xlu1 %8890  ;;  %v17102_v10 = vld [vmem:[#allocation168_spill] sm:$0xff] }
 0x29f   : > { %17097 = vst [vmem:[#allocation112_spill] sm:$0xff] %v12706_v13  ;;  %v12711_v49 = vpack.i.bf16 %v17100_v14, %v17099_v63  ;;  %v17106_v13 = vld [vmem:[#allocation56_spill] sm:$0xff]  ;;  %v17107_v63 = vld [vmem:[#allocation78_spill] sm:$0xff] }
 0x2a0   : > { %8815 = vrot.lane.b32.xlu0 %v12349_v55, %s10116_s16  ;;  %v12726_v45 = vsel %vm2488_vm5, %v17106_v13, %v8492_v21  ;;  %v17112_v21 = vld [vmem:[#allocation74_spill] sm:$0xff]  ;;  %v17116_v13 = vpack.i.bf16 %v12118_v17, %v12304_v44  ;;  %v8567_v17 = vunpack.i.l.bf16 %v17122_v34 }
 0x2a1   : > { %17101 = vst [vmem:[#allocation163_spill] sm:$0xff] %v12711_v49  ;;  %v12714_v50 = vpop.permute.xlu0 %8630  ;;  %v8322_v14 = vunpack.i.l.bf16 %v17112_v21  ;;  %v2283_v49 = vrot.slane %v17088_v57, 2  ;;  %v17118_v57 = vld [vmem:[#allocation91_spill] sm:$0xff] }
 0x2a2   : > { %17103 = vst [vmem:[#allocation33_spill] sm:$0xff] %v12714_v50  ;;  %9045 = vrot.lane.b32.xlu1 %v12683_v48, %s10111_s26  ;;  %v12737_v7 = vpop.permute.xlu1 %8900  ;;  %v8543_v20 = vunpack.i.h.bf16 %v17118_v57  ;;  %v8542_v51 = vunpack.i.l.bf16 %v17118_v57  ;;  %v17121_v50 = vld [vmem:[#allocation96_spill] sm:$0xff] }
 0x2a3   : > { %17111 = vst [vmem:[#allocation142_spill] sm:$0xff] %v12737_v7  ;;  %v8357_v7 = vunpack.i.l.bf16 %v17115_v23  ;;  %v8548_v4 = vunpack.i.h.bf16 %v17121_v50  ;;  %v8547_v21 = vunpack.i.l.bf16 %v17121_v50  ;;  %v12772_v44 = vsel %vm2150_vm4, %v2282_v56, %v2283_v49  ;;  %v17132_v56 = vld [vmem:[#allocation198_spill] sm:$0xff] }
 0x2a4   : > { %8825 = vrot.lane.b32.xlu0 %v17108_v9, %s10113_s28  ;;  %17125 = vst [vmem:[#allocation57_spill] sm:$0xff] %v12772_v44  ;;  %v12776_v57 = vsel %vm2150_vm4, %v2283_v49, %v12357_v3  ;;  %v8577_v37 = vunpack.i.l.bf16 %v17132_v56  ;;  %v17133_v49 = vpack.i.bf16 %v12357_v3, %v16985_v59 }
 0x2a5   : > { %v12741_v48 = vpop.permute.xlu0 %8635  ;;  %17126 = vst [vmem:[#allocation56_spill] sm:$0xff] %v12776_v57  ;;  %v2491_v50 = vsel %vm2488_vm5, %v17131_v31, %v8357_v7  ;;  %v3290_v31 = vsel %vm2497_vm6, %v12622_v53, %v8548_v4  ;;  %v17135_v7 = vld [vmem:[#allocation86_spill] sm:$0xff]  ;;  %v12820_v53 = vrot.slane %v11977_v42, 4 }
 0x2a6   : > { %17113 = vst [vmem:[#allocation9_spill] sm:$0xff] %v12741_v48  ;;  %9050 = vrot.lane.b32.xlu1 %v17116_v13, %s10117_s17  ;;  %v12766_v13 = vpop.permute.xlu1 %8910  ;;  %v17128_v48 = vrot.slane %v17063_v46, 4  ;;  %v8352_v46 = vunpack.i.l.bf16 %v17130_v40 }
 0x2a7   : > { %17123 = vst [vmem:[#allocation123_spill] sm:$0xff] %v12766_v13  ;;  %v8353_v13 = vunpack.i.h.bf16 %v17130_v40  ;;  %v3289_v40 = vsel %vm2497_vm6, %v12633_v58, %v8547_v21  ;;  %17139 = vst [vmem:[#allocation91_spill] sm:$0xff] %v12820_v53  ;;  %v2568_v58 = vsel %vm2506_vm7, %v12660_v43, %v8577_v37  ;;  %v17142_v21 = vpack.i.bf16 %v12121_v15, %v16995_v41  ;;  %v17147_v43 = vld [vmem:[#allocation133_spill] sm:$0xff] }
 0x2a8   : > { %8835 = vrot.lane.b32.xlu0 %v17119_v47, %s10117_s17  ;;  %v12783_v23 = vsel %vm2858_vm3, %v17128_v48, %v17127_v54  ;;  %v8578_v48 = vunpack.i.h.bf16 %v17132_v56 }
 0x2a9   : > { %v12769_v33 = vpop.permute.xlu0 %8640  ;;  %17129 = vst [vmem:[#allocation78_spill] sm:$0xff] %v12783_v23  ;;  %v4138_v23 = vsel %vm2488_vm5, %v17135_v7, %v8567_v17  ;;  %v17140_v17 = vld [vmem:[#allocation36_spill] sm:$0xff] }
 0x2aa   : > { %17124 = vst [vmem:[#allocation168_spill] sm:$0xff] %v12769_v33  ;;  %v8568_v33 = vunpack.i.h.bf16 %v17122_v34  ;;  %9055 = vrot.lane.b32.xlu1 %v17133_v49, %s10115_s30  ;;  %v17134_v34 = vld [vmem:[#allocation35_spill] sm:$0xff]  ;;  %v12805_v3 = vpop.permute.xlu1 %8915  ;;  %v12809_v49 = vpack.i.bf16 %v12776_v57, %v12772_v44  ;;  %v17141_v7 = vld [vmem:[#allocation60_spill] sm:$0xff]  ;;  %v17173_v44 = vld [vmem:[#allocation101_spill] sm:$0xff] }
 0x2ab   : > { %v2492_v54 = vsel %vm2488_vm5, %v17134_v34, %v8358_v6  ;;  %17136 = vst [vmem:[#allocation181_spill] sm:$0xff] %v12805_v3  ;;  %v12824_v34 = vsel %vm2488_vm5, %v17140_v17, %v8353_v13  ;;  %v12843_v13 = vsel %vm2488_vm5, %v17032_v30, %v8352_v46  ;;  %v17148_v17 = vunpack.i.h.bf16 %v17147_v43 }
 0x2ac   : > { %8845 = vrot.lane.b32.xlu0 %v17055_v36, %s10114_s29  ;;  %v17137_v36 = vunpack.i.l.bf16 %v17054_v24  ;;  %v4081_v0 = vsel %vm2488_vm5, %v17141_v7, %v8568_v33  ;;  %v17146_v33 = vunpack.i.h.bf16 %v17054_v24  ;;  %v8582_v57 = vunpack.i.l.bf16 %v17173_v44 }
 0x2ad   : > { %v12816_v4 = vpop.permute.xlu0 %8645  ;;  %v4146_v7 = vsel %vm2497_vm6, %v4138_v23, %v17148_v17  ;;  %v17154_v17 = vld [vmem:[#allocation122_spill] sm:$0xff] }
 0x2ae   : > { %v2500_v56 = vsel %vm2497_vm6, %v2491_v50, %v17137_v36  ;;  %17138 = vst [vmem:[#allocation188_spill] sm:$0xff] %v12816_v4  ;;  %9060 = vrot.lane.b32.xlu1 %v17142_v21, %s10117_s17  ;;  %v17143_v50 = vrot.slane %v17075_v19, 4  ;;  %v17144_v36 = vrot.slane %v17074_v26, 4  ;;  %v2501_v37 = vsel %vm2497_vm6, %v2492_v54, %v17146_v33  ;;  %v17149_v26 = vld [vmem:[#allocation126_spill] sm:$0xff]  ;;  %v12862_v54 = vpop.permute.xlu1 %8920  ;;  %v17153_v33 = vld [vmem:[#allocation193_spill] sm:$0xff]  ;;  %v17270_v4 = vld [vmem:[#allocation159_spill] sm:$0xff] }
 0x2af   : > { %v2569_v21 = vsel %vm2506_vm7, %v12656_v16, %v8578_v48  ;;  %v17151_v30 = vunpack.i.l.bf16 %v17149_v26  ;;  %v2509_v46 = vsel %vm2506_vm7, %v2500_v56, %v8542_v51  ;;  %17152 = vst [vmem:[#allocation93_spill] sm:$0xff] %v12862_v54  ;;  %v8573_v23 = vunpack.i.h.bf16 %v17153_v33  ;;  %v17229_v54 = vld [vmem:[#allocation27_spill] sm:$0xff] }
 0x2b0   : > { %v12839_v6 = vsel %vm2858_vm3, %v17144_v36, %v17143_v50  ;;  %8855 = vrot.lane.b32.xlu0 %v17069_v38, %s10111_s26  ;;  %v17150_v50 = vunpack.i.h.bf16 %v17149_v26  ;;  %v17155_v15 = vunpack.i.l.bf16 %v17154_v17  ;;  %v12869_v38 = vsel %vm2497_vm6, %v4081_v0, %v8322_v14 }
 0x2b1   : > { %17145 = vst [vmem:[#allocation202_spill] sm:$0xff] %v12839_v6  ;;  %v3297_v24 = vsel %vm2506_vm7, %v3289_v40, %v17151_v30  ;;  %v12871_v48 = vpop.permute.xlu0 %8650  ;;  %v8572_v26 = vunpack.i.l.bf16 %v17153_v33  ;;  %v17157_v40 = vunpack.i.h.bf16 %v17154_v17  ;;  %v17158_v56 = vunpack.i.h.bf16 %v11644_v39  ;;  %v17159_v30 = vld [vmem:[#allocation219_spill] sm:$0xff]  ;;  %v17166_v17 = vld [vmem:[#allocation201_spill] sm:$0xff] }
 0x2b2   : > { %v3298_v36 = vsel %vm2506_vm7, %v3290_v31, %v17150_v50  ;;  %v2576_v16 = vsel %vm869_vm0, %v2568_v58, %v17155_v15  ;;  %17156 = vst [vmem:[#allocation96_spill] sm:$0xff] %v12871_v48  ;;  %v2510_v31 = vsel %vm2506_vm7, %v2501_v37, %v8543_v20  ;;  %9065 = vrot.lane.b32.xlu1 %v17159_v30, %s10117_s17  ;;  %v17160_v15 = vld [vmem:[#allocation195_spill] sm:$0xff]  ;;  %v17161_v20 = vld [vmem:[#allocation120_spill] sm:$0xff]  ;;  %v17164_v33 = vrot.slane %v12641_v2, 4  ;;  %v17236_v48 = vld [vmem:[#allocation10_spill] sm:$0xff] }
 0x2b3   : > { %v2577_v51 = vsel %vm869_vm0, %v2569_v21, %v17157_v40  ;;  %v4154_v50 = vsel %vm2506_vm7, %v4146_v7, %v17158_v56  ;;  %v17162_v58 = vunpack.i.l.bf16 %v17161_v20  ;;  %v17163_v21 = vrot.slane %v12646_v28, 4  ;;  %v12898_v56 = vpop.permute.xlu1 %8925 }
 0x2b4   : > { %8865 = vrot.lane.b32.xlu0 %v17086_v25, %s10115_s30  ;;  %v8368_v40 = vunpack.i.h.bf16 %v17166_v17  ;;  %17167 = vst [vmem:[#allocation184_spill] sm:$0xff] %v12898_v56  ;;  %v17168_v14 = vunpack.i.l.bf16 %v16993_v11  ;;  %v17169_v25 = vunpack.i.h.bf16 %v17107_v63  ;;  %v8367_v19 = vunpack.i.l.bf16 %v17166_v17 }
 0x2b5   : > { %v2517_v37 = vsel %vm869_vm0, %v2509_v46, %v17162_v58  ;;  %v12895_v7 = vsel %vm2858_vm3, %v17164_v33, %v17163_v21  ;;  %v12908_v46 = vpop.permute.xlu0 %8665  ;;  %v17171_v58 = vunpack.i.h.bf16 %v16993_v11  ;;  %v17172_v33 = vunpack.i.h.bf16 %v17161_v20 }
 0x2b6   : > { %17165 = vst [vmem:[#allocation186_spill] sm:$0xff] %v12895_v7  ;;  %v2584_v0 = vsel %vm2523_vm8, %v2576_v16, %v17168_v14  ;;  %v12906_v6 = vsel %vm869_vm0, %v4154_v50, %v17169_v25  ;;  %17170 = vst [vmem:[#allocation34_spill] sm:$0xff] %v12908_v46  ;;  %9070 = vrot.lane.b32.xlu1 %v12809_v49, %s10115_s30  ;;  %v17174_v16 = vunpack.i.l.bf16 %v16986_v18  ;;  %v8583_v14 = vunpack.i.h.bf16 %v17173_v44  ;;  %v17250_v46 = vld [vmem:[#allocation116_spill] sm:$0xff] }
 0x2b7   : > { %v2585_v21 = vsel %vm2523_vm8, %v2577_v51, %v17171_v58  ;;  %v2518_v7 = vsel %vm869_vm0, %v2510_v31, %v17172_v33  ;;  %v17175_v11 = vunpack.i.l.bf16 %v17081_v62  ;;  %v17176_v51 = vld [vmem:[#allocation42_spill] sm:$0xff]  ;;  %v12933_v17 = vpop.permute.xlu1 %8930  ;;  %v17178_v25 = vunpack.i.h.bf16 %v17081_v62  ;;  %v17180_v33 = vld [vmem:[#allocation207_spill] sm:$0xff] }
 0x2b8   : > { %v2526_v50 = vsel %vm2523_vm8, %v2517_v37, %v17174_v16  ;;  %8875 = vrot.lane.b32.xlu0 %v12349_v55, %s10112_s27  ;;  %v12931_v20 = vsel %vm2488_vm5, %v17176_v51, %v8368_v40  ;;  %17177 = vst [vmem:[#allocation198_spill] sm:$0xff] %v12933_v17  ;;  %v17179_v37 = vunpack.i.h.bf16 %v16986_v18  ;;  %v8588_v55 = vunpack.i.h.bf16 %v17180_v33  ;;  %v17184_v18 = vld [vmem:[#allocation103_spill] sm:$0xff] }
 0x2b9   : > { %v2592_v31 = vsel %vm2532_vm9, %v2584_v0, %v17175_v11  ;;  %v2593_v58 = vsel %vm2532_vm9, %v2585_v21, %v17178_v25  ;;  %v8587_v16 = vunpack.i.l.bf16 %v17180_v33  ;;  %v12943_v41 = vpop.permute.xlu0 %8670  ;;  %v17182_v0 = vunpack.i.l.bf16 %v16997_v27  ;;  %v17185_v25 = vld [vmem:[#allocation218_spill] sm:$0xff] }
 0x2ba   : > { %v2527_v44 = vsel %vm2523_vm8, %v2518_v7, %v17179_v37  ;;  %17181 = vst [vmem:[#allocation35_spill] sm:$0xff] %v12943_v41  ;;  %v17183_v11 = vunpack.i.h.bf16 %v16997_v27  ;;  %v12953_v21 = vsel %vm2488_vm5, %v17037_v61, %v8367_v19  ;;  %9075 = vrot.lane.b32.xlu1 %v17185_v25, %s10117_s17  ;;  %v12959_v37 = vsel %vm2541_vm10, %v2592_v31, %v8582_v57 }
 0x2bb   : > { %v3305_v40 = vsel %vm869_vm0, %v3297_v24, %v17182_v0  ;;  %v17186_v33 = vunpack.i.l.bf16 %v17068_v32  ;;  %v17187_v0 = vld [vmem:[#allocation210_spill] sm:$0xff]  ;;  %v12969_v19 = vsel %vm2541_vm10, %v2593_v58, %v8583_v14  ;;  %v12975_v31 = vpop.permute.xlu1 %8935  ;;  %v8663_v51 = vunpack.i.h.bf16 %v17229_v54 }
 0x2bc   : > { %v3306_v62 = vsel %vm869_vm0, %v3298_v36, %v17183_v11  ;;  %v8598_v27 = vunpack.i.h.bf16 %v17187_v0  ;;  %v8597_v36 = vunpack.i.l.bf16 %v17187_v0  ;;  %8885 = vrot.lane.b32.xlu0 %v17108_v9, %s10116_s16  ;;  %17188 = vst [vmem:[#allocation86_spill] sm:$0xff] %v12969_v19  ;;  %v17189_v11 = vunpack.i.h.bf16 %v17068_v32  ;;  %17190 = vst [vmem:[#allocation36_spill] sm:$0xff] %v12975_v31  ;;  %v17193_v9 = vld [vmem:[#allocation209_spill] sm:$0xff] }
 0x2bd   : > { %v2535_v24 = vsel %vm2532_vm9, %v2526_v50, %v17186_v33  ;;  %v17191_v50 = vunpack.i.l.bf16 %v17094_v5  ;;  %v17192_v0 = vunpack.i.h.bf16 %v17094_v5  ;;  %v8407_v42 = vunpack.i.l.bf16 %v17193_v9  ;;  %v12984_v14 = vpop.permute.xlu0 %8675 }
 0x2be   : > { %v2536_v7 = vsel %vm2532_vm9, %v2527_v44, %v17189_v11  ;;  %17194 = vst [vmem:[#allocation60_spill] sm:$0xff] %v12984_v14  ;;  %v12987_v32 = vsel %vm2541_vm10, %v2535_v24, %v8572_v26  ;;  %9080 = vrot.lane.b32.xlu1 %v17159_v30, %s10113_s28  ;;  %v17210_v26 = vld [vmem:[#allocation225_spill] sm:$0xff]  ;;  %v17237_v14 = vunpack.i.h.bf16 %v17236_v48 }
 0x2bf   : > { %v3313_v33 = vsel %vm2523_vm8, %v3305_v40, %v17191_v50  ;;  %v3314_v59 = vsel %vm2523_vm8, %v3306_v62, %v17192_v0  ;;  %v12998_v11 = vsel %vm2541_vm10, %v2536_v7, %v8573_v23  ;;  %v17197_v50 = vld [vmem:[#allocation32_spill] sm:$0xff]  ;;  %v13009_v0 = vpop.permute.xlu1 %8940  ;;  %v17199_v7 = vld [vmem:[#allocation130_spill] sm:$0xff] }
 0x2c0   : > { %v3321_v58 = vsel %vm2532_vm9, %v3313_v33, %v8587_v16  ;;  %v3322_v44 = vsel %vm2532_vm9, %v3314_v59, %v8588_v55  ;;  %17195 = vst [vmem:[#allocation133_spill] sm:$0xff] %v12998_v11  ;;  %v3346_v16 = vsel %vm2497_vm6, %v12722_v22, %v8598_v27  ;;  %v3345_v59 = vsel %vm2497_vm6, %v12726_v45, %v8597_v36  ;;  %v17196_v55 = vld [vmem:[#allocation220_spill] sm:$0xff] }
 0x2c1   : > { %v8608_v24 = vunpack.i.h.bf16 %v17196_v55  ;;  %8895 = vrot.lane.b32.xlu0 %v17119_v47, %s10113_s28  ;;  %v8618_v33 = vunpack.i.h.bf16 %v17197_v50  ;;  %17198 = vst [vmem:[#allocation126_spill] sm:$0xff] %v13009_v0  ;;  %v17200_v40 = vunpack.i.l.bf16 %v17199_v7  ;;  %v17202_v22 = vunpack.i.h.bf16 %v17199_v7  ;;  %v13027_v62 = vpop.permute.xlu0 %8680  ;;  %v17218_v0 = vld [vmem:[#allocation147_spill] sm:$0xff] }
 0x2c2   : > { %v13024_v27 = vsel %vm2506_vm7, %v12869_v38, %v8407_v42  ;;  %17205 = vst [vmem:[#allocation219_spill] sm:$0xff] %v13027_v62  ;;  %9085 = vrot.lane.b32.xlu1 %v12546_v60, %s10114_s29  ;;  %v17209_v38 = vld [vmem:[#allocation185_spill] sm:$0xff]  ;;  %v17233_v62 = vld [vmem:[#allocation16_spill] sm:$0xff] }
 0x2c3   : > { %v13015_v5 = vsel %vm2541_vm10, %v3321_v58, %v17200_v40  ;;  %v13020_v45 = vsel %vm2541_vm10, %v3322_v44, %v17202_v22  ;;  %v17206_v58 = vunpack.i.h.bf16 %v17102_v10  ;;  %v17207_v44 = vunpack.i.l.bf16 %v17102_v10  ;;  %v17208_v22 = vld [vmem:[#allocation216_spill] sm:$0xff]  ;;  %v13053_v36 = vpop.permute.xlu1 %8945 }
 0x2c4   : > { %17201 = vst [vmem:[#allocation193_spill] sm:$0xff] %v13015_v5  ;;  %17203 = vst [vmem:[#allocation122_spill] sm:$0xff] %v13020_v45  ;;  %v8427_v42 = vunpack.i.l.bf16 %v17208_v22  ;;  %v4170_v23 = vsel %vm2523_vm8, %v12906_v6, %v8608_v24  ;;  %v4978_v3 = vsel %vm869_vm0, %v12747_v8, %v8618_v33  ;;  %v17216_v8 = vrot.slane %v11974_v12, 4  ;;  %v17219_v6 = vld [vmem:[#allocation194_spill] sm:$0xff]  ;;  %v17224_v12 = vld [vmem:[#allocation223_spill] sm:$0xff] }
 0x2c5   : > { %v3354_v40 = vsel %vm2506_vm7, %v3346_v16, %v17206_v58  ;;  %v3353_v7 = vsel %vm2506_vm7, %v3345_v59, %v17207_v44  ;;  %8905 = vrot.lane.b32.xlu0 %v17210_v26, %s10117_s17  ;;  %v17211_v59 = vld [vmem:[#allocation214_spill] sm:$0xff]  ;;  %17212 = vst [vmem:[#allocation195_spill] sm:$0xff] %v13053_v36  ;;  %v17213_v26 = vunpack.i.l.bf16 %v17024_v29  ;;  %v17214_v16 = vunpack.i.h.bf16 %v17024_v29  ;;  %v13064_v58 = vpop.permute.xlu0 %8690  ;;  %v17239_v5 = vld [vmem:[#allocation13_spill] sm:$0xff]  ;;  %v17241_v45 = vld [vmem:[#allocation72_spill] sm:$0xff] }
 0x2c6   : > { %v8602_v44 = vunpack.i.l.bf16 %v17211_v59  ;;  %17215 = vst [vmem:[#allocation120_spill] sm:$0xff] %v13064_v58  ;;  %v13070_v33 = vsel %vm2858_vm3, %v17216_v8, %v12820_v53  ;;  %v13074_v57 = vsel %vm2497_vm6, %v17218_v0, %v8427_v42  ;;  %9095 = vrot.lane.b32.xlu1 %v17219_v6, %s10115_s30  ;;  %v8453_v8 = vunpack.i.h.bf16 %v17224_v12 }
 0x2c7   : > { %v3361_v24 = vsel %vm869_vm0, %v3353_v7, %v17213_v26  ;;  %v3362_v10 = vsel %vm869_vm0, %v3354_v40, %v17214_v16  ;;  %17217 = vst [vmem:[#allocation201_spill] sm:$0xff] %v13070_v33  ;;  %v17220_v7 = vld [vmem:[#allocation63_spill] sm:$0xff]  ;;  %v17222_v40 = vrot.slane %v17209_v38, 4  ;;  %v8452_v31 = vunpack.i.l.bf16 %v17224_v12  ;;  %v13099_v56 = vpop.permute.xlu1 %8950  ;;  %v17238_v33 = vld [vmem:[#allocation26_spill] sm:$0xff] }
 0x2c8   : > { %v17221_v26 = vunpack.i.h.bf16 %v17220_v7  ;;  %v8592_v0 = vunpack.i.l.bf16 %v12583_v35  ;;  %v17225_v42 = vunpack.i.h.bf16 %v16983_v1  ;;  %17228 = vst [vmem:[#allocation207_spill] sm:$0xff] %v13099_v56  ;;  %v8662_v38 = vunpack.i.l.bf16 %v17229_v54 }
 0x2c9   : > { %v13085_v16 = vsel %vm2858_vm3, %v12820_v53, %v17222_v40  ;;  %9090 = vrot.lane.b32.xlu0 %v12809_v49, %s10111_s26  ;;  %v17227_v53 = vld [vmem:[#allocation87_spill] sm:$0xff]  ;;  %v13104_v60 = vpop.permute.xlu0 %8695  ;;  %v17234_v56 = vunpack.i.h.bf16 %v17233_v62 }
 0x2ca   : > { %v4178_v29 = vsel %vm2532_vm9, %v4170_v23, %v17221_v26  ;;  %17223 = vst [vmem:[#allocation101_spill] sm:$0xff] %v13085_v16  ;;  %v4986_v61 = vsel %vm2523_vm8, %v4978_v3, %v17225_v42  ;;  %v8497_v17 = vunpack.i.l.bf16 %v17227_v53  ;;  %v8498_v36 = vunpack.i.h.bf16 %v17227_v53  ;;  %17230 = vst [vmem:[#allocation103_spill] sm:$0xff] %v13104_v60  ;;  %v17231_v42 = vld [vmem:[#allocation75_spill] sm:$0xff] }
 0x2cb   : > { %v8463_v26 = vunpack.i.h.bf16 %v17231_v42  ;;  %v17232_v40 = vld [vmem:[#allocation199_spill] sm:$0xff]  ;;  %v13115_v12 = vsel %vm2541_vm10, %v4178_v29, %v17234_v56  ;;  %v4994_v53 = vsel %vm2532_vm9, %v4986_v61, %v17237_v14  ;;  %v13122_v60 = vsel %vm2497_vm6, %v12824_v34, %v8453_v8  ;;  %v17240_v56 = vld [vmem:[#allocation100_spill] sm:$0xff]  ;;  %v13135_v14 = vpop.permute.xlu1 %8955  ;;  %v17243_v8 = vld [vmem:[#allocation98_spill] sm:$0xff] }
 0x2cc   : > { %9105 = vrot.lane.b32.xlu1 %v17232_v40, %s10116_s16  ;;  %17235 = vst [vmem:[#allocation218_spill] sm:$0xff] %v13115_v12  ;;  %v2782_v3 = vsel %vm2497_vm6, %v12843_v13, %v8452_v31  ;;  %v8462_v54 = vunpack.i.l.bf16 %v17231_v42  ;;  %v4896_v16 = vsel %vm2488_vm5, %v17238_v33, %v8592_v0  ;;  %v3369_v34 = vsel %vm2523_vm8, %v3361_v24, %v8497_v17  ;;  %v10042_v13 = vld [vmem:[%s16024_s5 + $0xc0] sm:$0xff]   ;;  %v17261_v12 = vld [vmem:[#allocation92_spill] sm:$0xff] }
 0x2cd   : > { %9100 = vrot.lane.b32.xlu0 %v17239_v5, %s10112_s27  ;;  %17242 = vst [vmem:[#allocation210_spill] sm:$0xff] %v13135_v14  ;;  %v10043_v31 = vld [vmem:[%s16024_s5 + $0x80] sm:$0xff]   ;;  %v13146_v0 = vsel %vm2488_vm5, %v17243_v8, %v8663_v51  ;;  %v3370_v42 = vsel %vm2523_vm8, %v3362_v10, %v8498_v36  ;;  %v13149_v29 = vpop.permute.xlu0 %8700  ;;  %v13158_v61 = vsel %vm2497_vm6, %v12931_v20, %v8463_v26  ;;  %v17248_v14 = vld [vmem:[#allocation97_spill] sm:$0xff]  ;;  %v17251_v51 = vunpack.i.h.bf16 %v17250_v46 }
 0x2ce   : > { %17244 = vst [vmem:[#allocation209_spill] sm:$0xff] %v13146_v0  ;;  %v17245_v17 = vld [vmem:[#allocation174_spill] sm:$0xff]  ;;  %v13162_v33 = vsel %vm2488_vm5, %v17248_v14, %v8662_v38  ;;  %v8703_v36 = vunpack.i.h.bf16 %v13149_v29  ;;  %v17252_v10 = vld [vmem:[#allocation235_spill] sm:$0xff]  ;;  %7668 = vmatprep.subr.bf16.mxu1 %v10042_v13  ;;  %v13179_v46 = vsel %vm2532_vm9, %v3369_v34, %v8602_v44 }
 0x2cf   : > { %v17246_v24 = vunpack.i.h.bf16 %v17245_v17  ;;  %17249 = vst [vmem:[#allocation32_spill] sm:$0xff] %v13162_v33  ;;  %v4904_v8 = vsel %vm2497_vm6, %v4896_v16, %v17251_v51  ;;  %17255 = vst [vmem:[#allocation130_spill] sm:$0xff] %v13179_v46  ;;  %7669 = vmatpush3.bf16.msra.mxu1 %v10043_v31  ;;  %v17256_v16 = vld [vmem:[#allocation141_spill] sm:$0xff]  ;;  %v17257_v13 = vld [vmem:[#allocation46_spill] sm:$0xff] }
 0x2d0   : > { %9115 = vrot.lane.b32.xlu1 %v17252_v10, %s10117_s17  ;;  %v8537_v14 = vunpack.i.l.bf16 %v17256_v16  ;;  %v4135_v51 = vsel %vm2488_vm5, %v17257_v13, %v8703_v36  ;;  %v17260_v33 = vld [vmem:[#allocation81_spill] sm:$0xff]  ;;  %v17262_v44 = vld [vmem:[#allocation150_spill] sm:$0xff] }
 0x2d1   : > { %v13154_v58 = vsel %vm2541_vm10, %v4994_v53, %v17246_v24  ;;  %v13172_v53 = vsel %vm2497_vm6, %v12953_v21, %v8462_v54  ;;  %v17254_v24 = vld [vmem:[#allocation117_spill] sm:$0xff]  ;;  %9110 = vrot.lane.b32.xlu0 %v17185_v25, %s10113_s28  ;;  %v13185_v21 = vpop.permute.xlu1 %8960  ;;  %v17259_v54 = vunpack.i.h.bf16 %v17211_v59  ;;  %v17263_v34 = vunpack.i.h.bf16 %v17262_v44  ;;  %v17264_v38 = vld [vmem:[#allocation66_spill] sm:$0xff]  ;;  %v13198_v23 = vpop.permute.xlu0 %8705 }
 0x2d2   : > { %17247 = vst [vmem:[#allocation220_spill] sm:$0xff] %v13154_v58  ;;  %v8533_v0 = vunpack.i.h.bf16 %v17254_v24  ;;  %17258 = vst [vmem:[#allocation225_spill] sm:$0xff] %v13185_v21  ;;  %v17265_v20 = vunpack.i.l.bf16 %v17264_v38  ;;  %v17267_v13 = vld [vmem:[#allocation105_spill] sm:$0xff]  ;;  %v17268_v21 = vld [vmem:[#allocation79_spill] sm:$0xff] }
 0x2d3   : > { %v3378_v26 = vsel %vm2532_vm9, %v3370_v42, %v17259_v54  ;;  %v4912_v31 = vsel %vm2506_vm7, %v4904_v8, %v17263_v34  ;;  %17266 = vst [vmem:[#allocation214_spill] sm:$0xff] %v13198_v23  ;;  %v8507_v59 = vunpack.i.l.bf16 %v17267_v13  ;;  %v17269_v42 = vunpack.i.l.bf16 %v17268_v21  ;;  %v17271_v44 = vld [vmem:[#allocation169_spill] sm:$0xff]  ;;  %v17276_v21 = vld [vmem:[#allocation90_spill] sm:$0xff] }
 0x2d4   : > { %v4143_v22 = vsel %vm2497_vm6, %v4135_v51, %v17265_v20  ;;  %9125 = vrot.lane.b32.xlu1 %v17270_v4, %s10114_s29  ;;  %v17272_v41 = vunpack.i.l.bf16 %v17271_v44  ;;  %v17274_v20 = vld [vmem:[#allocation124_spill] sm:$0xff]  ;;  %v17275_v51 = vld [vmem:[#allocation107_spill] sm:$0xff]  ;;  %v17277_v36 = vunpack.i.l.bf16 %v17276_v21  ;;  %v17278_v4 = vunpack.i.h.bf16 %v17271_v44  ;;  %v17293_v44 = vld [vmem:[#allocation29_spill] sm:$0xff] }
 0x2d5   : > { %v4151_v54 = vsel %vm2506_vm7, %v4143_v22, %v17269_v42  ;;  %v4953_v38 = vsel %vm2488_vm5, %v17274_v20, %v8533_v0  ;;  %v8807_v34 = vunpack.i.l.bf16 %v17275_v51  ;;  %9120 = vrot.lane.b32.xlu0 %v12809_v49, %s10114_s29  ;;  %v13228_v23 = vpop.permute.xlu1 %8965  ;;  %v17281_v0 = vld [vmem:[#allocation109_spill] sm:$0xff] }
 0x2d6   : > { %v13211_v8 = vsel %vm2541_vm10, %v13179_v46, %v17272_v41  ;;  %v4159_v22 = vsel %vm869_vm0, %v4151_v54, %v17277_v36  ;;  %v13224_v42 = vsel %vm2541_vm10, %v3378_v26, %v17278_v4  ;;  %v2786_v41 = vsel %vm2506_vm7, %v2782_v3, %v8537_v14  ;;  %17280 = vst [vmem:[#allocation223_spill] sm:$0xff] %v13228_v23  ;;  %v17284_v49 = vld [vmem:[#allocation165_spill] sm:$0xff]  ;;  %v17286_v54 = vld [vmem:[#allocation18_spill] sm:$0xff]  ;;  %v13241_v3 = vpop.permute.xlu0 %8710 }
 0x2d7   : > { %17273 = vst [vmem:[#allocation147_spill] sm:$0xff] %v13211_v8  ;;  %17279 = vst [vmem:[#allocation63_spill] sm:$0xff] %v13224_v42  ;;  %v8593_v46 = vunpack.i.h.bf16 %v12583_v35  ;;  %v17282_v20 = vunpack.i.l.bf16 %v17281_v0  ;;  %v17285_v21 = vunpack.i.h.bf16 %v17284_v49  ;;  %v8532_v26 = vunpack.i.l.bf16 %v17254_v24  ;;  %v17288_v35 = vld [vmem:[#allocation69_spill] sm:$0xff]  ;;  %v17290_v49 = vld [vmem:[#allocation187_spill] sm:$0xff] }
 0x2d8   : > { %v8808_v4 = vunpack.i.h.bf16 %v17275_v51  ;;  %17287 = vst [vmem:[#allocation27_spill] sm:$0xff] %v13241_v3  ;;  %v17289_v14 = vunpack.i.l.bf16 %v17288_v35  ;;  %9135 = vrot.lane.b32.xlu1 %v17290_v49, %s10111_s26  ;;  %v17294_v23 = vunpack.i.l.bf16 %v17293_v44  ;;  %v17295_v3 = vld [vmem:[#allocation166_spill] sm:$0xff]  ;;  %v17298_v49 = vld [vmem:[#allocation89_spill] sm:$0xff] }
 0x2d9   : > { %v13233_v47 = vsel %vm2523_vm8, %v4159_v22, %v17282_v20  ;;  %v4920_v36 = vsel %vm869_vm0, %v4912_v31, %v17285_v21  ;;  %v17291_v31 = vld [vmem:[#allocation80_spill] sm:$0xff]  ;;  %9130 = vrot.lane.b32.xlu0 %v17219_v6, %s10111_s26  ;;  %v17300_v44 = vld [vmem:[#allocation38_spill] sm:$0xff]  ;;  %v17302_v8 = vld [vmem:[#allocation85_spill] sm:$0xff] }
 0x2da   : > { %17283 = vst [vmem:[#allocation87_spill] sm:$0xff] %v13233_v47  ;;  %v4175_v0 = vsel %vm2532_vm9, %v13233_v47, %v17289_v14  ;;  %v17292_v21 = vunpack.i.l.bf16 %v17291_v31  ;;  %v4961_v35 = vsel %vm2497_vm6, %v4953_v38, %v17294_v23  ;;  %v17296_v14 = vunpack.i.l.bf16 %v17295_v3  ;;  %v17297_v20 = vld [vmem:[#allocation44_spill] sm:$0xff]  ;;  %v17301_v23 = vld [vmem:[#allocation217_spill] sm:$0xff]  ;;  %v17304_v6 = vld [vmem:[#allocation95_spill] sm:$0xff]  ;;  %v13285_v42 = vpop.permute.xlu0 %8715 }
 0x2db   : > { %v17299_v31 = vunpack.i.h.bf16 %v17298_v49  ;;  %v8517_v51 = vunpack.i.l.bf16 %v17300_v44  ;;  %v4139_v38 = vsel %vm2488_vm5, %v17301_v23, %v8807_v34  ;;  %v17308_v23 = vld [vmem:[#allocation172_spill] sm:$0xff]  ;;  %v17317_v34 = vld [vmem:[#allocation19_spill] sm:$0xff] }
 0x2dc   : > { %v4183_v24 = vsel %vm2541_vm10, %v4175_v0, %v17292_v21  ;;  %v2790_v22 = vsel %vm869_vm0, %v2786_v41, %v17296_v14  ;;  %v13270_v21 = vsel %vm869_vm0, %v13024_v27, %v8507_v59  ;;  %v4137_v41 = vsel %vm2488_vm5, %v17302_v8, %v8593_v46  ;;  %v13277_v14 = vpop.permute.xlu1 %8970  ;;  %v17307_v27 = vld [vmem:[#allocation4_spill] sm:$0xff] }
 0x2dd   : > { %v5372_v47 = vpack.c.bf16 %v17297_v20, %v4183_v24  ;;  %v4928_v0 = vsel %vm2523_vm8, %v4920_v36, %v17299_v31  ;;  %17303 = vst [vmem:[#allocation75_spill] sm:$0xff] %v13277_v14  ;;  %v17305_v20 = vld [vmem:[#allocation61_spill] sm:$0xff]  ;;  %v17306_v36 = vld [vmem:[#allocation224_spill] sm:$0xff]  ;;  %v8557_v59 = vunpack.i.l.bf16 %v17307_v27  ;;  %v17309_v58 = vunpack.i.l.bf16 %v17308_v23  ;;  %9140 = vrot.lane.b32.xlu0 %v17239_v5, %s10115_s30 }
 0x2de   : > { %v4082_v49 = vsel %vm2488_vm5, %v17305_v20, %v8532_v26  ;;  %v4140_v31 = vsel %vm2488_vm5, %v17306_v36, %v8808_v4  ;;  %v17310_v8 = vunpack.i.l.bf16 %v17160_v15  ;;  %v17311_v26 = vpack.c.bf16 %v12646_v28, %v12641_v2  ;;  %v17312_v4 = vld [vmem:[#allocation156_spill] sm:$0xff] }
 0x2df   : > { %5667 = vmatprep.mubr.bf16.mxu1 %v5372_v47  ;;  %v4969_v46 = vsel %vm2506_vm7, %v4961_v35, %v17309_v58  ;;  %9145 = vrot.lane.b32.xlu1 %v17312_v4, %s10115_s30  ;;  %v17313_v47 = vld [vmem:[#allocation121_spill] sm:$0xff]  ;;  %v10044_v23 = vld [vmem:[%s16024_s5 + $0xc8] sm:$0xff]   ;;  %v17315_v35 = vunpack.i.l.bf16 %v17241_v45  ;;  %v8538_v2 = vunpack.i.h.bf16 %v17256_v16  ;;  %v17325_v58 = vunpack.i.l.bf16 %v17240_v56 }
 0x2e0   : > { %v2794_v24 = vsel %vm2523_vm8, %v2790_v22, %v17310_v8  ;;  %5668 = vmatmul.mubr.bf16.gmra.mrb[8].mxu1 %v17311_v26  ;;  %v17314_v20 = vunpack.i.h.bf16 %v17313_v47  ;;  %v17316_v8 = vunpack.i.l.bf16 %v17147_v43  ;;  %v17318_v47 = vld [vmem:[#allocation236_spill] sm:$0xff]  ;;  %7670 = vmatprep.subr.bf16.mxu1 %v10044_v23  ;;  %v17331_v23 = vld [vmem:[#allocation138_spill] sm:$0xff] }
 0x2e1   : > { %v4147_v22 = vsel %vm2497_vm6, %v4139_v38, %v17315_v35  ;;  %v17319_v28 = vpack.c.bf16 %v17317_v34, %v17318_v47  ;;  %v4913_v38 = vsel %vm2506_vm7, %v13074_v57, %v8517_v51  ;;  %v13330_v47 = vpop.permute.xlu1 %8975  ;;  %v2798_v34 = vsel %vm2532_vm9, %v2794_v24, %v17325_v58  ;;  %v13337_v51 = vpop.permute.xlu0 %8720  ;;  %9150 = vrot.lane.b32.xlu0 %v17232_v40, %s10112_s27  ;;  %v17348_v24 = vld [vmem:[#allocation70_spill] sm:$0xff]  ;;  %v17416_v14 = vld [vmem:[#allocation120_spill] sm:$0xff] }
 0x2e2   : > { %v4936_v36 = vsel %vm2532_vm9, %v4928_v0, %v17314_v20  ;;  %v4145_v26 = vsel %vm2497_vm6, %v4137_v41, %v17316_v8  ;;  %v10045_v0 = vld [vmem:[%s16024_s5 + $0x88] sm:$0xff]   ;;  %v17320_v20 = vld [vmem:[#allocation74_spill] sm:$0xff]  ;;  %v17322_v41 = vunpack.i.h.bf16 %v17241_v45  ;;  %17324 = vst [vmem:[#allocation199_spill] sm:$0xff] %v13330_v47  ;;  %v2814_v57 = vsel %vm2506_vm7, %v13172_v53, %v8557_v59 }
 0x2e3   : > { %5675 = vmatprep.mubr.bf16.mxu1 %v17319_v28  ;;  %v17321_v16 = vunpack.i.h.bf16 %v17320_v20  ;;  %v17323_v8 = vld [vmem:[#allocation43_spill] sm:$0xff]  ;;  %v17326_v20 = vld [vmem:[#allocation40_spill] sm:$0xff]  ;;  %7671 = vmatpush3.bf16.msra.mxu1 %v10045_v0  ;;  %v17332_v58 = vunpack.i.l.bf16 %v17261_v12  ;;  %v17333_v59 = vunpack.i.l.bf16 %v11644_v39  ;;  %v17337_v39 = vrot.slane %v12998_v11, 4 }
 0x2e4   : > { %v4148_v35 = vsel %vm2497_vm6, %v4140_v31, %v17322_v41  ;;  %v8552_v28 = vunpack.i.l.bf16 %v17323_v8  ;;  %v17329_v31 = vunpack.i.l.bf16 %v17197_v50  ;;  %v2787_v50 = vsel %vm2506_vm7, %v13122_v60, %v8538_v2  ;;  %v17340_v2 = vld [vmem:[#allocation167_spill] sm:$0xff] }
 0x2e5   : > { %v4090_v43 = vsel %vm2497_vm6, %v4082_v49, %v17321_v16  ;;  %v17327_v49 = vunpack.i.h.bf16 %v17326_v20  ;;  %v4155_v53 = vsel %vm2506_vm7, %v4147_v22, %v17332_v58  ;;  %v4153_v20 = vsel %vm2506_vm7, %v4145_v26, %v17333_v59  ;;  %v13380_v58 = vpop.permute.xlu1 %8980  ;;  %9160 = vrot.lane.b32.xlu0 %v17185_v25, %s10116_s16 }
 0x2e6   : > { %v13347_v16 = vsel %vm869_vm0, %v4969_v46, %v17329_v31  ;;  %v17335_v46 = vunpack.i.h.bf16 %v17261_v12  ;;  %v17338_v22 = vrot.slane %v12987_v32, 4  ;;  %v2802_v60 = vsel %vm2541_vm10, %v2798_v34, %v8552_v28  ;;  %17342 = vst [vmem:[#allocation13_spill] sm:$0xff] %v13380_v58  ;;  %v13391_v28 = vpop.permute.xlu0 %8725 }
 0x2e7   : > { %v13342_v45 = vsel %vm2541_vm10, %v4936_v36, %v17327_v49  ;;  %17330 = vst [vmem:[#allocation10_spill] sm:$0xff] %v13347_v16  ;;  %v17334_v36 = vld [vmem:[#allocation200_spill] sm:$0xff]  ;;  %v17336_v49 = vunpack.i.h.bf16 %v17193_v9  ;;  %v17341_v12 = vunpack.i.l.bf16 %v17340_v2  ;;  %v17343_v9 = vld [vmem:[#allocation162_spill] sm:$0xff]  ;;  %v17344_v59 = vunpack.i.l.bf16 %v16983_v1 }
 0x2e8   : > { %17328 = vst [vmem:[#allocation16_spill] sm:$0xff] %v13342_v45  ;;  %9155 = vrot.lane.b32.xlu1 %v17334_v36, %s10112_s27  ;;  %v4156_v0 = vsel %vm2506_vm7, %v4148_v35, %v17335_v46  ;;  %v13374_v26 = vsel %vm2858_vm3, %v17338_v22, %v17337_v39  ;;  %v17346_v22 = vld [vmem:[#allocation76_spill] sm:$0xff]  ;;  %v8813_v58 = vunpack.i.h.bf16 %v17348_v24  ;;  %v17349_v1 = vunpack.i.l.bf16 %v17286_v54 }
 0x2e9   : > { %v4098_v31 = vsel %vm2506_vm7, %v4090_v43, %v17336_v49  ;;  %17339 = vst [vmem:[#allocation26_spill] sm:$0xff] %v13374_v26  ;;  %v2818_v35 = vsel %vm869_vm0, %v2814_v57, %v17341_v12  ;;  %v5375_v43 = vpack.c.bf16 %v13342_v45, %v17343_v9  ;;  %v4985_v46 = vsel %vm2523_vm8, %v13347_v16, %v17344_v59  ;;  %v17345_v49 = vld [vmem:[#allocation157_spill] sm:$0xff] }
 0x2ea   : > { %v8613_v41 = vunpack.i.h.bf16 %v17345_v49  ;;  %v8612_v39 = vunpack.i.l.bf16 %v17345_v49  ;;  %v8622_v34 = vunpack.i.l.bf16 %v17346_v22  ;;  %v17347_v57 = vunpack.i.l.bf16 %v17107_v63  ;;  %9170 = vrot.lane.b32.xlu0 %v17252_v10, %s10113_s28 }
 0x2eb   : > { %v8812_v45 = vunpack.i.l.bf16 %v17348_v24  ;;  %v4163_v59 = vsel %vm869_vm0, %v4155_v53, %v17349_v1  ;;  %v17350_v16 = vunpack.i.h.bf16 %v17286_v54  ;;  %5676 = vmatmul.mubr.bf16.gmra.mrb[12].mxu1 %v5375_v43  ;;  %v17351_v63 = vunpack.i.h.bf16 %v17295_v3  ;;  %v13437_v1 = vpop.permute.xlu0 %8730 }
 0x2ec   : > { %v4161_v12 = vsel %vm869_vm0, %v4153_v20, %v17347_v57  ;;  %9165 = vrot.lane.b32.xlu1 %v17159_v30, %s10116_s16  ;;  %v2865_v57 = vrot.slane %v2802_v60, 4  ;;  %v17352_v9 = vunpack.i.l.bf16 %v17184_v18  ;;  %v17353_v47 = vunpack.i.h.bf16 %v17267_v13 }
 0x2ed   : > { %v4164_v49 = vsel %vm869_vm0, %v4156_v0, %v17350_v16  ;;  %v2791_v20 = vsel %vm869_vm0, %v2787_v50, %v17351_v63  ;;  %v17354_v54 = vpack.c.bf16 %v12969_v19, %v12959_v37  ;;  %v8558_v3 = vunpack.i.h.bf16 %v17307_v27  ;;  %v17355_v16 = vld [vmem:[#allocation234_spill] sm:$0xff]  ;;  %v13422_v0 = vpop.permute.xlu1 %8985  ;;  %v17360_v63 = vld [vmem:[#allocation71_spill] sm:$0xff] }
 0x2ee   : > { %v2822_v24 = vsel %vm2523_vm8, %v2818_v35, %v17352_v9  ;;  %v4106_v53 = vsel %vm869_vm0, %v4098_v31, %v17353_v47  ;;  %v8562_v50 = vunpack.i.l.bf16 %v17355_v16  ;;  %17356 = vst [vmem:[#allocation100_spill] sm:$0xff] %v13422_v0  ;;  %v17357_v60 = vunpack.i.l.bf16 %v17196_v55  ;;  %v17417_v16 = vld [vmem:[#allocation197_spill] sm:$0xff] }
 0x2ef   : > { %5683 = vmatprep.mubr.bf16.mxu1 %v17354_v54  ;;  %v17359_v13 = vunpack.i.l.bf16 %v17236_v48  ;;  %v4114_v31 = vsel %vm2523_vm8, %v4106_v53, %v8613_v41  ;;  %v4113_v9 = vsel %vm2523_vm8, %v13270_v21, %v8612_v39  ;;  %v4921_v27 = vsel %vm869_vm0, %v4913_v38, %v8622_v34 }
 0x2f0   : > { %v13427_v35 = vsel %vm2523_vm8, %v4161_v12, %v17357_v60  ;;  %v8727_v43 = vunpack.i.l.bf16 %v13391_v28  ;;  %v8527_v12 = vunpack.i.l.bf16 %v17360_v63  ;;  %v13442_v54 = vsel %vm2523_vm8, %v4163_v59, %v8812_v45 }
 0x2f1   : > { %17358 = vst [vmem:[#allocation72_spill] sm:$0xff] %v13427_v35  ;;  %v4993_v47 = vsel %vm2532_vm9, %v4985_v46, %v17359_v13  ;;  %17361 = vst [vmem:[#allocation98_spill] sm:$0xff] %v13442_v54  ;;  %v17362_v48 = vunpack.i.l.bf16 %v17260_v33  ;;  %v17363_v46 = vld [vmem:[#allocation151_spill] sm:$0xff]  ;;  %v13450_v21 = vsel %vm2523_vm8, %v4164_v49, %v8813_v58  ;;  %v17365_v38 = vunpack.i.h.bf16 %v17160_v15  ;;  %v7572_v58 = vpop.f32.mrb[0].mxu1  ;;  %v13468_v49 = vpop.permute.xlu1 %8990  ;;  %v17369_v15 = vld [vmem:[#allocation176_spill] sm:$0xff] }
 0x2f2   : > { %9175 = vrot.lane.b32.xlu1 %v17363_v46, %s10113_s28  ;;  %17364 = vst [vmem:[#allocation174_spill] sm:$0xff] %v13450_v21  ;;  %v17366_v45 = vunpack.i.l.bf16 %v17220_v7  ;;  %v17367_v59 = vunpack.i.l.bf16 %v17245_v17  ;;  %17368 = vst [vmem:[#allocation97_spill] sm:$0xff] %v13468_v49  ;;  %v17370_v53 = vunpack.i.l.bf16 %v17369_v15  ;;  %v17371_v60 = vunpack.i.h.bf16 %v17369_v15  ;;  %v17419_v33 = vld [vmem:[#allocation122_spill] sm:$0xff] }
 0x2f3   : > { %v2826_v41 = vsel %vm2532_vm9, %v2822_v24, %v17362_v48  ;;  %v13455_v39 = vsel %vm2523_vm8, %v2791_v20, %v17365_v38  ;;  %v17372_v7 = vunpack.i.l.bf16 %v17120_v52  ;;  %v17373_v17 = vrot.slane %v12969_v19, 4 }
 0x2f4   : > { %v4177_v34 = vsel %vm2532_vm9, %v13427_v35, %v17366_v45  ;;  %v13466_v24 = vsel %vm2541_vm10, %v4993_v47, %v17367_v59  ;;  %v4121_v20 = vsel %vm2532_vm9, %v4113_v9, %v17370_v53  ;;  %v4122_v13 = vsel %vm2532_vm9, %v4114_v31, %v17371_v60  ;;  %v17376_v45 = vld [vmem:[#allocation131_spill] sm:$0xff]  ;;  %v7573_v53 = vpop.f32.mrb[1].mxu1  ;;  %v17396_v35 = vld [vmem:[#allocation216_spill] sm:$0xff] }
 0x2f5   : > { %v4929_v48 = vsel %vm2523_vm8, %v4921_v27, %v17372_v7  ;;  %v17374_v47 = vrot.slane %v12959_v37, 4  ;;  %v17377_v59 = vrot.slane %v17376_v45, 4  ;;  %v13493_v9 = vsel %vm2506_vm7, %v13158_v61, %v8558_v3  ;;  %v17379_v27 = vld [vmem:[#allocation106_spill] sm:$0xff]  ;;  %v13500_v37 = vpop.permute.xlu0 %8735  ;;  %v17382_v61 = vld [vmem:[#allocation31_spill] sm:$0xff] }
 0x2f6   : > { %v13496_v31 = vsel %vm2541_vm10, %v2826_v41, %v8562_v50  ;;  %v4898_v15 = vsel %vm2488_vm5, %v17379_v27, %v8727_v43  ;;  %v8702_v60 = vunpack.i.l.bf16 %v13149_v29  ;;  %v13503_v7 = vadd.f32 %v7573_v53, %v7572_v58  ;;  %9185 = vrot.lane.b32.xlu1 %v17382_v61, %s10117_s17  ;;  %v17384_v43 = vld [vmem:[#allocation220_spill] sm:$0xff]  ;;  %v17386_v58 = vld [vmem:[#allocation63_spill] sm:$0xff] }
 0x2f7   : > { %v13484_v38 = vsel %vm2858_vm3, %v17374_v47, %v17373_v17  ;;  %v13489_v55 = vsel %vm2858_vm3, %v17377_v59, %v2865_v57  ;;  %v7575_v17 = vpop.f32.mrb[2].mxu1  ;;  %v17381_v57 = vpack.c.bf16 %v12998_v11, %v12987_v32  ;;  %v17383_v3 = vunpack.i.l.bf16 %v17233_v62  ;;  %v17385_v47 = vld [vmem:[#allocation143_spill] sm:$0xff] }
 0x2f8   : > { %17375 = vst [vmem:[#allocation116_spill] sm:$0xff] %v13484_v38  ;;  %17378 = vst [vmem:[#allocation235_spill] sm:$0xff] %v13489_v55  ;;  %v7576_v29 = vpop.f32.mrb[3].mxu1  ;;  %v17387_v59 = vld [vmem:[#allocation147_spill] sm:$0xff]  ;;  %v17546_v55 = vld [vmem:[#allocation204_spill] sm:$0xff] }
 0x2f9   : > { %17380 = vst [vmem:[#allocation117_spill] sm:$0xff] %v13503_v7  ;;  %5684 = vmatmul.mubr.bf16.gmra.mrb[16].mxu1 %v17381_v57  ;;  %v4185_v50 = vsel %vm2541_vm10, %v4177_v34, %v17383_v3  ;;  %v17388_v27 = vpack.c.bf16 %v17386_v58, %v17387_v59  ;;  %v17389_v32 = vld [vmem:[#allocation51_spill] sm:$0xff]  ;;  %v17394_v3 = vld [vmem:[#allocation221_spill] sm:$0xff]  ;;  %v17397_v58 = vunpack.i.h.bf16 %v17396_v35  ;;  %v13539_v19 = vadd.f32 %v7576_v29, %v7575_v17  ;;  %v17403_v29 = vld [vmem:[#allocation196_spill] sm:$0xff]  ;;  %v7578_v26 = vpop.f32.mrb[4].mxu1 }
 0x2fa   : > { %9180 = vrot.lane.b32.xlu0 %v17389_v32, %s10117_s17  ;;  %v17390_v53 = vld [vmem:[#allocation211_spill] sm:$0xff]  ;;  %v17395_v45 = vunpack.i.l.bf16 %v17394_v3  ;;  %v8728_v59 = vunpack.i.h.bf16 %v13391_v28 }
 0x2fb   : > { %5691 = vmatprep.mubr.bf16.mxu1 %v17388_v27  ;;  %v17391_v57 = vunpack.i.l.bf16 %v17390_v53  ;;  %v17392_v62 = vunpack.i.h.bf16 %v17390_v53  ;;  %v8623_v27 = vunpack.i.h.bf16 %v17346_v22  ;;  %v4906_v38 = vsel %vm2497_vm6, %v4898_v15, %v17397_v58  ;;  %17398 = vst [vmem:[#allocation46_spill] sm:$0xff] %v13539_v19  ;;  %v17402_v15 = vld [vmem:[#allocation218_spill] sm:$0xff]  ;;  %v17404_v19 = vld [vmem:[#allocation187_spill] sm:$0xff]  ;;  %v17406_v22 = vld [vmem:[#allocation33_spill] sm:$0xff] }
 0x2fc   : > { %v4937_v41 = vsel %vm2532_vm9, %v4929_v48, %v17395_v45  ;;  %v10047_v48 = vld [vmem:[%s16024_s5 + $0x90] sm:$0xff]   ;;  %v5388_v17 = vpack.c.bf16 %v17402_v15, %v4185_v50  ;;  %v3339_v58 = vsel %vm2488_vm5, %v17403_v29, %v8702_v60  ;;  %9195 = vrot.lane.b32.xlu1 %v17404_v19, %s10114_s29  ;;  %v17407_v60 = vunpack.i.h.bf16 %v17300_v44  ;;  %v17408_v29 = vld [vmem:[#allocation194_spill] sm:$0xff] }
 0x2fd   : > { %v13524_v7 = vsel %vm2541_vm10, %v4121_v20, %v17391_v57  ;;  %v13529_v34 = vsel %vm2541_vm10, %v4122_v13, %v17392_v62  ;;  %v13541_v20 = vpop.permute.xlu1 %8995  ;;  %v10046_v13 = vld [vmem:[%s16024_s5 + $0xd0] sm:$0xff]   ;;  %v17401_v57 = vld [vmem:[#allocation35_spill] sm:$0xff]  ;;  %v13552_v62 = vpop.permute.xlu0 %8740  ;;  %v13563_v53 = vsel %vm2541_vm10, %v4937_v41, %v8527_v12 }
 0x2fe   : > { %17393 = vst [vmem:[#allocation141_spill] sm:$0xff] %v13529_v34  ;;  %17399 = vst [vmem:[#allocation92_spill] sm:$0xff] %v13541_v20  ;;  %v17400_v45 = vld [vmem:[#allocation140_spill] sm:$0xff]  ;;  %v8673_v35 = vunpack.i.h.bf16 %v17401_v57  ;;  %7672 = vmatprep.subr.bf16.mxu1 %v10046_v13  ;;  %v8672_v50 = vunpack.i.l.bf16 %v17401_v57  ;;  %v4914_v28 = vsel %vm2506_vm7, %v4906_v38, %v17407_v60  ;;  %9190 = vrot.lane.b32.xlu0 %v17408_v29, %s10114_s29  ;;  %v17409_v19 = vld [vmem:[#allocation9_spill] sm:$0xff]  ;;  %v17414_v29 = vunpack.i.l.bf16 %v17304_v6  ;;  %v7579_v20 = vpop.f32.mrb[5].mxu1 }
 0x2ff   : > { %17405 = vst [vmem:[#allocation150_spill] sm:$0xff] %v13563_v53  ;;  %v17410_v12 = vld [vmem:[#allocation188_spill] sm:$0xff]  ;;  %7673 = vmatpush3.bf16.msra.mxu1 %v10047_v48  ;;  %v17412_v57 = vld [vmem:[#allocation34_spill] sm:$0xff]  ;;  %v13591_v48 = vadd.f32 %v7579_v20, %v7578_v26  ;;  %v7581_v49 = vpop.f32.mrb[6].mxu1  ;;  %v17420_v44 = vld [vmem:[#allocation193_spill] sm:$0xff] }
 0x300   : > { %v8648_v41 = vunpack.i.h.bf16 %v17410_v12  ;;  %v8647_v13 = vunpack.i.l.bf16 %v17410_v12  ;;  %v17413_v38 = vld [vmem:[#allocation178_spill] sm:$0xff]  ;;  %v3347_v15 = vsel %vm2497_vm6, %v3339_v58, %v17414_v29  ;;  %v8693_v12 = vunpack.i.h.bf16 %v17416_v14  ;;  %9205 = vrot.lane.b32.xlu1 %v17312_v4, %s10111_s26  ;;  %v17422_v58 = vld [vmem:[#allocation177_spill] sm:$0xff] }
 0x301   : > { %v13577_v0 = vpop.permute.xlu1 %9000  ;;  %v2555_v60 = vsel %vm2488_vm5, %v17413_v38, %v8673_v35  ;;  %v13586_v11 = vpop.permute.xlu0 %8745  ;;  %17418 = vst [vmem:[#allocation79_spill] sm:$0xff] %v13591_v48  ;;  %v17421_v21 = vpack.c.bf16 %v17419_v33, %v17420_v44  ;;  %v4922_v35 = vsel %vm869_vm0, %v4914_v28, %v8623_v27  ;;  %v2554_v38 = vsel %vm2488_vm5, %v17422_v58, %v8672_v50 }
 0x302   : > { %17411 = vst [vmem:[#allocation66_spill] sm:$0xff] %v13577_v0  ;;  %17415 = vst [vmem:[#allocation105_spill] sm:$0xff] %v13586_v11  ;;  %v3340_v0 = vsel %vm2488_vm5, %v17417_v16, %v8728_v59  ;;  %v8692_v29 = vunpack.i.l.bf16 %v17416_v14  ;;  %v17423_v11 = vld [vmem:[#allocation103_spill] sm:$0xff]  ;;  %v7582_v16 = vpop.f32.mrb[7].mxu1  ;;  %9200 = vrot.lane.b32.xlu0 %v17239_v5, %s10111_s26  ;;  %v3355_v27 = vsel %vm2506_vm7, %v3347_v15, %v8647_v13  ;;  %v10048_v14 = vld [vmem:[%s16024_s5 + $0xd8] sm:$0xff]   ;;  %v17427_v58 = vunpack.i.h.bf16 %v17304_v6 }
 0x303   : > { %5692 = vmatmul.mubr.bf16.gmra.mrb[20].mxu1 %v17421_v21  ;;  %v8698_v54 = vunpack.i.h.bf16 %v17423_v11  ;;  %v8697_v26 = vunpack.i.l.bf16 %v17423_v11  ;;  %v17424_v21 = vld [vmem:[#allocation60_spill] sm:$0xff]  ;;  %v13609_v20 = vadd.f32 %v7582_v16, %v7581_v49  ;;  %v10049_v11 = vld [vmem:[%s16024_s5 + $0x98] sm:$0xff]   ;;  %v17428_v13 = vunpack.i.h.bf16 %v17120_v52  ;;  %7674 = vmatprep.subr.bf16.mxu1 %v10048_v14 }
 0x304   : > { %5699 = vmatprep.mubr.bf16.mxu1 %v5388_v17  ;;  %v17426_v17 = vld [vmem:[#allocation27_spill] sm:$0xff]  ;;  %v3348_v15 = vsel %vm2497_vm6, %v3340_v0, %v17427_v58  ;;  %v17429_v59 = vld [vmem:[#allocation209_spill] sm:$0xff]  ;;  %v8737_v48 = vunpack.i.l.bf16 %v13500_v37  ;;  %9215 = vrot.lane.b32.xlu1 %v17334_v36, %s10115_s30  ;;  %v17430_v6 = vrot.slane %v17419_v33, 4  ;;  %v17431_v0 = vrot.slane %v17420_v44, 4  ;;  %v17433_v52 = vld [vmem:[#allocation32_spill] sm:$0xff] }
 0x305   : > { %17425 = vst [vmem:[#allocation159_spill] sm:$0xff] %v13609_v20  ;;  %v13611_v50 = vpop.permute.xlu1 %9005  ;;  %v8713_v5 = vunpack.i.h.bf16 %v17426_v17  ;;  %v8712_v28 = vunpack.i.l.bf16 %v17426_v17  ;;  %v13624_v49 = vpop.permute.xlu0 %8750  ;;  %v4930_v16 = vsel %vm2523_vm8, %v4922_v35, %v17428_v13  ;;  %v2503_v4 = vsel %vm2497_vm6, %v17429_v59, %v8693_v12  ;;  %v17434_v58 = vld [vmem:[#allocation113_spill] sm:$0xff]  ;;  %v17435_v59 = vld [vmem:[#allocation111_spill] sm:$0xff]  ;;  %7675 = vmatpush3.bf16.msra.mxu1 %v10049_v11  ;;  %v17436_v44 = vld [vmem:[#allocation214_spill] sm:$0xff] }
 0x306   : > { %v8738_v20 = vunpack.i.h.bf16 %v13500_v37  ;;  %v13640_v17 = vsel %vm2858_vm3, %v17431_v0, %v17430_v6  ;;  %v2502_v35 = vsel %vm2497_vm6, %v17433_v52, %v8692_v29  ;;  %v3284_v12 = vsel %vm2488_vm5, %v17434_v58, %v8698_v54  ;;  %9210 = vrot.lane.b32.xlu0 %v17232_v40, %s10115_s30  ;;  %v10050_v36 = vld [vmem:[%s16024_s5 + $0xe0] sm:$0xff]  }
 0x307   : > { %17432 = vst [vmem:[#allocation169_spill] sm:$0xff] %v13640_v17  ;;  %v3283_v37 = vsel %vm2488_vm5, %v17435_v59, %v8697_v26  ;;  %v8732_v13 = vunpack.i.l.bf16 %v13437_v1  ;;  %v3356_v29 = vsel %vm2506_vm7, %v3348_v15, %v8648_v41  ;;  %v17437_v6 = vld [vmem:[#allocation47_spill] sm:$0xff]  ;;  %v17440_v26 = vunpack.i.h.bf16 %v17394_v3  ;;  %7676 = vmatprep.subr.bf16.mxu1 %v10050_v36 }
 0x308   : > { %v17438_v0 = vunpack.i.l.bf16 %v17437_v6  ;;  %v10051_v40 = vld [vmem:[%s16024_s5 + $0xa0] sm:$0xff]   ;;  %v2563_v11 = vsel %vm2497_vm6, %v2555_v60, %v8713_v5  ;;  %v2562_v59 = vsel %vm2497_vm6, %v2554_v38, %v8712_v28  ;;  %v8718_v41 = vunpack.i.h.bf16 %v13285_v42  ;;  %9225 = vrot.lane.b32.xlu1 %v17159_v30, %s10112_s27  ;;  %v10052_v30 = vld [vmem:[%s16024_s5 + $0xe8] sm:$0xff]  }
 0x309   : > { %v13659_v52 = vpop.permute.xlu1 %9010  ;;  %v4938_v58 = vsel %vm2532_vm9, %v4930_v16, %v17440_v26  ;;  %v8717_v15 = vunpack.i.l.bf16 %v13285_v42  ;;  %v8756_v14 = vpop.permute.xlu0 %8755  ;;  %v2511_v3 = vsel %vm2506_vm7, %v2502_v35, %v8737_v48  ;;  %v17441_v26 = vpack.c.bf16 %v13529_v34, %v13524_v7  ;;  %7677 = vmatpush3.bf16.msra.mxu1 %v10051_v40  ;;  %v17536_v17 = vld [vmem:[#allocation75_spill] sm:$0xff] }
 0x30a   : > { %v3363_v54 = vsel %vm869_vm0, %v3355_v27, %v17438_v0  ;;  %17439 = vst [vmem:[#allocation124_spill] sm:$0xff] %v13659_v52  ;;  %v2512_v27 = vsel %vm2506_vm7, %v2503_v4, %v8738_v20  ;;  %v8758_v0 = vunpack.i.h.bf16 %v8756_v14  ;;  %v8757_v16 = vunpack.i.l.bf16 %v8756_v14  ;;  %9220 = vrot.lane.b32.xlu0 %v17185_v25, %s10112_s27  ;;  %v10053_v25 = vld [vmem:[%s16024_s5 + $0xa8] sm:$0xff]   ;;  %7678 = vmatprep.subr.bf16.mxu1 %v10052_v30 }
 0x30b   : > { %5700 = vmatmul.mubr.bf16.gmra.mrb[24].mxu1 %v17441_v26  ;;  %v8733_v60 = vunpack.i.h.bf16 %v13437_v1  ;;  %v17442_v38 = vunpack.i.h.bf16 %v17437_v6  ;;  %v3371_v5 = vsel %vm2523_vm8, %v3363_v54, %v8732_v13  ;;  %v17443_v48 = vpack.c.bf16 %v17384_v43, %v13466_v24 }
 0x30c   : > { %v17444_v4 = vunpack.i.h.bf16 %v17360_v63  ;;  %v8743_v1 = vunpack.i.h.bf16 %v13552_v62  ;;  %v8742_v28 = vunpack.i.l.bf16 %v13552_v62  ;;  %v2571_v35 = vsel %vm2506_vm7, %v2563_v11, %v8758_v0  ;;  %9235 = vrot.lane.b32.xlu1 %v17363_v46, %s10116_s16 }
 0x30d   : > { %v3364_v42 = vsel %vm869_vm0, %v3356_v29, %v17442_v38  ;;  %5707 = vmatprep.mubr.bf16.mxu1 %v17443_v48  ;;  %v2570_v24 = vsel %vm2506_vm7, %v2562_v59, %v8757_v16  ;;  %v13700_v13 = vpop.permute.xlu1 %9015  ;;  %v17446_v63 = vunpack.i.h.bf16 %v17400_v45  ;;  %v17447_v14 = vunpack.i.l.bf16 %v17400_v45  ;;  %v8761_v40 = vpop.permute.xlu0 %8760  ;;  %7679 = vmatpush3.bf16.msra.mxu1 %v10053_v25 }
 0x30e   : > { %v13691_v20 = vsel %vm2541_vm10, %v4938_v58, %v17444_v4  ;;  %v17448_v62 = vunpack.i.h.bf16 %v17406_v22  ;;  %v17449_v54 = vunpack.i.l.bf16 %v17406_v22  ;;  %v8763_v11 = vunpack.i.h.bf16 %v8761_v40  ;;  %9230 = vrot.lane.b32.xlu0 %v17252_v10, %s10116_s16 }
 0x30f   : > { %17445 = vst [vmem:[#allocation107_spill] sm:$0xff] %v13691_v20  ;;  %v2520_v36 = vsel %vm869_vm0, %v2512_v27, %v17446_v63  ;;  %v2519_v29 = vsel %vm869_vm0, %v2511_v3, %v17447_v14  ;;  %v8762_v59 = vunpack.i.l.bf16 %v8761_v40  ;;  %v17450_v27 = vunpack.i.l.bf16 %v17424_v21 }
 0x310   : > { %v2579_v6 = vsel %vm869_vm0, %v2571_v35, %v17448_v62  ;;  %v2578_v58 = vsel %vm869_vm0, %v2570_v24, %v17449_v54  ;;  %v17451_v3 = vunpack.i.h.bf16 %v17424_v21  ;;  %v3372_v16 = vsel %vm2523_vm8, %v3364_v42, %v8733_v60  ;;  %9245 = vrot.lane.b32.xlu1 %v17382_v61, %s10113_s28 }
 0x311   : > { %v2586_v45 = vsel %vm2523_vm8, %v2578_v58, %v17450_v27  ;;  %v5391_v22 = vpack.c.bf16 %v13691_v20, %v13563_v53  ;;  %v3292_v38 = vsel %vm2497_vm6, %v3284_v12, %v8743_v1  ;;  %v3291_v48 = vsel %vm2497_vm6, %v3283_v37, %v8742_v28  ;;  %v13734_v4 = vpop.permute.xlu1 %9020  ;;  %v10054_v1 = vld [vmem:[%s16024_s5 + $0xf0] sm:$0xff]   ;;  %v17512_v53 = vld [vmem:[#allocation142_spill] sm:$0xff] }
 0x312   : > { %v2587_v0 = vsel %vm2523_vm8, %v2579_v6, %v17451_v3  ;;  %v2594_v26 = vsel %vm2532_vm9, %v2586_v45, %v8717_v15  ;;  %v8753_v10 = vunpack.i.h.bf16 %v13624_v49  ;;  %v8752_v42 = vunpack.i.l.bf16 %v13624_v49  ;;  %v8766_v15 = vpop.permute.xlu0 %8765  ;;  %v10055_v28 = vld [vmem:[%s16024_s5 + $0xb0] sm:$0xff]   ;;  %9240 = vrot.lane.b32.xlu0 %v17389_v32, %s10113_s28  ;;  %7680 = vmatprep.subr.bf16.mxu1 %v10054_v1 }
 0x313   : > { %v2595_v46 = vsel %vm2532_vm9, %v2587_v0, %v8718_v41  ;;  %v13737_v21 = vsel %vm2541_vm10, %v2594_v26, %v8762_v59  ;;  %v17454_v41 = vunpack.i.l.bf16 %v17412_v57  ;;  %v17455_v37 = vunpack.i.h.bf16 %v17412_v57  ;;  %5708 = vmatmul.mubr.bf16.gmra.mrb[28].mxu1 %v5391_v22  ;;  %v17472_v1 = vld [vmem:[#allocation160_spill] sm:$0xff] }
 0x314   : > { %17452 = vst [vmem:[#allocation90_spill] sm:$0xff] %v13737_v21  ;;  %v13740_v60 = vsel %vm2541_vm10, %v2595_v46, %v8763_v11  ;;  %v8707_v35 = vunpack.i.l.bf16 %v17436_v44  ;;  %v17456_v57 = vunpack.i.l.bf16 %v17331_v23  ;;  %v17458_v25 = vunpack.i.h.bf16 %v17331_v23  ;;  %7681 = vmatpush3.bf16.msra.mxu1 %v10055_v28  ;;  %v17467_v46 = vld [vmem:[#allocation233_spill] sm:$0xff] }
 0x315   : > { %17453 = vst [vmem:[#allocation109_spill] sm:$0xff] %v13740_v60  ;;  %v2528_v12 = vsel %vm2523_vm8, %v2519_v29, %v17454_v41  ;;  %v2529_v30 = vsel %vm2523_vm8, %v2520_v36, %v17455_v37  ;;  %v5396_v49 = vpack.c.bf16 %v13740_v60, %v13737_v21  ;;  %v17459_v36 = vld [vmem:[#allocation96_spill] sm:$0xff]  ;;  %v17460_v62 = vunpack.i.h.bf16 %v17409_v19  ;;  %v13781_v40 = vpop.permute.xlu1 %9025  ;;  %9255 = vrot.lane.b32.xlu1 %v17467_v46, %s10117_s17  ;;  %v17469_v37 = vld [vmem:[#allocation201_spill] sm:$0xff]  ;;  %v17549_v60 = vld [vmem:[#allocation199_spill] sm:$0xff] }
 0x316   : > { %v13764_v24 = vsel %vm2532_vm9, %v3371_v5, %v17456_v57  ;;  %v3380_v63 = vsel %vm2532_vm9, %v3372_v16, %v17458_v25  ;;  %v8653_v14 = vunpack.i.h.bf16 %v17459_v36  ;;  %v8652_v29 = vunpack.i.l.bf16 %v17459_v36  ;;  %v17462_v5 = vld [vmem:[#allocation219_spill] sm:$0xff]  ;;  %v10057_v16 = vld [vmem:[%s16024_s5 + $0xb8] sm:$0xff]  }
 0x317   : > { %17457 = vst [vmem:[#allocation165_spill] sm:$0xff] %v13764_v24  ;;  %v3300_v6 = vsel %vm2506_vm7, %v3292_v38, %v17460_v62  ;;  %v17461_v54 = vunpack.i.l.bf16 %v17409_v19  ;;  %v8683_v23 = vunpack.i.h.bf16 %v17462_v5  ;;  %v8682_v58 = vunpack.i.l.bf16 %v17462_v5  ;;  %5715 = vmatprep.mubr.bf16.mxu1 %v5396_v49  ;;  %v13787_v19 = vpop.permute.xlu0 %8770  ;;  %v17479_v5 = vld [vmem:[#allocation149_spill] sm:$0xff]  ;;  %v17542_v62 = vld [vmem:[#allocation223_spill] sm:$0xff] }
 0x318   : > { %v2537_v11 = vsel %vm2532_vm9, %v2528_v12, %v8707_v35  ;;  %v17463_v59 = vunpack.i.h.bf16 %v17436_v44  ;;  %v3387_v3 = vsel %vm2541_vm10, %v13764_v24, %v8652_v29  ;;  %v13798_v0 = vsel %vm2541_vm10, %v3380_v63, %v8653_v14  ;;  %v10056_v44 = vld [vmem:[%s16024_s5 + $0xf8] sm:$0xff]  }
 0x319   : > { %v3299_v61 = vsel %vm2506_vm7, %v3291_v48, %v17461_v54  ;;  %v13790_v45 = vsel %vm2541_vm10, %v2537_v11, %v8752_v42  ;;  %17466 = vst [vmem:[#allocation80_spill] sm:$0xff] %v13798_v0  ;;  %v8768_v22 = vunpack.i.h.bf16 %v8766_v15  ;;  %v8767_v26 = vunpack.i.l.bf16 %v8766_v15  ;;  %v17468_v12 = vld [vmem:[#allocation101_spill] sm:$0xff]  ;;  %7682 = vmatprep.subr.bf16.mxu1 %v10056_v44  ;;  %v13829_v57 = vpop.permute.xlu1 %9030  ;;  %9265 = vrot.lane.b32.xlu1 %v17479_v5, %s10111_s26  ;;  %v17482_v44 = vld [vmem:[#allocation168_spill] sm:$0xff] }
 0x31a   : > { %v2538_v27 = vsel %vm2532_vm9, %v2529_v30, %v17463_v59  ;;  %17464 = vst [vmem:[#allocation18_spill] sm:$0xff] %v13790_v45  ;;  %v3307_v38 = vsel %vm869_vm0, %v3299_v61, %v8682_v58  ;;  %v3308_v48 = vsel %vm869_vm0, %v3300_v6, %v8683_v23  ;;  %v8723_v42 = vunpack.i.h.bf16 %v13337_v51  ;;  %7683 = vmatpush3.bf16.msra.mxu1 %v10057_v16  ;;  %v17478_v6 = vld [vmem:[#allocation21_spill] sm:$0xff] }
 0x31b   : > { %v13793_v32 = vsel %vm2541_vm10, %v2538_v27, %v8753_v10  ;;  %v8553_v10 = vunpack.i.h.bf16 %v17323_v8  ;;  %v8722_v41 = vunpack.i.l.bf16 %v13337_v51  ;;  %v17470_v30 = vpack.i.bf16 %v17468_v12, %v17469_v37  ;;  %v13835_v36 = vpop.permute.xlu0 %8780  ;;  %v17481_v27 = vld [vmem:[#allocation232_spill] sm:$0xff] }
 0x31c   : > { %17465 = vst [vmem:[#allocation69_spill] sm:$0xff] %v13793_v32  ;;  %v17471_v15 = vrot.slane %v13496_v31, 4  ;;  %v17473_v28 = vrot.slane %v17472_v1, 4  ;;  %v8822_v49 = vunpack.i.l.bf16 %v17385_v47  ;;  %v17475_v8 = vunpack.i.h.bf16 %v17340_v2  ;;  %v17509_v31 = vld [vmem:[#allocation55_spill] sm:$0xff] }
 0x31d   : > { %9250 = vrot.lane.b32.xlu0 %v17470_v30, %s10117_s17  ;;  %v5395_v25 = vpack.c.bf16 %v13793_v32, %v13790_v45  ;;  %v5400_v14 = vpack.c.bf16 %v13798_v0, %v3387_v3  ;;  %v3315_v29 = vsel %vm2523_vm8, %v3307_v38, %v8722_v41  ;;  %v3316_v2 = vsel %vm2523_vm8, %v3308_v48, %v8723_v42  ;;  %v17483_v38 = vld [vmem:[#allocation20_spill] sm:$0xff]  ;;  %v17484_v48 = vld [vmem:[#allocation45_spill] sm:$0xff]  ;;  %v13865_v37 = vpop.permute.xlu1 %9035 }
 0x31e   : > { %v13822_v35 = vsel %vm2858_vm3, %v17473_v28, %v17471_v15  ;;  %v2819_v51 = vsel %vm869_vm0, %v13493_v9, %v17475_v8  ;;  %v8833_v54 = vunpack.i.h.bf16 %v17478_v6  ;;  %v8832_v61 = vunpack.i.l.bf16 %v17478_v6  ;;  %v17487_v41 = vld [vmem:[#allocation237_spill] sm:$0xff]  ;;  %v17490_v28 = vld [vmem:[#allocation98_spill] sm:$0xff]  ;;  %v17494_v6 = vld [vmem:[#allocation7_spill] sm:$0xff] }
 0x31f   : > { %17474 = vst [vmem:[#allocation29_spill] sm:$0xff] %v13822_v35  ;;  %5716 = vmatmul.mubr.bf16.gmra.mrb[32].mxu1 %v5395_v25  ;;  %v3323_v23 = vsel %vm2532_vm9, %v3315_v29, %v8767_v26  ;;  %v3324_v58 = vsel %vm2532_vm9, %v3316_v2, %v8768_v22  ;;  %v17480_v11 = vunpack.i.h.bf16 %v17240_v56  ;;  %v8843_v3 = vunpack.i.h.bf16 %v17481_v27  ;;  %v13867_v30 = vpop.permute.xlu0 %8790  ;;  %9275 = vrot.lane.b32.xlu1 %v17494_v6, %s10112_s27  ;;  %v17503_v9 = vld [vmem:[#allocation41_spill] sm:$0xff] }
 0x320   : > { %v8643_v16 = vunpack.i.h.bf16 %v17482_v44  ;;  %v8642_v46 = vunpack.i.l.bf16 %v17482_v44  ;;  %5723 = vmatprep.mubr.bf16.mxu1 %v5400_v14  ;;  %v17485_v42 = vpack.i.bf16 %v17483_v38, %v17484_v48  ;;  %v17486_v26 = vunpack.i.h.bf16 %v17184_v18  ;;  %v17493_v14 = vld [vmem:[#allocation104_spill] sm:$0xff] }
 0x321   : > { %v2799_v59 = vsel %vm2532_vm9, %v13455_v39, %v17480_v11  ;;  %v8842_v56 = vunpack.i.l.bf16 %v17481_v27  ;;  %v8853_v39 = vunpack.i.h.bf16 %v17487_v41  ;;  %v8852_v12 = vunpack.i.l.bf16 %v17487_v41  ;;  %v17496_v11 = vld [vmem:[#allocation81_spill] sm:$0xff]  ;;  %v17500_v41 = vld [vmem:[#allocation148_spill] sm:$0xff] }
 0x322   : > { %9260 = vrot.lane.b32.xlu0 %v17485_v42, %s10114_s29  ;;  %v2823_v22 = vsel %vm2523_vm8, %v2819_v51, %v17486_v26  ;;  %v13870_v15 = vsel %vm2541_vm10, %v3323_v23, %v8642_v46  ;;  %v13873_v1 = vsel %vm2541_vm10, %v3324_v58, %v8643_v16  ;;  %v4179_v18 = vsel %vm2532_vm9, %v17490_v28, %v8822_v49  ;;  %v17492_v51 = vld [vmem:[#allocation174_spill] sm:$0xff] }
 0x323   : > { %17488 = vst [vmem:[#allocation166_spill] sm:$0xff] %v13870_v15  ;;  %17489 = vst [vmem:[#allocation89_spill] sm:$0xff] %v13873_v1  ;;  %v17491_v8 = vunpack.i.h.bf16 %v17385_v47  ;;  %v8863_v29 = vunpack.i.h.bf16 %v17493_v14  ;;  %v8862_v2 = vunpack.i.l.bf16 %v17493_v14  ;;  %v4187_v23 = vsel %vm2541_vm10, %v4179_v18, %v8832_v61  ;;  %v17497_v47 = vld [vmem:[#allocation84_spill] sm:$0xff]  ;;  %v17498_v46 = vld [vmem:[#allocation6_spill] sm:$0xff]  ;;  %v8816_v14 = vpop.permute.xlu0 %8815  ;;  %9285 = vrot.lane.b32.xlu1 %v17503_v9, %s10113_s28 }
 0x324   : > { %v8468_v27 = vunpack.i.h.bf16 %v17496_v11  ;;  %v13891_v49 = vsel %vm2541_vm10, %v2799_v59, %v8553_v10  ;;  %v8873_v44 = vunpack.i.h.bf16 %v17497_v47  ;;  %v8872_v16 = vunpack.i.l.bf16 %v17497_v47  ;;  %v17499_v42 = vld [vmem:[#allocation234_spill] sm:$0xff]  ;;  %v17501_v18 = vld [vmem:[#allocation73_spill] sm:$0xff] }
 0x325   : > { %v4180_v25 = vsel %vm2532_vm9, %v17492_v51, %v17491_v8  ;;  %v4956_v61 = vsel %vm2488_vm5, %v17500_v41, %v8843_v3  ;;  %v13902_v8 = vpop.permute.xlu1 %9040  ;;  %v5399_v10 = vpack.c.bf16 %v13873_v1, %v13870_v15  ;;  %v8818_v26 = vunpack.i.h.bf16 %v8816_v14 }
 0x326   : > { %v13887_v58 = vsel %vm2541_vm10, %v4180_v25, %v8833_v54  ;;  %9270 = vrot.lane.b32.xlu0 %v17498_v46, %s10115_s30  ;;  %v4955_v54 = vsel %vm2488_vm5, %v17501_v18, %v8842_v56  ;;  %v13907_v59 = vsel %vm2532_vm9, %v2823_v22, %v8468_v27  ;;  %v4964_v25 = vsel %vm2497_vm6, %v4956_v61, %v8853_v39  ;;  %v17502_v56 = vld [vmem:[#allocation105_spill] sm:$0xff] }
 0x327   : > { %17495 = vst [vmem:[#allocation38_spill] sm:$0xff] %v13887_v58  ;;  %v4963_v51 = vsel %vm2497_vm6, %v4955_v54, %v8852_v12  ;;  %v5404_v11 = vpack.c.bf16 %v13887_v58, %v4187_v23  ;;  %v4972_v47 = vsel %vm2506_vm7, %v4964_v25, %v8863_v29  ;;  %v8748_v41 = vunpack.i.h.bf16 %v17502_v56  ;;  %5724 = vmatmul.mubr.bf16.gmra.mrb[36].mxu1 %v5399_v10  ;;  %v17505_v29 = vld [vmem:[#allocation22_spill] sm:$0xff] }
 0x328   : > { %v4971_v3 = vsel %vm2506_vm7, %v4963_v51, %v8862_v2  ;;  %v8747_v18 = vunpack.i.l.bf16 %v17502_v56  ;;  %v4980_v39 = vsel %vm869_vm0, %v4972_v47, %v8873_v44  ;;  %v8773_v12 = vunpack.i.h.bf16 %v13787_v19  ;;  %v17506_v2 = vld [vmem:[#allocation50_spill] sm:$0xff]  ;;  %v17507_v51 = vld [vmem:[#allocation112_spill] sm:$0xff] }
 0x329   : > { %v13919_v22 = vsel %vm869_vm0, %v4971_v3, %v8872_v16  ;;  %v8772_v23 = vunpack.i.l.bf16 %v13787_v19  ;;  %5731 = vmatprep.mubr.bf16.mxu1 %v5404_v11  ;;  %v8883_v27 = vunpack.i.h.bf16 %v17506_v2  ;;  %v8882_v61 = vunpack.i.l.bf16 %v17506_v2  ;;  %v13930_v16 = vpop.permute.xlu1 %9045  ;;  %v8826_v3 = vpop.permute.xlu0 %8825  ;;  %v17508_v47 = vld [vmem:[#allocation136_spill] sm:$0xff] }
 0x32a   : > { %17504 = vst [vmem:[#allocation217_spill] sm:$0xff] %v13919_v22  ;;  %9280 = vrot.lane.b32.xlu0 %v17505_v29, %s10116_s16  ;;  %v8783_v54 = vunpack.i.h.bf16 %v13835_v36  ;;  %v8782_v10 = vunpack.i.l.bf16 %v13835_v36  ;;  %v8893_v44 = vunpack.i.h.bf16 %v17507_v51  ;;  %v8892_v25 = vunpack.i.l.bf16 %v17507_v51  ;;  %v17510_v36 = vld [vmem:[#allocation17_spill] sm:$0xff] }
 0x32b   : > { %v8793_v19 = vunpack.i.h.bf16 %v13867_v30  ;;  %v8792_v11 = vunpack.i.l.bf16 %v13867_v30  ;;  %v4084_v56 = vsel %vm2488_vm5, %v17508_v47, %v8748_v41  ;;  %v4083_v2 = vsel %vm2488_vm5, %v17509_v31, %v8747_v18  ;;  %9295 = vrot.lane.b32.xlu1 %v17510_v36, %s10117_s17  ;;  %v17511_v30 = vld [vmem:[#allocation8_spill] sm:$0xff] }
 0x32c   : > { %v8817_v58 = vunpack.i.l.bf16 %v8816_v14  ;;  %v4092_v28 = vsel %vm2497_vm6, %v4084_v56, %v8773_v12  ;;  %v4091_v51 = vsel %vm2497_vm6, %v4083_v2, %v8772_v23  ;;  %v8828_v0 = vunpack.i.h.bf16 %v8826_v3 }
 0x32d   : > { %v8827_v24 = vunpack.i.l.bf16 %v8826_v3  ;;  %v8903_v20 = vunpack.i.h.bf16 %v17512_v53  ;;  %v8902_v41 = vunpack.i.l.bf16 %v17512_v53  ;;  %v4099_v31 = vsel %vm2506_vm7, %v4091_v51, %v8782_v10  ;;  %v13950_v18 = vpop.permute.xlu1 %9050  ;;  %v8836_v56 = vpop.permute.xlu0 %8835 }
 0x32e   : > { %9290 = vrot.lane.b32.xlu0 %v17511_v30, %s10117_s17  ;;  %v4100_v14 = vsel %vm2506_vm7, %v4092_v28, %v8783_v54  ;;  %17513 = vst [vmem:[#allocation85_spill] sm:$0xff] %v13950_v18  ;;  %v4987_v12 = vsel %vm2523_vm8, %v13919_v22, %v8882_v61  ;;  %v4988_v23 = vsel %vm2523_vm8, %v4980_v39, %v8883_v27  ;;  %v8838_v43 = vunpack.i.h.bf16 %v8836_v56 }
 0x32f   : > { %v4107_v3 = vsel %vm869_vm0, %v4099_v31, %v8792_v11  ;;  %v4108_v47 = vsel %vm869_vm0, %v4100_v14, %v8793_v19  ;;  %v8837_v10 = vunpack.i.l.bf16 %v8836_v56  ;;  %9305 = vrot.lane.b32.xlu1 %v17498_v46, %s10111_s26  ;;  %v4995_v27 = vsel %vm2532_vm9, %v4987_v12, %v8892_v25  ;;  %v17518_v25 = vld [vmem:[#allocation23_spill] sm:$0xff]  ;;  %v17524_v12 = vld [vmem:[#allocation37_spill] sm:$0xff] }
 0x330   : > { %v4115_v2 = vsel %vm2523_vm8, %v4107_v3, %v8817_v58  ;;  %v4116_v53 = vsel %vm2523_vm8, %v4108_v47, %v8818_v26  ;;  %v4996_v61 = vsel %vm2532_vm9, %v4988_v23, %v8893_v44  ;;  %v5003_v19 = vsel %vm2541_vm10, %v4995_v27, %v8902_v41  ;;  %v17522_v41 = vld [vmem:[#allocation62_spill] sm:$0xff]  ;;  %v17523_v14 = vld [vmem:[#allocation39_spill] sm:$0xff]  ;;  %v17526_v47 = vld [vmem:[#allocation53_spill] sm:$0xff] }
 0x331   : > { %v4123_v28 = vsel %vm2532_vm9, %v4115_v2, %v8827_v24  ;;  %v4124_v39 = vsel %vm2532_vm9, %v4116_v53, %v8828_v0  ;;  %v13967_v54 = vpop.permute.xlu1 %9055  ;;  %v17517_v24 = vunpack.i.h.bf16 %v17499_v42  ;;  %v13985_v44 = vpop.permute.xlu0 %8845  ;;  %v17519_v11 = vrot.slane %v17483_v38, 4  ;;  %v17521_v42 = vld [vmem:[#allocation82_spill] sm:$0xff]  ;;  %v17527_v53 = vld [vmem:[#allocation195_spill] sm:$0xff] }
 0x332   : > { %9300 = vrot.lane.b32.xlu0 %v17479_v5, %s10114_s29  ;;  %v13970_v58 = vsel %vm2541_vm10, %v4123_v28, %v8837_v10  ;;  %v13973_v26 = vsel %vm2541_vm10, %v4124_v39, %v8838_v43  ;;  %v13977_v5 = vsel %vm2541_vm10, %v4996_v61, %v8903_v20  ;;  %v17520_v43 = vld [vmem:[#allocation49_spill] sm:$0xff]  ;;  %v14002_v23 = vpack.i.bf16 %v17524_v12, %v17523_v14  ;;  %v17525_v3 = vld [vmem:[#allocation58_spill] sm:$0xff]  ;;  %v17538_v38 = vld [vmem:[#allocation175_spill] sm:$0xff] }
 0x333   : > { %17514 = vst [vmem:[#allocation95_spill] sm:$0xff] %v13970_v58  ;;  %17515 = vst [vmem:[#allocation61_spill] sm:$0xff] %v13973_v26  ;;  %v13983_v0 = vsel %vm2541_vm10, %v13907_v59, %v17517_v24  ;;  %v13990_v51 = vpack.i.bf16 %v17519_v11, %v17518_v25  ;;  %v5403_v20 = vpack.c.bf16 %v13973_v26, %v13970_v58  ;;  %9315 = vrot.lane.b32.xlu1 %v17505_v29, %s10112_s27  ;;  %v17529_v25 = vld [vmem:[#allocation65_spill] sm:$0xff]  ;;  %v17532_v12 = vld [vmem:[#allocation42_spill] sm:$0xff] }
 0x334   : > { %17516 = vst [vmem:[#allocation224_spill] sm:$0xff] %v13977_v5  ;;  %v14006_v56 = vpack.i.bf16 %v17526_v47, %v17525_v3  ;;  %v2875_v2 = vrot.slane %v13891_v49, 4  ;;  %v8948_v10 = vunpack.i.h.bf16 %v17527_v53  ;;  %v8947_v28 = vunpack.i.l.bf16 %v17527_v53  ;;  %v17530_v11 = vld [vmem:[#allocation125_spill] sm:$0xff]  ;;  %v17531_v49 = vld [vmem:[#allocation48_spill] sm:$0xff]  ;;  %v17537_v53 = vld [vmem:[#allocation179_spill] sm:$0xff] }
 0x335   : > { %v5408_v39 = vpack.c.bf16 %v13977_v5, %v5003_v19  ;;  %v2877_v27 = vrot.slane %v13983_v0, 4  ;;  %5732 = vmatmul.mubr.bf16.gmra.mrb[40].mxu1 %v5403_v20  ;;  %v14016_v24 = vpop.permute.xlu1 %9060  ;;  %v14022_v3 = vpack.i.bf16 %v17532_v12, %v17531_v49  ;;  %v17533_v47 = vld [vmem:[#allocation93_spill] sm:$0xff]  ;;  %v17534_v59 = vld [vmem:[#allocation184_spill] sm:$0xff]  ;;  %v14028_v61 = vpop.permute.xlu0 %8855  ;;  %v17535_v5 = vld [vmem:[#allocation198_spill] sm:$0xff]  ;;  %v8973_v33 = vunpack.i.h.bf16 %v17536_v17 }
 0x336   : > { %9310 = vrot.lane.b32.xlu0 %v17494_v6, %s10115_s30  ;;  %17528 = vst [vmem:[#allocation4_spill] sm:$0xff] %v14016_v24  ;;  %v8928_v19 = vunpack.i.h.bf16 %v17534_v59  ;;  %v8927_v20 = vunpack.i.l.bf16 %v17534_v59  ;;  %v2496_v31 = vsel %vm2488_vm5, %v17537_v53, %v8948_v10  ;;  %v2495_v0 = vsel %vm2488_vm5, %v17538_v38, %v8947_v28  ;;  %v17539_v59 = vld [vmem:[#allocation133_spill] sm:$0xff]  ;;  %v17543_v26 = vld [vmem:[#allocation100_spill] sm:$0xff] }
 0x337   : > { %5739 = vmatprep.mubr.bf16.mxu1 %v5408_v39  ;;  %9325 = vrot.lane.b32.xlu1 %v17511_v30, %s10113_s28  ;;  %v8972_v39 = vunpack.i.l.bf16 %v17536_v17  ;;  %v17540_v22 = vrot.slane %v17539_v59, 4  ;;  %v8988_v58 = vunpack.i.h.bf16 %v17543_v26  ;;  %v8987_v63 = vunpack.i.l.bf16 %v17543_v26  ;;  %v17544_v10 = vld [vmem:[#allocation97_spill] sm:$0xff]  ;;  %v17547_v17 = vld [vmem:[#allocation163_spill] sm:$0xff] }
 0x338   : > { %v8993_v53 = vunpack.i.h.bf16 %v17544_v10  ;;  %v8992_v38 = vunpack.i.l.bf16 %v17544_v10  ;;  %v9023_v28 = vunpack.i.h.bf16 %v13734_v4  ;;  %v2557_v1 = vsel %vm2488_vm5, %v17546_v55, %v8973_v33  ;;  %v17548_v10 = vld [vmem:[#allocation203_spill] sm:$0xff] }
 0x339   : > { %v14046_v14 = vsel %vm2858_vm3, %v17540_v22, %v2875_v2  ;;  %v14052_v35 = vpop.permute.xlu1 %9065  ;;  %v14057_v59 = vpop.permute.xlu0 %8865  ;;  %v9022_v26 = vunpack.i.l.bf16 %v13734_v4  ;;  %v9043_v15 = vunpack.i.h.bf16 %v13902_v8  ;;  %v9042_v32 = vunpack.i.l.bf16 %v13902_v8  ;;  %v17550_v2 = vld [vmem:[#allocation13_spill] sm:$0xff]  ;;  %v17551_v8 = vld [vmem:[#allocation152_spill] sm:$0xff] }
 0x33a   : > { %9320 = vrot.lane.b32.xlu0 %v17503_v9, %s10116_s16  ;;  %17541 = vst [vmem:[#allocation172_spill] sm:$0xff] %v14046_v14  ;;  %v2556_v45 = vsel %vm2488_vm5, %v17548_v10, %v8972_v39  ;;  %v8978_v21 = vunpack.i.h.bf16 %v17549_v60  ;;  %v8977_v18 = vunpack.i.l.bf16 %v17549_v60  ;;  %v2505_v55 = vsel %vm2497_vm6, %v2496_v31, %v8988_v58  ;;  %v17552_v39 = vld [vmem:[#allocation155_spill] sm:$0xff] }
 0x33b   : > { %9335 = vrot.lane.b32.xlu1 %v17547_v17, %s10117_s17  ;;  %v2504_v4 = vsel %vm2497_vm6, %v2495_v0, %v8987_v63  ;;  %v3286_v14 = vsel %vm2488_vm5, %v17551_v8, %v8993_v53  ;;  %v3285_v10 = vsel %vm2488_vm5, %v17552_v39, %v8992_v38  ;;  %v2565_v60 = vsel %vm2497_vm6, %v2557_v1, %v9023_v28  ;;  %v17553_v63 = vld [vmem:[#allocation86_spill] sm:$0xff] }
 0x33c   : > { %v2514_v33 = vsel %vm2506_vm7, %v2505_v55, %v9043_v15  ;;  %v2513_v58 = vsel %vm2506_vm7, %v2504_v4, %v9042_v32  ;;  %v17554_v31 = vrot.slane %v17553_v63, 4  ;;  %v8847_v53 = vunpack.i.l.bf16 %v13985_v44 }
 0x33d   : > { %v9071_v24 = vpop.permute.xlu1 %9070  ;;  %v8876_v52 = vpop.permute.xlu0 %8875  ;;  %v8848_v15 = vunpack.i.h.bf16 %v13985_v44  ;;  %v17557_v4 = vunpack.i.h.bf16 %v17533_v47  ;;  %v17558_v8 = vunpack.i.l.bf16 %v17533_v47  ;;  %v9047_v39 = vunpack.i.l.bf16 %v13930_v16 }
 0x33e   : > { %9330 = vrot.lane.b32.xlu0 %v17510_v36, %s10113_s28  ;;  %v9073_v22 = vunpack.i.h.bf16 %v9071_v24  ;;  %v9072_v12 = vunpack.i.l.bf16 %v9071_v24  ;;  %v2564_v36 = vsel %vm2497_vm6, %v2556_v45, %v9022_v26  ;;  %v14091_v0 = vsel %vm2858_vm3, %v17554_v31, %v2877_v27 }
 0x33f   : > { %9345 = vrot.lane.b32.xlu1 %v17494_v6, %s10111_s26  ;;  %17555 = vst [vmem:[#allocation156_spill] sm:$0xff] %v14091_v0  ;;  %v8857_v6 = vunpack.i.l.bf16 %v14028_v61  ;;  %v9018_v26 = vunpack.i.h.bf16 %v13700_v13  ;;  %v2522_v44 = vsel %vm869_vm0, %v2514_v33, %v17557_v4  ;;  %v8868_v31 = vunpack.i.h.bf16 %v14057_v59 }
 0x340   : > { %v2573_v1 = vsel %vm2506_vm7, %v2565_v60, %v9073_v22  ;;  %v2572_v24 = vsel %vm2506_vm7, %v2564_v36, %v9072_v12  ;;  %v9017_v22 = vunpack.i.l.bf16 %v13700_v13  ;;  %v9028_v12 = vunpack.i.h.bf16 %v13781_v40  ;;  %v17559_v60 = vld [vmem:[#allocation127_spill] sm:$0xff] }
 0x341   : > { %v2581_v38 = vsel %vm869_vm0, %v2573_v1, %v8928_v19  ;;  %v2580_v27 = vsel %vm869_vm0, %v2572_v24, %v8927_v20  ;;  %v9076_v28 = vpop.permute.xlu1 %9075  ;;  %v8886_v55 = vpop.permute.xlu0 %8885  ;;  %v2521_v19 = vsel %vm869_vm0, %v2513_v58, %v17558_v8  ;;  %v9048_v20 = vunpack.i.h.bf16 %v13930_v16  ;;  %v17560_v58 = vld [vmem:[#allocation128_spill] sm:$0xff] }
 0x342   : > { %9340 = vrot.lane.b32.xlu0 %v17498_v46, %s10114_s29  ;;  %v9027_v46 = vunpack.i.l.bf16 %v13781_v40  ;;  %v4899_v36 = vsel %vm2488_vm5, %v17559_v60, %v8847_v53  ;;  %v8858_v40 = vunpack.i.h.bf16 %v14028_v61  ;;  %v2588_v33 = vsel %vm2523_vm8, %v2580_v27, %v8977_v18 }
 0x343   : > { %9355 = vrot.lane.b32.xlu1 %v17503_v9, %s10112_s27  ;;  %v2589_v47 = vsel %vm2523_vm8, %v2581_v38, %v8978_v21  ;;  %v4900_v63 = vsel %vm2488_vm5, %v17560_v58, %v8848_v15  ;;  %v4907_v16 = vsel %vm2497_vm6, %v4899_v36, %v8857_v6  ;;  %v8867_v9 = vunpack.i.l.bf16 %v14057_v59  ;;  %v17561_v21 = vld [vmem:[#allocation64_spill] sm:$0xff]  ;;  %v17562_v38 = vld [vmem:[#allocation11_spill] sm:$0xff] }
 0x344   : > { %v8878_v53 = vunpack.i.h.bf16 %v8876_v52  ;;  %v8877_v61 = vunpack.i.l.bf16 %v8876_v52  ;;  %v9078_v24 = vunpack.i.h.bf16 %v9076_v28  ;;  %v9077_v4 = vunpack.i.l.bf16 %v9076_v28 }
 0x345   : > { %v14130_v1 = vpop.permute.xlu1 %9080  ;;  %v8888_v8 = vunpack.i.h.bf16 %v8886_v55  ;;  %v8887_v18 = vunpack.i.l.bf16 %v8886_v55  ;;  %v17563_v27 = vpack.i.bf16 %v17561_v21, %v17562_v38  ;;  %v2596_v15 = vsel %vm2532_vm9, %v2588_v33, %v9027_v46 }
 0x346   : > { %9350 = vrot.lane.b32.xlu0 %v17505_v29, %s10115_s30  ;;  %v8896_v29 = vpop.permute.xlu0 %8895  ;;  %v2597_v6 = vsel %vm2532_vm9, %v2589_v47, %v9028_v12  ;;  %v4908_v59 = vsel %vm2497_vm6, %v4900_v63, %v8858_v40  ;;  %v17564_v52 = vrot.slane %v13529_v34, 4  ;;  %v17565_v28 = vrot.slane %v13524_v7, 4  ;;  %v17600_v34 = vld [vmem:[#allocation182_spill] sm:$0xff] }
 0x347   : > { %9365 = vrot.lane.b32.xlu1 %v17563_v27, %s10116_s16  ;;  %v8898_v60 = vunpack.i.h.bf16 %v8896_v29  ;;  %v8897_v36 = vunpack.i.l.bf16 %v8896_v29  ;;  %v3294_v58 = vsel %vm2497_vm6, %v3286_v14, %v9048_v20  ;;  %v3293_v46 = vsel %vm2497_vm6, %v3285_v10, %v9047_v39 }
 0x348   : > { %v14146_v55 = vsel %vm2858_vm3, %v17565_v28, %v17564_v52  ;;  %v4915_v12 = vsel %vm2506_vm7, %v4907_v16, %v8867_v9  ;;  %v4916_v40 = vsel %vm2506_vm7, %v4908_v59, %v8868_v31  ;;  %v14155_v29 = vsel %vm2541_vm10, %v2596_v15, %v9077_v4 }
 0x349   : > { %17566 = vst [vmem:[#allocation121_spill] sm:$0xff] %v14146_v55  ;;  %v9086_v33 = vpop.permute.xlu1 %9085  ;;  %v4923_v47 = vsel %vm869_vm0, %v4915_v12, %v8877_v61  ;;  %v14158_v7 = vsel %vm2541_vm10, %v2597_v6, %v9078_v24  ;;  %v17570_v15 = vunpack.i.l.bf16 %v17535_v5  ;;  %v9068_v59 = vunpack.i.h.bf16 %v14052_v35 }
 0x34a   : > { %9360 = vrot.lane.b32.xlu0 %v17511_v30, %s10116_s16  ;;  %v4924_v30 = vsel %vm869_vm0, %v4916_v40, %v8878_v53  ;;  %v8906_v63 = vpop.permute.xlu0 %8905  ;;  %v4931_v14 = vsel %vm2523_vm8, %v4923_v47, %v8887_v18  ;;  %v9088_v16 = vunpack.i.h.bf16 %v9086_v33  ;;  %v9087_v31 = vunpack.i.l.bf16 %v9086_v33 }
 0x34b   : > { %v4932_v10 = vsel %vm2523_vm8, %v4924_v30, %v8888_v8  ;;  %v8908_v20 = vunpack.i.h.bf16 %v8906_v63  ;;  %v8907_v39 = vunpack.i.l.bf16 %v8906_v63  ;;  %9375 = vrot.lane.b32.xlu1 %v13990_v51, %s10117_s17  ;;  %v4939_v9 = vsel %vm2532_vm9, %v4931_v14, %v8897_v36  ;;  %v17575_v14 = vld [vmem:[#allocation114_spill] sm:$0xff] }
 0x34c   : > { %v4940_v53 = vsel %vm2532_vm9, %v4932_v10, %v8898_v60  ;;  %v17567_v8 = vunpack.i.l.bf16 %v17542_v62  ;;  %v17568_v18 = vunpack.i.h.bf16 %v17542_v62  ;;  %v3301_v6 = vsel %vm2506_vm7, %v3293_v46, %v17570_v15  ;;  %v17573_v46 = vld [vmem:[#allocation226_spill] sm:$0xff]  ;;  %v17576_v10 = vld [vmem:[#allocation108_spill] sm:$0xff] }
 0x34d   : > { %v9096_v61 = vpop.permute.xlu1 %9095  ;;  %v14169_v24 = vsel %vm2541_vm10, %v4939_v9, %v8907_v39  ;;  %v14172_v4 = vsel %vm2541_vm10, %v4940_v53, %v8908_v20  ;;  %v9067_v60 = vunpack.i.l.bf16 %v14052_v35  ;;  %v3341_v35 = vsel %vm2488_vm5, %v17573_v46, %v9087_v31  ;;  %v17577_v39 = vld [vmem:[#allocation119_spill] sm:$0xff] }
 0x34e   : > { %9370 = vrot.lane.b32.xlu0 %v17547_v17, %s10113_s28  ;;  %v2530_v51 = vsel %vm2523_vm8, %v2521_v19, %v17567_v8  ;;  %v2531_v38 = vsel %vm2523_vm8, %v2522_v44, %v17568_v18  ;;  %v17569_v17 = vunpack.i.h.bf16 %v17535_v5  ;;  %v9091_v36 = vpop.permute.xlu0 %9090  ;;  %v5407_v62 = vpack.c.bf16 %v14172_v4, %v14169_v24  ;;  %v17572_v19 = vld [vmem:[#allocation227_spill] sm:$0xff] }
 0x34f   : > { %v9093_v52 = vunpack.i.h.bf16 %v9091_v36  ;;  %v9092_v28 = vunpack.i.l.bf16 %v9091_v36  ;;  %v17571_v44 = vpack.i.bf16 %v17522_v41, %v17521_v42  ;;  %v5412_v5 = vpack.c.bf16 %v14158_v7, %v14155_v29 }
 0x350   : > { %v3302_v27 = vsel %vm2506_vm7, %v3294_v58, %v17569_v17  ;;  %v3342_v58 = vsel %vm2488_vm5, %v17572_v19, %v9088_v16  ;;  %v9098_v12 = vunpack.i.h.bf16 %v9096_v61  ;;  %v9097_v40 = vunpack.i.l.bf16 %v9096_v61  ;;  %5740 = vmatmul.mubr.bf16.gmra.mrb[44].mxu1 %v5407_v62 }
 0x351   : > { %9385 = vrot.lane.b32.xlu1 %v17571_v44, %s10114_s29  ;;  %v17574_v33 = vpack.i.bf16 %v17520_v43, %v17484_v48  ;;  %v3349_v47 = vsel %vm2497_vm6, %v3341_v35, %v9092_v28  ;;  %v3350_v30 = vsel %vm2497_vm6, %v3342_v58, %v9093_v52  ;;  %v9106_v63 = vpop.permute.xlu1 %9105  ;;  %v14208_v20 = vpack.i.bf16 %v17576_v10, %v17575_v14  ;;  %v17580_v58 = vld [vmem:[#allocation36_spill] sm:$0xff] }
 0x352   : > { %v14212_v16 = vpack.i.bf16 %v17577_v39, %v17530_v11  ;;  %5747 = vmatprep.mubr.bf16.mxu1 %v5412_v5  ;;  %v9101_v31 = vpop.permute.xlu0 %9100  ;;  %v2539_v9 = vsel %vm2532_vm9, %v2530_v51, %v9017_v22  ;;  %v2540_v53 = vsel %vm2532_vm9, %v2531_v38, %v9018_v26  ;;  %v17578_v61 = vunpack.i.l.bf16 %v17550_v2 }
 0x353   : > { %9380 = vrot.lane.b32.xlu0 %v17574_v33, %s10117_s17  ;;  %v17579_v18 = vunpack.i.h.bf16 %v17550_v2  ;;  %v9103_v15 = vunpack.i.h.bf16 %v9101_v31  ;;  %v9102_v36 = vunpack.i.l.bf16 %v9101_v31  ;;  %v14229_v52 = vsel %vm2541_vm10, %v2539_v9, %v9067_v60 }
 0x354   : > { %v3309_v8 = vsel %vm869_vm0, %v3301_v6, %v17578_v61  ;;  %v14232_v13 = vsel %vm2541_vm10, %v2540_v53, %v9068_v59  ;;  %v3357_v26 = vsel %vm2506_vm7, %v3349_v47, %v9097_v40  ;;  %v3358_v22 = vsel %vm2506_vm7, %v3350_v30, %v9098_v12 }
 0x355   : > { %v3310_v17 = vsel %vm869_vm0, %v3302_v27, %v17579_v18  ;;  %9395 = vrot.lane.b32.xlu1 %v14002_v23, %s10115_s30  ;;  %v9108_v51 = vunpack.i.h.bf16 %v9106_v63  ;;  %v9107_v38 = vunpack.i.l.bf16 %v9106_v63  ;;  %v9083_v2 = vunpack.i.h.bf16 %v14130_v1  ;;  %v9116_v28 = vpop.permute.xlu1 %9115  ;;  %v17583_v18 = vld [vmem:[#allocation210_spill] sm:$0xff] }
 0x356   : > { %v9082_v27 = vunpack.i.l.bf16 %v14130_v1  ;;  %v3365_v6 = vsel %vm869_vm0, %v3357_v26, %v9102_v36  ;;  %v3366_v60 = vsel %vm869_vm0, %v3358_v22, %v9103_v15  ;;  %v9033_v59 = vunpack.i.h.bf16 %v13829_v57  ;;  %v9111_v44 = vpop.permute.xlu0 %9110 }
 0x357   : > { %9390 = vrot.lane.b32.xlu0 %v14208_v20, %s10111_s26  ;;  %v9032_v62 = vunpack.i.l.bf16 %v13829_v57  ;;  %v9118_v5 = vunpack.i.h.bf16 %v9116_v28  ;;  %v9117_v19 = vunpack.i.l.bf16 %v9116_v28  ;;  %v8938_v46 = vunpack.i.h.bf16 %v17580_v58 }
 0x358   : > { %v9113_v35 = vunpack.i.h.bf16 %v9111_v44  ;;  %v9112_v12 = vunpack.i.l.bf16 %v9111_v44  ;;  %v17581_v1 = vpack.i.bf16 %v17530_v11, %v17529_v25  ;;  %v5411_v40 = vpack.c.bf16 %v14232_v13, %v14229_v52 }
 0x359   : > { %v3373_v33 = vsel %vm2523_vm8, %v3365_v6, %v9107_v38  ;;  %v3374_v47 = vsel %vm2523_vm8, %v3366_v60, %v9108_v51  ;;  %v3317_v57 = vsel %vm2523_vm8, %v3309_v8, %v9032_v62  ;;  %v3318_v30 = vsel %vm2523_vm8, %v3310_v17, %v9033_v59  ;;  %v14257_v63 = vpop.permute.xlu1 %9125  ;;  %v17585_v6 = vld [vmem:[#allocation173_spill] sm:$0xff]  ;;  %v17586_v59 = vld [vmem:[#allocation126_spill] sm:$0xff] }
 0x35a   : > { %9405 = vrot.lane.b32.xlu1 %v17581_v1, %s10116_s16  ;;  %5748 = vmatmul.mubr.bf16.gmra.mrb[48].mxu1 %v5411_v40  ;;  %v14260_v11 = vsel %vm2532_vm9, %v3373_v33, %v9112_v12  ;;  %v3382_v31 = vsel %vm2532_vm9, %v3374_v47, %v9113_v35  ;;  %v3325_v9 = vsel %vm2532_vm9, %v3317_v57, %v9082_v27  ;;  %v8937_v61 = vunpack.i.l.bf16 %v17580_v58  ;;  %v14267_v36 = vpop.permute.xlu0 %9120  ;;  %v17588_v35 = vld [vmem:[#allocation181_spill] sm:$0xff] }
 0x35b   : > { %9400 = vrot.lane.b32.xlu0 %v14006_v56, %s10112_s27  ;;  %17582 = vst [vmem:[#allocation236_spill] sm:$0xff] %v14260_v11  ;;  %v3326_v53 = vsel %vm2532_vm9, %v3318_v30, %v9083_v2  ;;  %v8957_v15 = vunpack.i.l.bf16 %v17583_v18  ;;  %v3389_v8 = vsel %vm2541_vm10, %v14260_v11, %v9117_v19  ;;  %v14272_v17 = vsel %vm2541_vm10, %v3382_v31, %v9118_v5  ;;  %v17587_v19 = vld [vmem:[#allocation92_spill] sm:$0xff]  ;;  %v17589_v30 = vld [vmem:[#allocation94_spill] sm:$0xff] }
 0x35c   : > { %17584 = vst [vmem:[#allocation74_spill] sm:$0xff] %v14272_v17  ;;  %v9007_v26 = vunpack.i.l.bf16 %v13611_v50  ;;  %v5416_v22 = vpack.c.bf16 %v14272_v17, %v3389_v8  ;;  %v9057_v51 = vunpack.i.l.bf16 %v13967_v54  ;;  %v14282_v38 = vsel %vm2541_vm10, %v3325_v9, %v8937_v61  ;;  %v17591_v61 = vld [vmem:[#allocation68_spill] sm:$0xff] }
 0x35d   : > { %v14285_v2 = vsel %vm2541_vm10, %v3326_v53, %v8938_v46  ;;  %v9136_v27 = vpop.permute.xlu1 %9135  ;;  %v2808_v60 = vsel %vm2488_vm5, %v17585_v6, %v8957_v15  ;;  %v8942_v62 = vunpack.i.l.bf16 %v17586_v59  ;;  %v8997_v58 = vunpack.i.l.bf16 %v17587_v19  ;;  %v17590_v53 = vld [vmem:[#allocation42_spill] sm:$0xff]  ;;  %v17598_v11 = vld [vmem:[#allocation4_spill] sm:$0xff] }
 0x35e   : > { %9415 = vrot.lane.b32.xlu1 %v14022_v3, %s10117_s17  ;;  %5755 = vmatprep.mubr.bf16.mxu1 %v5416_v22  ;;  %v9131_v28 = vpop.permute.xlu0 %9130  ;;  %v2812_v44 = vsel %vm2497_vm6, %v2808_v60, %v9007_v26  ;;  %v5415_v5 = vpack.c.bf16 %v14285_v2, %v14282_v38  ;;  %v8917_v12 = vunpack.i.l.bf16 %v17588_v35  ;;  %v9037_v1 = vunpack.i.l.bf16 %v13865_v37  ;;  %v17594_v22 = vld [vmem:[#allocation54_spill] sm:$0xff] }
 0x35f   : > { %9410 = vrot.lane.b32.xlu0 %v14212_v16, %s10113_s28  ;;  %v2816_v46 = vsel %vm2506_vm7, %v2812_v44, %v9057_v51  ;;  %v14303_v33 = vpack.i.bf16 %v17529_v25, %v17561_v21  ;;  %v9439_v57 = vpack.i.bf16 %v17520_v43, %v17577_v39  ;;  %v2780_v31 = vsel %vm2488_vm5, %v17589_v30, %v8942_v62  ;;  %v17592_v25 = vld [vmem:[#allocation225_spill] sm:$0xff]  ;;  %v17593_v39 = vld [vmem:[#allocation67_spill] sm:$0xff]  ;;  %v17595_v51 = vld [vmem:[#allocation102_spill] sm:$0xff] }
 0x360   : > { %v2820_v9 = vsel %vm869_vm0, %v2816_v46, %v8917_v12  ;;  %v9449_v15 = vpack.i.bf16 %v17591_v61, %v17590_v53  ;;  %v8962_v21 = vunpack.i.l.bf16 %v17592_v25  ;;  %v2784_v8 = vsel %vm2497_vm6, %v2780_v31, %v8997_v58 }
 0x361   : > { %v9146_v40 = vpop.permute.xlu1 %9145  ;;  %v9454_v26 = vpack.i.bf16 %v17593_v39, %v17591_v61  ;;  %v9459_v60 = vpack.i.bf16 %v17595_v51, %v17594_v22  ;;  %v2788_v62 = vsel %vm2506_vm7, %v2784_v8, %v9037_v1  ;;  %v9123_v12 = vunpack.i.h.bf16 %v14267_v36  ;;  %v17597_v61 = vld [vmem:[#allocation124_spill] sm:$0xff] }
 0x362   : > { %9425 = vrot.lane.b32.xlu1 %v14002_v23, %s10111_s26  ;;  %5756 = vmatmul.mubr.bf16.gmra.mrb[52].mxu1 %v5415_v5  ;;  %v9141_v47 = vpop.permute.xlu0 %9140  ;;  %v17596_v5 = vld [vmem:[#allocation123_spill] sm:$0xff]  ;;  %v2824_v58 = vsel %vm2523_vm8, %v2820_v9, %v8962_v21  ;;  %v9122_v31 = vunpack.i.l.bf16 %v14267_v36  ;;  %v9012_v32 = vunpack.i.l.bf16 %v17597_v61  ;;  %v9138_v17 = vunpack.i.h.bf16 %v9136_v27 }
 0x363   : > { %9420 = vrot.lane.b32.xlu0 %v14208_v20, %s10114_s29  ;;  %v9444_v20 = vpack.i.bf16 %v17531_v49, %v17520_v43  ;;  %v9128_v43 = vunpack.i.h.bf16 %v14257_v63  ;;  %v9127_v49 = vunpack.i.l.bf16 %v14257_v63  ;;  %v8912_v46 = vunpack.i.l.bf16 %v17596_v5  ;;  %v17599_v36 = vld [vmem:[#allocation183_spill] sm:$0xff] }
 0x364   : > { %v9137_v51 = vunpack.i.l.bf16 %v9136_v27  ;;  %v9133_v63 = vunpack.i.h.bf16 %v9131_v28  ;;  %v9132_v8 = vunpack.i.l.bf16 %v9131_v28  ;;  %v14339_v21 = vsel %vm2532_vm9, %v2824_v58, %v9012_v32 }
 0x365   : > { %v9156_v44 = vpop.permute.xlu1 %9155  ;;  %v14334_v1 = vsel %vm869_vm0, %v2788_v62, %v8912_v46  ;;  %v4086_v55 = vsel %vm2488_vm5, %v17599_v36, %v9128_v43  ;;  %v4085_v27 = vsel %vm2488_vm5, %v17600_v34, %v9127_v49  ;;  %v17602_v46 = vld [vmem:[#allocation230_spill] sm:$0xff]  ;;  %v9148_v10 = vunpack.i.h.bf16 %v9146_v40 }
 0x366   : > { %9435 = vrot.lane.b32.xlu1 %v14303_v33, %s10112_s27  ;;  %v9151_v53 = vpop.permute.xlu0 %9150  ;;  %v4141_v28 = vsel %vm2488_vm5, %v17602_v46, %v9122_v31  ;;  %v4093_v9 = vsel %vm2497_vm6, %v4085_v27, %v9137_v51  ;;  %v4094_v32 = vsel %vm2497_vm6, %v4086_v55, %v9138_v17  ;;  %v9143_v58 = vunpack.i.h.bf16 %v9141_v47 }
 0x367   : > { %9430 = vrot.lane.b32.xlu0 %v14006_v56, %s10115_s30  ;;  %v9142_v0 = vunpack.i.l.bf16 %v9141_v47  ;;  %v4149_v34 = vsel %vm2497_vm6, %v4141_v28, %v9132_v8  ;;  %v9158_v49 = vunpack.i.h.bf16 %v9156_v44  ;;  %v9153_v31 = vunpack.i.h.bf16 %v9151_v53 }
 0x368   : > { %v9152_v36 = vunpack.i.l.bf16 %v9151_v53  ;;  %v4102_v55 = vsel %vm2506_vm7, %v4094_v32, %v9148_v10 }
 0x369   : > { %v9166_v14 = vpop.permute.xlu1 %9165  ;;  %v4157_v8 = vsel %vm2506_vm7, %v4149_v34, %v9142_v0 }
 0x36a   : > { %9445 = vrot.lane.b32.xlu1 %v9444_v20, %s10113_s28  ;;  %v17601_v20 = vld [vmem:[#allocation231_spill] sm:$0xff]  ;;  %v9161_v45 = vpop.permute.xlu0 %9160 }
 0x36b   : > { %9440 = vrot.lane.b32.xlu0 %v9439_v57, %s10116_s16  ;;  %v4142_v62 = vsel %vm2488_vm5, %v17601_v20, %v9123_v12  ;;  %v9147_v57 = vunpack.i.l.bf16 %v9146_v40  ;;  %v9157_v12 = vunpack.i.l.bf16 %v9156_v44  ;;  %v9168_v40 = vunpack.i.h.bf16 %v9166_v14 }
 0x36c   : > { %v4150_v43 = vsel %vm2497_vm6, %v4142_v62, %v9133_v63  ;;  %v9167_v20 = vunpack.i.l.bf16 %v9166_v14  ;;  %v9163_v17 = vunpack.i.h.bf16 %v9161_v45  ;;  %v9162_v47 = vunpack.i.l.bf16 %v9161_v45 }
 0x36d   : > { %v9176_v46 = vpop.permute.xlu1 %9175  ;;  %v4101_v51 = vsel %vm2506_vm7, %v4093_v9, %v9147_v57  ;;  %v4158_v63 = vsel %vm2506_vm7, %v4150_v43, %v9143_v58  ;;  %v4110_v14 = vsel %vm869_vm0, %v4102_v55, %v9158_v49  ;;  %v4165_v45 = vsel %vm869_vm0, %v4157_v8, %v9152_v36  ;;  %v17608_v8 = vld [vmem:[#allocation85_spill] sm:$0xff] }
 0x36e   : > { %9455 = vrot.lane.b32.xlu1 %v9454_v26, %s10117_s17  ;;  %v9171_v26 = vpop.permute.xlu0 %9170  ;;  %v9178_v27 = vunpack.i.h.bf16 %v9176_v46  ;;  %v9177_v44 = vunpack.i.l.bf16 %v9176_v46  ;;  %v4166_v10 = vsel %vm869_vm0, %v4158_v63, %v9153_v31  ;;  %v4118_v62 = vsel %vm2523_vm8, %v4110_v14, %v9168_v40  ;;  %v17606_v46 = vld [vmem:[#allocation207_spill] sm:$0xff]  ;;  %v17610_v14 = vld [vmem:[#allocation66_spill] sm:$0xff] }
 0x36f   : > { %9450 = vrot.lane.b32.xlu0 %v9449_v15, %s10113_s28  ;;  %v4109_v15 = vsel %vm869_vm0, %v4101_v51, %v9157_v12  ;;  %v9173_v53 = vunpack.i.h.bf16 %v9171_v26  ;;  %v9172_v9 = vunpack.i.l.bf16 %v9171_v26  ;;  %v14369_v57 = vsel %vm2523_vm8, %v4165_v45, %v9162_v47 }
 0x370   : > { %v4117_v0 = vsel %vm2523_vm8, %v4109_v15, %v9167_v20  ;;  %17603 = vst [vmem:[#allocation43_spill] sm:$0xff] %v14369_v57  ;;  %v4126_v12 = vsel %vm2532_vm9, %v4118_v62, %v9178_v27  ;;  %v9052_v63 = vunpack.i.l.bf16 %v17608_v8  ;;  %v17609_v27 = vunpack.i.l.bf16 %v17598_v11 }
 0x371   : > { %v9186_v28 = vpop.permute.xlu1 %9185  ;;  %v4181_v31 = vsel %vm2532_vm9, %v14369_v57, %v9172_v9  ;;  %v9489_v9 = vpack.i.bf16 %v17594_v22, %v17593_v39  ;;  %v17611_v45 = vrot.slane %v17522_v41, 4  ;;  %v17633_v57 = vld [vmem:[#allocation139_spill] sm:$0xff]  ;;  %v17638_v41 = vld [vmem:[#allocation205_spill] sm:$0xff] }
 0x372   : > { %9465 = vrot.lane.b32.xlu1 %v14002_v23, %s10114_s29  ;;  %v4174_v23 = vsel %vm2523_vm8, %v4166_v10, %v9163_v17  ;;  %v9181_v32 = vpop.permute.xlu0 %9180  ;;  %v9188_v58 = vunpack.i.h.bf16 %v9186_v28  ;;  %v9187_v34 = vunpack.i.l.bf16 %v9186_v28  ;;  %v17612_v10 = vld [vmem:[#allocation90_spill] sm:$0xff] }
 0x373   : > { %9460 = vrot.lane.b32.xlu0 %v9459_v60, %s10117_s17  ;;  %v9183_v43 = vunpack.i.h.bf16 %v9181_v32  ;;  %v9182_v49 = vunpack.i.l.bf16 %v9181_v32  ;;  %v4125_v60 = vsel %vm2532_vm9, %v4117_v0, %v9177_v44  ;;  %v4182_v36 = vsel %vm2532_vm9, %v4174_v23, %v9173_v53  ;;  %v17613_v0 = vld [vmem:[#allocation109_spill] sm:$0xff] }
 0x374   : > { %v14382_v40 = vsel %vm2541_vm10, %v4125_v60, %v9187_v34  ;;  %v14385_v20 = vsel %vm2541_vm10, %v4126_v12, %v9188_v58  ;;  %v2832_v44 = vsel %vm2541_vm10, %v14339_v21, %v17609_v27  ;;  %v9002_v53 = vunpack.i.l.bf16 %v17610_v14  ;;  %v17614_v58 = vld [vmem:[#allocation18_spill] sm:$0xff] }
 0x375   : > { %17604 = vst [vmem:[#allocation40_spill] sm:$0xff] %v14382_v40  ;;  %17605 = vst [vmem:[#allocation138_spill] sm:$0xff] %v14385_v20  ;;  %v14388_v51 = vpop.permute.xlu1 %9195  ;;  %v4189_v55 = vsel %vm2541_vm10, %v4181_v31, %v9182_v49  ;;  %v14392_v17 = vsel %vm2541_vm10, %v4182_v36, %v9183_v43  ;;  %v5419_v15 = vpack.c.bf16 %v14385_v20, %v14382_v40  ;;  %v2883_v62 = vrot.slane %v17613_v0, 4  ;;  %v17615_v43 = vld [vmem:[#allocation222_spill] sm:$0xff]  ;;  %v17616_v49 = vld [vmem:[#allocation137_spill] sm:$0xff] }
 0x376   : > { %9475 = vrot.lane.b32.xlu1 %v14303_v33, %s10115_s30  ;;  %v8952_v33 = vunpack.i.l.bf16 %v17606_v46  ;;  %17607 = vst [vmem:[#allocation200_spill] sm:$0xff] %v14392_v17  ;;  %v5420_v47 = vpack.c.bf16 %v14392_v17, %v4189_v55  ;;  %v9494_v21 = vpack.i.bf16 %v17521_v42, %v17611_v45  ;;  %v2887_v23 = vrot.slane %v2832_v44, 4  ;;  %v17617_v12 = vld [vmem:[#allocation146_spill] sm:$0xff]  ;;  %v17618_v31 = vld [vmem:[#allocation129_spill] sm:$0xff]  ;;  %v17624_v45 = vld [vmem:[#allocation132_spill] sm:$0xff] }
 0x377   : > { %9470 = vrot.lane.b32.xlu0 %v14006_v56, %s10111_s26  ;;  %v14394_v56 = vpop.permute.xlu0 %9190  ;;  %v2879_v39 = vrot.slane %v17614_v58, 4  ;;  %v9499_v60 = vpack.i.bf16 %v17616_v49, %v17615_v43  ;;  %v14427_v36 = vpack.i.bf16 %v17618_v31, %v17617_v12  ;;  %v17622_v44 = vld [vmem:[#allocation161_spill] sm:$0xff]  ;;  %v9197_v58 = vunpack.i.l.bf16 %v14388_v51 }
 0x378   : > { %v2796_v26 = vsel %vm2523_vm8, %v14334_v1, %v8952_v33  ;;  %5763 = vmatprep.mubr.bf16.mxu1 %v5420_v47  ;;  %v17619_v33 = vld [vmem:[#allocation69_spill] sm:$0xff]  ;;  %v14434_v27 = vsel %vm2858_vm3, %v2883_v62, %v2887_v23  ;;  %v9193_v23 = vunpack.i.h.bf16 %v14394_v56 }
 0x379   : > { %5764 = vmatmul.mubr.bf16.gmra.mrb[56].mxu1 %v5419_v15  ;;  %v9206_v1 = vpop.permute.xlu1 %9205  ;;  %v2800_v28 = vsel %vm2532_vm9, %v2796_v26, %v9002_v53  ;;  %v2880_v55 = vrot.slane %v17619_v33, 4  ;;  %17621 = vst [vmem:[#allocation157_spill] sm:$0xff] %v14434_v27  ;;  %v17628_v33 = vld [vmem:[#allocation118_spill] sm:$0xff]  ;;  %v17629_v53 = vld [vmem:[#allocation135_spill] sm:$0xff] }
 0x37a   : > { %9485 = vrot.lane.b32.xlu1 %v14022_v3, %s10116_s16  ;;  %v2882_v3 = vrot.slane %v17612_v10, 4  ;;  %v17625_v10 = vld [vmem:[#allocation145_spill] sm:$0xff]  ;;  %v9208_v17 = vunpack.i.h.bf16 %v9206_v1 }
 0x37b   : > { %9480 = vrot.lane.b32.xlu0 %v14212_v16, %s10112_s27  ;;  %v9201_v32 = vpop.permute.xlu0 %9200  ;;  %v2804_v16 = vsel %vm2541_vm10, %v2800_v28, %v9052_v63 }
 0x37c   : > { %v2885_v47 = vrot.slane %v2804_v16, 4  ;;  %v14431_v63 = vsel %vm2858_vm3, %v2882_v3, %v2883_v62  ;;  %v17626_v3 = vrot.slane %v17589_v30, 4  ;;  %v17627_v62 = vld [vmem:[#allocation3_spill] sm:$0xff]  ;;  %v9198_v16 = vunpack.i.h.bf16 %v14388_v51  ;;  %v17632_v51 = vld [vmem:[#allocation144_spill] sm:$0xff] }
 0x37d   : > { %v9216_v34 = vpop.permute.xlu1 %9215  ;;  %17620 = vst [vmem:[#allocation167_spill] sm:$0xff] %v14431_v63  ;;  %v14453_v28 = vpack.i.bf16 %v17627_v62, %v17585_v6  ;;  %v9207_v30 = vunpack.i.l.bf16 %v9206_v1  ;;  %v9202_v15 = vunpack.i.l.bf16 %v9201_v32  ;;  %v14473_v31 = vpack.i.bf16 %v17633_v57, %v17632_v51  ;;  %v17636_v1 = vld [vmem:[#allocation166_spill] sm:$0xff]  ;;  %v17637_v63 = vld [vmem:[#allocation89_spill] sm:$0xff] }
 0x37e   : > { %9495 = vrot.lane.b32.xlu1 %v9494_v21, %s10117_s17  ;;  %v14449_v0 = vpack.i.bf16 %v17626_v3, %v17625_v10  ;;  %v14464_v3 = vsel %vm2858_vm3, %v2879_v39, %v2880_v55  ;;  %v14467_v62 = vsel %vm2858_vm3, %v2880_v55, %v2885_v47  ;;  %v17634_v39 = vld [vmem:[#allocation134_spill] sm:$0xff]  ;;  %v17635_v55 = vld [vmem:[#allocation115_spill] sm:$0xff]  ;;  %v3679_v12 = vrot.slane %v17636_v1, 4 }
 0x37f   : > { %9490 = vrot.lane.b32.xlu0 %v9489_v9, %s10113_s28  ;;  %v9211_v26 = vpop.permute.xlu0 %9210  ;;  %v17623_v9 = vld [vmem:[#allocation99_spill] sm:$0xff]  ;;  %17630 = vst [vmem:[#allocation76_spill] sm:$0xff] %v14464_v3  ;;  %17631 = vst [vmem:[#allocation70_spill] sm:$0xff] %v14467_v62  ;;  %v14481_v47 = vpack.i.bf16 %v17635_v55, %v17634_v39  ;;  %v4902_v57 = vsel %vm2488_vm5, %v17638_v41, %v9198_v16  ;;  %v17639_v51 = vld [vmem:[#allocation206_spill] sm:$0xff]  ;;  %v9218_v55 = vunpack.i.h.bf16 %v9216_v34 }
 0x380   : > { %v14444_v21 = vpack.i.bf16 %v17624_v45, %v17623_v9  ;;  %v14460_v9 = vpack.i.bf16 %v17629_v53, %v17628_v33  ;;  %v9192_v45 = vunpack.i.l.bf16 %v14394_v56  ;;  %v9203_v53 = vunpack.i.h.bf16 %v9201_v32  ;;  %v17640_v32 = vld [vmem:[#allocation56_spill] sm:$0xff]  ;;  %v17641_v62 = vld [vmem:[#allocation57_spill] sm:$0xff] }
 0x381   : > { %v9217_v33 = vunpack.i.l.bf16 %v9216_v34  ;;  %v4901_v42 = vsel %vm2488_vm5, %v17639_v51, %v9197_v58  ;;  %v4958_v3 = vsel %vm2488_vm5, %v17640_v32, %v9193_v23  ;;  %v4910_v27 = vsel %vm2497_vm6, %v4902_v57, %v9208_v17 }
 0x382   : > { %9505 = vrot.lane.b32.xlu1 %v14427_v36, %s10111_s26  ;;  %v4957_v22 = vsel %vm2488_vm5, %v17641_v62, %v9192_v45  ;;  %v4909_v39 = vsel %vm2497_vm6, %v4901_v42, %v9207_v30  ;;  %v9213_v40 = vunpack.i.h.bf16 %v9211_v26  ;;  %v9212_v41 = vunpack.i.l.bf16 %v9211_v26 }
 0x383   : > { %9500 = vrot.lane.b32.xlu0 %v9499_v60, %s10114_s29  ;;  %v9226_v60 = vpop.permute.xlu1 %9225  ;;  %v9221_v10 = vpop.permute.xlu0 %9220  ;;  %v4965_v1 = vsel %vm2497_vm6, %v4957_v22, %v9202_v15  ;;  %v4966_v16 = vsel %vm2497_vm6, %v4958_v3, %v9203_v53  ;;  %v4917_v23 = vsel %vm2506_vm7, %v4909_v39, %v9217_v33  ;;  %v4918_v17 = vsel %vm2506_vm7, %v4910_v27, %v9218_v55 }
 0x384   : > { %v9228_v58 = vunpack.i.h.bf16 %v9226_v60  ;;  %v9227_v51 = vunpack.i.l.bf16 %v9226_v60  ;;  %v9223_v42 = vunpack.i.h.bf16 %v9221_v10  ;;  %v9222_v34 = vunpack.i.l.bf16 %v9221_v10 }
 0x385   : > { %v17642_v57 = vrot.slane %v17637_v63, 4  ;;  %v4973_v60 = vsel %vm2506_vm7, %v4965_v1, %v9212_v41  ;;  %v4974_v53 = vsel %vm2506_vm7, %v4966_v16, %v9213_v40 }
 0x386   : > { %9515 = vrot.lane.b32.xlu1 %v14460_v9, %s10112_s27  ;;  %v4925_v10 = vsel %vm869_vm0, %v4917_v23, %v9227_v51  ;;  %v4926_v27 = vsel %vm869_vm0, %v4918_v17, %v9228_v58  ;;  %v4982_v39 = vsel %vm869_vm0, %v4974_v53, %v9223_v42 }
 0x387   : > { %9510 = vrot.lane.b32.xlu0 %v14444_v21, %s10115_s30  ;;  %v9236_v56 = vpop.permute.xlu1 %9235  ;;  %v9231_v20 = vpop.permute.xlu0 %9230  ;;  %v14506_v3 = vsel %vm2858_vm3, %v3679_v12, %v17642_v57  ;;  %v14517_v12 = vsel %vm869_vm0, %v4973_v60, %v9222_v34 }
 0x388   : > { %v9238_v45 = vunpack.i.h.bf16 %v9236_v56  ;;  %v9237_v22 = vunpack.i.l.bf16 %v9236_v56  ;;  %v9233_v26 = vunpack.i.h.bf16 %v9231_v20  ;;  %v9232_v30 = vunpack.i.l.bf16 %v9231_v20 }
 0x38a   : > { %9525 = vrot.lane.b32.xlu1 %v14481_v47, %s10113_s28  ;;  %v4933_v40 = vsel %vm2523_vm8, %v4925_v10, %v9237_v22  ;;  %v4934_v55 = vsel %vm2523_vm8, %v4926_v27, %v9238_v45  ;;  %v4989_v41 = vsel %vm2523_vm8, %v14517_v12, %v9232_v30  ;;  %v4990_v16 = vsel %vm2523_vm8, %v4982_v39, %v9233_v26 }
 0x38b   : > { %9520 = vrot.lane.b32.xlu0 %v14473_v31, %s10116_s16  ;;  %v9246_v15 = vpop.permute.xlu1 %9245  ;;  %v9241_v62 = vpop.permute.xlu0 %9240 }
 0x38c   : > { %v9248_v33 = vunpack.i.h.bf16 %v9246_v15  ;;  %v9247_v32 = vunpack.i.l.bf16 %v9246_v15  ;;  %v9243_v20 = vunpack.i.h.bf16 %v9241_v62  ;;  %v9242_v56 = vunpack.i.l.bf16 %v9241_v62  ;;  %v17643_v62 = vld [vmem:[#allocation44_spill] sm:$0xff] }
 0x38e   : > { %9535 = vrot.lane.b32.xlu1 %v14453_v28, %s10117_s17  ;;  %v4941_v42 = vsel %vm2532_vm9, %v4933_v40, %v9247_v32  ;;  %v4942_v34 = vsel %vm2532_vm9, %v4934_v55, %v9248_v33  ;;  %v4997_v45 = vsel %vm2532_vm9, %v4989_v41, %v9242_v56  ;;  %v4998_v22 = vsel %vm2532_vm9, %v4990_v16, %v9243_v20  ;;  %v17645_v40 = vld [vmem:[#allocation192_spill] sm:$0xff] }
 0x38f   : > { %9530 = vrot.lane.b32.xlu0 %v14449_v0, %s10117_s17  ;;  %v9256_v1 = vpop.permute.xlu1 %9255  ;;  %v9251_v23 = vpop.permute.xlu0 %9250  ;;  %v17646_v41 = vld [vmem:[#allocation12_spill] sm:$0xff]  ;;  %v8943_v55 = vunpack.i.h.bf16 %v17586_v59 }
 0x390   : > { %v9258_v58 = vunpack.i.h.bf16 %v9256_v1  ;;  %v9257_v51 = vunpack.i.l.bf16 %v9256_v1  ;;  %v9253_v15 = vunpack.i.h.bf16 %v9251_v23  ;;  %v9252_v17 = vunpack.i.l.bf16 %v9251_v23  ;;  %v17647_v23 = vld [vmem:[#allocation25_spill] sm:$0xff] }
 0x391   : > { %v8958_v1 = vunpack.i.h.bf16 %v17583_v18  ;;  %v17652_v18 = vld [vmem:[#allocation78_spill] sm:$0xff] }
 0x392   : > { %9545 = vrot.lane.b32.xlu1 %v14444_v21, %s10111_s26  ;;  %v14534_v26 = vsel %vm2541_vm10, %v4941_v42, %v9257_v51  ;;  %v14537_v30 = vsel %vm2541_vm10, %v4942_v34, %v9258_v58  ;;  %v5005_v53 = vsel %vm2541_vm10, %v4997_v45, %v9252_v17  ;;  %v14542_v33 = vsel %vm2541_vm10, %v4998_v22, %v9253_v15  ;;  %v17648_v15 = vld [vmem:[#allocation110_spill] sm:$0xff]  ;;  %v17650_v42 = vld [vmem:[#allocation189_spill] sm:$0xff] }
 0x393   : > { %9540 = vrot.lane.b32.xlu0 %v14427_v36, %s10114_s29  ;;  %v9266_v60 = vpop.permute.xlu1 %9265  ;;  %17644 = vst [vmem:[#allocation71_spill] sm:$0xff] %v14542_v33  ;;  %v5424_v36 = vpack.c.bf16 %v14542_v33, %v5005_v53  ;;  %v5423_v20 = vpack.c.bf16 %v14537_v30, %v14534_v26  ;;  %v17649_v17 = vrot.slane %v17648_v15, 4  ;;  %v9008_v45 = vunpack.i.h.bf16 %v13611_v50  ;;  %v17651_v53 = vld [vmem:[#allocation29_spill] sm:$0xff]  ;;  %v17659_v33 = vld [vmem:[#allocation88_spill] sm:$0xff] }
 0x394   : > { %v9261_v32 = vpop.permute.xlu0 %9260  ;;  %v9268_v56 = vunpack.i.h.bf16 %v9266_v60  ;;  %v9267_v39 = vunpack.i.l.bf16 %v9266_v60  ;;  %v9058_v22 = vunpack.i.h.bf16 %v13967_v54 }
 0x395   : > { %v9263_v10 = vunpack.i.h.bf16 %v9261_v32  ;;  %v9262_v27 = vunpack.i.l.bf16 %v9261_v32  ;;  %5771 = vmatprep.mubr.bf16.mxu1 %v5424_v36  ;;  %v14561_v34 = vpack.i.bf16 %v17650_v42, %v17649_v17  ;;  %v17653_v32 = vpack.c.bf16 %v17651_v53, %v17652_v18  ;;  %v17654_v36 = vld [vmem:[#allocation95_spill] sm:$0xff]  ;;  %v17656_v53 = vld [vmem:[#allocation190_spill] sm:$0xff] }
 0x396   : > { %9555 = vrot.lane.b32.xlu1 %v14473_v31, %s10112_s27  ;;  %5772 = vmatmul.mubr.bf16.gmra.mrb[60].mxu1 %v5423_v20  ;;  %v2809_v18 = vsel %vm2488_vm5, %v17656_v53, %v8958_v1 }
 0x397   : > { %9550 = vrot.lane.b32.xlu0 %v14460_v9, %s10115_s30  ;;  %v3575_v16 = vsel %vm2488_vm5, %v17646_v41, %v9263_v10  ;;  %v3603_v58 = vsel %vm2488_vm5, %v17647_v23, %v9262_v27  ;;  %v9276_v51 = vpop.permute.xlu1 %9275  ;;  %5812 = vmatprep.mubr.bf16.mxu1 %v17653_v32  ;;  %v4495_v10 = vrot.slane %v17654_v36, 4  ;;  %v17655_v41 = vld [vmem:[#allocation61_spill] sm:$0xff]  ;;  %v8998_v27 = vunpack.i.h.bf16 %v17587_v19 }
 0x398   : > { %v9271_v60 = vpop.permute.xlu0 %9270  ;;  %v3579_v17 = vsel %vm2497_vm6, %v3575_v16, %v9268_v56  ;;  %v3607_v50 = vsel %vm2497_vm6, %v3603_v58, %v9267_v39  ;;  %v9278_v57 = vunpack.i.h.bf16 %v9276_v51  ;;  %v9277_v54 = vunpack.i.l.bf16 %v9276_v51 }
 0x399   : > { %v9273_v20 = vunpack.i.h.bf16 %v9271_v60  ;;  %v9272_v23 = vunpack.i.l.bf16 %v9271_v60  ;;  %v2813_v56 = vsel %vm2497_vm6, %v2809_v18, %v9008_v45  ;;  %v17657_v1 = vrot.slane %v17655_v41, 4 }
 0x39a   : > { %9565 = vrot.lane.b32.xlu1 %v14449_v0, %s10113_s28  ;;  %v8918_v45 = vunpack.i.h.bf16 %v17588_v35 }
 0x39b   : > { %9560 = vrot.lane.b32.xlu0 %v14481_v47, %s10116_s16  ;;  %v3583_v32 = vsel %vm2506_vm7, %v3579_v17, %v9273_v20  ;;  %v3611_v36 = vsel %vm2506_vm7, %v3607_v50, %v9272_v23  ;;  %v9286_v60 = vpop.permute.xlu1 %9285  ;;  %v14588_v20 = vsel %vm2858_vm3, %v4495_v10, %v17657_v1  ;;  %v2817_v23 = vsel %vm2506_vm7, %v2813_v56, %v9058_v22  ;;  %v17661_v22 = vld [vmem:[#allocation170_spill] sm:$0xff] }
 0x39c   : > { %v9281_v39 = vpop.permute.xlu0 %9280  ;;  %v9288_v51 = vunpack.i.h.bf16 %v9286_v60  ;;  %v3587_v59 = vsel %vm869_vm0, %v3583_v32, %v9278_v57  ;;  %v3615_v19 = vsel %vm869_vm0, %v3611_v36, %v9277_v54  ;;  %v9287_v17 = vunpack.i.l.bf16 %v9286_v60  ;;  %v17663_v32 = vld [vmem:[#allocation171_spill] sm:$0xff] }
 0x39d   : > { %v9283_v16 = vunpack.i.h.bf16 %v9281_v39  ;;  %v9282_v58 = vunpack.i.l.bf16 %v9281_v39  ;;  %v17658_v39 = vld [vmem:[#allocation235_spill] sm:$0xff]  ;;  %v17662_v57 = vrot.slane %v17616_v49, 4 }
 0x39e   : > { %9575 = vrot.lane.b32.xlu1 %v14561_v34, %s10117_s17  ;;  %v17660_v10 = vpack.c.bf16 %v17658_v39, %v17659_v33  ;;  %v17664_v60 = vld [vmem:[#allocation83_spill] sm:$0xff] }
 0x39f   : > { %9570 = vrot.lane.b32.xlu0 %v14453_v28, %s10113_s28  ;;  %v3591_v50 = vsel %vm2523_vm8, %v3587_v59, %v9283_v16  ;;  %v3619_v18 = vsel %vm2523_vm8, %v3615_v19, %v9282_v58  ;;  %v14601_v1 = vpop.permute.xlu1 %9295  ;;  %v14606_v54 = vpack.i.bf16 %v17662_v57, %v17661_v22  ;;  %v2781_v28 = vsel %vm2488_vm5, %v17663_v32, %v8943_v55 }
 0x3a0   : > { %5813 = vmatmul.mubr.bf16.vlgmr.msra.gmra.mrb[64].mxu1 %v17660_v10  ;;  %v9291_v36 = vpop.permute.xlu0 %9290  ;;  %v9297_v35 = vunpack.i.l.bf16 %v14601_v1  ;;  %v9619_v56 = vpack.i.bf16 %v17664_v60, %v17615_v43  ;;  %v2821_v16 = vsel %vm869_vm0, %v2817_v23, %v8918_v45  ;;  %v3595_v33 = vsel %vm2532_vm9, %v3591_v50, %v9288_v51  ;;  %v17665_v45 = vld [vmem:[#allocation158_spill] sm:$0xff] }
 0x3a1   : > { %v9293_v58 = vunpack.i.h.bf16 %v9291_v36  ;;  %v9292_v59 = vunpack.i.l.bf16 %v9291_v36  ;;  %v8963_v19 = vunpack.i.h.bf16 %v17592_v25  ;;  %v2785_v39 = vsel %vm2497_vm6, %v2781_v28, %v8998_v27 }
 0x3a2   : > { %9585 = vrot.lane.b32.xlu1 %v14460_v9, %s10111_s26  ;;  %v3623_v55 = vsel %vm2532_vm9, %v3619_v18, %v9287_v17  ;;  %v3599_v10 = vsel %vm2541_vm10, %v3595_v33, %v9297_v35  ;;  %v9038_v23 = vunpack.i.h.bf16 %v13865_v37  ;;  %v9013_v25 = vunpack.i.h.bf16 %v17597_v61  ;;  %v17666_v37 = vld [vmem:[#allocation164_spill] sm:$0xff] }
 0x3a3   : > { %9580 = vrot.lane.b32.xlu0 %v14444_v21, %s10114_s29  ;;  %v3627_v51 = vsel %vm2541_vm10, %v17665_v45, %v9292_v59  ;;  %v3628_v50 = vsel %vm2541_vm10, %v3623_v55, %v9293_v58  ;;  %v3665_v22 = vrot.slane %v3599_v10, 4  ;;  %v9306_v9 = vpop.permute.xlu1 %9305  ;;  %v2825_v27 = vsel %vm2523_vm8, %v2821_v16, %v8963_v19  ;;  %v17670_v59 = vld [vmem:[#allocation202_spill] sm:$0xff] }
 0x3a4   : > { %v3662_v57 = vrot.slane %v3627_v51, 4  ;;  %v3667_v17 = vrot.slane %v3628_v50, 4  ;;  %v9301_v18 = vpop.permute.xlu0 %9300  ;;  %v9063_v32 = vunpack.i.h.bf16 %v17598_v11  ;;  %v17667_v36 = vrot.slane %v17666_v37, 4 }
 0x3a5   : > { %v9303_v28 = vunpack.i.h.bf16 %v9301_v18  ;;  %v9302_v21 = vunpack.i.l.bf16 %v9301_v18  ;;  %v9307_v33 = vunpack.i.l.bf16 %v9306_v9  ;;  %v17668_v61 = vrot.slane %v17622_v44, 4 }
 0x3a6   : > { %9595 = vrot.lane.b32.xlu1 %v14481_v47, %s10112_s27  ;;  %v3666_v35 = vsel %vm2858_vm3, %v17667_v36, %v3665_v22  ;;  %v2789_v47 = vsel %vm2506_vm7, %v2785_v39, %v9038_v23  ;;  %v2829_v55 = vsel %vm2532_vm9, %v2825_v27, %v9013_v25  ;;  %v8953_v50 = vunpack.i.h.bf16 %v17606_v46  ;;  %v17673_v23 = vld [vmem:[#allocation228_spill] sm:$0xff]  ;;  %v17674_v25 = vld [vmem:[#allocation185_spill] sm:$0xff] }
 0x3a7   : > { %9590 = vrot.lane.b32.xlu0 %v14473_v31, %s10115_s30  ;;  %v3664_v16 = vsel %vm2858_vm3, %v3662_v57, %v17668_v61  ;;  %v17669_v58 = vmov %v17668_v61  ;;  %v5369_v19 = vpack.c.bf16 %v3666_v35, %v17670_v59  ;;  %v4415_v10 = vsel %vm2488_vm5, %v17484_v48, %v9302_v21  ;;  %v9316_v45 = vpop.permute.xlu1 %9315 }
 0x3a8   : > { %v3668_v11 = vsel %vm2858_vm3, %v17669_v58, %v3667_v17  ;;  %v8913_v31 = vunpack.i.h.bf16 %v17596_v5  ;;  %v9003_v22 = vunpack.i.h.bf16 %v17610_v14  ;;  %v9308_v44 = vunpack.i.h.bf16 %v9306_v9  ;;  %v9311_v57 = vpop.permute.xlu0 %9310  ;;  %v17671_v17 = vld [vmem:[#allocation20_spill] sm:$0xff] }
 0x3a9   : > { %v5370_v51 = vpack.c.bf16 %v3668_v11, %v3664_v16  ;;  %v4387_v18 = vsel %vm2488_vm5, %v17671_v17, %v9303_v28  ;;  %v9313_v37 = vunpack.i.h.bf16 %v9311_v57  ;;  %v9312_v39 = vunpack.i.l.bf16 %v9311_v57 }
 0x3aa   : > { %v17672_v48 = vpack.i.bf16 %v17645_v40, %v17585_v6  ;;  %v9624_v5 = vpack.i.bf16 %v17674_v25, %v17673_v23  ;;  %v2793_v46 = vsel %vm869_vm0, %v2789_v47, %v8913_v31  ;;  %v2833_v14 = vsel %vm2541_vm10, %v2829_v55, %v9063_v32  ;;  %v17675_v47 = vld [vmem:[#allocation87_spill] sm:$0xff] }
 0x3ab   : > { %5820 = vmatprep.mubr.bf16.mxu1 %v5370_v51  ;;  %v4419_v9 = vsel %vm2497_vm6, %v4415_v10, %v9307_v33  ;;  %v9317_v27 = vunpack.i.l.bf16 %v9316_v45  ;;  %9600 = vrot.lane.b32.xlu0 %v14449_v0, %s10116_s16  ;;  %v5327_v28 = vrot.slane %v14169_v24, 4  ;;  %v2892_v21 = vrot.slane %v14155_v29, 4  ;;  %v9326_v35 = vpop.permute.xlu1 %9325 }
 0x3ac   : > { %9605 = vrot.lane.b32.xlu1 %v17672_v48, %s10116_s16  ;;  %5821 = vmatmul.mubr.bf16.gmra.mrb[68].mxu1 %v5369_v19  ;;  %v2893_v6 = vrot.slane %v14158_v7, 4  ;;  %v4423_v36 = vsel %vm2506_vm7, %v4419_v9, %v9312_v39  ;;  %v4391_v61 = vsel %vm2497_vm6, %v4387_v18, %v9308_v44  ;;  %v9318_v16 = vunpack.i.h.bf16 %v9316_v45  ;;  %v9321_v32 = vpop.permute.xlu0 %9320 }
 0x3ad   : > { %v9328_v58 = vunpack.i.h.bf16 %v9326_v35  ;;  %v9327_v33 = vunpack.i.l.bf16 %v9326_v35  ;;  %v16587_v11 = vrot.slane %v14172_v4, 4  ;;  %v9298_v0 = vunpack.i.h.bf16 %v14601_v1 }
 0x3ae   : > { %v4395_v59 = vsel %vm2506_vm7, %v4391_v61, %v9313_v37  ;;  %v9322_v24 = vunpack.i.l.bf16 %v9321_v32  ;;  %v2797_v29 = vsel %vm2523_vm8, %v2793_v46, %v8953_v50  ;;  %v4427_v7 = vsel %vm869_vm0, %v4423_v36, %v9317_v27  ;;  %v17676_v46 = vld [vmem:[#allocation180_spill] sm:$0xff] }
 0x3af   : > { %v9323_v19 = vunpack.i.h.bf16 %v9321_v32  ;;  %v4435_v55 = vsel %vm2532_vm9, %v17675_v47, %v9327_v33  ;;  %9610 = vrot.lane.b32.xlu0 %v14561_v34, %s10113_s28  ;;  %v9053_v10 = vunpack.i.h.bf16 %v17608_v8  ;;  %v2897_v1 = vrot.slane %v2833_v14, 4  ;;  %v9336_v51 = vpop.permute.xlu1 %9335  ;;  %v17679_v33 = vld [vmem:[#allocation208_spill] sm:$0xff] }
 0x3b0   : > { %9615 = vrot.lane.b32.xlu1 %v14606_v54, %s10117_s17  ;;  %v4431_v45 = vsel %vm2523_vm8, %v4427_v7, %v9322_v24  ;;  %v4443_v31 = vsel %vm2541_vm10, %v4435_v55, %v9298_v0  ;;  %v4399_v54 = vsel %vm869_vm0, %v4395_v59, %v9318_v16  ;;  %v14685_v44 = vpop.permute.xlu0 %9330  ;;  %v9338_v57 = vunpack.i.h.bf16 %v9336_v51  ;;  %v17682_v55 = vld [vmem:[#allocation191_spill] sm:$0xff] }
 0x3b1   : > { %v4436_v50 = vsel %vm2532_vm9, %v4431_v45, %v9328_v58  ;;  %v9337_v17 = vunpack.i.l.bf16 %v9336_v51  ;;  %v9332_v18 = vunpack.i.l.bf16 %v14685_v44  ;;  %v4478_v34 = vrot.slane %v4443_v31, 4  ;;  %v17678_v58 = vld [vmem:[#allocation229_spill] sm:$0xff] }
 0x3b2   : > { %v14692_v8 = vsel %vm2858_vm3, %v5327_v28, %v16587_v11  ;;  %v14695_v37 = vsel %vm2858_vm3, %v2892_v21, %v2893_v6  ;;  %v4403_v39 = vsel %vm2523_vm8, %v4399_v54, %v9323_v19  ;;  %v14708_v9 = vsel %vm2858_vm3, %v2893_v6, %v2897_v1  ;;  %v17684_v1 = vld [vmem:[#allocation59_spill] sm:$0xff] }
 0x3b3   : > { %v4444_v48 = vsel %vm2541_vm10, %v4436_v50, %v9337_v17  ;;  %9620 = vrot.lane.b32.xlu0 %v9619_v56, %s10117_s17  ;;  %v2801_v27 = vsel %vm2532_vm9, %v2797_v29, %v9003_v22  ;;  %v4407_v28 = vsel %vm2532_vm9, %v4403_v39, %v9332_v18  ;;  %v9346_v36 = vpop.permute.xlu1 %9345  ;;  %v2889_v56 = vrot.slane %v14229_v52, 4 }
 0x3b4   : > { %9625 = vrot.lane.b32.xlu1 %v9624_v5, %s10114_s29  ;;  %v17677_v5 = vld [vmem:[#allocation77_spill] sm:$0xff]  ;;  %v4483_v21 = vrot.slane %v4444_v48, 4  ;;  %v2805_v61 = vsel %vm2541_vm10, %v2801_v27, %v9053_v10  ;;  %v4411_v16 = vsel %vm2541_vm10, %v4407_v28, %v9338_v57  ;;  %v9341_v32 = vpop.permute.xlu0 %9340  ;;  %v14719_v6 = vpack.i.bf16 %v17679_v33, %v17678_v58  ;;  %v17687_v57 = vld [vmem:[#allocation14_spill] sm:$0xff]  ;;  %v17690_v28 = vld [vmem:[#allocation15_spill] sm:$0xff] }
 0x3b5   : > { %v14705_v14 = vpack.i.bf16 %v17677_v5, %v17676_v46  ;;  %v2890_v22 = vrot.slane %v14232_v13, 4  ;;  %v4481_v0 = vrot.slane %v4411_v16, 4  ;;  %v17680_v59 = vrot.slane %v17643_v62, 4  ;;  %v17683_v13 = vld [vmem:[#allocation213_spill] sm:$0xff]  ;;  %v17686_v62 = vld [vmem:[#allocation30_spill] sm:$0xff]  ;;  %v17689_v46 = vld [vmem:[#allocation28_spill] sm:$0xff] }
 0x3b6   : > { %v9342_v7 = vunpack.i.l.bf16 %v9341_v32  ;;  %v9644_v10 = vpack.i.bf16 %v17683_v13, %v17682_v55  ;;  %v17685_v45 = vrot.slane %v17684_v1, 4  ;;  %v2895_v31 = vrot.slane %v2805_v61, 4 }
 0x3b7   : > { %v4480_v24 = vsel %vm2858_vm3, %v4478_v34, %v17680_v59  ;;  %v17681_v29 = vmov %v17680_v59  ;;  %9630 = vrot.lane.b32.xlu0 %v14719_v6, %s10111_s26  ;;  %v9356_v47 = vpop.permute.xlu1 %9355  ;;  %v9343_v54 = vunpack.i.h.bf16 %v9341_v32  ;;  %v14739_v17 = vpack.i.bf16 %v17687_v57, %v17686_v62  ;;  %v17688_v34 = vld [vmem:[#allocation186_spill] sm:$0xff] }
 0x3b8   : > { %9635 = vrot.lane.b32.xlu1 %v14705_v14, %s10115_s30  ;;  %v4484_v52 = vsel %vm2858_vm3, %v17681_v29, %v4483_v21  ;;  %v4482_v51 = vsel %vm2858_vm3, %v17685_v45, %v4481_v0  ;;  %v9351_v50 = vpop.permute.xlu0 %9350  ;;  %v9347_v18 = vunpack.i.l.bf16 %v9346_v36  ;;  %v14744_v48 = vsel %vm2858_vm3, %v2889_v56, %v2890_v22 }
 0x3b9   : > { %v5374_v19 = vpack.c.bf16 %v4484_v52, %v4480_v24  ;;  %v5373_v39 = vpack.c.bf16 %v4482_v51, %v17688_v34  ;;  %v5243_v5 = vsel %vm2488_vm5, %v17689_v46, %v9342_v7  ;;  %v9352_v27 = vunpack.i.l.bf16 %v9351_v50  ;;  %v17691_v24 = vld [vmem:[#allocation24_spill] sm:$0xff] }
 0x3ba   : > { %v14752_v21 = vpack.i.bf16 %v17656_v53, %v17690_v28  ;;  %v14755_v61 = vsel %vm2858_vm3, %v2890_v22, %v2895_v31  ;;  %v3689_v16 = vrot.slane %v14282_v38, 4  ;;  %v16586_v32 = vrot.slane %v14285_v2, 4 }
 0x3bb   : > { %5828 = vmatprep.mubr.bf16.mxu1 %v5374_v19  ;;  %9640 = vrot.lane.b32.xlu0 %v14739_v17, %s10112_s27  ;;  %v9348_v56 = vunpack.i.h.bf16 %v9346_v36  ;;  %v14759_v0 = vpop.permute.xlu1 %9365  ;;  %v5215_v29 = vsel %vm2488_vm5, %v17691_v24, %v9343_v54  ;;  %v9353_v52 = vunpack.i.h.bf16 %v9351_v50  ;;  %v17692_v19 = vld [vmem:[#allocation212_spill] sm:$0xff]  ;;  %v5247_v1 = vsel %vm2497_vm6, %v5243_v5, %v9347_v18  ;;  %v17694_v50 = vld [vmem:[#allocation153_spill] sm:$0xff] }
 0x3bc   : > { %9645 = vrot.lane.b32.xlu1 %v9644_v10, %s10116_s16  ;;  %5829 = vmatmul.mubr.bf16.gmra.mrb[72].mxu1 %v5373_v39  ;;  %v9361_v7 = vpop.permute.xlu0 %9360  ;;  %v14767_v22 = vpack.i.bf16 %v17692_v19, %v17683_v13  ;;  %v17693_v10 = vld [vmem:[#allocation19_spill] sm:$0xff]  ;;  %v9357_v36 = vunpack.i.l.bf16 %v9356_v47  ;;  %v5251_v51 = vsel %vm2506_vm7, %v5247_v1, %v9352_v27  ;;  %v9333_v54 = vunpack.i.h.bf16 %v14685_v44 }
 0x3bd   : > { %v5311_v38 = vrot.slane %v17693_v10, 4  ;;  %v9362_v45 = vunpack.i.l.bf16 %v9361_v7  ;;  %v9363_v31 = vunpack.i.h.bf16 %v9361_v7  ;;  %v5219_v13 = vsel %vm2497_vm6, %v5215_v29, %v9348_v56  ;;  %v17695_v7 = vld [vmem:[#allocation162_spill] sm:$0xff] }
 0x3be   : > { %v14783_v18 = vsel %vm2858_vm3, %v3689_v16, %v16586_v32  ;;  %v5223_v34 = vsel %vm2506_vm7, %v5219_v13, %v9353_v52  ;;  %v9358_v39 = vunpack.i.h.bf16 %v9356_v47  ;;  %v5255_v24 = vsel %vm869_vm0, %v5251_v51, %v9357_v36  ;;  %v17696_v52 = vld [vmem:[#allocation16_spill] sm:$0xff] }
 0x3bf   : > { %9650 = vrot.lane.b32.xlu0 %v14767_v22, %s10113_s28  ;;  %v5259_v62 = vsel %vm2523_vm8, %v17694_v50, %v9362_v45  ;;  %v9376_v57 = vpop.permute.xlu1 %9375  ;;  %v9367_v44 = vunpack.i.l.bf16 %v14759_v0  ;;  %v5307_v10 = vrot.slane %v17695_v7, 4  ;;  %v5260_v16 = vsel %vm2523_vm8, %v5255_v24, %v9363_v31  ;;  %v17721_v32 = vld [vmem:[#allocation108_spill] sm:$0xff] }
 0x3c0   : > { %9655 = vrot.lane.b32.xlu1 %v14752_v21, %s10117_s17  ;;  %v9371_v46 = vpop.permute.xlu0 %9370  ;;  %v9378_v5 = vunpack.i.h.bf16 %v9376_v57  ;;  %v9377_v27 = vunpack.i.l.bf16 %v9376_v57  ;;  %v5267_v29 = vsel %vm2532_vm9, %v5259_v62, %v9333_v54  ;;  %v5308_v36 = vrot.slane %v17696_v52, 4  ;;  %v7584_v62 = vpop.f32.mrb[8].mxu1  ;;  %v17697_v52 = vld [vmem:[#allocation40_spill] sm:$0xff] }
 0x3c1   : > { %v9372_v56 = vunpack.i.l.bf16 %v9371_v46  ;;  %v9373_v1 = vunpack.i.h.bf16 %v9371_v46  ;;  %v14800_v54 = vpack.i.bf16 %v17682_v55, %v17645_v40  ;;  %v5227_v50 = vsel %vm869_vm0, %v5223_v34, %v9358_v39 }
 0x3c2   : > { %v5275_v47 = vsel %vm2541_vm10, %v5267_v29, %v9377_v27  ;;  %v5231_v46 = vsel %vm2523_vm8, %v5227_v50, %v9367_v44  ;;  %v7585_v29 = vpop.f32.mrb[9].mxu1 }
 0x3c3   : > { %9660 = vrot.lane.b32.xlu0 %v14719_v6, %s10114_s29  ;;  %v5268_v45 = vsel %vm2532_vm9, %v5260_v16, %v9372_v56  ;;  %v5310_v51 = vrot.slane %v5275_v47, 4  ;;  %v9386_v13 = vpop.permute.xlu1 %9385  ;;  %v9679_v6 = vpack.i.bf16 %v17664_v60, %v17692_v19  ;;  %v5235_v40 = vsel %vm2532_vm9, %v5231_v46, %v9373_v1  ;;  %v7587_v39 = vpop.f32.mrb[10].mxu1 }
 0x3c4   : > { %9665 = vrot.lane.b32.xlu1 %v14705_v14, %s10111_s26  ;;  %v5276_v31 = vsel %vm2541_vm10, %v5268_v45, %v9378_v5  ;;  %v9388_v56 = vunpack.i.h.bf16 %v9386_v13  ;;  %v9387_v55 = vunpack.i.l.bf16 %v9386_v13  ;;  %v14813_v34 = vadd.f32 %v7585_v29, %v7584_v62  ;;  %v7588_v44 = vpop.f32.mrb[11].mxu1  ;;  %v17698_v13 = vld [vmem:[#allocation138_spill] sm:$0xff] }
 0x3c5   : > { %v14804_v57 = vpop.permute.xlu0 %9380  ;;  %v5315_v27 = vrot.slane %v5276_v31, 4  ;;  %v5312_v19 = vsel %vm2858_vm3, %v5310_v51, %v5311_v38  ;;  %v9684_v16 = vpack.i.bf16 %v17690_v28, %v17664_v60  ;;  %v5309_v1 = vsel %vm2858_vm3, %v5307_v10, %v5308_v36  ;;  %v17699_v51 = vld [vmem:[#allocation52_spill] sm:$0xff]  ;;  %v17700_v28 = vld [vmem:[#allocation54_spill] sm:$0xff] }
 0x3c6   : > { %v9382_v24 = vunpack.i.l.bf16 %v14804_v57  ;;  %v4505_v45 = vrot.slane %v17697_v52, 4  ;;  %v16584_v50 = vrot.slane %v17698_v13, 4  ;;  %v14825_v62 = vadd.f32 %v7588_v44, %v7587_v39 }
 0x3c7   : > { %9670 = vrot.lane.b32.xlu0 %v14739_v17, %s10115_s30  ;;  %v9396_v7 = vpop.permute.xlu1 %9395  ;;  %v5316_v47 = vsel %vm2858_vm3, %v5311_v38, %v5315_v27  ;;  %v3604_v38 = vsel %vm2488_vm5, %v17700_v28, %v9387_v55  ;;  %v17704_v28 = vld [vmem:[#allocation116_spill] sm:$0xff] }
 0x3c8   : > { %9675 = vrot.lane.b32.xlu1 %v14800_v54, %s10112_s27  ;;  %v5239_v5 = vsel %vm2541_vm10, %v5235_v40, %v9382_v24  ;;  %v3576_v24 = vsel %vm2488_vm5, %v17699_v51, %v9388_v56  ;;  %v5378_v60 = vpack.c.bf16 %v5316_v47, %v5312_v19  ;;  %v9398_v10 = vunpack.i.h.bf16 %v9396_v7  ;;  %v7590_v47 = vpop.f32.mrb[12].mxu1 }
 0x3c9   : > { %v5313_v31 = vrot.slane %v5239_v5, 4  ;;  %v9391_v46 = vpop.permute.xlu0 %9390  ;;  %v9397_v27 = vunpack.i.l.bf16 %v9396_v7 }
 0x3ca   : > { %v9393_v29 = vunpack.i.h.bf16 %v9391_v46  ;;  %v9392_v40 = vunpack.i.l.bf16 %v9391_v46  ;;  %5836 = vmatprep.mubr.bf16.mxu1 %v5378_v60  ;;  %v17701_v46 = vld [vmem:[#allocation5_spill] sm:$0xff]  ;;  %v17703_v60 = vld [vmem:[#allocation156_spill] sm:$0xff] }
 0x3cb   : > { %9680 = vrot.lane.b32.xlu0 %v9679_v6, %s10116_s16  ;;  %v5314_v5 = vsel %vm2858_vm3, %v5308_v36, %v5313_v31  ;;  %v9689_v55 = vpack.i.bf16 %v17701_v46, %v17656_v53  ;;  %v9383_v6 = vunpack.i.h.bf16 %v14804_v57  ;;  %v7591_v31 = vpop.f32.mrb[13].mxu1 }
 0x3cc   : > { %9685 = vrot.lane.b32.xlu1 %v9684_v16, %s10113_s28  ;;  %v3580_v39 = vsel %vm2497_vm6, %v3576_v24, %v9393_v29  ;;  %v3608_v44 = vsel %vm2497_vm6, %v3604_v38, %v9392_v40  ;;  %v14836_v56 = vpop.permute.xlu1 %9405  ;;  %v5377_v52 = vpack.c.bf16 %v5314_v5, %v5309_v1  ;;  %v17702_v16 = vld [vmem:[#allocation238_spill] sm:$0xff]  ;;  %v14847_v1 = vsel %vm2858_vm3, %v4505_v45, %v16584_v50  ;;  %v7593_v57 = vpop.f32.mrb[14].mxu1 }
 0x3cd   : > { %v9694_v19 = vpack.i.bf16 %v17702_v16, %v17701_v46  ;;  %v9401_v51 = vpop.permute.xlu0 %9400  ;;  %v3584_v24 = vsel %vm2506_vm7, %v3580_v39, %v9398_v10  ;;  %v3612_v29 = vsel %vm2506_vm7, %v3608_v44, %v9397_v27  ;;  %v9407_v40 = vunpack.i.l.bf16 %v14836_v56 }
 0x3ce   : > { %v9403_v7 = vunpack.i.h.bf16 %v9401_v51  ;;  %v9402_v36 = vunpack.i.l.bf16 %v9401_v51  ;;  %5837 = vmatmul.mubr.bf16.gmra.mrb[76].mxu1 %v5377_v52  ;;  %v14852_v53 = vadd.f32 %v7591_v31, %v7590_v47  ;;  %v17705_v38 = vpack.c.bf16 %v17703_v60, %v17704_v28  ;;  %v7594_v52 = vpop.f32.mrb[15].mxu1 }
 0x3cf   : > { %9690 = vrot.lane.b32.xlu0 %v9689_v55, %s10113_s28  ;;  %v9368_v10 = vunpack.i.h.bf16 %v14759_v0  ;;  %v14861_v27 = vadd.f32 %v7594_v52, %v7593_v57  ;;  %v17708_v0 = vld [vmem:[#allocation63_spill] sm:$0xff] }
 0x3d0   : > { %9695 = vrot.lane.b32.xlu1 %v9694_v19, %s10117_s17  ;;  %5844 = vmatprep.mubr.bf16.mxu1 %v17705_v38  ;;  %v3588_v5 = vsel %vm869_vm0, %v3584_v24, %v9403_v7  ;;  %v3616_v45 = vsel %vm869_vm0, %v3612_v29, %v9402_v36  ;;  %v9416_v46 = vpop.permute.xlu1 %9415  ;;  %v17706_v19 = vld [vmem:[#allocation130_spill] sm:$0xff]  ;;  %v17707_v24 = vld [vmem:[#allocation215_spill] sm:$0xff]  ;;  %v3673_v29 = vrot.slane %v17708_v0, 4 }
 0x3d1   : > { %v9411_v39 = vpop.permute.xlu0 %9410  ;;  %v9418_v44 = vunpack.i.h.bf16 %v9416_v46  ;;  %v3629_v47 = vsel %vm2541_vm10, %v17706_v19, %v9383_v6  ;;  %v9417_v31 = vunpack.i.l.bf16 %v9416_v46  ;;  %v3592_v7 = vsel %vm2523_vm8, %v3588_v5, %v9407_v40  ;;  %v17710_v19 = vld [vmem:[#allocation26_spill] sm:$0xff] }
 0x3d2   : > { %v9413_v51 = vunpack.i.h.bf16 %v9411_v39  ;;  %v9412_v55 = vunpack.i.l.bf16 %v9411_v39  ;;  %v3620_v36 = vsel %vm2523_vm8, %v3616_v45, %v9368_v10  ;;  %v3672_v28 = vrot.slane %v3629_v47, 4  ;;  %v17709_v39 = vld [vmem:[#allocation172_spill] sm:$0xff] }
 0x3d3   : > { %4269 = vrot.lane.b32.xlu0 %v17707_v24, %s10117_s17  ;;  %v17711_v50 = vpack.c.bf16 %v17709_v39, %v17710_v19  ;;  %v16585_v47 = vrot.slane %v14537_v30, 4 }
 0x3d4   : > { %9700 = vrot.lane.b32.xlu1 %v14705_v14, %s10114_s29  ;;  %v3596_v57 = vsel %vm2532_vm9, %v3592_v7, %v9413_v51  ;;  %v3624_v60 = vsel %vm2532_vm9, %v3620_v36, %v9412_v55  ;;  %v9426_v6 = vpop.permute.xlu1 %9425  ;;  %v7596_v14 = vpop.f32.mrb[16].mxu1  ;;  %v5337_v51 = vrot.slane %v14534_v26, 4  ;;  %v17712_v36 = vld [vmem:[#allocation82_spill] sm:$0xff] }
 0x3d5   : > { %v3600_v38 = vsel %vm2541_vm10, %v3596_v57, %v9418_v44  ;;  %v3630_v52 = vsel %vm2541_vm10, %v3624_v60, %v9417_v31  ;;  %v9421_v46 = vpop.permute.xlu0 %9420  ;;  %v7597_v10 = vpop.f32.mrb[17].mxu1  ;;  %v9427_v44 = vunpack.i.l.bf16 %v9426_v6 }
 0x3d6   : > { %v3675_v40 = vrot.slane %v3600_v38, 4  ;;  %v3677_v5 = vrot.slane %v3630_v52, 4  ;;  %v9422_v45 = vunpack.i.l.bf16 %v9421_v46  ;;  %5845 = vmatmul.mubr.bf16.gmra.mrb[80].mxu1 %v17711_v50  ;;  %v14883_v55 = vadd.f32 %v7597_v10, %v7596_v14  ;;  %v7599_v31 = vpop.f32.mrb[18].mxu1 }
 0x3d7   : > { %9705 = vrot.lane.b32.xlu0 %v14739_v17, %s10111_s26  ;;  %v9423_v7 = vunpack.i.h.bf16 %v9421_v46  ;;  %v7600_v57 = vpop.f32.mrb[19].mxu1  ;;  %v3674_v10 = vsel %vm2858_vm3, %v3672_v28, %v3673_v29  ;;  %v9428_v46 = vunpack.i.h.bf16 %v9426_v6 }
 0x3d8   : > { %9710 = vrot.lane.b32.xlu1 %v14800_v54, %s10115_s30  ;;  %v4416_v0 = vsel %vm2488_vm5, %v17712_v36, %v9422_v45  ;;  %v9436_v50 = vpop.permute.xlu1 %9435  ;;  %v3678_v60 = vsel %vm2858_vm3, %v3673_v29, %v3677_v5  ;;  %v17713_v54 = vld [vmem:[#allocation122_spill] sm:$0xff]  ;;  %v14893_v52 = vadd.f32 %v7600_v57, %v7599_v31  ;;  %v17715_v5 = vld [vmem:[#allocation169_spill] sm:$0xff]  ;;  %v17717_v57 = vld [vmem:[#allocation91_spill] sm:$0xff] }
 0x3d9   : > { %v17714_v38 = vrot.slane %v17713_v54, 4  ;;  %v9431_v14 = vpop.permute.xlu0 %9430  ;;  %v9437_v19 = vunpack.i.l.bf16 %v9436_v50  ;;  %v5386_v17 = vpack.c.bf16 %v3678_v60, %v3674_v10  ;;  %v4420_v45 = vsel %vm2497_vm6, %v4416_v0, %v9427_v44  ;;  %v17716_v29 = vld [vmem:[#allocation62_spill] sm:$0xff]  ;;  %v7602_v54 = vpop.f32.mrb[20].mxu1 }
 0x3da   : > { %v9432_v39 = vunpack.i.l.bf16 %v9431_v14  ;;  %v4388_v28 = vsel %vm2488_vm5, %v17716_v29, %v9423_v7  ;;  %v9433_v31 = vunpack.i.h.bf16 %v9431_v14  ;;  %v17718_v44 = vrot.slane %v17674_v25, 4  ;;  %v7603_v14 = vpop.f32.mrb[21].mxu1 }
 0x3db   : > { %v3676_v26 = vsel %vm2858_vm3, %v17714_v38, %v3675_v40  ;;  %9715 = vrot.lane.b32.xlu0 %v14767_v22, %s10112_s27  ;;  %v14905_v40 = vsel %vm2858_vm3, %v5337_v51, %v16585_v47  ;;  %5852 = vmatprep.mubr.bf16.mxu1 %v5386_v17  ;;  %v9408_v22 = vunpack.i.h.bf16 %v14836_v56  ;;  %v9724_v51 = vpack.i.bf16 %v17707_v24, %v17702_v16  ;;  %v7605_v56 = vpop.f32.mrb[22].mxu1 }
 0x3dc   : > { %9720 = vrot.lane.b32.xlu1 %v14752_v21, %s10116_s16  ;;  %v5385_v36 = vpack.c.bf16 %v3676_v26, %v17715_v5  ;;  %v4424_v21 = vsel %vm2506_vm7, %v4420_v45, %v9432_v39  ;;  %v9446_v6 = vpop.permute.xlu1 %9445  ;;  %v9729_v0 = vpack.i.bf16 %v17718_v44, %v17717_v57  ;;  %v4392_v10 = vsel %vm2497_vm6, %v4388_v28, %v9428_v46  ;;  %v7606_v5 = vpop.f32.mrb[23].mxu1  ;;  %v17719_v28 = vld [vmem:[#allocation72_spill] sm:$0xff] }
 0x3dd   : > { %v4428_v60 = vsel %vm869_vm0, %v4424_v21, %v9437_v19  ;;  %v14915_v38 = vpop.permute.xlu0 %9440  ;;  %v9448_v7 = vunpack.i.h.bf16 %v9446_v6  ;;  %v9447_v26 = vunpack.i.l.bf16 %v9446_v6  ;;  %v14922_v17 = vadd.f32 %v7603_v14, %v7602_v54 }
 0x3de   : > { %5853 = vmatmul.mubr.bf16.gmra.mrb[84].mxu1 %v5385_v36  ;;  %v4432_v39 = vsel %vm2523_vm8, %v4428_v60, %v9408_v22  ;;  %v4396_v19 = vsel %vm2506_vm7, %v4392_v10, %v9433_v31  ;;  %v9438_v45 = vunpack.i.h.bf16 %v9436_v50  ;;  %v9442_v29 = vunpack.i.l.bf16 %v14915_v38  ;;  %v17720_v22 = vld [vmem:[#allocation218_spill] sm:$0xff] }
 0x3df   : > { %9725 = vrot.lane.b32.xlu0 %v9724_v51, %s10113_s28  ;;  %v14927_v21 = vadd.f32 %v7606_v5, %v7605_v56  ;;  %v4437_v57 = vsel %vm2532_vm9, %v17719_v28, %v9447_v26  ;;  %v4438_v44 = vsel %vm2532_vm9, %v4432_v39, %v9448_v7  ;;  %v4489_v60 = vrot.slane %v17720_v22, 4  ;;  %v7608_v56 = vpop.f32.mrb[24].mxu1 }
 0x3e0   : > { %9730 = vrot.lane.b32.xlu1 %v9729_v0, %s10117_s17  ;;  %v9456_v16 = vpop.permute.xlu1 %9455  ;;  %v4400_v54 = vsel %vm869_vm0, %v4396_v19, %v9438_v45 }
 0x3e1   : > { %v14929_v36 = vpop.permute.xlu0 %9450  ;;  %v9458_v6 = vunpack.i.h.bf16 %v9456_v16  ;;  %v9457_v46 = vunpack.i.l.bf16 %v9456_v16  ;;  %v4404_v26 = vsel %vm2523_vm8, %v4400_v54, %v9442_v29  ;;  %v7609_v16 = vpop.f32.mrb[25].mxu1 }
 0x3e2   : > { %v9452_v0 = vunpack.i.l.bf16 %v14929_v36  ;;  %v7611_v19 = vpop.f32.mrb[26].mxu1 }
 0x3e3   : > { %v4445_v31 = vsel %vm2541_vm10, %v4437_v57, %v9457_v46  ;;  %v4446_v50 = vsel %vm2541_vm10, %v4438_v44, %v9458_v6  ;;  %5085 = vrot.lane.b32.xlu0 %v17673_v23, %s10117_s17  ;;  %v14945_v44 = vadd.f32 %v7609_v16, %v7608_v56  ;;  %v17723_v16 = vld [vmem:[#allocation141_spill] sm:$0xff] }
 0x3e4   : > { %v4488_v51 = vrot.slane %v4445_v31, 4  ;;  %v4493_v14 = vrot.slane %v4446_v50, 4  ;;  %v9466_v10 = vpop.permute.xlu1 %9465  ;;  %v4408_v39 = vsel %vm2532_vm9, %v4404_v26, %v9452_v0  ;;  %v7612_v50 = vpop.f32.mrb[27].mxu1 }
 0x3e5   : > { %v9461_v7 = vpop.permute.xlu0 %9460  ;;  %v9468_v28 = vunpack.i.h.bf16 %v9466_v10  ;;  %v9467_v57 = vunpack.i.l.bf16 %v9466_v10  ;;  %v14948_v54 = vadd.f32 %v7612_v50, %v7611_v19 }
 0x3e6   : > { %v9462_v5 = vunpack.i.l.bf16 %v9461_v7  ;;  %v4490_v6 = vsel %vm2858_vm3, %v4488_v51, %v4489_v60  ;;  %v4494_v46 = vsel %vm2858_vm3, %v4489_v60, %v4493_v14  ;;  %v17722_v14 = vld [vmem:[#allocation114_spill] sm:$0xff]  ;;  %v9463_v59 = vunpack.i.h.bf16 %v9461_v7 }
 0x3e7   : > { %v5390_v45 = vpack.c.bf16 %v4494_v46, %v4490_v6  ;;  %v5216_v60 = vsel %vm2488_vm5, %v17721_v32, %v9468_v28  ;;  %v5244_v10 = vsel %vm2488_vm5, %v17722_v14, %v9467_v57  ;;  %v17724_v6 = vrot.slane %v17723_v16, 4  ;;  %v7614_v32 = vpop.f32.mrb[28].mxu1 }
 0x3e8   : > { %v4412_v31 = vsel %vm2541_vm10, %v4408_v39, %v9462_v5  ;;  %v9476_v29 = vpop.permute.xlu1 %9475  ;;  %v9443_v5 = vunpack.i.h.bf16 %v14915_v38  ;;  %v7615_v16 = vpop.f32.mrb[29].mxu1 }
 0x3e9   : > { %v4491_v22 = vrot.slane %v4412_v31, 4  ;;  %v9471_v0 = vpop.permute.xlu0 %9470  ;;  %5860 = vmatprep.mubr.bf16.mxu1 %v5390_v45  ;;  %v9478_v51 = vunpack.i.h.bf16 %v9476_v29  ;;  %v9477_v56 = vunpack.i.l.bf16 %v9476_v29  ;;  %v17725_v31 = vld [vmem:[#allocation121_spill] sm:$0xff] }
 0x3ea   : > { %v9473_v26 = vunpack.i.h.bf16 %v9471_v0  ;;  %v9472_v47 = vunpack.i.l.bf16 %v9471_v0  ;;  %v9453_v0 = vunpack.i.h.bf16 %v14929_v36 }
 0x3eb   : > { %v4492_v39 = vsel %vm2858_vm3, %v17724_v6, %v4491_v22 }
 0x3ec   : > { %v5220_v46 = vsel %vm2497_vm6, %v5216_v60, %v9473_v26  ;;  %v5248_v19 = vsel %vm2497_vm6, %v5244_v10, %v9472_v47  ;;  %v9486_v45 = vpop.permute.xlu1 %9485  ;;  %v5389_v50 = vpack.c.bf16 %v4492_v39, %v17725_v31  ;;  %v14964_v60 = vadd.f32 %v7615_v16, %v7614_v32  ;;  %v7617_v47 = vpop.f32.mrb[30].mxu1  ;;  %v17726_v10 = vld [vmem:[#allocation10_spill] sm:$0xff] }
 0x3ed   : > { %v9481_v28 = vpop.permute.xlu0 %9480  ;;  %v5224_v57 = vsel %vm2506_vm7, %v5220_v46, %v9478_v51  ;;  %v5252_v38 = vsel %vm2506_vm7, %v5248_v19, %v9477_v56  ;;  %v9488_v22 = vunpack.i.h.bf16 %v9486_v45  ;;  %v9487_v26 = vunpack.i.l.bf16 %v9486_v45  ;;  %v7618_v39 = vpop.f32.mrb[31].mxu1 }
 0x3ee   : > { %v9483_v29 = vunpack.i.h.bf16 %v9481_v28  ;;  %v9482_v14 = vunpack.i.l.bf16 %v9481_v28  ;;  %5861 = vmatmul.mubr.bf16.gmra.mrb[88].mxu1 %v5389_v50  ;;  %v5261_v6 = vsel %vm2523_vm8, %v17726_v10, %v9443_v5  ;;  %v14971_v31 = vadd.f32 %v7618_v39, %v7617_v47  ;;  %v17728_v47 = vld [vmem:[#allocation107_spill] sm:$0xff] }
 0x3ef   : > { %v5269_v46 = vsel %vm2532_vm9, %v5261_v6, %v9453_v0  ;;  %v5318_v10 = vrot.slane %v17728_v47, 4 }
 0x3f0   : > { %v5228_v36 = vsel %vm869_vm0, %v5224_v57, %v9483_v29  ;;  %v5256_v7 = vsel %vm869_vm0, %v5252_v38, %v9482_v14  ;;  %v9496_v51 = vpop.permute.xlu1 %9495  ;;  %v5277_v19 = vsel %vm2541_vm10, %v5269_v46, %v9463_v59  ;;  %v17727_v57 = vld [vmem:[#allocation220_spill] sm:$0xff] }
 0x3f1   : > { %v9491_v50 = vpop.permute.xlu0 %9490  ;;  %v9498_v56 = vunpack.i.h.bf16 %v9496_v51  ;;  %v9497_v28 = vunpack.i.l.bf16 %v9496_v51  ;;  %v5232_v16 = vsel %vm2523_vm8, %v5228_v36, %v9488_v22  ;;  %v5262_v5 = vsel %vm2523_vm8, %v5256_v7, %v9487_v26 }
 0x3f2   : > { %v9493_v45 = vunpack.i.h.bf16 %v9491_v50  ;;  %v9492_v32 = vunpack.i.l.bf16 %v9491_v50  ;;  %v5321_v29 = vrot.slane %v17727_v57, 4  ;;  %v5320_v6 = vrot.slane %v5277_v19, 4  ;;  %v7620_v46 = vpop.f32.mrb[32].mxu1  ;;  %v17729_v57 = vld [vmem:[#allocation150_spill] sm:$0xff] }
 0x3f3   : > { %v7621_v7 = vpop.f32.mrb[33].mxu1  ;;  %v5317_v35 = vrot.slane %v17729_v57, 4 }
 0x3f4   : > { %v5236_v14 = vsel %vm2532_vm9, %v5232_v16, %v9493_v45  ;;  %v5270_v38 = vsel %vm2532_vm9, %v5262_v5, %v9492_v32  ;;  %v9506_v0 = vpop.permute.xlu1 %9505  ;;  %v14983_v32 = vadd.f32 %v7621_v7, %v7620_v46  ;;  %v7623_v5 = vpop.f32.mrb[34].mxu1 }
 0x3f5   : > { %v5240_v39 = vsel %vm2541_vm10, %v5236_v14, %v9498_v56  ;;  %v5278_v59 = vsel %vm2541_vm10, %v5270_v38, %v9497_v28  ;;  %v9501_v51 = vpop.permute.xlu0 %9500  ;;  %v9508_v45 = vunpack.i.h.bf16 %v9506_v0  ;;  %v9507_v16 = vunpack.i.l.bf16 %v9506_v0  ;;  %v7624_v28 = vpop.f32.mrb[35].mxu1 }
 0x3f6   : > { %v5323_v50 = vrot.slane %v5240_v39, 4  ;;  %v5325_v22 = vrot.slane %v5278_v59, 4  ;;  %v9503_v36 = vunpack.i.h.bf16 %v9501_v51  ;;  %v9502_v26 = vunpack.i.l.bf16 %v9501_v51 }
 0x3f7   : > { %v14991_v39 = vadd.f32 %v7624_v28, %v7623_v5  ;;  %v5322_v0 = vsel %vm2858_vm3, %v5320_v6, %v5321_v29  ;;  %v5319_v46 = vsel %vm2858_vm3, %v5317_v35, %v5318_v10 }
 0x3f8   : > { %v3577_v19 = vsel %vm2488_vm5, %v17648_v15, %v9503_v36  ;;  %v3605_v56 = vsel %vm2488_vm5, %v17650_v42, %v9502_v26  ;;  %v9516_v14 = vpop.permute.xlu1 %9515  ;;  %v5326_v38 = vsel %vm2858_vm3, %v5321_v29, %v5325_v22  ;;  %v5324_v47 = vsel %vm2858_vm3, %v5318_v10, %v5323_v50 }
 0x3f9   : > { %v9511_v59 = vpop.permute.xlu0 %9510  ;;  %v9518_v57 = vunpack.i.h.bf16 %v9516_v14  ;;  %v5394_v15 = vpack.c.bf16 %v5326_v38, %v5322_v0  ;;  %v3581_v36 = vsel %vm2497_vm6, %v3577_v19, %v9508_v45  ;;  %v3609_v42 = vsel %vm2497_vm6, %v3605_v56, %v9507_v16  ;;  %v17730_v38 = vld [vmem:[#allocation157_spill] sm:$0xff] }
 0x3fa   : > { %v9513_v51 = vunpack.i.h.bf16 %v9511_v59  ;;  %v9512_v7 = vunpack.i.l.bf16 %v9511_v59  ;;  %v9517_v26 = vunpack.i.l.bf16 %v9516_v14  ;;  %v5393_v11 = vpack.c.bf16 %v5324_v47, %v5319_v46  ;;  %v7626_v29 = vpop.f32.mrb[36].mxu1  ;;  %v17731_v59 = vld [vmem:[#allocation167_spill] sm:$0xff] }
 0x3fb   : > { %5868 = vmatprep.mubr.bf16.mxu1 %v5394_v15  ;;  %v17732_v45 = vpack.c.bf16 %v17730_v38, %v17731_v59  ;;  %v7627_v16 = vpop.f32.mrb[37].mxu1 }
 0x3fc   : > { %v3585_v22 = vsel %vm2506_vm7, %v3581_v36, %v9513_v51  ;;  %v3613_v50 = vsel %vm2506_vm7, %v3609_v42, %v9512_v7  ;;  %v9526_v5 = vpop.permute.xlu1 %9525  ;;  %5869 = vmatmul.mubr.bf16.gmra.mrb[92].mxu1 %v5393_v11  ;;  %v15004_v47 = vadd.f32 %v7627_v16, %v7626_v29  ;;  %v7629_v0 = vpop.f32.mrb[38].mxu1 }
 0x3fd   : > { %v9521_v6 = vpop.permute.xlu0 %9520  ;;  %v3589_v35 = vsel %vm869_vm0, %v3585_v22, %v9518_v57  ;;  %5876 = vmatprep.mubr.bf16.mxu1 %v17732_v45  ;;  %v3617_v19 = vsel %vm869_vm0, %v3613_v50, %v9517_v26  ;;  %v9528_v56 = vunpack.i.h.bf16 %v9526_v5  ;;  %v9527_v14 = vunpack.i.l.bf16 %v9526_v5  ;;  %v7630_v51 = vpop.f32.mrb[39].mxu1  ;;  %v17733_v50 = vld [vmem:[#allocation165_spill] sm:$0xff] }
 0x3fe   : > { %v9523_v10 = vunpack.i.h.bf16 %v9521_v6  ;;  %v9522_v28 = vunpack.i.l.bf16 %v9521_v6  ;;  %v15008_v57 = vadd.f32 %v7630_v51, %v7629_v0  ;;  %v17736_v0 = vld [vmem:[#allocation76_spill] sm:$0xff] }
 0x400   : > { %v3593_v11 = vsel %vm2523_vm8, %v3589_v35, %v9523_v10  ;;  %v3621_v46 = vsel %vm2523_vm8, %v3617_v19, %v9522_v28  ;;  %v9536_v7 = vpop.permute.xlu1 %9535  ;;  %v17734_v28 = vld [vmem:[#allocation80_spill] sm:$0xff]  ;;  %v17735_v19 = vld [vmem:[#allocation70_spill] sm:$0xff] }
 0x401   : > { %v9531_v15 = vpop.permute.xlu0 %9530  ;;  %v9537_v22 = vunpack.i.l.bf16 %v9536_v7  ;;  %v3597_v6 = vsel %vm2532_vm9, %v3593_v11, %v9528_v56  ;;  %v3625_v26 = vsel %vm2532_vm9, %v3621_v46, %v9527_v14  ;;  %v3683_v38 = vrot.slane %v17734_v28, 4 }
 0x402   : > { %v9533_v36 = vunpack.i.h.bf16 %v9531_v15  ;;  %v9532_v42 = vunpack.i.l.bf16 %v9531_v15  ;;  %v17737_v51 = vpack.c.bf16 %v17735_v19, %v17736_v0 }
 0x403   : > { %v3601_v35 = vsel %vm2541_vm10, %v3597_v6, %v9537_v22 }
 0x404   : > { %v3631_v5 = vsel %vm2541_vm10, %v17733_v50, %v9532_v42  ;;  %v3632_v29 = vsel %vm2541_vm10, %v3625_v26, %v9533_v36  ;;  %v9546_v10 = vpop.permute.xlu1 %9545  ;;  %v3685_v16 = vrot.slane %v3601_v35, 4  ;;  %5877 = vmatmul.mubr.bf16.gmra.mrb[96].mxu1 %v17737_v51  ;;  %v17738_v42 = vrot.slane %v17637_v63, 4 }
 0x405   : > { %v3682_v59 = vrot.slane %v3631_v5, 4  ;;  %v3687_v45 = vrot.slane %v3632_v29, 4  ;;  %v9541_v56 = vpop.permute.xlu0 %9540  ;;  %v9547_v46 = vunpack.i.l.bf16 %v9546_v10  ;;  %v9548_v29 = vunpack.i.h.bf16 %v9546_v10 }
 0x406   : > { %v9543_v11 = vunpack.i.h.bf16 %v9541_v56  ;;  %v9542_v14 = vunpack.i.l.bf16 %v9541_v56  ;;  %v3686_v22 = vsel %vm2858_vm3, %v17738_v42, %v3685_v16  ;;  %v9538_v51 = vunpack.i.h.bf16 %v9536_v7 }
 0x407   : > { %v3684_v15 = vsel %vm2858_vm3, %v3682_v59, %v3683_v38  ;;  %v3688_v36 = vsel %vm2858_vm3, %v3683_v38, %v3687_v45  ;;  %v5401_v5 = vpack.c.bf16 %v3686_v22, %v14506_v3 }
 0x408   : > { %v4417_v6 = vsel %vm2488_vm5, %v17615_v43, %v9542_v14  ;;  %v9556_v26 = vpop.permute.xlu1 %9555  ;;  %v5402_v50 = vpack.c.bf16 %v3688_v36, %v3684_v15  ;;  %v4389_v28 = vsel %vm2488_vm5, %v17616_v49, %v9543_v11  ;;  %v7632_v45 = vpop.f32.mrb[40].mxu1 }
 0x409   : > { %v9551_v35 = vpop.permute.xlu0 %9550  ;;  %v4421_v38 = vsel %vm2497_vm6, %v4417_v6, %v9547_v46  ;;  %v9557_v63 = vunpack.i.l.bf16 %v9556_v26  ;;  %v7633_v0 = vpop.f32.mrb[41].mxu1  ;;  %v4393_v56 = vsel %vm2497_vm6, %v4389_v28, %v9548_v29  ;;  %v9558_v49 = vunpack.i.h.bf16 %v9556_v26  ;;  %v17739_v29 = vld [vmem:[#allocation98_spill] sm:$0xff] }
 0x40a   : > { %v9552_v19 = vunpack.i.l.bf16 %v9551_v35  ;;  %5884 = vmatprep.mubr.bf16.mxu1 %v5402_v50  ;;  %v9553_v59 = vunpack.i.h.bf16 %v9551_v35  ;;  %v15033_v3 = vadd.f32 %v7633_v0, %v7632_v45  ;;  %v7635_v10 = vpop.f32.mrb[42].mxu1 }
 0x40b   : > { %v7636_v11 = vpop.f32.mrb[43].mxu1 }
 0x40c   : > { %v4425_v16 = vsel %vm2506_vm7, %v4421_v38, %v9552_v19  ;;  %v9566_v43 = vpop.permute.xlu1 %9565  ;;  %5885 = vmatmul.mubr.bf16.gmra.mrb[100].mxu1 %v5401_v5  ;;  %v4397_v42 = vsel %vm2506_vm7, %v4393_v56, %v9553_v59  ;;  %v15037_v6 = vadd.f32 %v7636_v11, %v7635_v10  ;;  %v17740_v56 = vld [vmem:[#allocation38_spill] sm:$0xff] }
 0x40d   : > { %v9561_v14 = vpop.permute.xlu0 %9560  ;;  %v9568_v36 = vunpack.i.h.bf16 %v9566_v43  ;;  %v9567_v46 = vunpack.i.l.bf16 %v9566_v43  ;;  %v4429_v22 = vsel %vm869_vm0, %v4425_v16, %v9557_v63  ;;  %v4401_v45 = vsel %vm869_vm0, %v4397_v42, %v9558_v49 }
 0x40e   : > { %v9562_v15 = vunpack.i.l.bf16 %v9561_v14  ;;  %v9563_v50 = vunpack.i.h.bf16 %v9561_v14  ;;  %v4499_v10 = vrot.slane %v17740_v56, 4 }
 0x40f   : > { %v4439_v35 = vsel %vm2532_vm9, %v17739_v29, %v9567_v46 }
 0x410   : > { %v4433_v7 = vsel %vm2523_vm8, %v4429_v22, %v9562_v15  ;;  %v9576_v28 = vpop.permute.xlu1 %9575  ;;  %v4447_v5 = vsel %vm2541_vm10, %v4439_v35, %v9538_v51  ;;  %v4405_v16 = vsel %vm2523_vm8, %v4401_v45, %v9563_v50  ;;  %v17741_v50 = vrot.slane %v17655_v41, 4 }
 0x411   : > { %v9571_v26 = vpop.permute.xlu0 %9570  ;;  %v9578_v19 = vunpack.i.h.bf16 %v9576_v28  ;;  %v9577_v38 = vunpack.i.l.bf16 %v9576_v28  ;;  %v4440_v59 = vsel %vm2532_vm9, %v4433_v7, %v9568_v36  ;;  %v4498_v0 = vrot.slane %v4447_v5, 4 }
 0x412   : > { %v9572_v63 = vunpack.i.l.bf16 %v9571_v26 }
 0x413   : > { %v4448_v43 = vsel %vm2541_vm10, %v4440_v59, %v9577_v38  ;;  %v4500_v49 = vsel %vm2858_vm3, %v4498_v0, %v4499_v10 }
 0x414   : > { %v4409_v14 = vsel %vm2532_vm9, %v4405_v16, %v9572_v63  ;;  %v4503_v11 = vrot.slane %v4448_v43, 4  ;;  %v9586_v15 = vpop.permute.xlu1 %9585  ;;  %v17743_v43 = vld [vmem:[#allocation129_spill] sm:$0xff] }
 0x415   : > { %v4413_v51 = vsel %vm2541_vm10, %v4409_v14, %v9578_v19  ;;  %v9581_v46 = vpop.permute.xlu0 %9580  ;;  %v9587_v38 = vunpack.i.l.bf16 %v9586_v15  ;;  %v17742_v19 = vld [vmem:[#allocation146_spill] sm:$0xff]  ;;  %v9588_v0 = vunpack.i.h.bf16 %v9586_v15 }
 0x416   : > { %v4501_v22 = vrot.slane %v4413_v51, 4  ;;  %v4504_v36 = vsel %vm2858_vm3, %v4499_v10, %v4503_v11  ;;  %v9582_v42 = vunpack.i.l.bf16 %v9581_v46  ;;  %v9583_v28 = vunpack.i.h.bf16 %v9581_v46 }
 0x417   : > { %v5406_v7 = vpack.c.bf16 %v4504_v36, %v4500_v49  ;;  %v17744_v36 = vld [vmem:[#allocation217_spill] sm:$0xff] }
 0x418   : > { %v9596_v29 = vpop.permute.xlu1 %9595  ;;  %v4502_v35 = vsel %vm2858_vm3, %v17741_v50, %v4501_v22  ;;  %v5245_v59 = vsel %vm2488_vm5, %v17742_v19, %v9582_v42  ;;  %v5217_v56 = vsel %vm2488_vm5, %v17743_v43, %v9583_v28  ;;  %v9573_v22 = vunpack.i.h.bf16 %v9571_v26 }
 0x419   : > { %v9591_v5 = vpop.permute.xlu0 %9590  ;;  %5892 = vmatprep.mubr.bf16.mxu1 %v5406_v7  ;;  %v5405_v45 = vpack.c.bf16 %v4502_v35, %v14588_v20  ;;  %v5249_v14 = vsel %vm2497_vm6, %v5245_v59, %v9587_v38  ;;  %v9597_v11 = vunpack.i.l.bf16 %v9596_v29  ;;  %v5221_v49 = vsel %vm2497_vm6, %v5217_v56, %v9588_v0 }
 0x41a   : > { %v9592_v63 = vunpack.i.l.bf16 %v9591_v5  ;;  %v9593_v41 = vunpack.i.h.bf16 %v9591_v5  ;;  %v9598_v50 = vunpack.i.h.bf16 %v9596_v29  ;;  %v17745_v29 = vld [vmem:[#allocation224_spill] sm:$0xff] }
 0x41b   : > { %5893 = vmatmul.mubr.bf16.gmra.mrb[104].mxu1 %v5405_v45 }
 0x41c   : > { %v5253_v46 = vsel %vm2506_vm7, %v5249_v14, %v9592_v63  ;;  %v5225_v7 = vsel %vm2506_vm7, %v5221_v49, %v9593_v41 }
 0x41d   : > { %v9601_v10 = vpop.permute.xlu0 %9600  ;;  %v5257_v38 = vsel %vm869_vm0, %v5253_v46, %v9597_v11  ;;  %v5229_v14 = vsel %vm869_vm0, %v5225_v7, %v9598_v50 }
 0x41e   : > { %v15058_v16 = vpop.permute.xlu1 %9605  ;;  %v9602_v51 = vunpack.i.l.bf16 %v9601_v10  ;;  %v9603_v20 = vunpack.i.h.bf16 %v9601_v10  ;;  %v5331_v10 = vrot.slane %v17745_v29, 4 }
 0x41f   : > { %v9607_v45 = vunpack.i.l.bf16 %v15058_v16 }
 0x420   : > { %v5263_v15 = vsel %vm2523_vm8, %v17744_v36, %v9602_v51  ;;  %v5264_v26 = vsel %vm2523_vm8, %v5257_v38, %v9603_v20 }
 0x421   : > { %v9611_v35 = vpop.permute.xlu0 %9610  ;;  %v5271_v59 = vsel %vm2532_vm9, %v5263_v15, %v9573_v22  ;;  %v5233_v49 = vsel %vm2523_vm8, %v5229_v14, %v9607_v45 }
 0x422   : > { %v9616_v42 = vpop.permute.xlu1 %9615  ;;  %v9612_v19 = vunpack.i.l.bf16 %v9611_v35  ;;  %v9613_v63 = vunpack.i.h.bf16 %v9611_v35 }
 0x423   : > { %v9618_v28 = vunpack.i.h.bf16 %v9616_v42  ;;  %v9617_v5 = vunpack.i.l.bf16 %v9616_v42  ;;  %v7638_v42 = vpop.f32.mrb[44].mxu1 }
 0x424   : > { %v5272_v43 = vsel %vm2532_vm9, %v5264_v26, %v9612_v19  ;;  %v5237_v15 = vsel %vm2532_vm9, %v5233_v49, %v9613_v63  ;;  %v7639_v38 = vpop.f32.mrb[45].mxu1 }
 0x425   : > { %v5279_v0 = vsel %vm2541_vm10, %v5271_v59, %v9617_v5  ;;  %v5280_v11 = vsel %vm2541_vm10, %v5272_v43, %v9618_v28  ;;  %v9621_v51 = vpop.permute.xlu0 %9620  ;;  %v17746_v28 = vld [vmem:[#allocation154_spill] sm:$0xff]  ;;  %v15084_v26 = vadd.f32 %v7639_v38, %v7638_v42  ;;  %v7641_v45 = vpop.f32.mrb[46].mxu1 }
 0x426   : > { %v5330_v56 = vrot.slane %v5279_v0, 4  ;;  %v9626_v41 = vpop.permute.xlu1 %9625  ;;  %v5335_v22 = vrot.slane %v5280_v11, 4  ;;  %v9622_v36 = vunpack.i.l.bf16 %v9621_v51  ;;  %v7642_v43 = vpop.f32.mrb[47].mxu1  ;;  %v9623_v42 = vunpack.i.h.bf16 %v9621_v51 }
 0x427   : > { %v9628_v46 = vunpack.i.h.bf16 %v9626_v41  ;;  %v9627_v20 = vunpack.i.l.bf16 %v9626_v41  ;;  %v15088_v14 = vadd.f32 %v7642_v43, %v7641_v45  ;;  %v9608_v45 = vunpack.i.h.bf16 %v15058_v16 }
 0x428   : > { %v5332_v35 = vsel %vm2858_vm3, %v5330_v56, %v5331_v10  ;;  %v5241_v5 = vsel %vm2541_vm10, %v5237_v15, %v9622_v36  ;;  %v5336_v7 = vsel %vm2858_vm3, %v5331_v10, %v5335_v22  ;;  %v17747_v10 = vrot.slane %v14172_v4, 4 }
 0x429   : > { %v5333_v50 = vrot.slane %v5241_v5, 4  ;;  %v3578_v59 = vsel %vm2488_vm5, %v17746_v28, %v9628_v46  ;;  %v9631_v0 = vpop.permute.xlu0 %9630  ;;  %v3606_v63 = vsel %vm2488_vm5, %v17707_v24, %v9627_v20  ;;  %v5410_v29 = vpack.c.bf16 %v5336_v7, %v5332_v35 }
 0x42a   : > { %v9636_v19 = vpop.permute.xlu1 %9635  ;;  %v9633_v41 = vunpack.i.h.bf16 %v9631_v0  ;;  %v9632_v56 = vunpack.i.l.bf16 %v9631_v0 }
 0x42b   : > { %v9638_v11 = vunpack.i.h.bf16 %v9636_v19  ;;  %v9637_v49 = vunpack.i.l.bf16 %v9636_v19  ;;  %v5334_v22 = vsel %vm2858_vm3, %v17747_v10, %v5333_v50  ;;  %5900 = vmatprep.mubr.bf16.mxu1 %v5410_v29  ;;  %v17748_v50 = vpack.c.bf16 %v14708_v9, %v14695_v37 }
 0x42c   : > { %v3582_v46 = vsel %vm2497_vm6, %v3578_v59, %v9633_v41  ;;  %v3610_v36 = vsel %vm2497_vm6, %v3606_v63, %v9632_v56  ;;  %v5409_v24 = vpack.c.bf16 %v5334_v22, %v14692_v8  ;;  %v17749_v56 = vld [vmem:[#allocation236_spill] sm:$0xff] }
 0x42d   : > { %v9641_v20 = vpop.permute.xlu0 %9640  ;;  %v3586_v38 = vsel %vm2506_vm7, %v3582_v46, %v9638_v11  ;;  %v3614_v4 = vsel %vm2506_vm7, %v3610_v36, %v9637_v49  ;;  %v7644_v7 = vpop.f32.mrb[48].mxu1  ;;  %v3633_v29 = vsel %vm2541_vm10, %v17749_v56, %v9623_v42  ;;  %v17752_v56 = vrot.slane %v14285_v2, 4 }
 0x42e   : > { %v15095_v15 = vpop.permute.xlu1 %9645  ;;  %v9643_v35 = vunpack.i.h.bf16 %v9641_v20  ;;  %v9642_v5 = vunpack.i.l.bf16 %v9641_v20  ;;  %5901 = vmatmul.mubr.bf16.gmra.mrb[108].mxu1 %v5409_v24  ;;  %v7645_v59 = vpop.f32.mrb[49].mxu1  ;;  %v17750_v20 = vld [vmem:[#allocation74_spill] sm:$0xff] }
 0x42f   : > { %v9647_v19 = vunpack.i.l.bf16 %v15095_v15  ;;  %5908 = vmatprep.mubr.bf16.mxu1 %v17748_v50  ;;  %v15107_v0 = vadd.f32 %v7645_v59, %v7644_v7  ;;  %v7647_v63 = vpop.f32.mrb[50].mxu1 }
 0x430   : > { %v3590_v28 = vsel %vm869_vm0, %v3586_v38, %v9643_v35  ;;  %v3618_v8 = vsel %vm869_vm0, %v3614_v4, %v9642_v5  ;;  %v7648_v9 = vpop.f32.mrb[51].mxu1  ;;  %v3693_v35 = vrot.slane %v17750_v20, 4  ;;  %v3692_v5 = vrot.slane %v3633_v29, 4 }
 0x431   : > { %v9651_v43 = vpop.permute.xlu0 %9650  ;;  %v3594_v10 = vsel %vm2523_vm8, %v3590_v28, %v9647_v19  ;;  %v3622_v22 = vsel %vm2523_vm8, %v3618_v8, %v9608_v45  ;;  %v15113_v46 = vadd.f32 %v7648_v9, %v7647_v63  ;;  %v17751_v8 = vpack.c.bf16 %v14755_v61, %v14744_v48 }
 0x432   : > { %v9656_v51 = vpop.permute.xlu1 %9655  ;;  %v9653_v11 = vunpack.i.h.bf16 %v9651_v43  ;;  %v9652_v49 = vunpack.i.l.bf16 %v9651_v43  ;;  %v3694_v48 = vsel %vm2858_vm3, %v3692_v5, %v3693_v35 }
 0x433   : > { %v9658_v41 = vunpack.i.h.bf16 %v9656_v51  ;;  %v9657_v37 = vunpack.i.l.bf16 %v9656_v51 }
 0x434   : > { %v3598_v16 = vsel %vm2532_vm9, %v3594_v10, %v9653_v11  ;;  %v3626_v36 = vsel %vm2532_vm9, %v3622_v22, %v9652_v49 }
 0x435   : > { %v3602_v42 = vsel %vm2541_vm10, %v3598_v16, %v9658_v41  ;;  %v3634_v38 = vsel %vm2541_vm10, %v3626_v36, %v9657_v37  ;;  %v9661_v4 = vpop.permute.xlu0 %9660  ;;  %v7650_v51 = vpop.f32.mrb[52].mxu1 }
 0x436   : > { %v9666_v24 = vpop.permute.xlu1 %9665  ;;  %v3695_v7 = vrot.slane %v3602_v42, 4  ;;  %v3697_v50 = vrot.slane %v3634_v38, 4  ;;  %v9663_v19 = vunpack.i.h.bf16 %v9661_v4  ;;  %v9662_v28 = vunpack.i.l.bf16 %v9661_v4  ;;  %5909 = vmatmul.mubr.bf16.gmra.mrb[112].mxu1 %v17751_v8  ;;  %v7651_v63 = vpop.f32.mrb[53].mxu1 }
 0x437   : > { %v9667_v59 = vunpack.i.l.bf16 %v9666_v24  ;;  %v9668_v11 = vunpack.i.h.bf16 %v9666_v24  ;;  %v15129_v49 = vadd.f32 %v7651_v63, %v7650_v51  ;;  %v7653_v37 = vpop.f32.mrb[54].mxu1 }
 0x438   : > { %v4418_v45 = vsel %vm2488_vm5, %v17673_v23, %v9662_v28  ;;  %v3698_v41 = vsel %vm2858_vm3, %v3693_v35, %v3697_v50  ;;  %v3696_v29 = vsel %vm2858_vm3, %v17752_v56, %v3695_v7  ;;  %v4390_v61 = vsel %vm2488_vm5, %v17674_v25, %v9663_v19  ;;  %v7654_v22 = vpop.f32.mrb[55].mxu1 }
 0x439   : > { %v9671_v9 = vpop.permute.xlu0 %9670  ;;  %v5418_v16 = vpack.c.bf16 %v3698_v41, %v3694_v48  ;;  %v4422_v36 = vsel %vm2497_vm6, %v4418_v45, %v9667_v59  ;;  %v15135_v2 = vadd.f32 %v7654_v22, %v7653_v37  ;;  %v5417_v24 = vpack.c.bf16 %v3696_v29, %v14783_v18  ;;  %v17753_v41 = vld [vmem:[#allocation43_spill] sm:$0xff]  ;;  %v17754_v48 = vld [vmem:[#allocation200_spill] sm:$0xff] }
 0x43a   : > { %v9676_v43 = vpop.permute.xlu1 %9675  ;;  %v9672_v10 = vunpack.i.l.bf16 %v9671_v9  ;;  %v9673_v20 = vunpack.i.h.bf16 %v9671_v9  ;;  %v9648_v35 = vunpack.i.h.bf16 %v15095_v15  ;;  %v4394_v4 = vsel %vm2497_vm6, %v4390_v61, %v9668_v11 }
 0x43b   : > { %v9677_v23 = vunpack.i.l.bf16 %v9676_v43  ;;  %5916 = vmatprep.mubr.bf16.mxu1 %v5418_v16  ;;  %v9678_v7 = vunpack.i.h.bf16 %v9676_v43  ;;  %v4509_v61 = vrot.slane %v17754_v48, 4 }
 0x43c   : > { %v4426_v42 = vsel %vm2506_vm7, %v4422_v36, %v9672_v10  ;;  %v4398_v28 = vsel %vm2506_vm7, %v4394_v4, %v9673_v20 }
 0x43d   : > { %v4430_v5 = vsel %vm869_vm0, %v4426_v42, %v9677_v23  ;;  %v15141_v25 = vpop.permute.xlu0 %9680  ;;  %v4402_v63 = vsel %vm869_vm0, %v4398_v28, %v9678_v7 }
 0x43e   : > { %v9686_v38 = vpop.permute.xlu1 %9685  ;;  %5917 = vmatmul.mubr.bf16.gmra.mrb[116].mxu1 %v5417_v24  ;;  %v9682_v18 = vunpack.i.l.bf16 %v15141_v25  ;;  %v4434_v8 = vsel %vm2523_vm8, %v4430_v5, %v9648_v35 }
 0x43f   : > { %v9688_v50 = vunpack.i.h.bf16 %v9686_v38  ;;  %v9687_v19 = vunpack.i.l.bf16 %v9686_v38 }
 0x440   : > { %v4406_v9 = vsel %vm2523_vm8, %v4402_v63, %v9682_v18 }
 0x441   : > { %v9691_v51 = vpop.permute.xlu0 %9690  ;;  %v4441_v56 = vsel %vm2532_vm9, %v17753_v41, %v9687_v19  ;;  %v4442_v43 = vsel %vm2532_vm9, %v4434_v8, %v9688_v50  ;;  %v17755_v19 = vrot.slane %v17698_v13, 4 }
 0x442   : > { %v9696_v59 = vpop.permute.xlu1 %9695  ;;  %v9692_v29 = vunpack.i.l.bf16 %v9691_v51 }
 0x443   : > { %v9698_v45 = vunpack.i.h.bf16 %v9696_v59  ;;  %v9697_v15 = vunpack.i.l.bf16 %v9696_v59 }
 0x444   : > { %v4410_v22 = vsel %vm2532_vm9, %v4406_v9, %v9692_v29  ;;  %v9683_v29 = vunpack.i.h.bf16 %v15141_v25 }
 0x445   : > { %v4449_v11 = vsel %vm2541_vm10, %v4441_v56, %v9697_v15  ;;  %v4450_v37 = vsel %vm2541_vm10, %v4442_v43, %v9698_v45  ;;  %v4270_v36 = vpop.permute.xlu0 %4269 }
 0x446   : > { %v4508_v10 = vrot.slane %v4449_v11, 4  ;;  %v4513_v23 = vrot.slane %v4450_v37, 4  ;;  %v9701_v16 = vpop.permute.xlu1 %9700  ;;  %v4414_v20 = vsel %vm2541_vm10, %v4410_v22, %v4270_v36  ;;  %v9693_v37 = vunpack.i.h.bf16 %v9691_v51 }
 0x447   : > { %v4511_v38 = vrot.slane %v4414_v20, 4  ;;  %v9703_v35 = vunpack.i.h.bf16 %v9701_v16  ;;  %v9702_v5 = vunpack.i.l.bf16 %v9701_v16  ;;  %v5265_v25 = vsel %vm2523_vm8, %v14517_v12, %v9683_v29  ;;  %v17756_v12 = vld [vmem:[#allocation71_spill] sm:$0xff] }
 0x448   : > { %v4510_v24 = vsel %vm2858_vm3, %v4508_v10, %v4509_v61  ;;  %v4514_v42 = vsel %vm2858_vm3, %v4509_v61, %v4513_v23 }
 0x449   : > { %v5422_v4 = vpack.c.bf16 %v4514_v42, %v4510_v24  ;;  %v9706_v50 = vpop.permute.xlu0 %9705  ;;  %v4512_v28 = vsel %vm2858_vm3, %v17755_v19, %v4511_v38  ;;  %v5218_v45 = vsel %vm2488_vm5, %v17679_v33, %v9703_v35  ;;  %v5246_v15 = vsel %vm2488_vm5, %v17678_v58, %v9702_v5 }
 0x44a   : > { %v9711_v7 = vpop.permute.xlu1 %9710  ;;  %v9708_v18 = vunpack.i.h.bf16 %v9706_v50  ;;  %v9707_v8 = vunpack.i.l.bf16 %v9706_v50  ;;  %v5421_v59 = vpack.c.bf16 %v4512_v28, %v14847_v1  ;;  %v5273_v35 = vsel %vm2532_vm9, %v5265_v25, %v9693_v37 }
 0x44b   : > { %5924 = vmatprep.mubr.bf16.mxu1 %v5422_v4  ;;  %v9713_v63 = vunpack.i.h.bf16 %v9711_v7  ;;  %v9712_v41 = vunpack.i.l.bf16 %v9711_v7 }
 0x44c   : > { %v5222_v56 = vsel %vm2497_vm6, %v5218_v45, %v9708_v18  ;;  %v5250_v43 = vsel %vm2497_vm6, %v5246_v15, %v9707_v8  ;;  %5925 = vmatmul.mubr.bf16.gmra.mrb[120].mxu1 %v5421_v59  ;;  %v7656_v10 = vpop.f32.mrb[56].mxu1  ;;  %v5341_v8 = vrot.slane %v17756_v12, 4 }
 0x44d   : > { %v9716_v11 = vpop.permute.xlu0 %9715  ;;  %v5226_v48 = vsel %vm2506_vm7, %v5222_v56, %v9713_v63  ;;  %v5254_v33 = vsel %vm2506_vm7, %v5250_v43, %v9712_v41  ;;  %v7657_v16 = vpop.f32.mrb[57].mxu1 }
 0x44e   : > { %v9721_v13 = vpop.permute.xlu1 %9720  ;;  %v9718_v9 = vunpack.i.h.bf16 %v9716_v11  ;;  %v9717_v1 = vunpack.i.l.bf16 %v9716_v11  ;;  %v15176_v20 = vadd.f32 %v7657_v16, %v7656_v10  ;;  %v7659_v38 = vpop.f32.mrb[58].mxu1  ;;  %v10058_v16 = vld [vmem:[%s16028_s9 + $0x40] sm:$0xff]  }
 0x44f   : > { %v9723_v61 = vunpack.i.h.bf16 %v9721_v13  ;;  %v9722_v58 = vunpack.i.l.bf16 %v9721_v13  ;;  %v7660_v7 = vpop.f32.mrb[59].mxu1  ;;  %7780 = vmatprep.subr.bf16.mxu0 %v10058_v16 }
 0x450   : > { %v5230_v23 = vsel %vm869_vm0, %v5226_v48, %v9718_v9  ;;  %v5258_v22 = vsel %vm869_vm0, %v5254_v33, %v9717_v1  ;;  %v15181_v28 = vadd.f32 %v7660_v7, %v7659_v38  ;;  %v17757_v9 = vrot.slane %v14537_v30, 4 }
 0x451   : > { %v9726_v51 = vpop.permute.xlu0 %9725  ;;  %v5266_v50 = vsel %vm2523_vm8, %v5258_v22, %v9722_v58  ;;  %v5234_v18 = vsel %vm2523_vm8, %v5230_v23, %v9723_v61 }
 0x452   : > { %v9731_v36 = vpop.permute.xlu1 %9730  ;;  %v9728_v5 = vunpack.i.h.bf16 %v9726_v51  ;;  %v9727_v4 = vunpack.i.l.bf16 %v9726_v51 }
 0x453   : > { %v9733_v24 = vunpack.i.h.bf16 %v9731_v36  ;;  %v9732_v42 = vunpack.i.l.bf16 %v9731_v36 }
 0x454   : > { %v5274_v59 = vsel %vm2532_vm9, %v5266_v50, %v9727_v4  ;;  %v5238_v15 = vsel %vm2532_vm9, %v5234_v18, %v9728_v5  ;;  %v17759_v5 = vld [vmem:[#allocation46_spill] sm:$0xff] }
 0x455   : > { %v5281_v19 = vsel %vm2541_vm10, %v5273_v35, %v9732_v42  ;;  %v5282_v63 = vsel %vm2541_vm10, %v5274_v59, %v9733_v24  ;;  %v5086_v41 = vpop.permute.xlu0 %5085  ;;  %v17758_v24 = vld [vmem:[#allocation117_spill] sm:$0xff]  ;;  %v10059_v35 = vld [vmem:[%s16028_s9] sm:$0xff]  }
 0x456   : > { %v5340_v45 = vrot.slane %v5281_v19, 4  ;;  %v5345_v56 = vrot.slane %v5282_v63, 4  ;;  %v5242_v43 = vsel %vm2541_vm10, %v5238_v15, %v5086_v41  ;;  %7781 = vmatpush3.bf16.msra.mxu0 %v10059_v35  ;;  %v15210_v50 = vld [vmem:[%s16025_s6] ss:$0 sm:$0xff]  ;;  %v10063_v35 = vld [vmem:[%s16028_s9 + $0x10] sm:$0xff]  }
 0x457   : > { %v5343_v29 = vrot.slane %v5242_v43, 4  ;;  %v17761_v43 = vld [vmem:[#allocation159_spill] sm:$0xff] }
 0x458   : > { %v5342_v13 = vsel %vm2858_vm3, %v5340_v45, %v5341_v8  ;;  %v5346_v11 = vsel %vm2858_vm3, %v5341_v8, %v5345_v56  ;;  %v17760_v45 = vld [vmem:[#allocation79_spill] sm:$0xff] }
 0x459   : > { %v5426_v37 = vpack.c.bf16 %v5346_v11, %v5342_v13  ;;  %v5344_v1 = vsel %vm2858_vm3, %v17757_v9, %v5343_v29 }
 0x45a   : > { %v5425_v48 = vpack.c.bf16 %v5344_v1, %v14905_v40 }
 0x45b   : > { %5932 = vmatprep.mubr.bf16.mxu1 %v5426_v37 }
 0x45c   : > { %5933 = vmatmul.mubr.bf16.gmra.mrb[124].mxu1 %v5425_v48 }
 0x469   : > { %v7662_v33 = vpop.f32.mrb[60].mxu1 }
 0x46a   : > { %v7663_v61 = vpop.f32.mrb[61].mxu1 }
 0x46b   : > { %v15195_v58 = vadd.f32 %v7663_v61, %v7662_v33  ;;  %v7665_v10 = vpop.f32.mrb[62].mxu1 }
 0x46c   : > { %v7666_v23 = vpop.f32.mrb[63].mxu1 }
 0x46d   : > { %v15197_v22 = vadd.f32 %v7666_v23, %v7665_v10 }
 0x473   : > { %v7684_v30 = vpop.f32.mrb[64].mxu1 }
 0x474   : > { %v7685_v36 = vpop.f32.mrb[65].mxu1 }
 0x475   : > { %v7686_v25 = vadd.f32 %v7685_v36, %v7684_v30  ;;  %v7687_v51 = vpop.f32.mrb[66].mxu1  ;;  %v10060_v30 = vld [vmem:[%s16028_s9 + $0x48] sm:$0xff]  }
 0x476   : > { %v7688_v40 = vpop.f32.mrb[67].mxu1  ;;  %v10061_v36 = vld [vmem:[%s16028_s9 + $0x8] sm:$0xff]   ;;  %7782 = vmatprep.subr.bf16.mxu0 %v10060_v30 }
 0x477   : > { %v5815_v42 = vadd.f32 %v7686_v25, %v17758_v24  ;;  %v7689_v38 = vadd.f32 %v7688_v40, %v7687_v51  ;;  %7783 = vmatpush3.bf16.msra.mxu0 %v10061_v36  ;;  %v10067_v36 = vld [vmem:[%s16028_s9 + $0x20] sm:$0xff]  }
 0x479   : > { %v5818_v4 = vadd.f32 %v7689_v38, %v17759_v5  ;;  %v5947_v59 = vadd.f32 %v15210_v50, %v5815_v42  ;;  %v10062_v38 = vld [vmem:[%s16028_s9 + $0x50] sm:$0xff]  }
 0x47a   : > { %7784 = vmatprep.subr.bf16.mxu0 %v10062_v38 }
 0x47b   : > { %v5948_v41 = vadd.f32 %v15210_v50, %v5818_v4  ;;  %v5979_v29 = vmax.f32 %v5947_v59, 0.0  ;;  %v15235_v4 = vld [vmem:[%s16026_s7] ss:$0 sm:$0xff]  ;;  %7785 = vmatpush3.bf16.msra.mxu0 %v10063_v35 }
 0x47d   : > { %v5980_v9 = vmax.f32 %v5948_v41, 0.0 }
 0x47f   : > { %v7690_v7 = vpop.f32.mrb[68].mxu1 }
 0x480   : > { %v7691_v19 = vpop.f32.mrb[69].mxu1 }
 0x481   : > { %v7692_v18 = vadd.f32 %v7691_v19, %v7690_v7  ;;  %v7693_v12 = vpop.f32.mrb[70].mxu1 }
 0x482   : > { %v7694_v8 = vpop.f32.mrb[71].mxu1 }
 0x483   : > { %v5823_v15 = vadd.f32 %v7692_v18, %v17760_v45  ;;  %v7695_v63 = vadd.f32 %v7694_v8, %v7693_v12  ;;  %v15244_v45 = vld [vmem:[%s16027_s8] ss:$0 sm:$0xff] }
 0x485   : > { %v5949_v56 = vadd.f32 %v15210_v50, %v5823_v15  ;;  %v5826_v13 = vadd.f32 %v7695_v63, %v17761_v43 }
 0x487   : > { %v5981_v11 = vmax.f32 %v5949_v56, 0.0  ;;  %v5950_v37 = vadd.f32 %v15210_v50, %v5826_v13 }
 0x489   : > { %v6013_v1 = vmax.f32 %v5979_v29, %v5981_v11  ;;  %v5982_v48 = vmax.f32 %v5950_v37, 0.0  ;;  %v10064_v11 = vld [vmem:[%s16028_s9 + $0x58] sm:$0xff]  }
 0x48a   : > { %v10065_v37 = vld [vmem:[%s16028_s9 + $0x18] sm:$0xff]   ;;  %7786 = vmatprep.subr.bf16.mxu0 %v10064_v11 }
 0x48b   : > { %v6014_v33 = vmax.f32 %v5980_v9, %v5982_v48  ;;  %v6027_v59 = vmul.f32 %v15235_v4, %v6013_v1  ;;  %7787 = vmatpush3.bf16.msra.mxu0 %v10065_v37 }
 0x48d   : > { %v15263_v9 = vadd.f32 %v15244_v45, %v6027_v59 }
 0x48f   : > { %v7696_v61 = vpop.f32.mrb[72].mxu1  ;;  %v6162_v38 = vrot.slane %v15263_v9, 1  ;;  %v6254_v35 = vrot.slane %v15263_v9, 3  ;;  %v6433_v59 = vrot.slane %v15263_v9, 7 }
 0x490   : > { %v7697_v10 = vpop.f32.mrb[73].mxu1 }
 0x491   : > { %v7698_v23 = vadd.f32 %v7697_v10, %v7696_v61  ;;  %v7699_v16 = vpop.f32.mrb[74].mxu1 }
 0x492   : > { %v7700_v25 = vpop.f32.mrb[75].mxu1 }
 0x493   : > { %v5831_v51 = vadd.f32 %v7698_v23, %v14813_v34  ;;  %v7701_v40 = vadd.f32 %v7700_v25, %v7699_v16 }
 0x495   : > { %v5834_v24 = vadd.f32 %v7701_v40, %v14825_v62  ;;  %v6028_v62 = vmul.f32 %v15235_v4, %v6014_v33  ;;  %v5951_v18 = vadd.f32 %v15210_v50, %v5831_v51 }
 0x497   : > { %v5952_v15 = vadd.f32 %v15210_v50, %v5834_v24  ;;  %v15250_v56 = vadd.f32 %v15244_v45, %v6028_v62  ;;  %v5983_v43 = vmax.f32 %v5951_v18, 0.0 }
 0x499   : > { %v5984_v48 = vmax.f32 %v5952_v15, 0.0  ;;  %v6163_v30 = vrot.slane %v15250_v56, 1  ;;  %v10069_v15 = vld [vmem:[%s16028_s9 + $0x28] sm:$0xff]  }
 0x49b   : > { %v6164_v18 = vsel %vm1961_vm2, %v6162_v38, %v6163_v30 }
 0x4a1   : > { %v7702_v42 = vpop.f32.mrb[76].mxu1 }
 0x4a2   : > { %v7703_v5 = vpop.f32.mrb[77].mxu1 }
 0x4a3   : > { %v7704_v34 = vadd.f32 %v7703_v5, %v7702_v42  ;;  %v7705_v7 = vpop.f32.mrb[78].mxu1  ;;  %v10068_v42 = vld [vmem:[%s16028_s9 + $0x68] sm:$0xff]   ;;  %v6255_v5 = vrot.slane %v15250_v56, 3 }
 0x4a4   : > { %v7706_v19 = vpop.f32.mrb[79].mxu1 }
 0x4a5   : > { %v5839_v12 = vadd.f32 %v7704_v34, %v14852_v53  ;;  %v7707_v8 = vadd.f32 %v7706_v19, %v7705_v7  ;;  %v6215_v34 = vrot.slane %v15250_v56, 2  ;;  %v6214_v19 = vrot.slane %v15263_v9, 2 }
 0x4a6   : > { %v6256_v11 = vsel %vm2311_vm1, %v6254_v35, %v6255_v5 }
 0x4a7   : > { %v5953_v63 = vadd.f32 %v15210_v50, %v5839_v12  ;;  %v5842_v41 = vadd.f32 %v7707_v8, %v14861_v27  ;;  %v10066_v27 = vld [vmem:[%s16028_s9 + $0x60] sm:$0xff]   ;;  %v6302_v12 = vrot.slane %v15263_v9, 4  ;;  %v6343_v8 = vrot.slane %v15263_v9, 5 }
 0x4a8   : > { %7788 = vmatprep.subr.bf16.mxu0 %v10066_v27  ;;  %v15300_v37 = vsel %vm2150_vm4, %v6214_v19, %v6215_v34  ;;  %v6434_v27 = vrot.slane %v15250_v56, 7 }
 0x4a9   : > { %v5985_v13 = vmax.f32 %v5953_v63, 0.0  ;;  %v5954_v53 = vadd.f32 %v15210_v50, %v5842_v41  ;;  %v7708_v29 = vpop.f32.mrb[80].mxu1  ;;  %7789 = vmatpush3.bf16.msra.mxu0 %v10067_v36 }
 0x4aa   : > { %v7709_v1 = vpop.f32.mrb[81].mxu1  ;;  %7790 = vmatprep.subr.bf16.mxu0 %v10068_v42 }
 0x4ab   : > { %v6049_v33 = vmax.f32 %v5983_v43, %v5985_v13  ;;  %v5986_v61 = vmax.f32 %v5954_v53, 0.0  ;;  %v7710_v10 = vadd.f32 %v7709_v1, %v7708_v29  ;;  %v7711_v23 = vpop.f32.mrb[82].mxu1  ;;  %v6303_v43 = vrot.slane %v15250_v56, 4 }
 0x4ac   : > { %v7712_v16 = vpop.f32.mrb[83].mxu1  ;;  %v6344_v13 = vrot.slane %v15250_v56, 5 }
 0x4ad   : > { %v6057_v25 = vmul.f32 %v15235_v4, %v6049_v33  ;;  %v6050_v51 = vmax.f32 %v5984_v48, %v5986_v61  ;;  %v5847_v40 = vadd.f32 %v7710_v10, %v14883_v55  ;;  %v7713_v24 = vadd.f32 %v7712_v16, %v7711_v23  ;;  %7791 = vmatpush3.bf16.msra.mxu0 %v10069_v15 }
 0x4ae   : > { %v6345_v34 = vsel %vm6342_vm11, %v6343_v8, %v6344_v13 }
 0x4af   : > { %v15279_v7 = vadd.f32 %v15244_v45, %v6057_v25  ;;  %v6058_v62 = vmul.f32 %v15235_v4, %v6050_v51  ;;  %v5850_v55 = vadd.f32 %v7713_v24, %v14893_v52  ;;  %v5955_v23 = vadd.f32 %v15210_v50, %v5847_v40 }
 0x4b1   : > { %v15292_v63 = vadd.f32 %v15244_v45, %v6058_v62  ;;  %v7714_v41 = vpop.f32.mrb[84].mxu1  ;;  %v9734_v52 = vpack.i.bf16 %v6164_v18, %v15279_v7  ;;  %v6230_v29 = vrot.slane %v15279_v7, 2  ;;  %v6190_v61 = vrot.slane %v15279_v7, 1 }
 0x4b2   : > { %v7715_v53 = vpop.f32.mrb[85].mxu1  ;;  %v5956_v16 = vadd.f32 %v15210_v50, %v5850_v55  ;;  %v6278_v36 = vrot.slane %v15279_v7, 3  ;;  %v5987_v15 = vmax.f32 %v5955_v23, 0.0 }
 0x4b3   : > { %v7716_v1 = vadd.f32 %v7715_v53, %v7714_v41  ;;  %v7717_v48 = vpop.f32.mrb[86].mxu1  ;;  %9735 = vrot.lane.b32.xlu0 %v9734_v52, %s10111_s26  ;;  %v6231_v33 = vrot.slane %v15292_v63, 2  ;;  %v6191_v10 = vrot.slane %v15292_v63, 1  ;;  %v6279_v25 = vrot.slane %v15292_v63, 3 }
 0x4b4   : > { %v7718_v30 = vpop.f32.mrb[87].mxu1  ;;  %v6318_v41 = vrot.slane %v15279_v7, 4  ;;  %v6368_v52 = vrot.slane %v15292_v63, 5  ;;  %v5988_v53 = vmax.f32 %v5956_v16, 0.0  ;;  %v15339_v16 = vsel %vm2858_vm3, %v6302_v12, %v6303_v43  ;;  %v10070_v12 = vld [vmem:[%s16028_s9 + $0x70] sm:$0xff]  }
 0x4b5   : > { %v5855_v51 = vadd.f32 %v7716_v1, %v14922_v17  ;;  %v7719_v24 = vadd.f32 %v7718_v30, %v7717_v48  ;;  %v15313_v42 = vsel %vm2150_vm4, %v6230_v29, %v6231_v33  ;;  %v6192_v38 = vsel %vm1961_vm2, %v6190_v61, %v6191_v10  ;;  %7792 = vmatprep.subr.bf16.mxu0 %v10070_v12 }
 0x4b6   : > { %v9739_v35 = vpack.i.bf16 %v6256_v11, %v15313_v42  ;;  %v9749_v5 = vpack.i.bf16 %v6192_v38, %v6164_v18  ;;  %v6280_v40 = vsel %vm2311_vm1, %v6278_v36, %v6279_v25  ;;  %v6319_v17 = vrot.slane %v15292_v63, 4 }
 0x4b7   : > { %v5957_v62 = vadd.f32 %v15210_v50, %v5855_v51  ;;  %v5858_v55 = vadd.f32 %v7719_v24, %v14927_v21  ;;  %v9744_v19 = vpack.i.bf16 %v6280_v40, %v6256_v11  ;;  %v6367_v18 = vrot.slane %v15279_v7, 5 }
 0x4b8   : > { %9740 = vrot.lane.b32.xlu1 %v9739_v35, %s10111_s26  ;;  %9750 = vrot.lane.b32.xlu0 %v9749_v5, %s10112_s27  ;;  %v6409_v21 = vrot.slane %v15292_v63, 6  ;;  %v9759_v29 = vpack.i.bf16 %v15300_v37, %v6192_v38  ;;  %v6457_v1 = vrot.slane %v15279_v7, 7  ;;  %v6458_v48 = vrot.slane %v15292_v63, 7 }
 0x4b9   : > { %v5989_v8 = vmax.f32 %v5957_v62, 0.0  ;;  %v5958_v13 = vadd.f32 %v15210_v50, %v5858_v55  ;;  %v6369_v11 = vsel %vm6342_vm11, %v6367_v18, %v6368_v52  ;;  %v15334_v10 = vsel %vm2858_vm3, %v6318_v41, %v6319_v17  ;;  %v10073_v55 = vld [vmem:[%s16028_s9 + $0x38] sm:$0xff]  }
 0x4ba   : > { %v9779_v23 = vpack.i.bf16 %v6369_v11, %v6345_v34  ;;  %v6435_v30 = vsel %vm6432_vm12, %v6433_v59, %v6434_v27  ;;  %v6459_v36 = vsel %vm6432_vm12, %v6457_v1, %v6458_v48  ;;  %v6408_v63 = vrot.slane %v15279_v7, 6  ;;  %v10071_v59 = vld [vmem:[%s16028_s9 + $0x30] sm:$0xff]   ;;  %v10072_v27 = vld [vmem:[%s16028_s9 + $0x78] sm:$0xff]  }
 0x4bb   : > { %v6015_v33 = vmax.f32 %v5987_v15, %v5989_v8  ;;  %v5990_v61 = vmax.f32 %v5958_v13, 0.0  ;;  %v9774_v51 = vpack.i.bf16 %v6459_v36, %v6435_v30  ;;  %v9784_v24 = vpack.i.bf16 %v15250_v56, %v6459_v36  ;;  %7793 = vmatpush3.bf16.msra.mxu0 %v10071_v59 }
 0x4bc   : > { %9745 = vrot.lane.b32.xlu1 %v9744_v19, %s10112_s27  ;;  %9760 = vrot.lane.b32.xlu0 %v9759_v29, %s10113_s28  ;;  %v9754_v38 = vpack.i.bf16 %v15339_v16, %v6280_v40  ;;  %v9769_v35 = vpack.i.bf16 %v6345_v34, %v15334_v10  ;;  %v15354_v43 = vsel %vm6391_vm13, %v6408_v63, %v6409_v21  ;;  %v6393_v40 = vrot.slane %v15250_v56, 6 }
 0x4bd   : > { %v6016_v25 = vmax.f32 %v5988_v53, %v5990_v61  ;;  %v9764_v62 = vpack.i.bf16 %v6435_v30, %v15354_v43  ;;  %v6392_v15 = vrot.slane %v15263_v9, 6  ;;  %7794 = vmatprep.subr.bf16.mxu0 %v10072_v27 }
 0x4bf   : > { %v15371_v52 = vsel %vm6391_vm13, %v6392_v15, %v6393_v40  ;;  %7795 = vmatpush3.bf16.msra.mxu0 %v10073_v55 }
 0x4c0   : > { %9755 = vrot.lane.b32.xlu1 %v9754_v38, %s10113_s28  ;;  %9770 = vrot.lane.b32.xlu0 %v9769_v35, %s10111_s26  ;;  %v9789_v53 = vpack.i.bf16 %v15371_v52, %v6369_v11 }
 0x4c1   : > { %v7720_v5 = vpop.f32.mrb[88].mxu1 }
 0x4c2   : > { %v7721_v34 = vpop.f32.mrb[89].mxu1 }
 0x4c3   : > { %v7722_v19 = vadd.f32 %v7721_v34, %v7720_v5  ;;  %v7723_v17 = vpop.f32.mrb[90].mxu1 }
 0x4c4   : > { %v7724_v41 = vpop.f32.mrb[91].mxu1  ;;  %9765 = vrot.lane.b32.xlu1 %v9764_v62, %s10111_s26  ;;  %9780 = vrot.lane.b32.xlu0 %v9779_v23, %s10112_s27 }
 0x4c5   : > { %v5863_v56 = vadd.f32 %v7722_v19, %v14945_v44  ;;  %v7725_v18 = vadd.f32 %v7724_v41, %v7723_v17  ;;  %v6030_v44 = vmul.f32 %v15235_v4, %v6016_v25 }
 0x4c7   : > { %v5866_v8 = vadd.f32 %v7725_v18, %v14948_v54  ;;  %v5959_v61 = vadd.f32 %v15210_v50, %v5863_v56  ;;  %v6029_v54 = vmul.f32 %v15235_v4, %v6015_v33 }
 0x4c8   : > { %9775 = vrot.lane.b32.xlu1 %v9774_v51, %s10112_s27  ;;  %9790 = vrot.lane.b32.xlu0 %v9789_v53, %s10113_s28  ;;  %v15386_v51 = vadd.f32 %v15244_v45, %v6030_v44 }
 0x4c9   : > { %v5960_v30 = vadd.f32 %v15210_v50, %v5866_v8  ;;  %v15390_v12 = vadd.f32 %v15244_v45, %v6029_v54 }
 0x4ca   : > { %v6258_v56 = vrot.slane %v15386_v51, 3  ;;  %v6218_v18 = vrot.slane %v15386_v51, 2 }
 0x4cb   : > { %v5992_v59 = vmax.f32 %v5960_v30, 0.0  ;;  %v6165_v15 = vrot.slane %v15390_v12, 1  ;;  %v6257_v41 = vrot.slane %v15390_v12, 3  ;;  %v6436_v44 = vrot.slane %v15390_v12, 7 }
 0x4cc   : > { %9785 = vrot.lane.b32.xlu1 %v9784_v24, %s10113_s28  ;;  %v5991_v24 = vmax.f32 %v5959_v61, 0.0 }
 0x4cf   : > { %v7726_v13 = vpop.f32.mrb[92].mxu1 }
 0x4d0   : > { %v7727_v21 = vpop.f32.mrb[93].mxu1 }
 0x4d1   : > { %v7728_v29 = vadd.f32 %v7727_v21, %v7726_v13  ;;  %v7729_v1 = vpop.f32.mrb[94].mxu1  ;;  %v6217_v21 = vrot.slane %v15390_v12, 2 }
 0x4d2   : > { %v7730_v48 = vpop.f32.mrb[95].mxu1 }
 0x4d3   : > { %v5871_v11 = vadd.f32 %v7728_v29, %v14964_v60  ;;  %v7731_v23 = vadd.f32 %v7730_v48, %v7729_v1  ;;  %v6305_v29 = vrot.slane %v15390_v12, 4  ;;  %v6346_v1 = vrot.slane %v15390_v12, 5 }
 0x4d5   : > { %v5961_v36 = vadd.f32 %v15210_v50, %v5871_v11  ;;  %v5874_v63 = vadd.f32 %v7731_v23, %v14971_v31  ;;  %v6166_v31 = vrot.slane %v15386_v51, 1  ;;  %v6306_v23 = vrot.slane %v15386_v51, 4 }
 0x4d7   : > { %v5993_v38 = vmax.f32 %v5961_v36, 0.0  ;;  %v5962_v25 = vadd.f32 %v15210_v50, %v5874_v63  ;;  %v7732_v35 = vpop.f32.mrb[96].mxu1  ;;  %v6259_v36 = vsel %vm2311_vm1, %v6257_v41, %v6258_v56  ;;  %v15418_v63 = vsel %vm2150_vm4, %v6217_v21, %v6218_v18 }
 0x4d8   : > { %v7733_v60 = vpop.f32.mrb[97].mxu1 }
 0x4d9   : > { %v6051_v33 = vmax.f32 %v5991_v24, %v5993_v38  ;;  %v5994_v27 = vmax.f32 %v5962_v25, 0.0  ;;  %v7734_v5 = vadd.f32 %v7733_v60, %v7732_v35  ;;  %v7735_v40 = vpop.f32.mrb[98].mxu1  ;;  %v6437_v24 = vrot.slane %v15386_v51, 7 }
 0x4da   : > { %v7736_v34 = vpop.f32.mrb[99].mxu1 }
 0x4db   : > { %v6059_v62 = vmul.f32 %v15235_v4, %v6051_v33  ;;  %v6052_v55 = vmax.f32 %v5992_v59, %v5994_v27  ;;  %v5879_v19 = vadd.f32 %v7734_v5, %v14983_v32  ;;  %v7737_v17 = vadd.f32 %v7736_v34, %v7735_v40 }
 0x4dc   : > { %v6167_v32 = vsel %vm1961_vm2, %v6165_v15, %v6166_v31 }
 0x4dd   : > { %v15400_v53 = vadd.f32 %v15244_v45, %v6059_v62  ;;  %v6060_v8 = vmul.f32 %v15235_v4, %v6052_v55  ;;  %v5882_v13 = vadd.f32 %v7737_v17, %v14991_v39  ;;  %v6347_v39 = vrot.slane %v15386_v51, 5 }
 0x4de   : > { %v5963_v33 = vadd.f32 %v15210_v50, %v5879_v19 }
 0x4df   : > { %v15410_v48 = vadd.f32 %v15244_v45, %v6060_v8  ;;  %v7738_v61 = vpop.f32.mrb[100].mxu1  ;;  %v9794_v11 = vpack.i.bf16 %v6167_v32, %v15400_v53  ;;  %v6233_v30 = vrot.slane %v15400_v53, 2  ;;  %v6193_v60 = vrot.slane %v15400_v53, 1 }
 0x4e0   : > { %v7739_v54 = vpop.f32.mrb[101].mxu1  ;;  %v5964_v27 = vadd.f32 %v15210_v50, %v5882_v13  ;;  %v6281_v40 = vrot.slane %v15400_v53, 3  ;;  %v15437_v56 = vsel %vm6342_vm11, %v6346_v1, %v6347_v39  ;;  %v5995_v21 = vmax.f32 %v5963_v33, 0.0 }
 0x4e1   : > { %v7740_v38 = vadd.f32 %v7739_v54, %v7738_v61  ;;  %v7741_v25 = vpop.f32.mrb[102].mxu1  ;;  %9795 = vrot.lane.b32.xlu0 %v9794_v11, %s10111_s26  ;;  %v6234_v35 = vrot.slane %v15410_v48, 2  ;;  %v6194_v59 = vrot.slane %v15410_v48, 1  ;;  %v6282_v34 = vrot.slane %v15410_v48, 3 }
 0x4e2   : > { %v7742_v5 = vpop.f32.mrb[103].mxu1  ;;  %v6321_v61 = vrot.slane %v15400_v53, 4  ;;  %v6371_v11 = vrot.slane %v15410_v48, 5  ;;  %v5996_v1 = vmax.f32 %v5964_v27, 0.0  ;;  %v15463_v27 = vsel %vm2858_vm3, %v6305_v29, %v6306_v23 }
 0x4e3   : > { %v5887_v31 = vadd.f32 %v7740_v38, %v15004_v47  ;;  %v7743_v62 = vadd.f32 %v7742_v5, %v7741_v25  ;;  %v15431_v55 = vsel %vm2150_vm4, %v6233_v30, %v6234_v35  ;;  %v6195_v17 = vsel %vm1961_vm2, %v6193_v60, %v6194_v59 }
 0x4e4   : > { %v9799_v15 = vpack.i.bf16 %v6259_v36, %v15431_v55  ;;  %v9809_v41 = vpack.i.bf16 %v6195_v17, %v6167_v32  ;;  %v6283_v19 = vsel %vm2311_vm1, %v6281_v40, %v6282_v34  ;;  %v6322_v47 = vrot.slane %v15410_v48, 4 }
 0x4e5   : > { %v5965_v18 = vadd.f32 %v15210_v50, %v5887_v31  ;;  %v5890_v8 = vadd.f32 %v7743_v62, %v15008_v57  ;;  %v9804_v13 = vpack.i.bf16 %v6283_v19, %v6259_v36  ;;  %v6370_v32 = vrot.slane %v15400_v53, 5 }
 0x4e6   : > { %9800 = vrot.lane.b32.xlu1 %v9799_v15, %s10111_s26  ;;  %9810 = vrot.lane.b32.xlu0 %v9809_v41, %s10112_s27  ;;  %v6412_v57 = vrot.slane %v15410_v48, 6  ;;  %v9819_v30 = vpack.i.bf16 %v15418_v63, %v6195_v17  ;;  %v6460_v38 = vrot.slane %v15400_v53, 7  ;;  %v6461_v25 = vrot.slane %v15410_v48, 7 }
 0x4e7   : > { %v5997_v39 = vmax.f32 %v5965_v18, 0.0  ;;  %v5966_v54 = vadd.f32 %v15210_v50, %v5890_v8  ;;  %v15451_v36 = vsel %vm6342_vm11, %v6370_v32, %v6371_v11  ;;  %v15456_v59 = vsel %vm2858_vm3, %v6321_v61, %v6322_v47 }
 0x4e8   : > { %v15466_v5 = vsel %vm6432_vm12, %v6436_v44, %v6437_v24  ;;  %v15469_v48 = vsel %vm6432_vm12, %v6460_v38, %v6461_v25  ;;  %v6411_v34 = vrot.slane %v15400_v53, 6  ;;  %v9814_v17 = vpack.i.bf16 %v15463_v27, %v6283_v19 }
 0x4e9   : > { %v6017_v35 = vmax.f32 %v5995_v21, %v5997_v39  ;;  %v5998_v60 = vmax.f32 %v5966_v54, 0.0  ;;  %v9829_v29 = vpack.i.bf16 %v15437_v56, %v15456_v59 }
 0x4ea   : > { %9805 = vrot.lane.b32.xlu1 %v9804_v13, %s10112_s27  ;;  %9820 = vrot.lane.b32.xlu0 %v9819_v30, %s10113_s28  ;;  %v15480_v44 = vsel %vm6391_vm13, %v6411_v34, %v6412_v57 }
 0x4eb   : > { %v6018_v40 = vmax.f32 %v5996_v1, %v5998_v60  ;;  %v9824_v18 = vpack.i.bf16 %v15466_v5, %v15480_v44  ;;  %v6031_v38 = vmul.f32 %v15235_v4, %v6017_v35 }
 0x4ed   : > { %v6032_v1 = vmul.f32 %v15235_v4, %v6018_v40 }
 0x4ee   : > { %v7744_v23 = vpop.f32.mrb[104].mxu1  ;;  %9815 = vrot.lane.b32.xlu1 %v9814_v17, %s10113_s28  ;;  %9830 = vrot.lane.b32.xlu0 %v9829_v29, %s10111_s26 }
 0x4ef   : > { %v7745_v24 = vpop.f32.mrb[105].mxu1  ;;  %v15497_v60 = vadd.f32 %v15244_v45, %v6032_v1 }
 0x4f0   : > { %v7746_v15 = vadd.f32 %v7745_v24, %v7744_v23  ;;  %v7747_v41 = vpop.f32.mrb[106].mxu1  ;;  %v15501_v23 = vadd.f32 %v15244_v45, %v6031_v38 }
 0x4f1   : > { %v7748_v8 = vpop.f32.mrb[107].mxu1  ;;  %v6309_v62 = vrot.slane %v15497_v60, 4 }
 0x4f2   : > { %v5895_v19 = vadd.f32 %v7746_v15, %v15033_v3  ;;  %v7749_v13 = vadd.f32 %v7748_v8, %v7747_v41  ;;  %9825 = vrot.lane.b32.xlu1 %v9824_v18, %s10111_s26 }
 0x4f4   : > { %v5898_v47 = vadd.f32 %v7749_v13, %v15037_v6  ;;  %v5967_v54 = vadd.f32 %v15210_v50, %v5895_v19 }
 0x4f6   : > { %v5968_v3 = vadd.f32 %v15210_v50, %v5898_v47  ;;  %v5999_v34 = vmax.f32 %v5967_v54, 0.0  ;;  %v6260_v54 = vrot.slane %v15501_v23, 3 }
 0x4f8   : > { %v6000_v24 = vmax.f32 %v5968_v3, 0.0 }
 0x501   : > { %v7750_v21 = vpop.f32.mrb[108].mxu1 }
 0x502   : > { %v7751_v61 = vpop.f32.mrb[109].mxu1 }
 0x503   : > { %v7752_v32 = vadd.f32 %v7751_v61, %v7750_v21  ;;  %v7753_v11 = vpop.f32.mrb[110].mxu1  ;;  %v6168_v61 = vrot.slane %v15501_v23, 1 }
 0x504   : > { %v7754_v39 = vpop.f32.mrb[111].mxu1 }
 0x505   : > { %v5903_v57 = vadd.f32 %v7752_v32, %v15084_v26  ;;  %v7755_v30 = vadd.f32 %v7754_v39, %v7753_v11 }
 0x507   : > { %v5969_v25 = vadd.f32 %v15210_v50, %v5903_v57  ;;  %v5906_v6 = vadd.f32 %v7755_v30, %v15088_v14  ;;  %v6169_v14 = vrot.slane %v15497_v60, 1  ;;  %v6261_v57 = vrot.slane %v15497_v60, 3 }
 0x508   : > { %v6220_v30 = vrot.slane %v15501_v23, 2 }
 0x509   : > { %v6001_v17 = vmax.f32 %v5969_v25, 0.0  ;;  %v5970_v40 = vadd.f32 %v15210_v50, %v5906_v6  ;;  %v7756_v29 = vpop.f32.mrb[112].mxu1  ;;  %v6170_v39 = vsel %vm1961_vm2, %v6168_v61, %v6169_v14  ;;  %v6308_v25 = vrot.slane %v15501_v23, 4 }
 0x50a   : > { %v7757_v26 = vpop.f32.mrb[113].mxu1  ;;  %v6349_v6 = vrot.slane %v15501_v23, 5  ;;  %v6262_v14 = vsel %vm2311_vm1, %v6260_v54, %v6261_v57 }
 0x50b   : > { %v6053_v35 = vmax.f32 %v5999_v34, %v6001_v17  ;;  %v6002_v15 = vmax.f32 %v5970_v40, 0.0  ;;  %v7758_v41 = vadd.f32 %v7757_v26, %v7756_v29  ;;  %v7759_v18 = vpop.f32.mrb[114].mxu1  ;;  %v6221_v17 = vrot.slane %v15497_v60, 2 }
 0x50c   : > { %v7760_v8 = vpop.f32.mrb[115].mxu1  ;;  %v6350_v40 = vrot.slane %v15497_v60, 5  ;;  %v6439_v29 = vrot.slane %v15501_v23, 7 }
 0x50d   : > { %v6061_v19 = vmul.f32 %v15235_v4, %v6053_v35  ;;  %v6054_v13 = vmax.f32 %v6000_v24, %v6002_v15  ;;  %v5911_v47 = vadd.f32 %v7758_v41, %v15107_v0  ;;  %v7761_v21 = vadd.f32 %v7760_v8, %v7759_v18 }
 0x50f   : > { %v15508_v32 = vadd.f32 %v15244_v45, %v6061_v19  ;;  %v6062_v11 = vmul.f32 %v15235_v4, %v6054_v13  ;;  %v5914_v1 = vadd.f32 %v7761_v21, %v15113_v46  ;;  %v5971_v18 = vadd.f32 %v15210_v50, %v5911_v47 }
 0x511   : > { %v15517_v0 = vadd.f32 %v15244_v45, %v6062_v11  ;;  %v7762_v38 = vpop.f32.mrb[116].mxu1  ;;  %v9834_v3 = vpack.i.bf16 %v6170_v39, %v15508_v32  ;;  %v6236_v46 = vrot.slane %v15508_v32, 2  ;;  %v6196_v15 = vrot.slane %v15508_v32, 1 }
 0x512   : > { %v7763_v34 = vpop.f32.mrb[117].mxu1  ;;  %v6284_v19 = vrot.slane %v15508_v32, 3  ;;  %v5972_v54 = vadd.f32 %v15210_v50, %v5914_v1 }
 0x513   : > { %v7764_v26 = vadd.f32 %v7763_v34, %v7762_v38  ;;  %9835 = vrot.lane.b32.xlu0 %v9834_v3, %s10111_s26  ;;  %v7765_v24 = vpop.f32.mrb[118].mxu1  ;;  %v6237_v35 = vrot.slane %v15517_v0, 2  ;;  %v6197_v41 = vrot.slane %v15517_v0, 1  ;;  %v6285_v13 = vrot.slane %v15517_v0, 3 }
 0x514   : > { %v7766_v8 = vpop.f32.mrb[119].mxu1 }
 0x515   : > { %v5919_v21 = vadd.f32 %v7764_v26, %v15129_v49  ;;  %v7767_v61 = vadd.f32 %v7766_v8, %v7765_v24  ;;  %v15536_v11 = vsel %vm2150_vm4, %v6236_v46, %v6237_v35  ;;  %v6198_v38 = vsel %vm1961_vm2, %v6196_v15, %v6197_v41  ;;  %v10074_v41 = vld [vmem:[%s16028_s9 + $0xc0] sm:$0xff]  }
 0x516   : > { %v9839_v3 = vpack.i.bf16 %v6262_v14, %v15536_v11  ;;  %v9849_v34 = vpack.i.bf16 %v6198_v38, %v6170_v39  ;;  %v6286_v47 = vsel %vm2311_vm1, %v6284_v19, %v6285_v13  ;;  %v15548_v46 = vsel %vm2150_vm4, %v6220_v30, %v6221_v17  ;;  %7820 = vmatprep.subr.bf16.mxu0 %v10074_v41 }
 0x517   : > { %v5973_v57 = vadd.f32 %v15210_v50, %v5919_v21  ;;  %v5922_v31 = vadd.f32 %v7767_v61, %v15135_v2  ;;  %v9844_v49 = vpack.i.bf16 %v6286_v47, %v6262_v14  ;;  %v6440_v39 = vrot.slane %v15497_v60, 7 }
 0x518   : > { %9840 = vrot.lane.b32.xlu1 %v9839_v3, %s10111_s26  ;;  %9850 = vrot.lane.b32.xlu0 %v9849_v34, %s10112_s27  ;;  %v6373_v26 = vrot.slane %v15508_v32, 5  ;;  %v6374_v24 = vrot.slane %v15517_v0, 5  ;;  %v6003_v35 = vmax.f32 %v5971_v18, 0.0  ;;  %v15555_v2 = vsel %vm6342_vm11, %v6349_v6, %v6350_v40 }
 0x519   : > { %v6005_v1 = vmax.f32 %v5973_v57, 0.0  ;;  %v5974_v15 = vadd.f32 %v15210_v50, %v5922_v31  ;;  %v9859_v30 = vpack.i.bf16 %v15548_v46, %v6198_v38  ;;  %v6463_v8 = vrot.slane %v15508_v32, 7 }
 0x51a   : > { %v15562_v17 = vsel %vm6342_vm11, %v6373_v26, %v6374_v24  ;;  %v6464_v14 = vrot.slane %v15517_v0, 7  ;;  %v6004_v18 = vmax.f32 %v5972_v54, 0.0  ;;  %v15571_v6 = vsel %vm6432_vm12, %v6439_v29, %v6440_v39 }
 0x51b   : > { %v6019_v19 = vmax.f32 %v6003_v35, %v6005_v1  ;;  %v6006_v13 = vmax.f32 %v5974_v15, 0.0  ;;  %v15577_v61 = vsel %vm2858_vm3, %v6308_v25, %v6309_v62 }
 0x51c   : > { %9845 = vrot.lane.b32.xlu1 %v9844_v49, %s10112_s27  ;;  %9860 = vrot.lane.b32.xlu0 %v9859_v30, %s10113_s28  ;;  %v15574_v40 = vsel %vm6432_vm12, %v6463_v8, %v6464_v14  ;;  %v9854_v34 = vpack.i.bf16 %v15577_v61, %v6286_v47 }
 0x51d   : > { %v6020_v21 = vmax.f32 %v6004_v18, %v6006_v13  ;;  %v6033_v15 = vmul.f32 %v15235_v4, %v6019_v19 }
 0x51f   : > { %v7768_v54 = vpop.f32.mrb[120].mxu1  ;;  %v6034_v41 = vmul.f32 %v15235_v4, %v6020_v21 }
 0x520   : > { %9855 = vrot.lane.b32.xlu1 %v9854_v34, %s10113_s28  ;;  %v7769_v29 = vpop.f32.mrb[121].mxu1 }
 0x521   : > { %v7770_v57 = vadd.f32 %v7769_v29, %v7768_v54  ;;  %v7771_v49 = vpop.f32.mrb[122].mxu1 }
 0x522   : > { %v7772_v39 = vpop.f32.mrb[123].mxu1 }
 0x523   : > { %v5927_v26 = vadd.f32 %v7770_v57, %v15176_v20  ;;  %v7773_v24 = vadd.f32 %v7772_v39, %v7771_v49  ;;  %v15590_v20 = vadd.f32 %v15244_v45, %v6033_v15 }
 0x525   : > { %v5930_v62 = vadd.f32 %v7773_v24, %v15181_v28  ;;  %v9736_v25 = vpop.permute.xlu0 %9735  ;;  %v15593_v28 = vadd.f32 %v15244_v45, %v6034_v41 }
 0x526   : > { %v9738_v47 = vunpack.i.h.bf16 %v9736_v25  ;;  %v9737_v30 = vunpack.i.l.bf16 %v9736_v25 }
 0x528   : > { %v6685_v19 = vsel %vm2497_vm6, %v15279_v7, %v9738_v47  ;;  %v6481_v21 = vsel %vm2497_vm6, %v15263_v9, %v9737_v30 }
 0x52a   : > { %v9741_v35 = vpop.permute.xlu1 %9740  ;;  %v9751_v1 = vpop.permute.xlu0 %9750 }
 0x52b   : > { %v9743_v8 = vunpack.i.h.bf16 %v9741_v35  ;;  %v9753_v14 = vunpack.i.h.bf16 %v9751_v1  ;;  %v9752_v18 = vunpack.i.l.bf16 %v9751_v1  ;;  %v9742_v13 = vunpack.i.l.bf16 %v9741_v35 }
 0x52c   : > { %v5975_v35 = vadd.f32 %v15210_v50, %v5927_v26 }
 0x52d   : > { %v6697_v1 = vsel %vm2497_vm6, %v15313_v42, %v9743_v8  ;;  %v6485_v15 = vsel %vm869_vm0, %v6481_v21, %v9752_v18  ;;  %v6689_v41 = vsel %vm869_vm0, %v6685_v19, %v9753_v14  ;;  %v6493_v3 = vsel %vm2497_vm6, %v15300_v37, %v9742_v13 }
 0x52e   : > { %v9746_v34 = vpop.permute.xlu1 %9745  ;;  %v9761_v54 = vpop.permute.xlu0 %9760  ;;  %v6007_v37 = vmax.f32 %v5975_v35, 0.0  ;;  %v5976_v13 = vadd.f32 %v15210_v50, %v5930_v62  ;;  %v10076_v35 = vld [vmem:[%s16028_s9 + $0xc8] sm:$0xff]  }
 0x52f   : > { %v9763_v29 = vunpack.i.h.bf16 %v9761_v54  ;;  %v9762_v57 = vunpack.i.l.bf16 %v9761_v54  ;;  %v7774_v49 = vpop.f32.mrb[124].mxu1  ;;  %v9748_v39 = vunpack.i.h.bf16 %v9746_v34  ;;  %v9747_v24 = vunpack.i.l.bf16 %v9746_v34 }
 0x530   : > { %v7775_v25 = vpop.f32.mrb[125].mxu1 }
 0x531   : > { %v7777_v54 = vpop.f32.mrb[126].mxu1  ;;  %v6489_v7 = vsel %vm2532_vm9, %v6485_v15, %v9762_v57  ;;  %v6693_v9 = vsel %vm2532_vm9, %v6689_v41, %v9763_v29  ;;  %v7776_v47 = vadd.f32 %v7775_v25, %v7774_v49  ;;  %v6497_v8 = vsel %vm869_vm0, %v6493_v3, %v9747_v24 }
 0x532   : > { %v9756_v30 = vpop.permute.xlu1 %9755  ;;  %v9771_v34 = vpop.permute.xlu0 %9770  ;;  %v6701_v14 = vsel %vm869_vm0, %v6697_v1, %v9748_v39  ;;  %v6733_v49 = vpack.c.bf16 %v6693_v9, %v6489_v7 }
 0x533   : > { %v9758_v38 = vunpack.i.h.bf16 %v9756_v30  ;;  %v9757_v26 = vunpack.i.l.bf16 %v9756_v30  ;;  %v9773_v31 = vunpack.i.h.bf16 %v9771_v34  ;;  %v9772_v33 = vunpack.i.l.bf16 %v9771_v34  ;;  %v7778_v42 = vpop.f32.mrb[127].mxu1 }
 0x534   : > { %v5935_v18 = vadd.f32 %v7776_v47, %v15195_v58  ;;  %v7779_v19 = vadd.f32 %v7778_v42, %v7777_v54  ;;  %v10075_v58 = vld [vmem:[%s16028_s9 + $0x80] sm:$0xff]  }
 0x535   : > { %v6501_v29 = vsel %vm2532_vm9, %v6497_v8, %v9757_v26  ;;  %v6705_v57 = vsel %vm2532_vm9, %v6701_v14, %v9758_v38  ;;  %v6709_v39 = vsel %vm2497_vm6, %v15334_v10, %v9773_v31  ;;  %v6505_v62 = vsel %vm2497_vm6, %v15339_v16, %v9772_v33 }
 0x536   : > { %v5977_v21 = vadd.f32 %v15210_v50, %v5935_v18  ;;  %v5938_v25 = vadd.f32 %v7779_v19, %v15197_v22  ;;  %v9766_v15 = vpop.permute.xlu1 %9765  ;;  %v9781_v41 = vpop.permute.xlu0 %9780  ;;  %v6734_v3 = vpack.c.bf16 %v6705_v57, %v6501_v29  ;;  %v6171_v10 = vrot.slane %v15590_v20, 1  ;;  %v10078_v19 = vld [vmem:[%s16028_s9 + $0xd0] sm:$0xff]  }
 0x537   : > { %v9783_v24 = vunpack.i.h.bf16 %v9781_v41  ;;  %v9782_v38 = vunpack.i.l.bf16 %v9781_v41  ;;  %v9768_v54 = vunpack.i.h.bf16 %v9766_v15  ;;  %v9767_v7 = vunpack.i.l.bf16 %v9766_v15 }
 0x538   : > { %v6009_v22 = vmax.f32 %v5977_v21, 0.0  ;;  %v5978_v1 = vadd.f32 %v15210_v50, %v5938_v25  ;;  %6973 = vmatprep.mubr.bf16.mxu0 %v6734_v3  ;;  %v6008_v16 = vmax.f32 %v5976_v13, 0.0  ;;  %v6172_v26 = vrot.slane %v15593_v28, 1  ;;  %v10077_v50 = vld [vmem:[%s16028_s9 + $0x88] sm:$0xff]   ;;  %v10079_v3 = vld [vmem:[%s16028_s9 + $0x90] sm:$0xff]  }
 0x539   : > { %v6509_v9 = vsel %vm869_vm0, %v6505_v62, %v9782_v38  ;;  %v6713_v47 = vsel %vm869_vm0, %v6709_v39, %v9783_v24  ;;  %6974 = vmatmul.mubr.bf16.vlgmr.msra.gmra.mrb[96].mxu0 %v6733_v49  ;;  %v6721_v29 = vsel %vm2497_vm6, %v15354_v43, %v9768_v54  ;;  %v6517_v57 = vsel %vm2497_vm6, %v15371_v52, %v9767_v7 }
 0x53a   : > { %v6055_v33 = vmax.f32 %v6007_v37, %v6009_v22  ;;  %v6010_v31 = vmax.f32 %v5978_v1, 0.0  ;;  %v9776_v30 = vpop.permute.xlu1 %9775  ;;  %v9791_v34 = vpop.permute.xlu0 %9790  ;;  %7821 = vmatpush3.bf16.msra.mxu0 %v10075_v58  ;;  %v6173_v58 = vsel %vm1961_vm2, %v6171_v10, %v6172_v26  ;;  %v6263_v39 = vrot.slane %v15590_v20, 3 }
 0x53b   : > { %v9778_v42 = vunpack.i.h.bf16 %v9776_v30  ;;  %v9777_v8 = vunpack.i.l.bf16 %v9776_v30  ;;  %v9793_v14 = vunpack.i.h.bf16 %v9791_v34  ;;  %v9792_v18 = vunpack.i.l.bf16 %v9791_v34  ;;  %7822 = vmatprep.subr.bf16.mxu0 %v10076_v35 }
 0x53c   : > { %v6063_v37 = vmul.f32 %v15235_v4, %v6055_v33  ;;  %v6056_v13 = vmax.f32 %v6008_v16, %v6010_v31  ;;  %v6264_v62 = vrot.slane %v15593_v28, 3  ;;  %v6223_v24 = vrot.slane %v15590_v20, 2  ;;  %v10081_v31 = vld [vmem:[%s16028_s9 + $0x98] sm:$0xff]  }
 0x53d   : > { %v15643_v49 = vsel %vm869_vm0, %v6517_v57, %v9777_v8  ;;  %v15646_v21 = vsel %vm869_vm0, %v6721_v29, %v9778_v42  ;;  %v15649_v25 = vsel %vm2532_vm9, %v6509_v9, %v9792_v18  ;;  %v15652_v15 = vsel %vm2532_vm9, %v6713_v47, %v9793_v14 }
 0x53e   : > { %v15655_v41 = vadd.f32 %v15244_v45, %v6063_v37  ;;  %v6064_v43 = vmul.f32 %v15235_v4, %v6056_v13  ;;  %v6735_v52 = vpack.c.bf16 %v15652_v15, %v15649_v25  ;;  %7823 = vmatpush3.bf16.msra.mxu0 %v10077_v50  ;;  %v10080_v4 = vld [vmem:[%s16028_s9 + $0xd8] sm:$0xff]   ;;  %v6352_v22 = vrot.slane %v15590_v20, 5  ;;  %v9786_v37 = vpop.permute.xlu1 %9785 }
 0x53f   : > { %7824 = vmatprep.subr.bf16.mxu0 %v10078_v19  ;;  %v6442_v1 = vrot.slane %v15590_v20, 7  ;;  %v6224_v9 = vrot.slane %v15593_v28, 2  ;;  %v6353_v47 = vrot.slane %v15593_v28, 5  ;;  %v6265_v30 = vsel %vm2311_vm1, %v6263_v39, %v6264_v62  ;;  %v10082_v19 = vld [vmem:[%s16028_s9 + $0xe0] sm:$0xff]  }
 0x540   : > { %v15671_v38 = vadd.f32 %v15244_v45, %v6064_v43  ;;  %v9864_v35 = vpack.i.bf16 %v6173_v58, %v15655_v41  ;;  %v6239_v54 = vrot.slane %v15655_v41, 2  ;;  %v6199_v7 = vrot.slane %v15655_v41, 1 }
 0x541   : > { %v6287_v16 = vrot.slane %v15655_v41, 3  ;;  %v6443_v34 = vrot.slane %v15593_v28, 7  ;;  %v6376_v18 = vrot.slane %v15655_v41, 5  ;;  %v6466_v43 = vrot.slane %v15655_v41, 7 }
 0x542   : > { %9865 = vrot.lane.b32.xlu0 %v9864_v35, %s10111_s26  ;;  %v6240_v10 = vrot.slane %v15671_v38, 2  ;;  %v6200_v45 = vrot.slane %v15671_v38, 1  ;;  %v6288_v33 = vrot.slane %v15671_v38, 3  ;;  %7825 = vmatpush3.bf16.msra.mxu0 %v10079_v3  ;;  %v6377_v26 = vrot.slane %v15671_v38, 5 }
 0x543   : > { %v6467_v50 = vrot.slane %v15671_v38, 7  ;;  %7826 = vmatprep.subr.bf16.mxu0 %v10080_v4  ;;  %v15704_v3 = vsel %vm2150_vm4, %v6223_v24, %v6224_v9  ;;  %v15707_v39 = vsel %vm6342_vm11, %v6352_v22, %v6353_v47  ;;  %v10083_v4 = vld [vmem:[%s16028_s9 + $0xa0] sm:$0xff]   ;;  %v15719_v24 = vsel %vm6432_vm12, %v6442_v1, %v6443_v34  ;;  %v10084_v1 = vld [vmem:[%s16028_s9 + $0xe8] sm:$0xff]  }
 0x544   : > { %v15693_v42 = vsel %vm2150_vm4, %v6239_v54, %v6240_v10  ;;  %v6201_v8 = vsel %vm1961_vm2, %v6199_v7, %v6200_v45  ;;  %v6289_v14 = vsel %vm2311_vm1, %v6287_v16, %v6288_v33  ;;  %v15710_v62 = vsel %vm6342_vm11, %v6376_v18, %v6377_v26  ;;  %v10085_v16 = vld [vmem:[%s16028_s9 + $0xa8] sm:$0xff]  }
 0x545   : > { %v9869_v13 = vpack.i.bf16 %v6265_v30, %v15693_v42  ;;  %v9879_v29 = vpack.i.bf16 %v6201_v8, %v6173_v58  ;;  %v9874_v57 = vpack.i.bf16 %v6289_v14, %v6265_v30  ;;  %v6312_v58 = vrot.slane %v15593_v28, 4  ;;  %v10086_v30 = vld [vmem:[%s16028_s9 + $0xf0] sm:$0xff]  }
 0x546   : > { %7827 = vmatpush3.bf16.msra.mxu0 %v10081_v31  ;;  %v9959_v35 = vpack.i.bf16 %v15710_v62, %v15707_v39  ;;  %v15724_v22 = vsel %vm6432_vm12, %v6466_v43, %v6467_v50  ;;  %v9788_v54 = vunpack.i.h.bf16 %v9786_v37  ;;  %v9787_v7 = vunpack.i.l.bf16 %v9786_v37  ;;  %v10087_v37 = vld [vmem:[%s16028_s9 + $0xb0] sm:$0xff]  }
 0x547   : > { %9870 = vrot.lane.b32.xlu1 %v9869_v13, %s10111_s26  ;;  %9880 = vrot.lane.b32.xlu0 %v9879_v29, %s10112_s27  ;;  %v9954_v9 = vpack.i.bf16 %v15724_v22, %v15719_v24  ;;  %v9964_v47 = vpack.i.bf16 %v15593_v28, %v15724_v22  ;;  %v9894_v10 = vpack.i.bf16 %v15704_v3, %v6201_v8  ;;  %v6311_v45 = vrot.slane %v15590_v20, 4  ;;  %v10088_v13 = vld [vmem:[%s16028_s9 + $0xf8] sm:$0xff]  }
 0x548   : > { %7828 = vmatprep.subr.bf16.mxu0 %v10082_v19  ;;  %v6396_v31 = vrot.slane %v15386_v51, 6  ;;  %v15749_v34 = vsel %vm2532_vm9, %v15643_v49, %v9787_v7  ;;  %v15753_v26 = vsel %vm2532_vm9, %v15646_v21, %v9788_v54  ;;  %v6395_v18 = vrot.slane %v15390_v12, 6 }
 0x549   : > { %v15741_v33 = vsel %vm2858_vm3, %v6311_v45, %v6312_v58  ;;  %v6736_v8 = vpack.c.bf16 %v15753_v26, %v15749_v34  ;;  %v6325_v19 = vrot.slane %v15517_v0, 4  ;;  %v17762_v49 = vpack.i.bf16 %v15451_v36, %v15437_v56  ;;  %v10089_v56 = vld [vmem:[%s16028_s9 + $0xb8] sm:$0xff]  }
 0x54a   : > { %7829 = vmatpush3.bf16.msra.mxu0 %v10083_v4  ;;  %v9884_v50 = vpack.i.bf16 %v15741_v33, %v6289_v14  ;;  %v15769_v21 = vsel %vm6391_vm13, %v6395_v18, %v6396_v31  ;;  %v6324_v14 = vrot.slane %v15508_v32, 4  ;;  %v6415_v43 = vrot.slane %v15517_v0, 6 }
 0x54b   : > { %9875 = vrot.lane.b32.xlu1 %v9874_v57, %s10112_s27  ;;  %9895 = vrot.lane.b32.xlu0 %v9894_v10, %s10113_s28  ;;  %v9909_v29 = vpack.i.bf16 %v15769_v21, %v15451_v36  ;;  %v17763_v4 = vpack.i.bf16 %v15469_v48, %v15466_v5  ;;  %v6414_v36 = vrot.slane %v15508_v32, 6  ;;  %v17764_v7 = vpack.i.bf16 %v15386_v51, %v15469_v48 }
 0x54c   : > { %7830 = vmatprep.subr.bf16.mxu0 %v10084_v1  ;;  %v15778_v57 = vsel %vm2858_vm3, %v6324_v14, %v6325_v19  ;;  %v6399_v5 = vrot.slane %v15497_v60, 6  ;;  %v6328_v1 = vrot.slane %v15671_v38, 4  ;;  %v6398_v31 = vrot.slane %v15501_v23, 6 }
 0x54d   : > { %v9919_v54 = vpack.i.bf16 %v15555_v2, %v15778_v57  ;;  %v15793_v0 = vsel %vm6391_vm13, %v6414_v36, %v6415_v43  ;;  %v17765_v51 = vpack.i.bf16 %v15562_v17, %v15555_v2  ;;  %v6417_v36 = vrot.slane %v15655_v41, 6 }
 0x54e   : > { %7831 = vmatpush3.bf16.msra.mxu0 %v10085_v16  ;;  %v9914_v16 = vpack.i.bf16 %v15571_v6, %v15793_v0  ;;  %v15812_v48 = vsel %vm6391_vm13, %v6398_v31, %v6399_v5  ;;  %vm7181_vm1 = vcmask 1042434   ;;  %vm7183_vm2 = vcmask 1043459  }
 0x54f   : > { %9885 = vrot.lane.b32.xlu1 %v9884_v50, %s10113_s28  ;;  %9900 = vrot.lane.b32.xlu0 %v17762_v49, %s10112_s27  ;;  %v9939_v18 = vpack.i.bf16 %v15812_v48, %v15562_v17  ;;  %v17766_v17 = vpack.i.bf16 %v15574_v40, %v15571_v6 }
 0x550   : > { %7832 = vmatprep.subr.bf16.mxu0 %v10086_v30  ;;  %v6327_v30 = vrot.slane %v15655_v41, 4 }
 0x552   : > { %7833 = vmatpush3.bf16.msra.mxu0 %v10087_v37  ;;  %v15817_v19 = vsel %vm2858_vm3, %v6327_v30, %v6328_v1  ;;  %v6418_v37 = vrot.slane %v15671_v38, 6  ;;  %vm7259_vm3 = vcmask 3072  }
 0x553   : > { %9890 = vrot.lane.b32.xlu1 %v17763_v4, %s10112_s27  ;;  %9910 = vrot.lane.b32.xlu0 %v9909_v29, %s10113_s28  ;;  %v9796_v58 = vpop.permute.xlu0 %9795 }
 0x554   : > { %7834 = vmatprep.subr.bf16.mxu0 %v10088_v13  ;;  %v9797_v50 = vunpack.i.l.bf16 %v9796_v58  ;;  %v9798_v49 = vunpack.i.h.bf16 %v9796_v58  ;;  %v9949_v58 = vpack.i.bf16 %v15707_v39, %v15817_v19  ;;  %v15831_v1 = vsel %vm6391_vm13, %v6417_v36, %v6418_v37 }
 0x556   : > { %7835 = vmatpush3.bf16.msra.mxu0 %v10089_v56  ;;  %v6482_v38 = vsel %vm2497_vm6, %v15390_v12, %v9797_v50 }
 0x557   : > { %9905 = vrot.lane.b32.xlu1 %v17764_v7, %s10113_s28  ;;  %9920 = vrot.lane.b32.xlu0 %v9919_v54, %s10111_s26 }
 0x558   : > { %v9801_v10 = vpop.permute.xlu1 %9800  ;;  %v9811_v45 = vpop.permute.xlu0 %9810 }
 0x559   : > { %v9803_v14 = vunpack.i.h.bf16 %v9801_v10  ;;  %v9802_v13 = vunpack.i.l.bf16 %v9801_v10  ;;  %v9812_v29 = vunpack.i.l.bf16 %v9811_v45  ;;  %v9813_v2 = vunpack.i.h.bf16 %v9811_v45 }
 0x55a   : > { %v6686_v10 = vsel %vm2497_vm6, %v15400_v53, %v9798_v49  ;;  %v17767_v53 = vpack.i.bf16 %v15497_v60, %v15574_v40  ;;  %v6401_v60 = vrot.slane %v15590_v20, 6 }
 0x55b   : > { %9915 = vrot.lane.b32.xlu1 %v9914_v16, %s10111_s26  ;;  %9930 = vrot.lane.b32.xlu0 %v17765_v51, %s10112_s27  ;;  %v6698_v45 = vsel %vm2497_vm6, %v15431_v55, %v9803_v14  ;;  %v6494_v6 = vsel %vm2497_vm6, %v15418_v63, %v9802_v13  ;;  %v6486_v16 = vsel %vm869_vm0, %v6482_v38, %v9812_v29  ;;  %v6402_v29 = vrot.slane %v15593_v28, 6 }
 0x55c   : > { %v9806_v43 = vpop.permute.xlu1 %9805  ;;  %v9821_v56 = vpop.permute.xlu0 %9820  ;;  %v6690_v12 = vsel %vm869_vm0, %v6686_v10, %v9813_v2  ;;  %v9944_v13 = vpack.i.bf16 %v15719_v24, %v15831_v1 }
 0x55d   : > { %v9807_v4 = vunpack.i.l.bf16 %v9806_v43  ;;  %v9808_v54 = vunpack.i.h.bf16 %v9806_v43  ;;  %v9823_v7 = vunpack.i.h.bf16 %v9821_v56  ;;  %v9822_v5 = vunpack.i.l.bf16 %v9821_v56 }
 0x55e   : > { %v15862_v40 = vsel %vm6391_vm13, %v6401_v60, %v6402_v29 }
 0x55f   : > { %9925 = vrot.lane.b32.xlu1 %v17766_v17, %s10112_s27  ;;  %9940 = vrot.lane.b32.xlu0 %v9939_v18, %s10113_s28  ;;  %v6498_v30 = vsel %vm869_vm0, %v6494_v6, %v9807_v4  ;;  %v6702_v18 = vsel %vm869_vm0, %v6698_v45, %v9808_v54  ;;  %v6490_v63 = vsel %vm2532_vm9, %v6486_v16, %v9822_v5 }
 0x560   : > { %v9816_v31 = vpop.permute.xlu1 %9815  ;;  %v6694_v55 = vsel %vm2532_vm9, %v6690_v12, %v9823_v7  ;;  %v9969_v56 = vpack.i.bf16 %v15862_v40, %v15710_v62  ;;  %v15875_v39 = vpop.permute.xlu0 %9830 }
 0x561   : > { %v9818_v51 = vunpack.i.h.bf16 %v9816_v31  ;;  %v9817_v50 = vunpack.i.l.bf16 %v9816_v31  ;;  %v6737_v43 = vpack.c.bf16 %v6694_v55, %v6490_v63 }
 0x563   : > { %9935 = vrot.lane.b32.xlu1 %v17767_v53, %s10113_s28  ;;  %9950 = vrot.lane.b32.xlu0 %v9949_v58, %s10111_s26  ;;  %v6502_v37 = vsel %vm2532_vm9, %v6498_v30, %v9817_v50  ;;  %v6706_v49 = vsel %vm2532_vm9, %v6702_v18, %v9818_v51 }
 0x564   : > { %v6738_v14 = vpack.c.bf16 %v6706_v49, %v6502_v37  ;;  %v15877_v2 = vpop.permute.xlu1 %9825 }
 0x566   : > { %6981 = vmatprep.mubr.bf16.mxu0 %v6738_v14 }
 0x567   : > { %9945 = vrot.lane.b32.xlu1 %v9944_v13, %s10111_s26  ;;  %9960 = vrot.lane.b32.xlu0 %v9959_v35, %s10112_s27  ;;  %s7321_s26 = sshll.u32 %s17771_s21, 2 }
 0x568   : > { %6982 = vmatmul.mubr.bf16.gmra.mrb[100].mxu0 %v6737_v43  ;;  %s499_s14 = scalar_lea.vmem %s16034_s15, %s7321_s26 }
 0x56b   : > { %9955 = vrot.lane.b32.xlu1 %v9954_v9, %s10112_s27  ;;  %9970 = vrot.lane.b32.xlu0 %v9969_v56, %s10113_s28 }
 0x56f   : > { %9965 = vrot.lane.b32.xlu1 %v9964_v47, %s10113_s28 }
 0x585   : > { %v9836_v35 = vpop.permute.xlu0 %9835 }
 0x586   : > { %v9838_v62 = vunpack.i.h.bf16 %v9836_v35  ;;  %v9837_v54 = vunpack.i.l.bf16 %v9836_v35 }
 0x588   : > { %v6687_v22 = vsel %vm2497_vm6, %v15508_v32, %v9838_v62  ;;  %v6483_v47 = vsel %vm2497_vm6, %v15501_v23, %v9837_v54 }
 0x58a   : > { %v9841_v4 = vpop.permute.xlu1 %9840  ;;  %v9851_v36 = vpop.permute.xlu0 %9850 }
 0x58b   : > { %v9843_v7 = vunpack.i.h.bf16 %v9841_v4  ;;  %v9842_v5 = vunpack.i.l.bf16 %v9841_v4  ;;  %v9853_v17 = vunpack.i.h.bf16 %v9851_v36  ;;  %v9852_v38 = vunpack.i.l.bf16 %v9851_v36 }
 0x58d   : > { %v6699_v6 = vsel %vm2497_vm6, %v15536_v11, %v9843_v7  ;;  %v6495_v16 = vsel %vm2497_vm6, %v15548_v46, %v9842_v5  ;;  %v6487_v12 = vsel %vm869_vm0, %v6483_v47, %v9852_v38  ;;  %v6691_v30 = vsel %vm869_vm0, %v6687_v22, %v9853_v17 }
 0x58e   : > { %v9846_v24 = vpop.permute.xlu1 %9845  ;;  %v9861_v9 = vpop.permute.xlu0 %9860 }
 0x58f   : > { %v9848_v58 = vunpack.i.h.bf16 %v9846_v24  ;;  %v9847_v10 = vunpack.i.l.bf16 %v9846_v24  ;;  %v9863_v45 = vunpack.i.h.bf16 %v9861_v9  ;;  %v9862_v28 = vunpack.i.l.bf16 %v9861_v9 }
 0x591   : > { %v6499_v18 = vsel %vm869_vm0, %v6495_v16, %v9847_v10  ;;  %v6703_v32 = vsel %vm869_vm0, %v6699_v6, %v9848_v58  ;;  %v6491_v53 = vsel %vm2532_vm9, %v6487_v12, %v9862_v28  ;;  %v6695_v23 = vsel %vm2532_vm9, %v6691_v30, %v9863_v45 }
 0x592   : > { %v9856_v31 = vpop.permute.xlu1 %9855  ;;  %v6741_v55 = vpack.c.bf16 %v6695_v23, %v6491_v53 }
 0x593   : > { %v9858_v51 = vunpack.i.h.bf16 %v9856_v31  ;;  %v9857_v50 = vunpack.i.l.bf16 %v9856_v31 }
 0x595   : > { %v6503_v11 = vsel %vm2532_vm9, %v6499_v18, %v9857_v50  ;;  %v6707_v63 = vsel %vm2532_vm9, %v6703_v32, %v9858_v51  ;;  %v9828_v51 = vunpack.i.h.bf16 %v15877_v2  ;;  %v9827_v50 = vunpack.i.l.bf16 %v15877_v2 }
 0x596   : > { %v6742_v46 = vpack.c.bf16 %v6707_v63, %v6503_v11  ;;  %v9833_v2 = vunpack.i.h.bf16 %v15875_v39 }
 0x597   : > { %v6722_v63 = vsel %vm2497_vm6, %v15480_v44, %v9828_v51 }
 0x598   : > { %6989 = vmatprep.mubr.bf16.mxu0 %v6742_v46  ;;  %v6518_v46 = vsel %vm2497_vm6, %v15769_v21, %v9827_v50 }
 0x599   : > { %6990 = vmatmul.mubr.bf16.gmra.mrb[104].mxu0 %v6741_v55 }
 0x5b4   : > { %v9866_v37 = vpop.permute.xlu0 %9865 }
 0x5b5   : > { %v9868_v13 = vunpack.i.h.bf16 %v9866_v37  ;;  %v9867_v29 = vunpack.i.l.bf16 %v9866_v37 }
 0x5b7   : > { %v6688_v24 = vsel %vm2497_vm6, %v15655_v41, %v9868_v13  ;;  %v6484_v9 = vsel %vm2497_vm6, %v15590_v20, %v9867_v29 }
 0x5b9   : > { %v9871_v49 = vpop.permute.xlu1 %9870  ;;  %v9881_v14 = vpop.permute.xlu0 %9880 }
 0x5ba   : > { %v9873_v43 = vunpack.i.h.bf16 %v9871_v49  ;;  %v9872_v60 = vunpack.i.l.bf16 %v9871_v49  ;;  %v9883_v4 = vunpack.i.h.bf16 %v9881_v14  ;;  %v9882_v36 = vunpack.i.l.bf16 %v9881_v14 }
 0x5bb   : > { %v9832_v49 = vunpack.i.l.bf16 %v15875_v39 }
 0x5bc   : > { %v6700_v17 = vsel %vm2497_vm6, %v15693_v42, %v9873_v43  ;;  %v6496_v38 = vsel %vm2497_vm6, %v15704_v3, %v9872_v60  ;;  %v6488_v45 = vsel %vm869_vm0, %v6484_v9, %v9882_v36  ;;  %v6692_v28 = vsel %vm869_vm0, %v6688_v24, %v9883_v4 }
 0x5bd   : > { %v9876_v56 = vpop.permute.xlu1 %9875  ;;  %v9896_v35 = vpop.permute.xlu0 %9895  ;;  %v6506_v39 = vsel %vm2497_vm6, %v15463_v27, %v9832_v49 }
 0x5be   : > { %v9878_v62 = vunpack.i.h.bf16 %v9876_v56  ;;  %v9877_v54 = vunpack.i.l.bf16 %v9876_v56  ;;  %v9898_v7 = vunpack.i.h.bf16 %v9896_v35  ;;  %v9897_v5 = vunpack.i.l.bf16 %v9896_v35 }
 0x5bf   : > { %v6710_v56 = vsel %vm2497_vm6, %v15456_v59, %v9833_v2 }
 0x5c0   : > { %v6500_v6 = vsel %vm869_vm0, %v6496_v38, %v9877_v54  ;;  %v6704_v41 = vsel %vm869_vm0, %v6700_v17, %v9878_v62  ;;  %v6492_v20 = vsel %vm2532_vm9, %v6488_v45, %v9897_v5  ;;  %v6696_v16 = vsel %vm2532_vm9, %v6692_v28, %v9898_v7 }
 0x5c1   : > { %v9886_v58 = vpop.permute.xlu1 %9885  ;;  %v9901_v10 = vpop.permute.xlu0 %9900  ;;  %v6745_v18 = vpack.c.bf16 %v6696_v16, %v6492_v20 }
 0x5c2   : > { %v9888_v22 = vunpack.i.h.bf16 %v9886_v58  ;;  %v9887_v47 = vunpack.i.l.bf16 %v9886_v58  ;;  %v9903_v29 = vunpack.i.h.bf16 %v9901_v10  ;;  %v9902_v43 = vunpack.i.l.bf16 %v9901_v10 }
 0x5c4   : > { %v6504_v42 = vsel %vm2532_vm9, %v6500_v6, %v9887_v47  ;;  %v6708_v3 = vsel %vm2532_vm9, %v6704_v41, %v9888_v22  ;;  %v6714_v4 = vsel %vm869_vm0, %v6710_v56, %v9903_v29  ;;  %v6510_v36 = vsel %vm869_vm0, %v6506_v39, %v9902_v43 }
 0x5c5   : > { %v9891_v31 = vpop.permute.xlu1 %9890  ;;  %v9911_v12 = vpop.permute.xlu0 %9910  ;;  %v6746_v30 = vpack.c.bf16 %v6708_v3, %v6504_v42 }
 0x5c6   : > { %v9893_v32 = vunpack.i.h.bf16 %v9891_v31  ;;  %v9892_v53 = vunpack.i.l.bf16 %v9891_v31  ;;  %v9913_v44 = vunpack.i.h.bf16 %v9911_v12 }
 0x5c7   : > { %6997 = vmatprep.mubr.bf16.mxu0 %v6746_v30 }
 0x5c8   : > { %6998 = vmatmul.mubr.bf16.gmra.mrb[108].mxu0 %v6745_v18  ;;  %v6726_v14 = vsel %vm869_vm0, %v6722_v63, %v9893_v32  ;;  %v6522_v13 = vsel %vm869_vm0, %v6518_v46, %v9892_v53  ;;  %v6718_v5 = vsel %vm2532_vm9, %v6714_v4, %v9913_v44 }
 0x5c9   : > { %v9906_v23 = vpop.permute.xlu1 %9905  ;;  %v9921_v11 = vpop.permute.xlu0 %9920  ;;  %7038 = vmatprep.mubr.bf16.mxu0 %v6736_v8  ;;  %v9912_v8 = vunpack.i.l.bf16 %v9911_v12 }
 0x5ca   : > { %v9908_v55 = vunpack.i.h.bf16 %v9906_v23  ;;  %v9907_v37 = vunpack.i.l.bf16 %v9906_v23  ;;  %v9923_v38 = vunpack.i.h.bf16 %v9921_v11  ;;  %v9922_v58 = vunpack.i.l.bf16 %v9921_v11 }
 0x5cb   : > { %v6514_v7 = vsel %vm2532_vm9, %v6510_v36, %v9912_v8 }
 0x5cc   : > { %v6526_v34 = vsel %vm2532_vm9, %v6522_v13, %v9907_v37  ;;  %v6730_v26 = vsel %vm2532_vm9, %v6726_v14, %v9908_v55  ;;  %v6739_v17 = vpack.c.bf16 %v6718_v5, %v6514_v7  ;;  %v6711_v31 = vsel %vm2497_vm6, %v15778_v57, %v9923_v38 }
 0x5cd   : > { %v9916_v60 = vpop.permute.xlu1 %9915  ;;  %v9931_v21 = vpop.permute.xlu0 %9930  ;;  %v6740_v35 = vpack.c.bf16 %v6730_v26, %v6526_v34 }
 0x5ce   : > { %v9918_v59 = vunpack.i.h.bf16 %v9916_v60  ;;  %v9917_v24 = vunpack.i.l.bf16 %v9916_v60  ;;  %v9933_v10 = vunpack.i.h.bf16 %v9931_v21  ;;  %v9932_v45 = vunpack.i.l.bf16 %v9931_v21 }
 0x5d0   : > { %7039 = vmatmul.mubr.bf16.vlgmr.msra.gmra.mrb[112].mxu0 %v6735_v52  ;;  %v6723_v25 = vsel %vm2497_vm6, %v15793_v0, %v9918_v59  ;;  %v6519_v15 = vsel %vm2497_vm6, %v15812_v48, %v9917_v24  ;;  %v6507_v0 = vsel %vm2497_vm6, %v15577_v61, %v9922_v58  ;;  %v6715_v51 = vsel %vm869_vm0, %v6711_v31, %v9933_v10 }
 0x5d1   : > { %v9926_v62 = vpop.permute.xlu1 %9925  ;;  %v9941_v54 = vpop.permute.xlu0 %9940  ;;  %7046 = vmatprep.mubr.bf16.mxu0 %v6740_v35  ;;  %v6511_v30 = vsel %vm869_vm0, %v6507_v0, %v9932_v45  ;;  %v10090_v45 = vld [vmem:[%s16032_s13] sm:$0xff]  }
 0x5d2   : > { %v9928_v9 = vunpack.i.h.bf16 %v9926_v62  ;;  %v9927_v27 = vunpack.i.l.bf16 %v9926_v62  ;;  %v9943_v20 = vunpack.i.h.bf16 %v9941_v54  ;;  %v9942_v16 = vunpack.i.l.bf16 %v9941_v54 }
 0x5d4   : > { %v6523_v6 = vsel %vm869_vm0, %v6519_v15, %v9927_v27  ;;  %v6727_v41 = vsel %vm869_vm0, %v6723_v25, %v9928_v9  ;;  %v6515_v18 = vsel %vm2532_vm9, %v6511_v30, %v9942_v16  ;;  %v6719_v32 = vsel %vm2532_vm9, %v6715_v51, %v9943_v20  ;;  %v10092_v25 = vld [vmem:[%s16032_s13 + $0x10] sm:$0xff]   ;;  %v10093_v15 = vld [vmem:[%s16032_s13 + $0x18] sm:$0xff]  }
 0x5d5   : > { %v9936_v28 = vpop.permute.xlu1 %9935  ;;  %v9951_v22 = vpop.permute.xlu0 %9950  ;;  %v6743_v37 = vpack.c.bf16 %v6719_v32, %v6515_v18  ;;  %v15988_v32 = vld [vmem:[%s16029_s10] ss:$0 sm:$0xff] }
 0x5d6   : > { %v9938_v52 = vunpack.i.h.bf16 %v9936_v28  ;;  %v9937_v47 = vunpack.i.l.bf16 %v9936_v28  ;;  %v9953_v53 = vunpack.i.h.bf16 %v9951_v22  ;;  %v9952_v23 = vunpack.i.l.bf16 %v9951_v22  ;;  %v10091_v22 = vld [vmem:[%s16032_s13 + $0x8] sm:$0xff]  }
 0x5d7   : > { %v10118_v28 = vmov 0.0  }
 0x5d8   : > { %7047 = vmatmul.mubr.bf16.gmra.mrb[116].mxu0 %v6739_v17  ;;  %v6527_v42 = vsel %vm2532_vm9, %v6523_v6, %v9937_v47  ;;  %v6731_v3 = vsel %vm2532_vm9, %v6727_v41, %v9938_v52  ;;  %v6712_v29 = vsel %vm2497_vm6, %v15817_v19, %v9953_v53  ;;  %v6508_v43 = vsel %vm2497_vm6, %v15741_v33, %v9952_v23 }
 0x5d9   : > { %v9946_v48 = vpop.permute.xlu1 %9945  ;;  %v6744_v12 = vpack.c.bf16 %v6731_v3, %v6527_v42  ;;  %v9961_v50 = vpop.permute.xlu0 %9960  ;;  %7969 = vmatprep.subr.bf16.mxu0 %v10118_v28 }
 0x5da   : > { %v9948_v11 = vunpack.i.h.bf16 %v9946_v48  ;;  %v9947_v63 = vunpack.i.l.bf16 %v9946_v48  ;;  %v9963_v46 = vunpack.i.h.bf16 %v9961_v50  ;;  %v9962_v55 = vunpack.i.l.bf16 %v9961_v50  ;;  %7970 = vmatpush3.bf16.msra.mxu0 %v10090_v45 }
 0x5db   : > { %7054 = vmatprep.mubr.bf16.mxu0 %v6744_v12  ;;  %7971 = vmatprep.subr.bf16.mxu0 %v10118_v28 }
 0x5dc   : > { %v6724_v34 = vsel %vm2497_vm6, %v15831_v1, %v9948_v11  ;;  %v6520_v26 = vsel %vm2497_vm6, %v15862_v40, %v9947_v63  ;;  %v6512_v8 = vsel %vm869_vm0, %v6508_v43, %v9962_v55  ;;  %v6716_v60 = vsel %vm869_vm0, %v6712_v29, %v9963_v46 }
 0x5dd   : > { %v9956_v57 = vpop.permute.xlu1 %9955  ;;  %v9971_v61 = vpop.permute.xlu0 %9970 }
 0x5de   : > { %v9958_v2 = vunpack.i.h.bf16 %v9956_v57  ;;  %v9957_v49 = vunpack.i.l.bf16 %v9956_v57  ;;  %v9973_v14 = vunpack.i.h.bf16 %v9971_v61  ;;  %v9972_v13 = vunpack.i.l.bf16 %v9971_v61  ;;  %7972 = vmatpush3.bf16.msra.mxu0 %v10091_v22 }
 0x5df   : > { %7973 = vmatprep.subr.bf16.mxu0 %v10118_v28 }
 0x5e0   : > { %7055 = vmatmul.mubr.bf16.gmra.mrb[120].mxu0 %v6743_v37  ;;  %v6524_v39 = vsel %vm869_vm0, %v6520_v26, %v9957_v49  ;;  %v6728_v19 = vsel %vm869_vm0, %v6724_v34, %v9958_v2  ;;  %v6516_v35 = vsel %vm2532_vm9, %v6512_v8, %v9972_v13  ;;  %v6720_v33 = vsel %vm2532_vm9, %v6716_v60, %v9973_v14  ;;  %v7493_v13 = vld [vmem:[%s16030_s11] ss:$0 sm:$0xff] }
 0x5e1   : > { %v9966_v44 = vpop.permute.xlu1 %9965  ;;  %v6747_v36 = vpack.c.bf16 %v6720_v33, %v6516_v35 }
 0x5e2   : > { %v9968_v21 = vunpack.i.h.bf16 %v9966_v44  ;;  %v9967_v56 = vunpack.i.l.bf16 %v9966_v44  ;;  %7974 = vmatpush3.bf16.msra.mxu0 %v10092_v25  ;;  %v7494_v44 = vld [vmem:[%s16031_s12] ss:$0 sm:$0xff] }
 0x5e3   : > { %7975 = vmatprep.subr.bf16.mxu0 %v10118_v28 }
 0x5e4   : > { %v6528_v1 = vsel %vm2532_vm9, %v6524_v39, %v9967_v56  ;;  %v6732_v4 = vsel %vm2532_vm9, %v6728_v19, %v9968_v21 }
 0x5e5   : > { %v6748_v40 = vpack.c.bf16 %v6732_v4, %v6528_v1 }
 0x5e6   : > { %7976 = vmatpush3.bf16.msra.mxu0 %v10093_v15 }
 0x5e7   : > { %7062 = vmatprep.mubr.bf16.mxu0 %v6748_v40 }
 0x5e8   : > { %7063 = vmatmul.mubr.bf16.gmra.mrb[124].mxu0 %v6747_v36 }
 0x5e9   : > { %7977 = vmatprep.mubr.msk.bf16.mxu0 %vm10119_vm14, %v10118_v28 }
 0x60c   : > { %v7796_v62 = vpop.f32.mrb[96].mxu0 }
 0x60d   : > { %v7797_v54 = vpop.f32.mrb[97].mxu0 }
 0x60e   : > { %v7798_v7 = vadd.f32 %v7797_v54, %v7796_v62  ;;  %v7799_v5 = vpop.f32.mrb[98].mxu0 }
 0x60f   : > { %v7800_v59 = vpop.f32.mrb[99].mxu0 }
 0x610   : > { %v7801_v24 = vadd.f32 %v7800_v59, %v7799_v5 }
 0x63b   : > { %v7802_v9 = vpop.f32.mrb[100].mxu0 }
 0x63c   : > { %v7803_v27 = vpop.f32.mrb[101].mxu0 }
 0x63d   : > { %v7804_v17 = vadd.f32 %v7803_v27, %v7802_v9  ;;  %v7805_v38 = vpop.f32.mrb[102].mxu0 }
 0x63e   : > { %v7806_v58 = vpop.f32.mrb[103].mxu0 }
 0x63f   : > { %v7807_v10 = vadd.f32 %v7806_v58, %v7805_v38 }
 0x66c   : > { %v7808_v52 = vpop.f32.mrb[104].mxu0 }
 0x66d   : > { %v7809_v47 = vpop.f32.mrb[105].mxu0 }
 0x66e   : > { %v7810_v6 = vadd.f32 %v7809_v47, %v7808_v52  ;;  %v7811_v41 = vpop.f32.mrb[106].mxu0 }
 0x66f   : > { %v7812_v20 = vpop.f32.mrb[107].mxu0 }
 0x670   : > { %v7813_v16 = vadd.f32 %v7812_v20, %v7811_v41 }
 0x69b   : > { %v7814_v42 = vpop.f32.mrb[108].mxu0 }
 0x69c   : > { %v7815_v3 = vpop.f32.mrb[109].mxu0 }
 0x69d   : > { %v15981_v31 = vadd.f32 %v7815_v3, %v7814_v42  ;;  %v7817_v0 = vpop.f32.mrb[110].mxu0 }
 0x69e   : > { %v7818_v48 = vpop.f32.mrb[111].mxu0 }
 0x69f   : > { %v15983_v12 = vadd.f32 %v7818_v48, %v7817_v0 }
 0x6a3   : > { %v7836_v30 = vpop.f32.mrb[112].mxu0 }
 0x6a4   : > { %v7837_v51 = vpop.f32.mrb[113].mxu0 }
 0x6a5   : > { %v7838_v50 = vadd.f32 %v7837_v51, %v7836_v30  ;;  %v7839_v18 = vpop.f32.mrb[114].mxu0 }
 0x6a6   : > { %v7840_v53 = vpop.f32.mrb[115].mxu0 }
 0x6a7   : > { %v7041_v23 = vadd.f32 %v7838_v50, %v7798_v7  ;;  %v7841_v11 = vadd.f32 %v7840_v53, %v7839_v18 }
 0x6a9   : > { %v7077_v63 = vadd.f32 %v15988_v32, %v7041_v23  ;;  %v7044_v57 = vadd.f32 %v7841_v11, %v7801_v24 }
 0x6ab   : > { %v7078_v46 = vadd.f32 %v15988_v32, %v7044_v57  ;;  %v7842_v55 = vpop.f32.mrb[116].mxu0  ;;  %v7085_v37 = vmax.f32 %v7077_v63, 0.0 }
 0x6ac   : > { %v7843_v61 = vpop.f32.mrb[117].mxu0 }
 0x6ad   : > { %v7086_v2 = vmax.f32 %v7078_v46, 0.0  ;;  %v7844_v49 = vadd.f32 %v7843_v61, %v7842_v55  ;;  %v7845_v14 = vpop.f32.mrb[118].mxu0 }
 0x6ae   : > { %v7846_v29 = vpop.f32.mrb[119].mxu0 }
 0x6af   : > { %v7095_v43 = vmax.f32 %v7085_v37, %v7086_v2  ;;  %v7049_v34 = vadd.f32 %v7844_v49, %v7804_v17  ;;  %v7847_v26 = vadd.f32 %v7846_v29, %v7845_v14 }
 0x6b1   : > { %v7105_v8 = vmul.f32 %v7493_v13, %v7095_v43  ;;  %v7079_v60 = vadd.f32 %v15988_v32, %v7049_v34  ;;  %v7052_v21 = vadd.f32 %v7847_v26, %v7807_v10 }
 0x6b3   : > { %v7115_v56 = vadd.f32 %v7494_v44, %v7105_v8  ;;  %v7080_v39 = vadd.f32 %v15988_v32, %v7052_v21  ;;  %v7848_v19 = vpop.f32.mrb[120].mxu0  ;;  %v7087_v1 = vmax.f32 %v7079_v60, 0.0 }
 0x6b4   : > { %v7849_v35 = vpop.f32.mrb[121].mxu0 }
 0x6b5   : > { %v7119_v33 = vsel %vm869_vm0, %v7115_v56, 0.0  ;;  %v7088_v4 = vmax.f32 %v7080_v39, 0.0  ;;  %v7850_v40 = vadd.f32 %v7849_v35, %v7848_v19  ;;  %v7851_v36 = vpop.f32.mrb[122].mxu0 }
 0x6b6   : > { %v7120_v62 = vrot.slane %v7119_v33, 4  ;;  %v7852_v54 = vpop.f32.mrb[123].mxu0 }
 0x6b7   : > { %v7096_v7 = vmax.f32 %v7087_v1, %v7088_v4  ;;  %v7057_v5 = vadd.f32 %v7850_v40, %v7810_v6  ;;  %v7853_v59 = vadd.f32 %v7852_v54, %v7851_v36 }
 0x6b8   : > { %v7121_v24 = vadd.f32 %v7120_v62, %v7119_v33 }
 0x6b9   : > { %v7106_v9 = vmul.f32 %v7493_v13, %v7096_v7  ;;  %v7081_v27 = vadd.f32 %v15988_v32, %v7057_v5  ;;  %v7060_v17 = vadd.f32 %v7853_v59, %v7813_v16 }
 0x6ba   : > { %v7122_v38 = vrot.slane %v7121_v24, 2 }
 0x6bb   : > { %v7116_v58 = vadd.f32 %v7494_v44, %v7106_v9  ;;  %v7082_v10 = vadd.f32 %v15988_v32, %v7060_v17  ;;  %v7854_v45 = vpop.f32.mrb[124].mxu0  ;;  %v7089_v15 = vmax.f32 %v7081_v27, 0.0  ;;  %v7495_v17 = vld [vmem:[#allocation2] ss:$0 sm:$0xff] }
 0x6bc   : > { %v7123_v28 = vadd.f32 %v7122_v38, %v7121_v24  ;;  %v7855_v22 = vpop.f32.mrb[125].mxu0 }
 0x6bd   : > { %v7126_v25 = vsel %vm869_vm0, %v7116_v58, 0.0  ;;  %v7090_v52 = vmax.f32 %v7082_v10, 0.0  ;;  %v7856_v47 = vadd.f32 %v7855_v22, %v7854_v45  ;;  %v7857_v41 = vpop.f32.mrb[126].mxu0 }
 0x6be   : > { %v7124_v6 = vrot.slane %v7123_v28, 1  ;;  %v7127_v20 = vrot.slane %v7126_v25, 4  ;;  %v7858_v42 = vpop.f32.mrb[127].mxu0 }
 0x6bf   : > { %v7097_v3 = vmax.f32 %v7089_v15, %v7090_v52  ;;  %v7065_v0 = vadd.f32 %v7856_v47, %v15981_v31  ;;  %v7859_v16 = vadd.f32 %v7858_v42, %v7857_v41 }
 0x6c0   : > { %v7128_v48 = vadd.f32 %v7127_v20, %v7126_v25  ;;  %v7125_v18 = vadd.f32 %v7124_v6, %v7123_v28 }
 0x6c1   : > { %v7107_v30 = vmul.f32 %v7493_v13, %v7097_v3  ;;  %v7083_v51 = vadd.f32 %v15988_v32, %v7065_v0  ;;  %v7068_v50 = vadd.f32 %v7859_v16, %v15983_v12 }
 0x6c2   : > { %v7129_v53 = vrot.slane %v7128_v48, 2  ;;  %v7148_v61 = vmul.f32 0.125, %v7125_v18 }
 0x6c3   : > { %v7117_v23 = vadd.f32 %v7494_v44, %v7107_v30  ;;  %v7084_v11 = vadd.f32 %v15988_v32, %v7068_v50  ;;  %v7091_v46 = vmax.f32 %v7083_v51, 0.0 }
 0x6c4   : > { %v7130_v63 = vadd.f32 %v7129_v53, %v7128_v48  ;;  %v7152_v43 = vpack.c.bf16 %v7148_v61, %v7148_v61 }
 0x6c5   : > { %v7133_v57 = vsel %vm869_vm0, %v7117_v23, 0.0  ;;  %v7092_v55 = vmax.f32 %v7084_v11, 0.0 }
 0x6c6   : > { %v7131_v37 = vrot.slane %v7130_v63, 1  ;;  %v7134_v31 = vrot.slane %v7133_v57, 4  ;;  %v7175_v21 = vunpack.c.l.b16 %v7152_v43 }
 0x6c7   : > { %v7098_v2 = vmax.f32 %v7091_v46, %v7092_v55 }
 0x6c8   : > { %v7132_v49 = vadd.f32 %v7131_v37, %v7130_v63  ;;  %v7135_v14 = vadd.f32 %v7134_v31, %v7133_v57 }
 0x6c9   : > { %v7108_v29 = vmul.f32 %v7493_v13, %v7098_v2 }
 0x6ca   : > { %v7149_v34 = vmul.f32 0.125, %v7132_v49  ;;  %v7136_v12 = vrot.slane %v7135_v14, 2 }
 0x6cb   : > { %v7118_v26 = vadd.f32 %v7494_v44, %v7108_v29 }
 0x6cc   : > { %v7153_v8 = vpack.c.bf16 %v7149_v34, %v7149_v34  ;;  %v7137_v60 = vadd.f32 %v7136_v12, %v7135_v14 }
 0x6cd   : > { %v7140_v32 = vsel %vm869_vm0, %v7118_v26, 0.0 }
 0x6ce   : > { %v7176_v56 = vunpack.c.l.b16 %v7153_v8  ;;  %v7138_v39 = vrot.slane %v7137_v60, 1  ;;  %v7141_v19 = vrot.slane %v7140_v32, 4 }
 0x6d0   : > { %v7139_v35 = vadd.f32 %v7138_v39, %v7137_v60  ;;  %v7142_v33 = vadd.f32 %v7141_v19, %v7140_v32  ;;  %v7180_v1 = vsel %vm7179_vm15, %v7176_v56, %v7175_v21 }
 0x6d2   : > { %v7150_v4 = vmul.f32 0.125, %v7139_v35  ;;  %v7143_v40 = vrot.slane %v7142_v33, 2 }
 0x6d4   : > { %v7154_v36 = vpack.c.bf16 %v7150_v4, %v7150_v4  ;;  %v7144_v13 = vadd.f32 %v7143_v40, %v7142_v33 }
 0x6d6   : > { %v7177_v62 = vunpack.c.l.b16 %v7154_v36  ;;  %v7145_v54 = vrot.slane %v7144_v13, 1 }
 0x6d8   : > { %v7146_v44 = vadd.f32 %v7145_v54, %v7144_v13  ;;  %v7182_v7 = vsel %vm7181_vm1, %v7177_v62, %v7180_v1 }
 0x6da   : > { %v7151_v5 = vmul.f32 0.125, %v7146_v44 }
 0x6dc   : > { %v7155_v59 = vpack.c.bf16 %v7151_v5, %v7151_v5 }
 0x6de   : > { %v7178_v24 = vunpack.c.l.b16 %v7155_v59 }
 0x6e0   : > { %v7184_v9 = vsel %vm7183_vm2, %v7178_v24, %v7182_v7 }
 0x6e1   : > { %v7185_v27 = vpack.c.b16 %v7184_v9, %v7184_v9 }
 0x6e3   : > { %7978 = vmatmul.mubr.msk.bf16.vlgmr.msra.gmra.mrb[128].mxu0 %vm869_vm0, %v7185_v27 }
 0x7b6   : > { %v7247_v38 = vpop.f32.mrb[128].mxu0 }
 0x7b7   : > { %v7248_v58 = vadd.f32 %v7495_v17, %v7247_v38  ;;  %v7979_v10 = vpop.f32.mrb[129].mxu0 }
 0x7b8   : > { %v7250_v45 = vpop.f32.mrb[130].mxu0 }
 0x7b9   : > { %v7501_v28 = vmul.f32 -1.442695, %v7248_v58  ;;  %v7980_v22 = vpop.f32.mrb[131].mxu0 }
 0x7bb   : > { %10094 = vpow2.f32 %v7501_v28 }
 0x7c5   : > { %v10095_v25 = vpop.eup %10094 }
 0x7c6   : > { %v7256_v15 = vadd.f32 1.0, %v10095_v25 }
 0x7c8   : > { %10096 = vrcp.f32 %v7256_v15 }
 0x7d2   : > { %v10097_v52 = vpop.eup %10096 }
 0x7d3   : > { %7260 = vst.msk [vmem:[%s499_s14] sm:$0xf] %vm7259_vm3, %v10097_v52 }
 0x7d4 PF: > { %s27_s20 = sadd.s32 1, %s10109_s20  }
 0x7d5   : > { %p24_p5 = scmp.ge.s32.totalorder %s27_s20, 4  }
 0x7d7   :  { %26 = sbr.rel (!%p24_p5) target bundleno = 3 (0x3), region = 110 }

</bundles_post_ra>
